<compile_context>
chip_gen: v7x
topology: tpu7x:2x2x1
jax: 0.10.0
libtpu: 0.0.40
codegen_flags: <defaults>
</compile_context>

<pallas_src>
import functools
import math

import jax
import jax.numpy as jnp
from jax import lax
from jax.experimental import pallas as pl
from jax.experimental.pallas import tpu as pltpu


# ------------------------- compile-time constants ---------------------------

def _nesterov_momentum_coeffs(n_iters: int):
    """FISTA momentum coefficients (t_k - 1)/t_{k+1}; data-independent."""
    t = 1.0
    coeffs = []
    for _ in range(n_iters):
        t_new = 0.5 * (1.0 + math.sqrt(1.0 + 4.0 * t * t))
        coeffs.append((t - 1.0) / t_new)
        t = t_new
    return tuple(coeffs)


def _round_up(v: int, m: int) -> int:
    return (v + m - 1) // m * m


# ------------------------------ Pallas kernel --------------------------------

def _factorized_rnn_seq_kernel(x_ref, h0_ref, whs_ref, wxs_ref, gs_ref,
                               wyT_ref, thr_ref,
                               y_ref, h_out_ref,
                               h_carry,
                               *, mom_coeffs, block_t):
    """block_t time steps per grid point; hidden state carried in VMEM scratch.

    Resident (constant index_map) refs: whs = W_h/L, wxs = W_x/L, gs = G/L,
    wyT = W_y^T, thr = (sparsity/L) broadcast row.
    """
    tb = pl.program_id(1)

    # Initialize the hidden-state carry from h_{-1} at the first time block of
    # each batch block.  Requires time to be the innermost ("arbitrary") axis.
    @pl.when(tb == 0)
    def _():
        h_carry[...] = h0_ref[...].astype(jnp.float32)

    whs = whs_ref[...]                           # (Hp, Hp)   = W_h / L
    wxs = wxs_ref[...]                           # (Xp, Hp)   = W_x / L
    gs = gs_ref[...]                             # (Hp, Hp)   = G / L
    wyT = wyT_ref[...]                           # (Hp, Op)   = W_y^T
    thr = thr_ref[...]                           # (1, Hp)    = sparsity / L
    mdt = gs.dtype                               # MXU operand dtype (f32/bf16)

    h = h_carry[...]                             # (Bb, Hp) f32 FISTA state

    for s in range(block_t):                     # static, fully unrolled
        x = x_ref[s]                             # (Bb, Xp) f32

        # (1/L)-scaled data term  Bm/L = (h_prev @ W_h + x @ W_x) / L   (MXU)
        bm_s = (jnp.dot(h.astype(mdt), whs, preferred_element_type=jnp.float32) +
                jnp.dot(x.astype(mdt), wxs, preferred_element_type=jnp.float32))
        # Hoisted loop-invariant: one broadcast + one subtract per time step.
        c = bm_s - thr

        # FISTA iterations, fully unrolled, momentum coefficients are Python
        # constants.  h_new = max(y_k - (1/L)*(y_k @ G - Bm) - sparsity/L, 0)
        h_k = h
        y_k = h
        for mom in mom_coeffs:
            h_new = jnp.maximum(
                y_k
                - jnp.dot(y_k.astype(mdt), gs, preferred_element_type=jnp.float32)
                + c,
                0.0)
            y_k = h_new + mom * (h_new - h_k)
            h_k = h_new
        h = h_k

        h_out_ref[s] = h.astype(h_out_ref.dtype)
        # y_t = h_t @ W_y^T  (W_y pre-transposed in wrapper; no in-kernel .T)
        y_ref[s] = jnp.dot(h.astype(mdt), wyT,
                           preferred_element_type=jnp.float32).astype(y_ref.dtype)

    h_carry[...] = h


# --------------------------------- wrappers -----------------------------------

def factorized_rnn_sequence(xs, h0, W_y, W_h, W_x,
                            *, n_iters=15, sparsity=0.0,
                            block_b=None, block_t=None,
                            mxu_dtype=jnp.float32, out_dtype=jnp.float32,
                            weight_buffers=None,
                            vmem_limit_bytes=64 * 1024 * 1024):
    """Run T FactorizedRNN steps in a single fused pallas_call.

    xs : (T, B, x_dim), h0 : (B, h_dim).  Returns (y_seq (T,B,out), h_seq (T,B,h)).
    Per-step semantics match the module's forward(x_t, h_{t-1}).
    """
    T, B, x_dim = xs.shape
    _, h_dim = h0.shape
    out_dim = W_y.shape[0]
    f32 = jnp.float32

    # Lane/sublane-dense padding (sliced off below; zero padding is exact).
    Hp = _round_up(h_dim, 128)
    Xp = _round_up(x_dim, 128)
    Op = _round_up(out_dim, 128)

    if block_b is None:
        # Cap at 256 to fill the MXU M dim on v6e/v7x while still giving
        # nb >= 2 blocks (both v7x TensorCores) for production batch sizes.
        block_b = min(_round_up(B, 8), 256)
    block_b = _round_up(block_b, 8)
    Bp = _round_up(B, block_b)
    nb = Bp // block_b

    if block_t is None:
        block_t = min(8, T)
    Tp = _round_up(T, block_t)
    ntb = Tp // block_t

    Wh = W_h.astype(f32)
    Wx = W_x.astype(f32)
    Wy = W_y.astype(f32)

    # Weight-only precomputation, once per sequence (plain JAX):
    #   G = W_z^T W_z = W_h^T W_h + W_x^T W_x, L = trace(G)  (Lipschitz bound).
    # 1/L is folded into the resident matrices so the kernel inner loop has no
    # per-iteration scalar math.
    L = jnp.sum(Wh * Wh) + jnp.sum(Wx * Wx) + f32(1e-12)
    inv_l = f32(1.0) / L

    Wh_p = jnp.zeros((Hp, Hp), f32).at[:h_dim, :h_dim].set(Wh)
    Wx_p = jnp.zeros((Xp, Hp), f32).at[:x_dim, :h_dim].set(Wx)
    WyT_p = jnp.zeros((Hp, Op), f32).at[:h_dim, :out_dim].set(Wy.T)

    G_p = (lax.dot_general(Wh_p, Wh_p, (((0,), (0,)), ((), ()))) +
           lax.dot_general(Wx_p, Wx_p, (((0,), (0,)), ((), ()))))
    Gs = (G_p * inv_l).astype(mxu_dtype)                 # (Hp, Hp)
    Whs = (Wh_p * inv_l).astype(mxu_dtype)               # (Hp, Hp)
    Wxs = (Wx_p * inv_l).astype(mxu_dtype)               # (Xp, Hp)
    WyTm = WyT_p.astype(mxu_dtype)                       # (Hp, Op)
    thr_row = jnp.full((1, Hp), sparsity, f32) * inv_l   # (1, Hp)

    xs_p = jnp.zeros((Tp, Bp, Xp), f32).at[:T, :B, :x_dim].set(xs.astype(f32))
    h0_p = jnp.zeros((Bp, Hp), f32).at[:B, :h_dim].set(h0.astype(f32))

    kernel = functools.partial(
        _factorized_rnn_seq_kernel,
        mom_coeffs=_nesterov_momentum_coeffs(n_iters),
        block_t=block_t)

    def _res_spec(shape):
        idx = lambda b, t, _n=len(shape): (0,) * _n
        if weight_buffers is None:
            return pl.BlockSpec(shape, idx)
        return pl.BlockSpec(shape, idx, pipeline_mode=pl.Buffered(weight_buffers))

    grid_spec = pltpu.PrefetchScalarGridSpec(
        num_scalar_prefetch=0,
        grid=(nb, ntb),                           # (parallel batch, sequential time)
        in_specs=[
            pl.BlockSpec((block_t, block_b, Xp), lambda b, t: (t, b, 0)),  # x block
            pl.BlockSpec((block_b, Hp),          lambda b, t: (b, 0)),     # h_{-1}
            _res_spec((Hp, Hp)),                                           # W_h / L
            _res_spec((Xp, Hp)),                                           # W_x / L
            _res_spec((Hp, Hp)),                                           # G / L
            _res_spec((Hp, Op)),                                           # W_y^T
            _res_spec((1, Hp)),                                            # thresh row
        ],
        out_specs=[
            pl.BlockSpec((block_t, block_b, Op), lambda b, t: (t, b, 0)),  # y block
            pl.BlockSpec((block_t, block_b, Hp), lambda b, t: (t, b, 0)),  # h block
        ],
        scratch_shapes=[pltpu.VMEM((block_b, Hp), jnp.float32)],           # h carry
    )

    y_p, h_p = pl.pallas_call(
        kernel,
        out_shape=(jax.ShapeDtypeStruct((Tp, Bp, Op), out_dtype),
                   jax.ShapeDtypeStruct((Tp, Bp, Hp), out_dtype)),
        grid_spec=grid_spec,
        compiler_params=pltpu.CompilerParams(
            dimension_semantics=("parallel", "arbitrary"),
            vmem_limit_bytes=vmem_limit_bytes),
    )(xs_p, h0_p, Whs, Wxs, Gs, WyTm, thr_row)

    return y_p[:T, :B, :out_dim], h_p[:T, :B, :h_dim]


def factorized_rnn_forward(x, h_prev, W_y, W_h, W_x, *, n_iters=15, sparsity=0.0,
                           **kwargs):
    """Single-step API matching the PyTorch module's forward(x, h_prev) -> (y, h)."""
    y_seq, h_seq = factorized_rnn_sequence(x[None], h_prev, W_y, W_h, W_x,
                                           n_iters=n_iters, sparsity=sparsity,
                                           **kwargs)
    return y_seq[0], h_seq[0]


# ----------------------------- pure-JAX reference -----------------------------

def _reference_step(x, h_prev, W_y, W_h, W_x, *, n_iters, sparsity):
    z = jnp.concatenate([h_prev, x], axis=1)
    Wz = jnp.concatenate([W_h, W_x], axis=0)
    G = Wz.T @ Wz
    Bm = z @ Wz
    L = jnp.sum(Wz * Wz) + 1e-12
    inv_l = 1.0 / L
    thresh = sparsity * inv_l
    h_k, y_k, t = h_prev, h_prev, 1.0
    for _ in range(n_iters):
        grad = y_k @ G - Bm
        h_new = jnp.maximum(y_k - inv_l * grad - thresh, 0.0)
        t_new = 0.5 * (1.0 + math.sqrt(1.0 + 4.0 * t * t))
        y_k = h_new + ((t - 1.0) / t_new) * (h_new - h_k)
        h_k, t = h_new, t_new
    return h_k @ W_y.T, h_k


# ----------------------------------- main --------------------------------------

if __name__ == "__main__":
    batch, x_dim, hidden_dim, out_dim, T = 8, 16, 32, 8, 6
    weights_noise_scale = 0.1          # config.weights_noise_scale (nonneg case)
    n_iters = 15                       # nmf_inference_iters_no_grad + nmf_gradient_iters_with_grad
    sparsity = 0.01                    # config.sparsity_L1_H

    key = jax.random.PRNGKey(0)
    kx, kh, kwy, kwh, kwx = jax.random.split(key, 5)

    W_y = jax.random.uniform(kwy, (out_dim, hidden_dim), jnp.float32) * weights_noise_scale
    W_h = jax.random.uniform(kwh, (hidden_dim, hidden_dim), jnp.float32) * weights_noise_scale
    W_x = jax.random.uniform(kwx, (x_dim, hidden_dim), jnp.float32) * weights_noise_scale

    xs = jax.random.uniform(kx, (T, batch, x_dim), jnp.float32)
    h0 = jax.random.uniform(kh, (batch, hidden_dim), jnp.float32)

    # Fused, time-blocked sequence kernel (f32 MXU path for exact comparison).
    y_seq, h_seq = factorized_rnn_sequence(xs, h0, W_y, W_h, W_x,
                                           n_iters=n_iters, sparsity=sparsity)
    jax.block_until_ready((y_seq, h_seq))

    # Per-step reference (exactly the module's forward() called once per step).
    h_r = h0
    ys_ref, hs_ref = [], []
    for t in range(T):
        y_r, h_r = _reference_step(xs[t], h_r, W_y, W_h, W_x,
                                   n_iters=n_iters, sparsity=sparsity)
        ys_ref.append(y_r)
        hs_ref.append(h_r)
    y_ref_seq = jnp.stack(ys_ref)
    h_ref_seq = jnp.stack(hs_ref)

    assert y_seq.shape == (T, batch, out_dim) and h_seq.shape == (T, batch, hidden_dim)
    assert jnp.allclose(y_seq, y_ref_seq, atol=1e-4, rtol=1e-4)
    assert jnp.allclose(h_seq, h_ref_seq, atol=1e-4, rtol=1e-4)

    # Single-step API (module-compatible signature).
    y1, h1 = factorized_rnn_forward(xs[0], h0, W_y, W_h, W_x,
                                    n_iters=n_iters, sparsity=sparsity)
    jax.block_until_ready((y1, h1))
    assert jnp.allclose(y1, y_ref_seq[0], atol=1e-4, rtol=1e-4)
    assert jnp.allclose(h1, h_ref_seq[0], atol=1e-4, rtol=1e-4)

    # bf16 MXU-operand / bf16 writeback path (the v6e/v7x production config):
    # exercised for compile/run health; accuracy is a documented tradeoff, so
    # only a sanity (finite + roughly close) check here.
    y_bf, h_bf = factorized_rnn_sequence(xs, h0, W_y, W_h, W_x,
                                         n_iters=n_iters, sparsity=sparsity,
                                         mxu_dtype=jnp.bfloat16,
                                         out_dtype=jnp.bfloat16)
    jax.block_until_ready((y_bf, h_bf))
    assert bool(jnp.all(jnp.isfinite(y_bf.astype(jnp.float32))))
    assert bool(jnp.all(jnp.isfinite(h_bf.astype(jnp.float32))))

    print("KERNEL_OK")
</pallas_src>

<mosaic_0001>
module attributes {stable_mosaic.version = 11 : i64} {
  func.func @_factorized_rnn_seq_kernel(%arg0: i32, %arg1: i32, %arg2: memref<6x8x128xf32, #tpu.memory_space<vmem>>, %arg3: memref<8x128xf32, #tpu.memory_space<vmem>>, %arg4: memref<128x128xf32, #tpu.memory_space<vmem>>, %arg5: memref<128x128xf32, #tpu.memory_space<vmem>>, %arg6: memref<128x128xf32, #tpu.memory_space<vmem>>, %arg7: memref<128x128xf32, #tpu.memory_space<vmem>>, %arg8: memref<1x128xf32, #tpu.memory_space<vmem>>, %arg9: memref<6x8x128xf32, #tpu.memory_space<vmem>>, %arg10: memref<6x8x128xf32, #tpu.memory_space<vmem>>, %arg11: memref<8x128xf32, #tpu.memory_space<vmem>>) attributes {dimension_semantics = [#tpu.dimension_semantics<parallel>, #tpu.dimension_semantics<arbitrary>], iteration_bounds = array<i64: 1, 1>, scalar_prefetch = 0 : i64, scratch_operands = 1 : i64, tpu.core_type = #tpu.core_type<tc>, window_params = [{transform_indices = @transform_0, window_bounds = array<i64: 6, 8, 128>}, {transform_indices = @transform_1, window_bounds = array<i64: 8, 128>}, {pipeline_mode = #tpu.pipeline_mode<synchronous>, transform_indices = @transform_2, window_bounds = array<i64: 128, 128>}, {pipeline_mode = #tpu.pipeline_mode<synchronous>, transform_indices = @transform_3, window_bounds = array<i64: 128, 128>}, {pipeline_mode = #tpu.pipeline_mode<synchronous>, transform_indices = @transform_4, window_bounds = array<i64: 128, 128>}, {pipeline_mode = #tpu.pipeline_mode<synchronous>, transform_indices = @transform_5, window_bounds = array<i64: 128, 128>}, {pipeline_mode = #tpu.pipeline_mode<synchronous>, transform_indices = @transform_6, window_bounds = array<i64: 1, 128>}, {transform_indices = @transform_7, window_bounds = array<i64: 6, 8, 128>}, {transform_indices = @transform_8, window_bounds = array<i64: 6, 8, 128>}]} {
    %c0_i32 = arith.constant 0 : i32
    %0 = arith.cmpi eq, %arg1, %c0_i32 : i32
    %1 = arith.extui %0 : i1 to i32
    %c0_i32_0 = arith.constant 0 : i32
    %2 = arith.cmpi ne, %1, %c0_i32_0 : i32
    scf.if %2 {
      %c0_344 = arith.constant 0 : index
      %c0_345 = arith.constant 0 : index
      %880 = vector.load %arg3[%c0_344, %c0_345] : memref<8x128xf32, #tpu.memory_space<vmem>>, vector<8x128xf32>
      %c0_346 = arith.constant 0 : index
      %c0_347 = arith.constant 0 : index
      %881 = vector.load %arg11[%c0_346, %c0_347] : memref<8x128xf32, #tpu.memory_space<vmem>>, vector<8x128xf32>
      tpu.vector_store %arg11[%c0_346, %c0_347], %880 {strides = array<i32>} : memref<8x128xf32, #tpu.memory_space<vmem>>, vector<8x128xf32>,
    } else {
    }
    %c0 = arith.constant 0 : index
    %c0_1 = arith.constant 0 : index
    %3 = vector.load %arg4[%c0, %c0_1] : memref<128x128xf32, #tpu.memory_space<vmem>>, vector<128x128xf32>
    %c0_2 = arith.constant 0 : index
    %c0_3 = arith.constant 0 : index
    %4 = vector.load %arg5[%c0_2, %c0_3] : memref<128x128xf32, #tpu.memory_space<vmem>>, vector<128x128xf32>
    %c0_4 = arith.constant 0 : index
    %c0_5 = arith.constant 0 : index
    %5 = vector.load %arg6[%c0_4, %c0_5] : memref<128x128xf32, #tpu.memory_space<vmem>>, vector<128x128xf32>
    %c0_6 = arith.constant 0 : index
    %c0_7 = arith.constant 0 : index
    %6 = vector.load %arg7[%c0_6, %c0_7] : memref<128x128xf32, #tpu.memory_space<vmem>>, vector<128x128xf32>
    %c0_8 = arith.constant 0 : index
    %c0_9 = arith.constant 0 : index
    %7 = vector.load %arg8[%c0_8, %c0_9] : memref<1x128xf32, #tpu.memory_space<vmem>>, vector<1x128xf32>
    %c0_10 = arith.constant 0 : index
    %c0_11 = arith.constant 0 : index
    %8 = vector.load %arg11[%c0_10, %c0_11] : memref<8x128xf32, #tpu.memory_space<vmem>>, vector<8x128xf32>
    %c0_12 = arith.constant 0 : index
    %c0_13 = arith.constant 0 : index
    %c0_14 = arith.constant 0 : index
    %9 = vector.load %arg2[%c0_12, %c0_13, %c0_14] : memref<6x8x128xf32, #tpu.memory_space<vmem>>, vector<1x8x128xf32>
    %10 = vector.shape_cast %9 : vector<1x8x128xf32> to vector<8x128xf32>
    %cst = arith.constant dense<0.000000e+00> : vector<8x128xf32>
    %11 = tpu.matmul %8, %3, %cst {dimension_numbers = #tpu.dot_dimension_numbers<[1], [0], [0], [1], [0, 0, 1, 1], [], []>} : vector<8x128xf32>, vector<128x128xf32>, vector<8x128xf32> -> vector<8x128xf32>
    %cst_15 = arith.constant dense<0.000000e+00> : vector<8x128xf32>
    %12 = tpu.matmul %10, %4, %cst_15 {dimension_numbers = #tpu.dot_dimension_numbers<[1], [0], [0], [1], [0, 0, 1, 1], [], []>} : vector<8x128xf32>, vector<128x128xf32>, vector<8x128xf32> -> vector<8x128xf32>
    %13 = arith.addf %11, %12 : vector<8x128xf32>
    %14 = vector.broadcast %7 : vector<1x128xf32> to vector<8x128xf32>
    %15 = arith.subf %13, %14 : vector<8x128xf32>
    %cst_16 = arith.constant dense<0.000000e+00> : vector<8x128xf32>
    %16 = tpu.matmul %8, %5, %cst_16 {dimension_numbers = #tpu.dot_dimension_numbers<[1], [0], [0], [1], [0, 0, 1, 1], [], []>} : vector<8x128xf32>, vector<128x128xf32>, vector<8x128xf32> -> vector<8x128xf32>
    %17 = arith.subf %8, %16 : vector<8x128xf32>
    %18 = arith.addf %17, %15 : vector<8x128xf32>
    %cst_17 = arith.constant 0.000000e+00 : f32
    %19 = vector.broadcast %cst_17 : f32 to vector<8x128xf32>
    %20 = arith.maximumf %18, %19 : vector<8x128xf32>
    %21 = arith.subf %20, %8 : vector<8x128xf32>
    %cst_18 = arith.constant 0.000000e+00 : f32
    %22 = vector.broadcast %cst_18 : f32 to vector<8x128xf32>
    %23 = arith.mulf %22, %21 : vector<8x128xf32>
    %24 = arith.addf %20, %23 : vector<8x128xf32>
    %cst_19 = arith.constant dense<0.000000e+00> : vector<8x128xf32>
    %25 = tpu.matmul %24, %5, %cst_19 {dimension_numbers = #tpu.dot_dimension_numbers<[1], [0], [0], [1], [0, 0, 1, 1], [], []>} : vector<8x128xf32>, vector<128x128xf32>, vector<8x128xf32> -> vector<8x128xf32>
    %26 = arith.subf %24, %25 : vector<8x128xf32>
    %27 = arith.addf %26, %15 : vector<8x128xf32>
    %cst_20 = arith.constant 0.000000e+00 : f32
    %28 = vector.broadcast %cst_20 : f32 to vector<8x128xf32>
    %29 = arith.maximumf %27, %28 : vector<8x128xf32>
    %30 = arith.subf %29, %20 : vector<8x128xf32>
    %cst_21 = arith.constant 0.28175351 : f32
    %31 = vector.broadcast %cst_21 : f32 to vector<8x128xf32>
    %32 = arith.mulf %31, %30 : vector<8x128xf32>
    %33 = arith.addf %29, %32 : vector<8x128xf32>
    %cst_22 = arith.constant dense<0.000000e+00> : vector<8x128xf32>
    %34 = tpu.matmul %33, %5, %cst_22 {dimension_numbers = #tpu.dot_dimension_numbers<[1], [0], [0], [1], [0, 0, 1, 1], [], []>} : vector<8x128xf32>, vector<128x128xf32>, vector<8x128xf32> -> vector<8x128xf32>
    %35 = arith.subf %33, %34 : vector<8x128xf32>
    %36 = arith.addf %35, %15 : vector<8x128xf32>
    %cst_23 = arith.constant 0.000000e+00 : f32
    %37 = vector.broadcast %cst_23 : f32 to vector<8x128xf32>
    %38 = arith.maximumf %36, %37 : vector<8x128xf32>
    %39 = arith.subf %38, %29 : vector<8x128xf32>
    %cst_24 = arith.constant 0.434042782 : f32
    %40 = vector.broadcast %cst_24 : f32 to vector<8x128xf32>
    %41 = arith.mulf %40, %39 : vector<8x128xf32>
    %42 = arith.addf %38, %41 : vector<8x128xf32>
    %cst_25 = arith.constant dense<0.000000e+00> : vector<8x128xf32>
    %43 = tpu.matmul %42, %5, %cst_25 {dimension_numbers = #tpu.dot_dimension_numbers<[1], [0], [0], [1], [0, 0, 1, 1], [], []>} : vector<8x128xf32>, vector<128x128xf32>, vector<8x128xf32> -> vector<8x128xf32>
    %44 = arith.subf %42, %43 : vector<8x128xf32>
    %45 = arith.addf %44, %15 : vector<8x128xf32>
    %cst_26 = arith.constant 0.000000e+00 : f32
    %46 = vector.broadcast %cst_26 : f32 to vector<8x128xf32>
    %47 = arith.maximumf %45, %46 : vector<8x128xf32>
    %48 = arith.subf %47, %38 : vector<8x128xf32>
    %cst_27 = arith.constant 0.531063795 : f32
    %49 = vector.broadcast %cst_27 : f32 to vector<8x128xf32>
    %50 = arith.mulf %49, %48 : vector<8x128xf32>
    %51 = arith.addf %47, %50 : vector<8x128xf32>
    %cst_28 = arith.constant dense<0.000000e+00> : vector<8x128xf32>
    %52 = tpu.matmul %51, %5, %cst_28 {dimension_numbers = #tpu.dot_dimension_numbers<[1], [0], [0], [1], [0, 0, 1, 1], [], []>} : vector<8x128xf32>, vector<128x128xf32>, vector<8x128xf32> -> vector<8x128xf32>
    %53 = arith.subf %51, %52 : vector<8x128xf32>
    %54 = arith.addf %53, %15 : vector<8x128xf32>
    %cst_29 = arith.constant 0.000000e+00 : f32
    %55 = vector.broadcast %cst_29 : f32 to vector<8x128xf32>
    %56 = arith.maximumf %54, %55 : vector<8x128xf32>
    %57 = arith.subf %56, %47 : vector<8x128xf32>
    %cst_30 = arith.constant 0.598778605 : f32
    %58 = vector.broadcast %cst_30 : f32 to vector<8x128xf32>
    %59 = arith.mulf %58, %57 : vector<8x128xf32>
    %60 = arith.addf %56, %59 : vector<8x128xf32>
    %cst_31 = arith.constant dense<0.000000e+00> : vector<8x128xf32>
    %61 = tpu.matmul %60, %5, %cst_31 {dimension_numbers = #tpu.dot_dimension_numbers<[1], [0], [0], [1], [0, 0, 1, 1], [], []>} : vector<8x128xf32>, vector<128x128xf32>, vector<8x128xf32> -> vector<8x128xf32>
    %62 = arith.subf %60, %61 : vector<8x128xf32>
    %63 = arith.addf %62, %15 : vector<8x128xf32>
    %cst_32 = arith.constant 0.000000e+00 : f32
    %64 = vector.broadcast %cst_32 : f32 to vector<8x128xf32>
    %65 = arith.maximumf %63, %64 : vector<8x128xf32>
    %66 = arith.subf %65, %56 : vector<8x128xf32>
    %cst_33 = arith.constant 0.648923337 : f32
    %67 = vector.broadcast %cst_33 : f32 to vector<8x128xf32>
    %68 = arith.mulf %67, %66 : vector<8x128xf32>
    %69 = arith.addf %65, %68 : vector<8x128xf32>
    %cst_34 = arith.constant dense<0.000000e+00> : vector<8x128xf32>
    %70 = tpu.matmul %69, %5, %cst_34 {dimension_numbers = #tpu.dot_dimension_numbers<[1], [0], [0], [1], [0, 0, 1, 1], [], []>} : vector<8x128xf32>, vector<128x128xf32>, vector<8x128xf32> -> vector<8x128xf32>
    %71 = arith.subf %69, %70 : vector<8x128xf32>
    %72 = arith.addf %71, %15 : vector<8x128xf32>
    %cst_35 = arith.constant 0.000000e+00 : f32
    %73 = vector.broadcast %cst_35 : f32 to vector<8x128xf32>
    %74 = arith.maximumf %72, %73 : vector<8x128xf32>
    %75 = arith.subf %74, %65 : vector<8x128xf32>
    %cst_36 = arith.constant 0.687645852 : f32
    %76 = vector.broadcast %cst_36 : f32 to vector<8x128xf32>
    %77 = arith.mulf %76, %75 : vector<8x128xf32>
    %78 = arith.addf %74, %77 : vector<8x128xf32>
    %cst_37 = arith.constant dense<0.000000e+00> : vector<8x128xf32>
    %79 = tpu.matmul %78, %5, %cst_37 {dimension_numbers = #tpu.dot_dimension_numbers<[1], [0], [0], [1], [0, 0, 1, 1], [], []>} : vector<8x128xf32>, vector<128x128xf32>, vector<8x128xf32> -> vector<8x128xf32>
    %80 = arith.subf %78, %79 : vector<8x128xf32>
    %81 = arith.addf %80, %15 : vector<8x128xf32>
    %cst_38 = arith.constant 0.000000e+00 : f32
    %82 = vector.broadcast %cst_38 : f32 to vector<8x128xf32>
    %83 = arith.maximumf %81, %82 : vector<8x128xf32>
    %84 = arith.subf %83, %74 : vector<8x128xf32>
    %cst_39 = arith.constant 0.718499839 : f32
    %85 = vector.broadcast %cst_39 : f32 to vector<8x128xf32>
    %86 = arith.mulf %85, %84 : vector<8x128xf32>
    %87 = arith.addf %83, %86 : vector<8x128xf32>
    %cst_40 = arith.constant dense<0.000000e+00> : vector<8x128xf32>
    %88 = tpu.matmul %87, %5, %cst_40 {dimension_numbers = #tpu.dot_dimension_numbers<[1], [0], [0], [1], [0, 0, 1, 1], [], []>} : vector<8x128xf32>, vector<128x128xf32>, vector<8x128xf32> -> vector<8x128xf32>
    %89 = arith.subf %87, %88 : vector<8x128xf32>
    %90 = arith.addf %89, %15 : vector<8x128xf32>
    %cst_41 = arith.constant 0.000000e+00 : f32
    %91 = vector.broadcast %cst_41 : f32 to vector<8x128xf32>
    %92 = arith.maximumf %90, %91 : vector<8x128xf32>
    %93 = arith.subf %92, %83 : vector<8x128xf32>
    %cst_42 = arith.constant 7.436910e-01 : f32
    %94 = vector.broadcast %cst_42 : f32 to vector<8x128xf32>
    %95 = arith.mulf %94, %93 : vector<8x128xf32>
    %96 = arith.addf %92, %95 : vector<8x128xf32>
    %cst_43 = arith.constant dense<0.000000e+00> : vector<8x128xf32>
    %97 = tpu.matmul %96, %5, %cst_43 {dimension_numbers = #tpu.dot_dimension_numbers<[1], [0], [0], [1], [0, 0, 1, 1], [], []>} : vector<8x128xf32>, vector<128x128xf32>, vector<8x128xf32> -> vector<8x128xf32>
    %98 = arith.subf %96, %97 : vector<8x128xf32>
    %99 = arith.addf %98, %15 : vector<8x128xf32>
    %cst_44 = arith.constant 0.000000e+00 : f32
    %100 = vector.broadcast %cst_44 : f32 to vector<8x128xf32>
    %101 = arith.maximumf %99, %100 : vector<8x128xf32>
    %102 = arith.subf %101, %92 : vector<8x128xf32>
    %cst_45 = arith.constant 0.764664709 : f32
    %103 = vector.broadcast %cst_45 : f32 to vector<8x128xf32>
    %104 = arith.mulf %103, %102 : vector<8x128xf32>
    %105 = arith.addf %101, %104 : vector<8x128xf32>
    %cst_46 = arith.constant dense<0.000000e+00> : vector<8x128xf32>
    %106 = tpu.matmul %105, %5, %cst_46 {dimension_numbers = #tpu.dot_dimension_numbers<[1], [0], [0], [1], [0, 0, 1, 1], [], []>} : vector<8x128xf32>, vector<128x128xf32>, vector<8x128xf32> -> vector<8x128xf32>
    %107 = arith.subf %105, %106 : vector<8x128xf32>
    %108 = arith.addf %107, %15 : vector<8x128xf32>
    %cst_47 = arith.constant 0.000000e+00 : f32
    %109 = vector.broadcast %cst_47 : f32 to vector<8x128xf32>
    %110 = arith.maximumf %108, %109 : vector<8x128xf32>
    %111 = arith.subf %110, %101 : vector<8x128xf32>
    %cst_48 = arith.constant 0.78240925 : f32
    %112 = vector.broadcast %cst_48 : f32 to vector<8x128xf32>
    %113 = arith.mulf %112, %111 : vector<8x128xf32>
    %114 = arith.addf %110, %113 : vector<8x128xf32>
    %cst_49 = arith.constant dense<0.000000e+00> : vector<8x128xf32>
    %115 = tpu.matmul %114, %5, %cst_49 {dimension_numbers = #tpu.dot_dimension_numbers<[1], [0], [0], [1], [0, 0, 1, 1], [], []>} : vector<8x128xf32>, vector<128x128xf32>, vector<8x128xf32> -> vector<8x128xf32>
    %116 = arith.subf %114, %115 : vector<8x128xf32>
    %117 = arith.addf %116, %15 : vector<8x128xf32>
    %cst_50 = arith.constant 0.000000e+00 : f32
    %118 = vector.broadcast %cst_50 : f32 to vector<8x128xf32>
    %119 = arith.maximumf %117, %118 : vector<8x128xf32>
    %120 = arith.subf %119, %110 : vector<8x128xf32>
    %cst_51 = arith.constant 0.797624409 : f32
    %121 = vector.broadcast %cst_51 : f32 to vector<8x128xf32>
    %122 = arith.mulf %121, %120 : vector<8x128xf32>
    %123 = arith.addf %119, %122 : vector<8x128xf32>
    %cst_52 = arith.constant dense<0.000000e+00> : vector<8x128xf32>
    %124 = tpu.matmul %123, %5, %cst_52 {dimension_numbers = #tpu.dot_dimension_numbers<[1], [0], [0], [1], [0, 0, 1, 1], [], []>} : vector<8x128xf32>, vector<128x128xf32>, vector<8x128xf32> -> vector<8x128xf32>
    %125 = arith.subf %123, %124 : vector<8x128xf32>
    %126 = arith.addf %125, %15 : vector<8x128xf32>
    %cst_53 = arith.constant 0.000000e+00 : f32
    %127 = vector.broadcast %cst_53 : f32 to vector<8x128xf32>
    %128 = arith.maximumf %126, %127 : vector<8x128xf32>
    %129 = arith.subf %128, %119 : vector<8x128xf32>
    %cst_54 = arith.constant 0.810819983 : f32
    %130 = vector.broadcast %cst_54 : f32 to vector<8x128xf32>
    %131 = arith.mulf %130, %129 : vector<8x128xf32>
    %132 = arith.addf %128, %131 : vector<8x128xf32>
    %cst_55 = arith.constant dense<0.000000e+00> : vector<8x128xf32>
    %133 = tpu.matmul %132, %5, %cst_55 {dimension_numbers = #tpu.dot_dimension_numbers<[1], [0], [0], [1], [0, 0, 1, 1], [], []>} : vector<8x128xf32>, vector<128x128xf32>, vector<8x128xf32> -> vector<8x128xf32>
    %134 = arith.subf %132, %133 : vector<8x128xf32>
    %135 = arith.addf %134, %15 : vector<8x128xf32>
    %cst_56 = arith.constant 0.000000e+00 : f32
    %136 = vector.broadcast %cst_56 : f32 to vector<8x128xf32>
    %137 = arith.maximumf %135, %136 : vector<8x128xf32>
    %138 = arith.subf %137, %128 : vector<8x128xf32>
    %cst_57 = arith.constant 0.822376668 : f32
    %139 = vector.broadcast %cst_57 : f32 to vector<8x128xf32>
    %140 = arith.mulf %139, %138 : vector<8x128xf32>
    %141 = arith.addf %137, %140 : vector<8x128xf32>
    %cst_58 = arith.constant dense<0.000000e+00> : vector<8x128xf32>
    %142 = tpu.matmul %141, %5, %cst_58 {dimension_numbers = #tpu.dot_dimension_numbers<[1], [0], [0], [1], [0, 0, 1, 1], [], []>} : vector<8x128xf32>, vector<128x128xf32>, vector<8x128xf32> -> vector<8x128xf32>
    %143 = arith.subf %141, %142 : vector<8x128xf32>
    %144 = arith.addf %143, %15 : vector<8x128xf32>
    %cst_59 = arith.constant 0.000000e+00 : f32
    %145 = vector.broadcast %cst_59 : f32 to vector<8x128xf32>
    %146 = arith.maximumf %144, %145 : vector<8x128xf32>
    %c0_60 = arith.constant 0 : index
    %c0_61 = arith.constant 0 : index
    %c0_62 = arith.constant 0 : index
    %147 = vector.load %arg10[%c0_60, %c0_61, %c0_62] : memref<6x8x128xf32, #tpu.memory_space<vmem>>, vector<1x8x128xf32>
    %148 = vector.shape_cast %147 : vector<1x8x128xf32> to vector<8x128xf32>
    %149 = vector.shape_cast %146 : vector<8x128xf32> to vector<1x8x128xf32>
    tpu.vector_store %arg10[%c0_60, %c0_61, %c0_62], %149 {strides = array<i32>} : memref<6x8x128xf32, #tpu.memory_space<vmem>>, vector<1x8x128xf32>,
    %cst_63 = arith.constant dense<0.000000e+00> : vector<8x128xf32>
    %150 = tpu.matmul %146, %6, %cst_63 {dimension_numbers = #tpu.dot_dimension_numbers<[1], [0], [0], [1], [0, 0, 1, 1], [], []>} : vector<8x128xf32>, vector<128x128xf32>, vector<8x128xf32> -> vector<8x128xf32>
    %c0_64 = arith.constant 0 : index
    %c0_65 = arith.constant 0 : index
    %c0_66 = arith.constant 0 : index
    %151 = vector.load %arg9[%c0_64, %c0_65, %c0_66] : memref<6x8x128xf32, #tpu.memory_space<vmem>>, vector<1x8x128xf32>
    %152 = vector.shape_cast %151 : vector<1x8x128xf32> to vector<8x128xf32>
    %153 = vector.shape_cast %150 : vector<8x128xf32> to vector<1x8x128xf32>
    tpu.vector_store %arg9[%c0_64, %c0_65, %c0_66], %153 {strides = array<i32>} : memref<6x8x128xf32, #tpu.memory_space<vmem>>, vector<1x8x128xf32>,
    %c1 = arith.constant 1 : index
    %c0_67 = arith.constant 0 : index
    %c0_68 = arith.constant 0 : index
    %154 = vector.load %arg2[%c1, %c0_67, %c0_68] : memref<6x8x128xf32, #tpu.memory_space<vmem>>, vector<1x8x128xf32>
    %155 = vector.shape_cast %154 : vector<1x8x128xf32> to vector<8x128xf32>
    %cst_69 = arith.constant dense<0.000000e+00> : vector<8x128xf32>
    %156 = tpu.matmul %146, %3, %cst_69 {dimension_numbers = #tpu.dot_dimension_numbers<[1], [0], [0], [1], [0, 0, 1, 1], [], []>} : vector<8x128xf32>, vector<128x128xf32>, vector<8x128xf32> -> vector<8x128xf32>
    %cst_70 = arith.constant dense<0.000000e+00> : vector<8x128xf32>
    %157 = tpu.matmul %155, %4, %cst_70 {dimension_numbers = #tpu.dot_dimension_numbers<[1], [0], [0], [1], [0, 0, 1, 1], [], []>} : vector<8x128xf32>, vector<128x128xf32>, vector<8x128xf32> -> vector<8x128xf32>
    %158 = arith.addf %156, %157 : vector<8x128xf32>
    %159 = vector.broadcast %7 : vector<1x128xf32> to vector<8x128xf32>
    %160 = arith.subf %158, %159 : vector<8x128xf32>
    %cst_71 = arith.constant dense<0.000000e+00> : vector<8x128xf32>
    %161 = tpu.matmul %146, %5, %cst_71 {dimension_numbers = #tpu.dot_dimension_numbers<[1], [0], [0], [1], [0, 0, 1, 1], [], []>} : vector<8x128xf32>, vector<128x128xf32>, vector<8x128xf32> -> vector<8x128xf32>
    %162 = arith.subf %146, %161 : vector<8x128xf32>
    %163 = arith.addf %162, %160 : vector<8x128xf32>
    %cst_72 = arith.constant 0.000000e+00 : f32
    %164 = vector.broadcast %cst_72 : f32 to vector<8x128xf32>
    %165 = arith.maximumf %163, %164 : vector<8x128xf32>
    %166 = arith.subf %165, %146 : vector<8x128xf32>
    %cst_73 = arith.constant 0.000000e+00 : f32
    %167 = vector.broadcast %cst_73 : f32 to vector<8x128xf32>
    %168 = arith.mulf %167, %166 : vector<8x128xf32>
    %169 = arith.addf %165, %168 : vector<8x128xf32>
    %cst_74 = arith.constant dense<0.000000e+00> : vector<8x128xf32>
    %170 = tpu.matmul %169, %5, %cst_74 {dimension_numbers = #tpu.dot_dimension_numbers<[1], [0], [0], [1], [0, 0, 1, 1], [], []>} : vector<8x128xf32>, vector<128x128xf32>, vector<8x128xf32> -> vector<8x128xf32>
    %171 = arith.subf %169, %170 : vector<8x128xf32>
    %172 = arith.addf %171, %160 : vector<8x128xf32>
    %cst_75 = arith.constant 0.000000e+00 : f32
    %173 = vector.broadcast %cst_75 : f32 to vector<8x128xf32>
    %174 = arith.maximumf %172, %173 : vector<8x128xf32>
    %175 = arith.subf %174, %165 : vector<8x128xf32>
    %cst_76 = arith.constant 0.28175351 : f32
    %176 = vector.broadcast %cst_76 : f32 to vector<8x128xf32>
    %177 = arith.mulf %176, %175 : vector<8x128xf32>
    %178 = arith.addf %174, %177 : vector<8x128xf32>
    %cst_77 = arith.constant dense<0.000000e+00> : vector<8x128xf32>
    %179 = tpu.matmul %178, %5, %cst_77 {dimension_numbers = #tpu.dot_dimension_numbers<[1], [0], [0], [1], [0, 0, 1, 1], [], []>} : vector<8x128xf32>, vector<128x128xf32>, vector<8x128xf32> -> vector<8x128xf32>
    %180 = arith.subf %178, %179 : vector<8x128xf32>
    %181 = arith.addf %180, %160 : vector<8x128xf32>
    %cst_78 = arith.constant 0.000000e+00 : f32
    %182 = vector.broadcast %cst_78 : f32 to vector<8x128xf32>
    %183 = arith.maximumf %181, %182 : vector<8x128xf32>
    %184 = arith.subf %183, %174 : vector<8x128xf32>
    %cst_79 = arith.constant 0.434042782 : f32
    %185 = vector.broadcast %cst_79 : f32 to vector<8x128xf32>
    %186 = arith.mulf %185, %184 : vector<8x128xf32>
    %187 = arith.addf %183, %186 : vector<8x128xf32>
    %cst_80 = arith.constant dense<0.000000e+00> : vector<8x128xf32>
    %188 = tpu.matmul %187, %5, %cst_80 {dimension_numbers = #tpu.dot_dimension_numbers<[1], [0], [0], [1], [0, 0, 1, 1], [], []>} : vector<8x128xf32>, vector<128x128xf32>, vector<8x128xf32> -> vector<8x128xf32>
    %189 = arith.subf %187, %188 : vector<8x128xf32>
    %190 = arith.addf %189, %160 : vector<8x128xf32>
    %cst_81 = arith.constant 0.000000e+00 : f32
    %191 = vector.broadcast %cst_81 : f32 to vector<8x128xf32>
    %192 = arith.maximumf %190, %191 : vector<8x128xf32>
    %193 = arith.subf %192, %183 : vector<8x128xf32>
    %cst_82 = arith.constant 0.531063795 : f32
    %194 = vector.broadcast %cst_82 : f32 to vector<8x128xf32>
    %195 = arith.mulf %194, %193 : vector<8x128xf32>
    %196 = arith.addf %192, %195 : vector<8x128xf32>
    %cst_83 = arith.constant dense<0.000000e+00> : vector<8x128xf32>
    %197 = tpu.matmul %196, %5, %cst_83 {dimension_numbers = #tpu.dot_dimension_numbers<[1], [0], [0], [1], [0, 0, 1, 1], [], []>} : vector<8x128xf32>, vector<128x128xf32>, vector<8x128xf32> -> vector<8x128xf32>
    %198 = arith.subf %196, %197 : vector<8x128xf32>
    %199 = arith.addf %198, %160 : vector<8x128xf32>
    %cst_84 = arith.constant 0.000000e+00 : f32
    %200 = vector.broadcast %cst_84 : f32 to vector<8x128xf32>
    %201 = arith.maximumf %199, %200 : vector<8x128xf32>
    %202 = arith.subf %201, %192 : vector<8x128xf32>
    %cst_85 = arith.constant 0.598778605 : f32
    %203 = vector.broadcast %cst_85 : f32 to vector<8x128xf32>
    %204 = arith.mulf %203, %202 : vector<8x128xf32>
    %205 = arith.addf %201, %204 : vector<8x128xf32>
    %cst_86 = arith.constant dense<0.000000e+00> : vector<8x128xf32>
    %206 = tpu.matmul %205, %5, %cst_86 {dimension_numbers = #tpu.dot_dimension_numbers<[1], [0], [0], [1], [0, 0, 1, 1], [], []>} : vector<8x128xf32>, vector<128x128xf32>, vector<8x128xf32> -> vector<8x128xf32>
    %207 = arith.subf %205, %206 : vector<8x128xf32>
    %208 = arith.addf %207, %160 : vector<8x128xf32>
    %cst_87 = arith.constant 0.000000e+00 : f32
    %209 = vector.broadcast %cst_87 : f32 to vector<8x128xf32>
    %210 = arith.maximumf %208, %209 : vector<8x128xf32>
    %211 = arith.subf %210, %201 : vector<8x128xf32>
    %cst_88 = arith.constant 0.648923337 : f32
    %212 = vector.broadcast %cst_88 : f32 to vector<8x128xf32>
    %213 = arith.mulf %212, %211 : vector<8x128xf32>
    %214 = arith.addf %210, %213 : vector<8x128xf32>
    %cst_89 = arith.constant dense<0.000000e+00> : vector<8x128xf32>
    %215 = tpu.matmul %214, %5, %cst_89 {dimension_numbers = #tpu.dot_dimension_numbers<[1], [0], [0], [1], [0, 0, 1, 1], [], []>} : vector<8x128xf32>, vector<128x128xf32>, vector<8x128xf32> -> vector<8x128xf32>
    %216 = arith.subf %214, %215 : vector<8x128xf32>
    %217 = arith.addf %216, %160 : vector<8x128xf32>
    %cst_90 = arith.constant 0.000000e+00 : f32
    %218 = vector.broadcast %cst_90 : f32 to vector<8x128xf32>
    %219 = arith.maximumf %217, %218 : vector<8x128xf32>
    %220 = arith.subf %219, %210 : vector<8x128xf32>
    %cst_91 = arith.constant 0.687645852 : f32
    %221 = vector.broadcast %cst_91 : f32 to vector<8x128xf32>
    %222 = arith.mulf %221, %220 : vector<8x128xf32>
    %223 = arith.addf %219, %222 : vector<8x128xf32>
    %cst_92 = arith.constant dense<0.000000e+00> : vector<8x128xf32>
    %224 = tpu.matmul %223, %5, %cst_92 {dimension_numbers = #tpu.dot_dimension_numbers<[1], [0], [0], [1], [0, 0, 1, 1], [], []>} : vector<8x128xf32>, vector<128x128xf32>, vector<8x128xf32> -> vector<8x128xf32>
    %225 = arith.subf %223, %224 : vector<8x128xf32>
    %226 = arith.addf %225, %160 : vector<8x128xf32>
    %cst_93 = arith.constant 0.000000e+00 : f32
    %227 = vector.broadcast %cst_93 : f32 to vector<8x128xf32>
    %228 = arith.maximumf %226, %227 : vector<8x128xf32>
    %229 = arith.subf %228, %219 : vector<8x128xf32>
    %cst_94 = arith.constant 0.718499839 : f32
    %230 = vector.broadcast %cst_94 : f32 to vector<8x128xf32>
    %231 = arith.mulf %230, %229 : vector<8x128xf32>
    %232 = arith.addf %228, %231 : vector<8x128xf32>
    %cst_95 = arith.constant dense<0.000000e+00> : vector<8x128xf32>
    %233 = tpu.matmul %232, %5, %cst_95 {dimension_numbers = #tpu.dot_dimension_numbers<[1], [0], [0], [1], [0, 0, 1, 1], [], []>} : vector<8x128xf32>, vector<128x128xf32>, vector<8x128xf32> -> vector<8x128xf32>
    %234 = arith.subf %232, %233 : vector<8x128xf32>
    %235 = arith.addf %234, %160 : vector<8x128xf32>
    %cst_96 = arith.constant 0.000000e+00 : f32
    %236 = vector.broadcast %cst_96 : f32 to vector<8x128xf32>
    %237 = arith.maximumf %235, %236 : vector<8x128xf32>
    %238 = arith.subf %237, %228 : vector<8x128xf32>
    %cst_97 = arith.constant 7.436910e-01 : f32
    %239 = vector.broadcast %cst_97 : f32 to vector<8x128xf32>
    %240 = arith.mulf %239, %238 : vector<8x128xf32>
    %241 = arith.addf %237, %240 : vector<8x128xf32>
    %cst_98 = arith.constant dense<0.000000e+00> : vector<8x128xf32>
    %242 = tpu.matmul %241, %5, %cst_98 {dimension_numbers = #tpu.dot_dimension_numbers<[1], [0], [0], [1], [0, 0, 1, 1], [], []>} : vector<8x128xf32>, vector<128x128xf32>, vector<8x128xf32> -> vector<8x128xf32>
    %243 = arith.subf %241, %242 : vector<8x128xf32>
    %244 = arith.addf %243, %160 : vector<8x128xf32>
    %cst_99 = arith.constant 0.000000e+00 : f32
    %245 = vector.broadcast %cst_99 : f32 to vector<8x128xf32>
    %246 = arith.maximumf %244, %245 : vector<8x128xf32>
    %247 = arith.subf %246, %237 : vector<8x128xf32>
    %cst_100 = arith.constant 0.764664709 : f32
    %248 = vector.broadcast %cst_100 : f32 to vector<8x128xf32>
    %249 = arith.mulf %248, %247 : vector<8x128xf32>
    %250 = arith.addf %246, %249 : vector<8x128xf32>
    %cst_101 = arith.constant dense<0.000000e+00> : vector<8x128xf32>
    %251 = tpu.matmul %250, %5, %cst_101 {dimension_numbers = #tpu.dot_dimension_numbers<[1], [0], [0], [1], [0, 0, 1, 1], [], []>} : vector<8x128xf32>, vector<128x128xf32>, vector<8x128xf32> -> vector<8x128xf32>
    %252 = arith.subf %250, %251 : vector<8x128xf32>
    %253 = arith.addf %252, %160 : vector<8x128xf32>
    %cst_102 = arith.constant 0.000000e+00 : f32
    %254 = vector.broadcast %cst_102 : f32 to vector<8x128xf32>
    %255 = arith.maximumf %253, %254 : vector<8x128xf32>
    %256 = arith.subf %255, %246 : vector<8x128xf32>
    %cst_103 = arith.constant 0.78240925 : f32
    %257 = vector.broadcast %cst_103 : f32 to vector<8x128xf32>
    %258 = arith.mulf %257, %256 : vector<8x128xf32>
    %259 = arith.addf %255, %258 : vector<8x128xf32>
    %cst_104 = arith.constant dense<0.000000e+00> : vector<8x128xf32>
    %260 = tpu.matmul %259, %5, %cst_104 {dimension_numbers = #tpu.dot_dimension_numbers<[1], [0], [0], [1], [0, 0, 1, 1], [], []>} : vector<8x128xf32>, vector<128x128xf32>, vector<8x128xf32> -> vector<8x128xf32>
    %261 = arith.subf %259, %260 : vector<8x128xf32>
    %262 = arith.addf %261, %160 : vector<8x128xf32>
    %cst_105 = arith.constant 0.000000e+00 : f32
    %263 = vector.broadcast %cst_105 : f32 to vector<8x128xf32>
    %264 = arith.maximumf %262, %263 : vector<8x128xf32>
    %265 = arith.subf %264, %255 : vector<8x128xf32>
    %cst_106 = arith.constant 0.797624409 : f32
    %266 = vector.broadcast %cst_106 : f32 to vector<8x128xf32>
    %267 = arith.mulf %266, %265 : vector<8x128xf32>
    %268 = arith.addf %264, %267 : vector<8x128xf32>
    %cst_107 = arith.constant dense<0.000000e+00> : vector<8x128xf32>
    %269 = tpu.matmul %268, %5, %cst_107 {dimension_numbers = #tpu.dot_dimension_numbers<[1], [0], [0], [1], [0, 0, 1, 1], [], []>} : vector<8x128xf32>, vector<128x128xf32>, vector<8x128xf32> -> vector<8x128xf32>
    %270 = arith.subf %268, %269 : vector<8x128xf32>
    %271 = arith.addf %270, %160 : vector<8x128xf32>
    %cst_108 = arith.constant 0.000000e+00 : f32
    %272 = vector.broadcast %cst_108 : f32 to vector<8x128xf32>
    %273 = arith.maximumf %271, %272 : vector<8x128xf32>
    %274 = arith.subf %273, %264 : vector<8x128xf32>
    %cst_109 = arith.constant 0.810819983 : f32
    %275 = vector.broadcast %cst_109 : f32 to vector<8x128xf32>
    %276 = arith.mulf %275, %274 : vector<8x128xf32>
    %277 = arith.addf %273, %276 : vector<8x128xf32>
    %cst_110 = arith.constant dense<0.000000e+00> : vector<8x128xf32>
    %278 = tpu.matmul %277, %5, %cst_110 {dimension_numbers = #tpu.dot_dimension_numbers<[1], [0], [0], [1], [0, 0, 1, 1], [], []>} : vector<8x128xf32>, vector<128x128xf32>, vector<8x128xf32> -> vector<8x128xf32>
    %279 = arith.subf %277, %278 : vector<8x128xf32>
    %280 = arith.addf %279, %160 : vector<8x128xf32>
    %cst_111 = arith.constant 0.000000e+00 : f32
    %281 = vector.broadcast %cst_111 : f32 to vector<8x128xf32>
    %282 = arith.maximumf %280, %281 : vector<8x128xf32>
    %283 = arith.subf %282, %273 : vector<8x128xf32>
    %cst_112 = arith.constant 0.822376668 : f32
    %284 = vector.broadcast %cst_112 : f32 to vector<8x128xf32>
    %285 = arith.mulf %284, %283 : vector<8x128xf32>
    %286 = arith.addf %282, %285 : vector<8x128xf32>
    %cst_113 = arith.constant dense<0.000000e+00> : vector<8x128xf32>
    %287 = tpu.matmul %286, %5, %cst_113 {dimension_numbers = #tpu.dot_dimension_numbers<[1], [0], [0], [1], [0, 0, 1, 1], [], []>} : vector<8x128xf32>, vector<128x128xf32>, vector<8x128xf32> -> vector<8x128xf32>
    %288 = arith.subf %286, %287 : vector<8x128xf32>
    %289 = arith.addf %288, %160 : vector<8x128xf32>
    %cst_114 = arith.constant 0.000000e+00 : f32
    %290 = vector.broadcast %cst_114 : f32 to vector<8x128xf32>
    %291 = arith.maximumf %289, %290 : vector<8x128xf32>
    %c1_115 = arith.constant 1 : index
    %c0_116 = arith.constant 0 : index
    %c0_117 = arith.constant 0 : index
    %292 = vector.load %arg10[%c1_115, %c0_116, %c0_117] : memref<6x8x128xf32, #tpu.memory_space<vmem>>, vector<1x8x128xf32>
    %293 = vector.shape_cast %292 : vector<1x8x128xf32> to vector<8x128xf32>
    %294 = vector.shape_cast %291 : vector<8x128xf32> to vector<1x8x128xf32>
    tpu.vector_store %arg10[%c1_115, %c0_116, %c0_117], %294 {strides = array<i32>} : memref<6x8x128xf32, #tpu.memory_space<vmem>>, vector<1x8x128xf32>,
    %cst_118 = arith.constant dense<0.000000e+00> : vector<8x128xf32>
    %295 = tpu.matmul %291, %6, %cst_118 {dimension_numbers = #tpu.dot_dimension_numbers<[1], [0], [0], [1], [0, 0, 1, 1], [], []>} : vector<8x128xf32>, vector<128x128xf32>, vector<8x128xf32> -> vector<8x128xf32>
    %c1_119 = arith.constant 1 : index
    %c0_120 = arith.constant 0 : index
    %c0_121 = arith.constant 0 : index
    %296 = vector.load %arg9[%c1_119, %c0_120, %c0_121] : memref<6x8x128xf32, #tpu.memory_space<vmem>>, vector<1x8x128xf32>
    %297 = vector.shape_cast %296 : vector<1x8x128xf32> to vector<8x128xf32>
    %298 = vector.shape_cast %295 : vector<8x128xf32> to vector<1x8x128xf32>
    tpu.vector_store %arg9[%c1_119, %c0_120, %c0_121], %298 {strides = array<i32>} : memref<6x8x128xf32, #tpu.memory_space<vmem>>, vector<1x8x128xf32>,
    %c2 = arith.constant 2 : index
    %c0_122 = arith.constant 0 : index
    %c0_123 = arith.constant 0 : index
    %299 = vector.load %arg2[%c2, %c0_122, %c0_123] : memref<6x8x128xf32, #tpu.memory_space<vmem>>, vector<1x8x128xf32>
    %300 = vector.shape_cast %299 : vector<1x8x128xf32> to vector<8x128xf32>
    %cst_124 = arith.constant dense<0.000000e+00> : vector<8x128xf32>
    %301 = tpu.matmul %291, %3, %cst_124 {dimension_numbers = #tpu.dot_dimension_numbers<[1], [0], [0], [1], [0, 0, 1, 1], [], []>} : vector<8x128xf32>, vector<128x128xf32>, vector<8x128xf32> -> vector<8x128xf32>
    %cst_125 = arith.constant dense<0.000000e+00> : vector<8x128xf32>
    %302 = tpu.matmul %300, %4, %cst_125 {dimension_numbers = #tpu.dot_dimension_numbers<[1], [0], [0], [1], [0, 0, 1, 1], [], []>} : vector<8x128xf32>, vector<128x128xf32>, vector<8x128xf32> -> vector<8x128xf32>
    %303 = arith.addf %301, %302 : vector<8x128xf32>
    %304 = vector.broadcast %7 : vector<1x128xf32> to vector<8x128xf32>
    %305 = arith.subf %303, %304 : vector<8x128xf32>
    %cst_126 = arith.constant dense<0.000000e+00> : vector<8x128xf32>
    %306 = tpu.matmul %291, %5, %cst_126 {dimension_numbers = #tpu.dot_dimension_numbers<[1], [0], [0], [1], [0, 0, 1, 1], [], []>} : vector<8x128xf32>, vector<128x128xf32>, vector<8x128xf32> -> vector<8x128xf32>
    %307 = arith.subf %291, %306 : vector<8x128xf32>
    %308 = arith.addf %307, %305 : vector<8x128xf32>
    %cst_127 = arith.constant 0.000000e+00 : f32
    %309 = vector.broadcast %cst_127 : f32 to vector<8x128xf32>
    %310 = arith.maximumf %308, %309 : vector<8x128xf32>
    %311 = arith.subf %310, %291 : vector<8x128xf32>
    %cst_128 = arith.constant 0.000000e+00 : f32
    %312 = vector.broadcast %cst_128 : f32 to vector<8x128xf32>
    %313 = arith.mulf %312, %311 : vector<8x128xf32>
    %314 = arith.addf %310, %313 : vector<8x128xf32>
    %cst_129 = arith.constant dense<0.000000e+00> : vector<8x128xf32>
    %315 = tpu.matmul %314, %5, %cst_129 {dimension_numbers = #tpu.dot_dimension_numbers<[1], [0], [0], [1], [0, 0, 1, 1], [], []>} : vector<8x128xf32>, vector<128x128xf32>, vector<8x128xf32> -> vector<8x128xf32>
    %316 = arith.subf %314, %315 : vector<8x128xf32>
    %317 = arith.addf %316, %305 : vector<8x128xf32>
    %cst_130 = arith.constant 0.000000e+00 : f32
    %318 = vector.broadcast %cst_130 : f32 to vector<8x128xf32>
    %319 = arith.maximumf %317, %318 : vector<8x128xf32>
    %320 = arith.subf %319, %310 : vector<8x128xf32>
    %cst_131 = arith.constant 0.28175351 : f32
    %321 = vector.broadcast %cst_131 : f32 to vector<8x128xf32>
    %322 = arith.mulf %321, %320 : vector<8x128xf32>
    %323 = arith.addf %319, %322 : vector<8x128xf32>
    %cst_132 = arith.constant dense<0.000000e+00> : vector<8x128xf32>
    %324 = tpu.matmul %323, %5, %cst_132 {dimension_numbers = #tpu.dot_dimension_numbers<[1], [0], [0], [1], [0, 0, 1, 1], [], []>} : vector<8x128xf32>, vector<128x128xf32>, vector<8x128xf32> -> vector<8x128xf32>
    %325 = arith.subf %323, %324 : vector<8x128xf32>
    %326 = arith.addf %325, %305 : vector<8x128xf32>
    %cst_133 = arith.constant 0.000000e+00 : f32
    %327 = vector.broadcast %cst_133 : f32 to vector<8x128xf32>
    %328 = arith.maximumf %326, %327 : vector<8x128xf32>
    %329 = arith.subf %328, %319 : vector<8x128xf32>
    %cst_134 = arith.constant 0.434042782 : f32
    %330 = vector.broadcast %cst_134 : f32 to vector<8x128xf32>
    %331 = arith.mulf %330, %329 : vector<8x128xf32>
    %332 = arith.addf %328, %331 : vector<8x128xf32>
    %cst_135 = arith.constant dense<0.000000e+00> : vector<8x128xf32>
    %333 = tpu.matmul %332, %5, %cst_135 {dimension_numbers = #tpu.dot_dimension_numbers<[1], [0], [0], [1], [0, 0, 1, 1], [], []>} : vector<8x128xf32>, vector<128x128xf32>, vector<8x128xf32> -> vector<8x128xf32>
    %334 = arith.subf %332, %333 : vector<8x128xf32>
    %335 = arith.addf %334, %305 : vector<8x128xf32>
    %cst_136 = arith.constant 0.000000e+00 : f32
    %336 = vector.broadcast %cst_136 : f32 to vector<8x128xf32>
    %337 = arith.maximumf %335, %336 : vector<8x128xf32>
    %338 = arith.subf %337, %328 : vector<8x128xf32>
    %cst_137 = arith.constant 0.531063795 : f32
    %339 = vector.broadcast %cst_137 : f32 to vector<8x128xf32>
    %340 = arith.mulf %339, %338 : vector<8x128xf32>
    %341 = arith.addf %337, %340 : vector<8x128xf32>
    %cst_138 = arith.constant dense<0.000000e+00> : vector<8x128xf32>
    %342 = tpu.matmul %341, %5, %cst_138 {dimension_numbers = #tpu.dot_dimension_numbers<[1], [0], [0], [1], [0, 0, 1, 1], [], []>} : vector<8x128xf32>, vector<128x128xf32>, vector<8x128xf32> -> vector<8x128xf32>
    %343 = arith.subf %341, %342 : vector<8x128xf32>
    %344 = arith.addf %343, %305 : vector<8x128xf32>
    %cst_139 = arith.constant 0.000000e+00 : f32
    %345 = vector.broadcast %cst_139 : f32 to vector<8x128xf32>
    %346 = arith.maximumf %344, %345 : vector<8x128xf32>
    %347 = arith.subf %346, %337 : vector<8x128xf32>
    %cst_140 = arith.constant 0.598778605 : f32
    %348 = vector.broadcast %cst_140 : f32 to vector<8x128xf32>
    %349 = arith.mulf %348, %347 : vector<8x128xf32>
    %350 = arith.addf %346, %349 : vector<8x128xf32>
    %cst_141 = arith.constant dense<0.000000e+00> : vector<8x128xf32>
    %351 = tpu.matmul %350, %5, %cst_141 {dimension_numbers = #tpu.dot_dimension_numbers<[1], [0], [0], [1], [0, 0, 1, 1], [], []>} : vector<8x128xf32>, vector<128x128xf32>, vector<8x128xf32> -> vector<8x128xf32>
    %352 = arith.subf %350, %351 : vector<8x128xf32>
    %353 = arith.addf %352, %305 : vector<8x128xf32>
    %cst_142 = arith.constant 0.000000e+00 : f32
    %354 = vector.broadcast %cst_142 : f32 to vector<8x128xf32>
    %355 = arith.maximumf %353, %354 : vector<8x128xf32>
    %356 = arith.subf %355, %346 : vector<8x128xf32>
    %cst_143 = arith.constant 0.648923337 : f32
    %357 = vector.broadcast %cst_143 : f32 to vector<8x128xf32>
    %358 = arith.mulf %357, %356 : vector<8x128xf32>
    %359 = arith.addf %355, %358 : vector<8x128xf32>
    %cst_144 = arith.constant dense<0.000000e+00> : vector<8x128xf32>
    %360 = tpu.matmul %359, %5, %cst_144 {dimension_numbers = #tpu.dot_dimension_numbers<[1], [0], [0], [1], [0, 0, 1, 1], [], []>} : vector<8x128xf32>, vector<128x128xf32>, vector<8x128xf32> -> vector<8x128xf32>
    %361 = arith.subf %359, %360 : vector<8x128xf32>
    %362 = arith.addf %361, %305 : vector<8x128xf32>
    %cst_145 = arith.constant 0.000000e+00 : f32
    %363 = vector.broadcast %cst_145 : f32 to vector<8x128xf32>
    %364 = arith.maximumf %362, %363 : vector<8x128xf32>
    %365 = arith.subf %364, %355 : vector<8x128xf32>
    %cst_146 = arith.constant 0.687645852 : f32
    %366 = vector.broadcast %cst_146 : f32 to vector<8x128xf32>
    %367 = arith.mulf %366, %365 : vector<8x128xf32>
    %368 = arith.addf %364, %367 : vector<8x128xf32>
    %cst_147 = arith.constant dense<0.000000e+00> : vector<8x128xf32>
    %369 = tpu.matmul %368, %5, %cst_147 {dimension_numbers = #tpu.dot_dimension_numbers<[1], [0], [0], [1], [0, 0, 1, 1], [], []>} : vector<8x128xf32>, vector<128x128xf32>, vector<8x128xf32> -> vector<8x128xf32>
    %370 = arith.subf %368, %369 : vector<8x128xf32>
    %371 = arith.addf %370, %305 : vector<8x128xf32>
    %cst_148 = arith.constant 0.000000e+00 : f32
    %372 = vector.broadcast %cst_148 : f32 to vector<8x128xf32>
    %373 = arith.maximumf %371, %372 : vector<8x128xf32>
    %374 = arith.subf %373, %364 : vector<8x128xf32>
    %cst_149 = arith.constant 0.718499839 : f32
    %375 = vector.broadcast %cst_149 : f32 to vector<8x128xf32>
    %376 = arith.mulf %375, %374 : vector<8x128xf32>
    %377 = arith.addf %373, %376 : vector<8x128xf32>
    %cst_150 = arith.constant dense<0.000000e+00> : vector<8x128xf32>
    %378 = tpu.matmul %377, %5, %cst_150 {dimension_numbers = #tpu.dot_dimension_numbers<[1], [0], [0], [1], [0, 0, 1, 1], [], []>} : vector<8x128xf32>, vector<128x128xf32>, vector<8x128xf32> -> vector<8x128xf32>
    %379 = arith.subf %377, %378 : vector<8x128xf32>
    %380 = arith.addf %379, %305 : vector<8x128xf32>
    %cst_151 = arith.constant 0.000000e+00 : f32
    %381 = vector.broadcast %cst_151 : f32 to vector<8x128xf32>
    %382 = arith.maximumf %380, %381 : vector<8x128xf32>
    %383 = arith.subf %382, %373 : vector<8x128xf32>
    %cst_152 = arith.constant 7.436910e-01 : f32
    %384 = vector.broadcast %cst_152 : f32 to vector<8x128xf32>
    %385 = arith.mulf %384, %383 : vector<8x128xf32>
    %386 = arith.addf %382, %385 : vector<8x128xf32>
    %cst_153 = arith.constant dense<0.000000e+00> : vector<8x128xf32>
    %387 = tpu.matmul %386, %5, %cst_153 {dimension_numbers = #tpu.dot_dimension_numbers<[1], [0], [0], [1], [0, 0, 1, 1], [], []>} : vector<8x128xf32>, vector<128x128xf32>, vector<8x128xf32> -> vector<8x128xf32>
    %388 = arith.subf %386, %387 : vector<8x128xf32>
    %389 = arith.addf %388, %305 : vector<8x128xf32>
    %cst_154 = arith.constant 0.000000e+00 : f32
    %390 = vector.broadcast %cst_154 : f32 to vector<8x128xf32>
    %391 = arith.maximumf %389, %390 : vector<8x128xf32>
    %392 = arith.subf %391, %382 : vector<8x128xf32>
    %cst_155 = arith.constant 0.764664709 : f32
    %393 = vector.broadcast %cst_155 : f32 to vector<8x128xf32>
    %394 = arith.mulf %393, %392 : vector<8x128xf32>
    %395 = arith.addf %391, %394 : vector<8x128xf32>
    %cst_156 = arith.constant dense<0.000000e+00> : vector<8x128xf32>
    %396 = tpu.matmul %395, %5, %cst_156 {dimension_numbers = #tpu.dot_dimension_numbers<[1], [0], [0], [1], [0, 0, 1, 1], [], []>} : vector<8x128xf32>, vector<128x128xf32>, vector<8x128xf32> -> vector<8x128xf32>
    %397 = arith.subf %395, %396 : vector<8x128xf32>
    %398 = arith.addf %397, %305 : vector<8x128xf32>
    %cst_157 = arith.constant 0.000000e+00 : f32
    %399 = vector.broadcast %cst_157 : f32 to vector<8x128xf32>
    %400 = arith.maximumf %398, %399 : vector<8x128xf32>
    %401 = arith.subf %400, %391 : vector<8x128xf32>
    %cst_158 = arith.constant 0.78240925 : f32
    %402 = vector.broadcast %cst_158 : f32 to vector<8x128xf32>
    %403 = arith.mulf %402, %401 : vector<8x128xf32>
    %404 = arith.addf %400, %403 : vector<8x128xf32>
    %cst_159 = arith.constant dense<0.000000e+00> : vector<8x128xf32>
    %405 = tpu.matmul %404, %5, %cst_159 {dimension_numbers = #tpu.dot_dimension_numbers<[1], [0], [0], [1], [0, 0, 1, 1], [], []>} : vector<8x128xf32>, vector<128x128xf32>, vector<8x128xf32> -> vector<8x128xf32>
    %406 = arith.subf %404, %405 : vector<8x128xf32>
    %407 = arith.addf %406, %305 : vector<8x128xf32>
    %cst_160 = arith.constant 0.000000e+00 : f32
    %408 = vector.broadcast %cst_160 : f32 to vector<8x128xf32>
    %409 = arith.maximumf %407, %408 : vector<8x128xf32>
    %410 = arith.subf %409, %400 : vector<8x128xf32>
    %cst_161 = arith.constant 0.797624409 : f32
    %411 = vector.broadcast %cst_161 : f32 to vector<8x128xf32>
    %412 = arith.mulf %411, %410 : vector<8x128xf32>
    %413 = arith.addf %409, %412 : vector<8x128xf32>
    %cst_162 = arith.constant dense<0.000000e+00> : vector<8x128xf32>
    %414 = tpu.matmul %413, %5, %cst_162 {dimension_numbers = #tpu.dot_dimension_numbers<[1], [0], [0], [1], [0, 0, 1, 1], [], []>} : vector<8x128xf32>, vector<128x128xf32>, vector<8x128xf32> -> vector<8x128xf32>
    %415 = arith.subf %413, %414 : vector<8x128xf32>
    %416 = arith.addf %415, %305 : vector<8x128xf32>
    %cst_163 = arith.constant 0.000000e+00 : f32
    %417 = vector.broadcast %cst_163 : f32 to vector<8x128xf32>
    %418 = arith.maximumf %416, %417 : vector<8x128xf32>
    %419 = arith.subf %418, %409 : vector<8x128xf32>
    %cst_164 = arith.constant 0.810819983 : f32
    %420 = vector.broadcast %cst_164 : f32 to vector<8x128xf32>
    %421 = arith.mulf %420, %419 : vector<8x128xf32>
    %422 = arith.addf %418, %421 : vector<8x128xf32>
    %cst_165 = arith.constant dense<0.000000e+00> : vector<8x128xf32>
    %423 = tpu.matmul %422, %5, %cst_165 {dimension_numbers = #tpu.dot_dimension_numbers<[1], [0], [0], [1], [0, 0, 1, 1], [], []>} : vector<8x128xf32>, vector<128x128xf32>, vector<8x128xf32> -> vector<8x128xf32>
    %424 = arith.subf %422, %423 : vector<8x128xf32>
    %425 = arith.addf %424, %305 : vector<8x128xf32>
    %cst_166 = arith.constant 0.000000e+00 : f32
    %426 = vector.broadcast %cst_166 : f32 to vector<8x128xf32>
    %427 = arith.maximumf %425, %426 : vector<8x128xf32>
    %428 = arith.subf %427, %418 : vector<8x128xf32>
    %cst_167 = arith.constant 0.822376668 : f32
    %429 = vector.broadcast %cst_167 : f32 to vector<8x128xf32>
    %430 = arith.mulf %429, %428 : vector<8x128xf32>
    %431 = arith.addf %427, %430 : vector<8x128xf32>
    %cst_168 = arith.constant dense<0.000000e+00> : vector<8x128xf32>
    %432 = tpu.matmul %431, %5, %cst_168 {dimension_numbers = #tpu.dot_dimension_numbers<[1], [0], [0], [1], [0, 0, 1, 1], [], []>} : vector<8x128xf32>, vector<128x128xf32>, vector<8x128xf32> -> vector<8x128xf32>
    %433 = arith.subf %431, %432 : vector<8x128xf32>
    %434 = arith.addf %433, %305 : vector<8x128xf32>
    %cst_169 = arith.constant 0.000000e+00 : f32
    %435 = vector.broadcast %cst_169 : f32 to vector<8x128xf32>
    %436 = arith.maximumf %434, %435 : vector<8x128xf32>
    %c2_170 = arith.constant 2 : index
    %c0_171 = arith.constant 0 : index
    %c0_172 = arith.constant 0 : index
    %437 = vector.load %arg10[%c2_170, %c0_171, %c0_172] : memref<6x8x128xf32, #tpu.memory_space<vmem>>, vector<1x8x128xf32>
    %438 = vector.shape_cast %437 : vector<1x8x128xf32> to vector<8x128xf32>
    %439 = vector.shape_cast %436 : vector<8x128xf32> to vector<1x8x128xf32>
    tpu.vector_store %arg10[%c2_170, %c0_171, %c0_172], %439 {strides = array<i32>} : memref<6x8x128xf32, #tpu.memory_space<vmem>>, vector<1x8x128xf32>,
    %cst_173 = arith.constant dense<0.000000e+00> : vector<8x128xf32>
    %440 = tpu.matmul %436, %6, %cst_173 {dimension_numbers = #tpu.dot_dimension_numbers<[1], [0], [0], [1], [0, 0, 1, 1], [], []>} : vector<8x128xf32>, vector<128x128xf32>, vector<8x128xf32> -> vector<8x128xf32>
    %c2_174 = arith.constant 2 : index
    %c0_175 = arith.constant 0 : index
    %c0_176 = arith.constant 0 : index
    %441 = vector.load %arg9[%c2_174, %c0_175, %c0_176] : memref<6x8x128xf32, #tpu.memory_space<vmem>>, vector<1x8x128xf32>
    %442 = vector.shape_cast %441 : vector<1x8x128xf32> to vector<8x128xf32>
    %443 = vector.shape_cast %440 : vector<8x128xf32> to vector<1x8x128xf32>
    tpu.vector_store %arg9[%c2_174, %c0_175, %c0_176], %443 {strides = array<i32>} : memref<6x8x128xf32, #tpu.memory_space<vmem>>, vector<1x8x128xf32>,
    %c3 = arith.constant 3 : index
    %c0_177 = arith.constant 0 : index
    %c0_178 = arith.constant 0 : index
    %444 = vector.load %arg2[%c3, %c0_177, %c0_178] : memref<6x8x128xf32, #tpu.memory_space<vmem>>, vector<1x8x128xf32>
    %445 = vector.shape_cast %444 : vector<1x8x128xf32> to vector<8x128xf32>
    %cst_179 = arith.constant dense<0.000000e+00> : vector<8x128xf32>
    %446 = tpu.matmul %436, %3, %cst_179 {dimension_numbers = #tpu.dot_dimension_numbers<[1], [0], [0], [1], [0, 0, 1, 1], [], []>} : vector<8x128xf32>, vector<128x128xf32>, vector<8x128xf32> -> vector<8x128xf32>
    %cst_180 = arith.constant dense<0.000000e+00> : vector<8x128xf32>
    %447 = tpu.matmul %445, %4, %cst_180 {dimension_numbers = #tpu.dot_dimension_numbers<[1], [0], [0], [1], [0, 0, 1, 1], [], []>} : vector<8x128xf32>, vector<128x128xf32>, vector<8x128xf32> -> vector<8x128xf32>
    %448 = arith.addf %446, %447 : vector<8x128xf32>
    %449 = vector.broadcast %7 : vector<1x128xf32> to vector<8x128xf32>
    %450 = arith.subf %448, %449 : vector<8x128xf32>
    %cst_181 = arith.constant dense<0.000000e+00> : vector<8x128xf32>
    %451 = tpu.matmul %436, %5, %cst_181 {dimension_numbers = #tpu.dot_dimension_numbers<[1], [0], [0], [1], [0, 0, 1, 1], [], []>} : vector<8x128xf32>, vector<128x128xf32>, vector<8x128xf32> -> vector<8x128xf32>
    %452 = arith.subf %436, %451 : vector<8x128xf32>
    %453 = arith.addf %452, %450 : vector<8x128xf32>
    %cst_182 = arith.constant 0.000000e+00 : f32
    %454 = vector.broadcast %cst_182 : f32 to vector<8x128xf32>
    %455 = arith.maximumf %453, %454 : vector<8x128xf32>
    %456 = arith.subf %455, %436 : vector<8x128xf32>
    %cst_183 = arith.constant 0.000000e+00 : f32
    %457 = vector.broadcast %cst_183 : f32 to vector<8x128xf32>
    %458 = arith.mulf %457, %456 : vector<8x128xf32>
    %459 = arith.addf %455, %458 : vector<8x128xf32>
    %cst_184 = arith.constant dense<0.000000e+00> : vector<8x128xf32>
    %460 = tpu.matmul %459, %5, %cst_184 {dimension_numbers = #tpu.dot_dimension_numbers<[1], [0], [0], [1], [0, 0, 1, 1], [], []>} : vector<8x128xf32>, vector<128x128xf32>, vector<8x128xf32> -> vector<8x128xf32>
    %461 = arith.subf %459, %460 : vector<8x128xf32>
    %462 = arith.addf %461, %450 : vector<8x128xf32>
    %cst_185 = arith.constant 0.000000e+00 : f32
    %463 = vector.broadcast %cst_185 : f32 to vector<8x128xf32>
    %464 = arith.maximumf %462, %463 : vector<8x128xf32>
    %465 = arith.subf %464, %455 : vector<8x128xf32>
    %cst_186 = arith.constant 0.28175351 : f32
    %466 = vector.broadcast %cst_186 : f32 to vector<8x128xf32>
    %467 = arith.mulf %466, %465 : vector<8x128xf32>
    %468 = arith.addf %464, %467 : vector<8x128xf32>
    %cst_187 = arith.constant dense<0.000000e+00> : vector<8x128xf32>
    %469 = tpu.matmul %468, %5, %cst_187 {dimension_numbers = #tpu.dot_dimension_numbers<[1], [0], [0], [1], [0, 0, 1, 1], [], []>} : vector<8x128xf32>, vector<128x128xf32>, vector<8x128xf32> -> vector<8x128xf32>
    %470 = arith.subf %468, %469 : vector<8x128xf32>
    %471 = arith.addf %470, %450 : vector<8x128xf32>
    %cst_188 = arith.constant 0.000000e+00 : f32
    %472 = vector.broadcast %cst_188 : f32 to vector<8x128xf32>
    %473 = arith.maximumf %471, %472 : vector<8x128xf32>
    %474 = arith.subf %473, %464 : vector<8x128xf32>
    %cst_189 = arith.constant 0.434042782 : f32
    %475 = vector.broadcast %cst_189 : f32 to vector<8x128xf32>
    %476 = arith.mulf %475, %474 : vector<8x128xf32>
    %477 = arith.addf %473, %476 : vector<8x128xf32>
    %cst_190 = arith.constant dense<0.000000e+00> : vector<8x128xf32>
    %478 = tpu.matmul %477, %5, %cst_190 {dimension_numbers = #tpu.dot_dimension_numbers<[1], [0], [0], [1], [0, 0, 1, 1], [], []>} : vector<8x128xf32>, vector<128x128xf32>, vector<8x128xf32> -> vector<8x128xf32>
    %479 = arith.subf %477, %478 : vector<8x128xf32>
    %480 = arith.addf %479, %450 : vector<8x128xf32>
    %cst_191 = arith.constant 0.000000e+00 : f32
    %481 = vector.broadcast %cst_191 : f32 to vector<8x128xf32>
    %482 = arith.maximumf %480, %481 : vector<8x128xf32>
    %483 = arith.subf %482, %473 : vector<8x128xf32>
    %cst_192 = arith.constant 0.531063795 : f32
    %484 = vector.broadcast %cst_192 : f32 to vector<8x128xf32>
    %485 = arith.mulf %484, %483 : vector<8x128xf32>
    %486 = arith.addf %482, %485 : vector<8x128xf32>
    %cst_193 = arith.constant dense<0.000000e+00> : vector<8x128xf32>
    %487 = tpu.matmul %486, %5, %cst_193 {dimension_numbers = #tpu.dot_dimension_numbers<[1], [0], [0], [1], [0, 0, 1, 1], [], []>} : vector<8x128xf32>, vector<128x128xf32>, vector<8x128xf32> -> vector<8x128xf32>
    %488 = arith.subf %486, %487 : vector<8x128xf32>
    %489 = arith.addf %488, %450 : vector<8x128xf32>
    %cst_194 = arith.constant 0.000000e+00 : f32
    %490 = vector.broadcast %cst_194 : f32 to vector<8x128xf32>
    %491 = arith.maximumf %489, %490 : vector<8x128xf32>
    %492 = arith.subf %491, %482 : vector<8x128xf32>
    %cst_195 = arith.constant 0.598778605 : f32
    %493 = vector.broadcast %cst_195 : f32 to vector<8x128xf32>
    %494 = arith.mulf %493, %492 : vector<8x128xf32>
    %495 = arith.addf %491, %494 : vector<8x128xf32>
    %cst_196 = arith.constant dense<0.000000e+00> : vector<8x128xf32>
    %496 = tpu.matmul %495, %5, %cst_196 {dimension_numbers = #tpu.dot_dimension_numbers<[1], [0], [0], [1], [0, 0, 1, 1], [], []>} : vector<8x128xf32>, vector<128x128xf32>, vector<8x128xf32> -> vector<8x128xf32>
    %497 = arith.subf %495, %496 : vector<8x128xf32>
    %498 = arith.addf %497, %450 : vector<8x128xf32>
    %cst_197 = arith.constant 0.000000e+00 : f32
    %499 = vector.broadcast %cst_197 : f32 to vector<8x128xf32>
    %500 = arith.maximumf %498, %499 : vector<8x128xf32>
    %501 = arith.subf %500, %491 : vector<8x128xf32>
    %cst_198 = arith.constant 0.648923337 : f32
    %502 = vector.broadcast %cst_198 : f32 to vector<8x128xf32>
    %503 = arith.mulf %502, %501 : vector<8x128xf32>
    %504 = arith.addf %500, %503 : vector<8x128xf32>
    %cst_199 = arith.constant dense<0.000000e+00> : vector<8x128xf32>
    %505 = tpu.matmul %504, %5, %cst_199 {dimension_numbers = #tpu.dot_dimension_numbers<[1], [0], [0], [1], [0, 0, 1, 1], [], []>} : vector<8x128xf32>, vector<128x128xf32>, vector<8x128xf32> -> vector<8x128xf32>
    %506 = arith.subf %504, %505 : vector<8x128xf32>
    %507 = arith.addf %506, %450 : vector<8x128xf32>
    %cst_200 = arith.constant 0.000000e+00 : f32
    %508 = vector.broadcast %cst_200 : f32 to vector<8x128xf32>
    %509 = arith.maximumf %507, %508 : vector<8x128xf32>
    %510 = arith.subf %509, %500 : vector<8x128xf32>
    %cst_201 = arith.constant 0.687645852 : f32
    %511 = vector.broadcast %cst_201 : f32 to vector<8x128xf32>
    %512 = arith.mulf %511, %510 : vector<8x128xf32>
    %513 = arith.addf %509, %512 : vector<8x128xf32>
    %cst_202 = arith.constant dense<0.000000e+00> : vector<8x128xf32>
    %514 = tpu.matmul %513, %5, %cst_202 {dimension_numbers = #tpu.dot_dimension_numbers<[1], [0], [0], [1], [0, 0, 1, 1], [], []>} : vector<8x128xf32>, vector<128x128xf32>, vector<8x128xf32> -> vector<8x128xf32>
    %515 = arith.subf %513, %514 : vector<8x128xf32>
    %516 = arith.addf %515, %450 : vector<8x128xf32>
    %cst_203 = arith.constant 0.000000e+00 : f32
    %517 = vector.broadcast %cst_203 : f32 to vector<8x128xf32>
    %518 = arith.maximumf %516, %517 : vector<8x128xf32>
    %519 = arith.subf %518, %509 : vector<8x128xf32>
    %cst_204 = arith.constant 0.718499839 : f32
    %520 = vector.broadcast %cst_204 : f32 to vector<8x128xf32>
    %521 = arith.mulf %520, %519 : vector<8x128xf32>
    %522 = arith.addf %518, %521 : vector<8x128xf32>
    %cst_205 = arith.constant dense<0.000000e+00> : vector<8x128xf32>
    %523 = tpu.matmul %522, %5, %cst_205 {dimension_numbers = #tpu.dot_dimension_numbers<[1], [0], [0], [1], [0, 0, 1, 1], [], []>} : vector<8x128xf32>, vector<128x128xf32>, vector<8x128xf32> -> vector<8x128xf32>
    %524 = arith.subf %522, %523 : vector<8x128xf32>
    %525 = arith.addf %524, %450 : vector<8x128xf32>
    %cst_206 = arith.constant 0.000000e+00 : f32
    %526 = vector.broadcast %cst_206 : f32 to vector<8x128xf32>
    %527 = arith.maximumf %525, %526 : vector<8x128xf32>
    %528 = arith.subf %527, %518 : vector<8x128xf32>
    %cst_207 = arith.constant 7.436910e-01 : f32
    %529 = vector.broadcast %cst_207 : f32 to vector<8x128xf32>
    %530 = arith.mulf %529, %528 : vector<8x128xf32>
    %531 = arith.addf %527, %530 : vector<8x128xf32>
    %cst_208 = arith.constant dense<0.000000e+00> : vector<8x128xf32>
    %532 = tpu.matmul %531, %5, %cst_208 {dimension_numbers = #tpu.dot_dimension_numbers<[1], [0], [0], [1], [0, 0, 1, 1], [], []>} : vector<8x128xf32>, vector<128x128xf32>, vector<8x128xf32> -> vector<8x128xf32>
    %533 = arith.subf %531, %532 : vector<8x128xf32>
    %534 = arith.addf %533, %450 : vector<8x128xf32>
    %cst_209 = arith.constant 0.000000e+00 : f32
    %535 = vector.broadcast %cst_209 : f32 to vector<8x128xf32>
    %536 = arith.maximumf %534, %535 : vector<8x128xf32>
    %537 = arith.subf %536, %527 : vector<8x128xf32>
    %cst_210 = arith.constant 0.764664709 : f32
    %538 = vector.broadcast %cst_210 : f32 to vector<8x128xf32>
    %539 = arith.mulf %538, %537 : vector<8x128xf32>
    %540 = arith.addf %536, %539 : vector<8x128xf32>
    %cst_211 = arith.constant dense<0.000000e+00> : vector<8x128xf32>
    %541 = tpu.matmul %540, %5, %cst_211 {dimension_numbers = #tpu.dot_dimension_numbers<[1], [0], [0], [1], [0, 0, 1, 1], [], []>} : vector<8x128xf32>, vector<128x128xf32>, vector<8x128xf32> -> vector<8x128xf32>
    %542 = arith.subf %540, %541 : vector<8x128xf32>
    %543 = arith.addf %542, %450 : vector<8x128xf32>
    %cst_212 = arith.constant 0.000000e+00 : f32
    %544 = vector.broadcast %cst_212 : f32 to vector<8x128xf32>
    %545 = arith.maximumf %543, %544 : vector<8x128xf32>
    %546 = arith.subf %545, %536 : vector<8x128xf32>
    %cst_213 = arith.constant 0.78240925 : f32
    %547 = vector.broadcast %cst_213 : f32 to vector<8x128xf32>
    %548 = arith.mulf %547, %546 : vector<8x128xf32>
    %549 = arith.addf %545, %548 : vector<8x128xf32>
    %cst_214 = arith.constant dense<0.000000e+00> : vector<8x128xf32>
    %550 = tpu.matmul %549, %5, %cst_214 {dimension_numbers = #tpu.dot_dimension_numbers<[1], [0], [0], [1], [0, 0, 1, 1], [], []>} : vector<8x128xf32>, vector<128x128xf32>, vector<8x128xf32> -> vector<8x128xf32>
    %551 = arith.subf %549, %550 : vector<8x128xf32>
    %552 = arith.addf %551, %450 : vector<8x128xf32>
    %cst_215 = arith.constant 0.000000e+00 : f32
    %553 = vector.broadcast %cst_215 : f32 to vector<8x128xf32>
    %554 = arith.maximumf %552, %553 : vector<8x128xf32>
    %555 = arith.subf %554, %545 : vector<8x128xf32>
    %cst_216 = arith.constant 0.797624409 : f32
    %556 = vector.broadcast %cst_216 : f32 to vector<8x128xf32>
    %557 = arith.mulf %556, %555 : vector<8x128xf32>
    %558 = arith.addf %554, %557 : vector<8x128xf32>
    %cst_217 = arith.constant dense<0.000000e+00> : vector<8x128xf32>
    %559 = tpu.matmul %558, %5, %cst_217 {dimension_numbers = #tpu.dot_dimension_numbers<[1], [0], [0], [1], [0, 0, 1, 1], [], []>} : vector<8x128xf32>, vector<128x128xf32>, vector<8x128xf32> -> vector<8x128xf32>
    %560 = arith.subf %558, %559 : vector<8x128xf32>
    %561 = arith.addf %560, %450 : vector<8x128xf32>
    %cst_218 = arith.constant 0.000000e+00 : f32
    %562 = vector.broadcast %cst_218 : f32 to vector<8x128xf32>
    %563 = arith.maximumf %561, %562 : vector<8x128xf32>
    %564 = arith.subf %563, %554 : vector<8x128xf32>
    %cst_219 = arith.constant 0.810819983 : f32
    %565 = vector.broadcast %cst_219 : f32 to vector<8x128xf32>
    %566 = arith.mulf %565, %564 : vector<8x128xf32>
    %567 = arith.addf %563, %566 : vector<8x128xf32>
    %cst_220 = arith.constant dense<0.000000e+00> : vector<8x128xf32>
    %568 = tpu.matmul %567, %5, %cst_220 {dimension_numbers = #tpu.dot_dimension_numbers<[1], [0], [0], [1], [0, 0, 1, 1], [], []>} : vector<8x128xf32>, vector<128x128xf32>, vector<8x128xf32> -> vector<8x128xf32>
    %569 = arith.subf %567, %568 : vector<8x128xf32>
    %570 = arith.addf %569, %450 : vector<8x128xf32>
    %cst_221 = arith.constant 0.000000e+00 : f32
    %571 = vector.broadcast %cst_221 : f32 to vector<8x128xf32>
    %572 = arith.maximumf %570, %571 : vector<8x128xf32>
    %573 = arith.subf %572, %563 : vector<8x128xf32>
    %cst_222 = arith.constant 0.822376668 : f32
    %574 = vector.broadcast %cst_222 : f32 to vector<8x128xf32>
    %575 = arith.mulf %574, %573 : vector<8x128xf32>
    %576 = arith.addf %572, %575 : vector<8x128xf32>
    %cst_223 = arith.constant dense<0.000000e+00> : vector<8x128xf32>
    %577 = tpu.matmul %576, %5, %cst_223 {dimension_numbers = #tpu.dot_dimension_numbers<[1], [0], [0], [1], [0, 0, 1, 1], [], []>} : vector<8x128xf32>, vector<128x128xf32>, vector<8x128xf32> -> vector<8x128xf32>
    %578 = arith.subf %576, %577 : vector<8x128xf32>
    %579 = arith.addf %578, %450 : vector<8x128xf32>
    %cst_224 = arith.constant 0.000000e+00 : f32
    %580 = vector.broadcast %cst_224 : f32 to vector<8x128xf32>
    %581 = arith.maximumf %579, %580 : vector<8x128xf32>
    %c3_225 = arith.constant 3 : index
    %c0_226 = arith.constant 0 : index
    %c0_227 = arith.constant 0 : index
    %582 = vector.load %arg10[%c3_225, %c0_226, %c0_227] : memref<6x8x128xf32, #tpu.memory_space<vmem>>, vector<1x8x128xf32>
    %583 = vector.shape_cast %582 : vector<1x8x128xf32> to vector<8x128xf32>
    %584 = vector.shape_cast %581 : vector<8x128xf32> to vector<1x8x128xf32>
    tpu.vector_store %arg10[%c3_225, %c0_226, %c0_227], %584 {strides = array<i32>} : memref<6x8x128xf32, #tpu.memory_space<vmem>>, vector<1x8x128xf32>,
    %cst_228 = arith.constant dense<0.000000e+00> : vector<8x128xf32>
    %585 = tpu.matmul %581, %6, %cst_228 {dimension_numbers = #tpu.dot_dimension_numbers<[1], [0], [0], [1], [0, 0, 1, 1], [], []>} : vector<8x128xf32>, vector<128x128xf32>, vector<8x128xf32> -> vector<8x128xf32>
    %c3_229 = arith.constant 3 : index
    %c0_230 = arith.constant 0 : index
    %c0_231 = arith.constant 0 : index
    %586 = vector.load %arg9[%c3_229, %c0_230, %c0_231] : memref<6x8x128xf32, #tpu.memory_space<vmem>>, vector<1x8x128xf32>
    %587 = vector.shape_cast %586 : vector<1x8x128xf32> to vector<8x128xf32>
    %588 = vector.shape_cast %585 : vector<8x128xf32> to vector<1x8x128xf32>
    tpu.vector_store %arg9[%c3_229, %c0_230, %c0_231], %588 {strides = array<i32>} : memref<6x8x128xf32, #tpu.memory_space<vmem>>, vector<1x8x128xf32>,
    %c4 = arith.constant 4 : index
    %c0_232 = arith.constant 0 : index
    %c0_233 = arith.constant 0 : index
    %589 = vector.load %arg2[%c4, %c0_232, %c0_233] : memref<6x8x128xf32, #tpu.memory_space<vmem>>, vector<1x8x128xf32>
    %590 = vector.shape_cast %589 : vector<1x8x128xf32> to vector<8x128xf32>
    %cst_234 = arith.constant dense<0.000000e+00> : vector<8x128xf32>
    %591 = tpu.matmul %581, %3, %cst_234 {dimension_numbers = #tpu.dot_dimension_numbers<[1], [0], [0], [1], [0, 0, 1, 1], [], []>} : vector<8x128xf32>, vector<128x128xf32>, vector<8x128xf32> -> vector<8x128xf32>
    %cst_235 = arith.constant dense<0.000000e+00> : vector<8x128xf32>
    %592 = tpu.matmul %590, %4, %cst_235 {dimension_numbers = #tpu.dot_dimension_numbers<[1], [0], [0], [1], [0, 0, 1, 1], [], []>} : vector<8x128xf32>, vector<128x128xf32>, vector<8x128xf32> -> vector<8x128xf32>
    %593 = arith.addf %591, %592 : vector<8x128xf32>
    %594 = vector.broadcast %7 : vector<1x128xf32> to vector<8x128xf32>
    %595 = arith.subf %593, %594 : vector<8x128xf32>
    %cst_236 = arith.constant dense<0.000000e+00> : vector<8x128xf32>
    %596 = tpu.matmul %581, %5, %cst_236 {dimension_numbers = #tpu.dot_dimension_numbers<[1], [0], [0], [1], [0, 0, 1, 1], [], []>} : vector<8x128xf32>, vector<128x128xf32>, vector<8x128xf32> -> vector<8x128xf32>
    %597 = arith.subf %581, %596 : vector<8x128xf32>
    %598 = arith.addf %597, %595 : vector<8x128xf32>
    %cst_237 = arith.constant 0.000000e+00 : f32
    %599 = vector.broadcast %cst_237 : f32 to vector<8x128xf32>
    %600 = arith.maximumf %598, %599 : vector<8x128xf32>
    %601 = arith.subf %600, %581 : vector<8x128xf32>
    %cst_238 = arith.constant 0.000000e+00 : f32
    %602 = vector.broadcast %cst_238 : f32 to vector<8x128xf32>
    %603 = arith.mulf %602, %601 : vector<8x128xf32>
    %604 = arith.addf %600, %603 : vector<8x128xf32>
    %cst_239 = arith.constant dense<0.000000e+00> : vector<8x128xf32>
    %605 = tpu.matmul %604, %5, %cst_239 {dimension_numbers = #tpu.dot_dimension_numbers<[1], [0], [0], [1], [0, 0, 1, 1], [], []>} : vector<8x128xf32>, vector<128x128xf32>, vector<8x128xf32> -> vector<8x128xf32>
    %606 = arith.subf %604, %605 : vector<8x128xf32>
    %607 = arith.addf %606, %595 : vector<8x128xf32>
    %cst_240 = arith.constant 0.000000e+00 : f32
    %608 = vector.broadcast %cst_240 : f32 to vector<8x128xf32>
    %609 = arith.maximumf %607, %608 : vector<8x128xf32>
    %610 = arith.subf %609, %600 : vector<8x128xf32>
    %cst_241 = arith.constant 0.28175351 : f32
    %611 = vector.broadcast %cst_241 : f32 to vector<8x128xf32>
    %612 = arith.mulf %611, %610 : vector<8x128xf32>
    %613 = arith.addf %609, %612 : vector<8x128xf32>
    %cst_242 = arith.constant dense<0.000000e+00> : vector<8x128xf32>
    %614 = tpu.matmul %613, %5, %cst_242 {dimension_numbers = #tpu.dot_dimension_numbers<[1], [0], [0], [1], [0, 0, 1, 1], [], []>} : vector<8x128xf32>, vector<128x128xf32>, vector<8x128xf32> -> vector<8x128xf32>
    %615 = arith.subf %613, %614 : vector<8x128xf32>
    %616 = arith.addf %615, %595 : vector<8x128xf32>
    %cst_243 = arith.constant 0.000000e+00 : f32
    %617 = vector.broadcast %cst_243 : f32 to vector<8x128xf32>
    %618 = arith.maximumf %616, %617 : vector<8x128xf32>
    %619 = arith.subf %618, %609 : vector<8x128xf32>
    %cst_244 = arith.constant 0.434042782 : f32
    %620 = vector.broadcast %cst_244 : f32 to vector<8x128xf32>
    %621 = arith.mulf %620, %619 : vector<8x128xf32>
    %622 = arith.addf %618, %621 : vector<8x128xf32>
    %cst_245 = arith.constant dense<0.000000e+00> : vector<8x128xf32>
    %623 = tpu.matmul %622, %5, %cst_245 {dimension_numbers = #tpu.dot_dimension_numbers<[1], [0], [0], [1], [0, 0, 1, 1], [], []>} : vector<8x128xf32>, vector<128x128xf32>, vector<8x128xf32> -> vector<8x128xf32>
    %624 = arith.subf %622, %623 : vector<8x128xf32>
    %625 = arith.addf %624, %595 : vector<8x128xf32>
    %cst_246 = arith.constant 0.000000e+00 : f32
    %626 = vector.broadcast %cst_246 : f32 to vector<8x128xf32>
    %627 = arith.maximumf %625, %626 : vector<8x128xf32>
    %628 = arith.subf %627, %618 : vector<8x128xf32>
    %cst_247 = arith.constant 0.531063795 : f32
    %629 = vector.broadcast %cst_247 : f32 to vector<8x128xf32>
    %630 = arith.mulf %629, %628 : vector<8x128xf32>
    %631 = arith.addf %627, %630 : vector<8x128xf32>
    %cst_248 = arith.constant dense<0.000000e+00> : vector<8x128xf32>
    %632 = tpu.matmul %631, %5, %cst_248 {dimension_numbers = #tpu.dot_dimension_numbers<[1], [0], [0], [1], [0, 0, 1, 1], [], []>} : vector<8x128xf32>, vector<128x128xf32>, vector<8x128xf32> -> vector<8x128xf32>
    %633 = arith.subf %631, %632 : vector<8x128xf32>
    %634 = arith.addf %633, %595 : vector<8x128xf32>
    %cst_249 = arith.constant 0.000000e+00 : f32
    %635 = vector.broadcast %cst_249 : f32 to vector<8x128xf32>
    %636 = arith.maximumf %634, %635 : vector<8x128xf32>
    %637 = arith.subf %636, %627 : vector<8x128xf32>
    %cst_250 = arith.constant 0.598778605 : f32
    %638 = vector.broadcast %cst_250 : f32 to vector<8x128xf32>
    %639 = arith.mulf %638, %637 : vector<8x128xf32>
    %640 = arith.addf %636, %639 : vector<8x128xf32>
    %cst_251 = arith.constant dense<0.000000e+00> : vector<8x128xf32>
    %641 = tpu.matmul %640, %5, %cst_251 {dimension_numbers = #tpu.dot_dimension_numbers<[1], [0], [0], [1], [0, 0, 1, 1], [], []>} : vector<8x128xf32>, vector<128x128xf32>, vector<8x128xf32> -> vector<8x128xf32>
    %642 = arith.subf %640, %641 : vector<8x128xf32>
    %643 = arith.addf %642, %595 : vector<8x128xf32>
    %cst_252 = arith.constant 0.000000e+00 : f32
    %644 = vector.broadcast %cst_252 : f32 to vector<8x128xf32>
    %645 = arith.maximumf %643, %644 : vector<8x128xf32>
    %646 = arith.subf %645, %636 : vector<8x128xf32>
    %cst_253 = arith.constant 0.648923337 : f32
    %647 = vector.broadcast %cst_253 : f32 to vector<8x128xf32>
    %648 = arith.mulf %647, %646 : vector<8x128xf32>
    %649 = arith.addf %645, %648 : vector<8x128xf32>
    %cst_254 = arith.constant dense<0.000000e+00> : vector<8x128xf32>
    %650 = tpu.matmul %649, %5, %cst_254 {dimension_numbers = #tpu.dot_dimension_numbers<[1], [0], [0], [1], [0, 0, 1, 1], [], []>} : vector<8x128xf32>, vector<128x128xf32>, vector<8x128xf32> -> vector<8x128xf32>
    %651 = arith.subf %649, %650 : vector<8x128xf32>
    %652 = arith.addf %651, %595 : vector<8x128xf32>
    %cst_255 = arith.constant 0.000000e+00 : f32
    %653 = vector.broadcast %cst_255 : f32 to vector<8x128xf32>
    %654 = arith.maximumf %652, %653 : vector<8x128xf32>
    %655 = arith.subf %654, %645 : vector<8x128xf32>
    %cst_256 = arith.constant 0.687645852 : f32
    %656 = vector.broadcast %cst_256 : f32 to vector<8x128xf32>
    %657 = arith.mulf %656, %655 : vector<8x128xf32>
    %658 = arith.addf %654, %657 : vector<8x128xf32>
    %cst_257 = arith.constant dense<0.000000e+00> : vector<8x128xf32>
    %659 = tpu.matmul %658, %5, %cst_257 {dimension_numbers = #tpu.dot_dimension_numbers<[1], [0], [0], [1], [0, 0, 1, 1], [], []>} : vector<8x128xf32>, vector<128x128xf32>, vector<8x128xf32> -> vector<8x128xf32>
    %660 = arith.subf %658, %659 : vector<8x128xf32>
    %661 = arith.addf %660, %595 : vector<8x128xf32>
    %cst_258 = arith.constant 0.000000e+00 : f32
    %662 = vector.broadcast %cst_258 : f32 to vector<8x128xf32>
    %663 = arith.maximumf %661, %662 : vector<8x128xf32>
    %664 = arith.subf %663, %654 : vector<8x128xf32>
    %cst_259 = arith.constant 0.718499839 : f32
    %665 = vector.broadcast %cst_259 : f32 to vector<8x128xf32>
    %666 = arith.mulf %665, %664 : vector<8x128xf32>
    %667 = arith.addf %663, %666 : vector<8x128xf32>
    %cst_260 = arith.constant dense<0.000000e+00> : vector<8x128xf32>
    %668 = tpu.matmul %667, %5, %cst_260 {dimension_numbers = #tpu.dot_dimension_numbers<[1], [0], [0], [1], [0, 0, 1, 1], [], []>} : vector<8x128xf32>, vector<128x128xf32>, vector<8x128xf32> -> vector<8x128xf32>
    %669 = arith.subf %667, %668 : vector<8x128xf32>
    %670 = arith.addf %669, %595 : vector<8x128xf32>
    %cst_261 = arith.constant 0.000000e+00 : f32
    %671 = vector.broadcast %cst_261 : f32 to vector<8x128xf32>
    %672 = arith.maximumf %670, %671 : vector<8x128xf32>
    %673 = arith.subf %672, %663 : vector<8x128xf32>
    %cst_262 = arith.constant 7.436910e-01 : f32
    %674 = vector.broadcast %cst_262 : f32 to vector<8x128xf32>
    %675 = arith.mulf %674, %673 : vector<8x128xf32>
    %676 = arith.addf %672, %675 : vector<8x128xf32>
    %cst_263 = arith.constant dense<0.000000e+00> : vector<8x128xf32>
    %677 = tpu.matmul %676, %5, %cst_263 {dimension_numbers = #tpu.dot_dimension_numbers<[1], [0], [0], [1], [0, 0, 1, 1], [], []>} : vector<8x128xf32>, vector<128x128xf32>, vector<8x128xf32> -> vector<8x128xf32>
    %678 = arith.subf %676, %677 : vector<8x128xf32>
    %679 = arith.addf %678, %595 : vector<8x128xf32>
    %cst_264 = arith.constant 0.000000e+00 : f32
    %680 = vector.broadcast %cst_264 : f32 to vector<8x128xf32>
    %681 = arith.maximumf %679, %680 : vector<8x128xf32>
    %682 = arith.subf %681, %672 : vector<8x128xf32>
    %cst_265 = arith.constant 0.764664709 : f32
    %683 = vector.broadcast %cst_265 : f32 to vector<8x128xf32>
    %684 = arith.mulf %683, %682 : vector<8x128xf32>
    %685 = arith.addf %681, %684 : vector<8x128xf32>
    %cst_266 = arith.constant dense<0.000000e+00> : vector<8x128xf32>
    %686 = tpu.matmul %685, %5, %cst_266 {dimension_numbers = #tpu.dot_dimension_numbers<[1], [0], [0], [1], [0, 0, 1, 1], [], []>} : vector<8x128xf32>, vector<128x128xf32>, vector<8x128xf32> -> vector<8x128xf32>
    %687 = arith.subf %685, %686 : vector<8x128xf32>
    %688 = arith.addf %687, %595 : vector<8x128xf32>
    %cst_267 = arith.constant 0.000000e+00 : f32
    %689 = vector.broadcast %cst_267 : f32 to vector<8x128xf32>
    %690 = arith.maximumf %688, %689 : vector<8x128xf32>
    %691 = arith.subf %690, %681 : vector<8x128xf32>
    %cst_268 = arith.constant 0.78240925 : f32
    %692 = vector.broadcast %cst_268 : f32 to vector<8x128xf32>
    %693 = arith.mulf %692, %691 : vector<8x128xf32>
    %694 = arith.addf %690, %693 : vector<8x128xf32>
    %cst_269 = arith.constant dense<0.000000e+00> : vector<8x128xf32>
    %695 = tpu.matmul %694, %5, %cst_269 {dimension_numbers = #tpu.dot_dimension_numbers<[1], [0], [0], [1], [0, 0, 1, 1], [], []>} : vector<8x128xf32>, vector<128x128xf32>, vector<8x128xf32> -> vector<8x128xf32>
    %696 = arith.subf %694, %695 : vector<8x128xf32>
    %697 = arith.addf %696, %595 : vector<8x128xf32>
    %cst_270 = arith.constant 0.000000e+00 : f32
    %698 = vector.broadcast %cst_270 : f32 to vector<8x128xf32>
    %699 = arith.maximumf %697, %698 : vector<8x128xf32>
    %700 = arith.subf %699, %690 : vector<8x128xf32>
    %cst_271 = arith.constant 0.797624409 : f32
    %701 = vector.broadcast %cst_271 : f32 to vector<8x128xf32>
    %702 = arith.mulf %701, %700 : vector<8x128xf32>
    %703 = arith.addf %699, %702 : vector<8x128xf32>
    %cst_272 = arith.constant dense<0.000000e+00> : vector<8x128xf32>
    %704 = tpu.matmul %703, %5, %cst_272 {dimension_numbers = #tpu.dot_dimension_numbers<[1], [0], [0], [1], [0, 0, 1, 1], [], []>} : vector<8x128xf32>, vector<128x128xf32>, vector<8x128xf32> -> vector<8x128xf32>
    %705 = arith.subf %703, %704 : vector<8x128xf32>
    %706 = arith.addf %705, %595 : vector<8x128xf32>
    %cst_273 = arith.constant 0.000000e+00 : f32
    %707 = vector.broadcast %cst_273 : f32 to vector<8x128xf32>
    %708 = arith.maximumf %706, %707 : vector<8x128xf32>
    %709 = arith.subf %708, %699 : vector<8x128xf32>
    %cst_274 = arith.constant 0.810819983 : f32
    %710 = vector.broadcast %cst_274 : f32 to vector<8x128xf32>
    %711 = arith.mulf %710, %709 : vector<8x128xf32>
    %712 = arith.addf %708, %711 : vector<8x128xf32>
    %cst_275 = arith.constant dense<0.000000e+00> : vector<8x128xf32>
    %713 = tpu.matmul %712, %5, %cst_275 {dimension_numbers = #tpu.dot_dimension_numbers<[1], [0], [0], [1], [0, 0, 1, 1], [], []>} : vector<8x128xf32>, vector<128x128xf32>, vector<8x128xf32> -> vector<8x128xf32>
    %714 = arith.subf %712, %713 : vector<8x128xf32>
    %715 = arith.addf %714, %595 : vector<8x128xf32>
    %cst_276 = arith.constant 0.000000e+00 : f32
    %716 = vector.broadcast %cst_276 : f32 to vector<8x128xf32>
    %717 = arith.maximumf %715, %716 : vector<8x128xf32>
    %718 = arith.subf %717, %708 : vector<8x128xf32>
    %cst_277 = arith.constant 0.822376668 : f32
    %719 = vector.broadcast %cst_277 : f32 to vector<8x128xf32>
    %720 = arith.mulf %719, %718 : vector<8x128xf32>
    %721 = arith.addf %717, %720 : vector<8x128xf32>
    %cst_278 = arith.constant dense<0.000000e+00> : vector<8x128xf32>
    %722 = tpu.matmul %721, %5, %cst_278 {dimension_numbers = #tpu.dot_dimension_numbers<[1], [0], [0], [1], [0, 0, 1, 1], [], []>} : vector<8x128xf32>, vector<128x128xf32>, vector<8x128xf32> -> vector<8x128xf32>
    %723 = arith.subf %721, %722 : vector<8x128xf32>
    %724 = arith.addf %723, %595 : vector<8x128xf32>
    %cst_279 = arith.constant 0.000000e+00 : f32
    %725 = vector.broadcast %cst_279 : f32 to vector<8x128xf32>
    %726 = arith.maximumf %724, %725 : vector<8x128xf32>
    %c4_280 = arith.constant 4 : index
    %c0_281 = arith.constant 0 : index
    %c0_282 = arith.constant 0 : index
    %727 = vector.load %arg10[%c4_280, %c0_281, %c0_282] : memref<6x8x128xf32, #tpu.memory_space<vmem>>, vector<1x8x128xf32>
    %728 = vector.shape_cast %727 : vector<1x8x128xf32> to vector<8x128xf32>
    %729 = vector.shape_cast %726 : vector<8x128xf32> to vector<1x8x128xf32>
    tpu.vector_store %arg10[%c4_280, %c0_281, %c0_282], %729 {strides = array<i32>} : memref<6x8x128xf32, #tpu.memory_space<vmem>>, vector<1x8x128xf32>,
    %cst_283 = arith.constant dense<0.000000e+00> : vector<8x128xf32>
    %730 = tpu.matmul %726, %6, %cst_283 {dimension_numbers = #tpu.dot_dimension_numbers<[1], [0], [0], [1], [0, 0, 1, 1], [], []>} : vector<8x128xf32>, vector<128x128xf32>, vector<8x128xf32> -> vector<8x128xf32>
    %c4_284 = arith.constant 4 : index
    %c0_285 = arith.constant 0 : index
    %c0_286 = arith.constant 0 : index
    %731 = vector.load %arg9[%c4_284, %c0_285, %c0_286] : memref<6x8x128xf32, #tpu.memory_space<vmem>>, vector<1x8x128xf32>
    %732 = vector.shape_cast %731 : vector<1x8x128xf32> to vector<8x128xf32>
    %733 = vector.shape_cast %730 : vector<8x128xf32> to vector<1x8x128xf32>
    tpu.vector_store %arg9[%c4_284, %c0_285, %c0_286], %733 {strides = array<i32>} : memref<6x8x128xf32, #tpu.memory_space<vmem>>, vector<1x8x128xf32>,
    %c5 = arith.constant 5 : index
    %c0_287 = arith.constant 0 : index
    %c0_288 = arith.constant 0 : index
    %734 = vector.load %arg2[%c5, %c0_287, %c0_288] : memref<6x8x128xf32, #tpu.memory_space<vmem>>, vector<1x8x128xf32>
    %735 = vector.shape_cast %734 : vector<1x8x128xf32> to vector<8x128xf32>
    %cst_289 = arith.constant dense<0.000000e+00> : vector<8x128xf32>
    %736 = tpu.matmul %726, %3, %cst_289 {dimension_numbers = #tpu.dot_dimension_numbers<[1], [0], [0], [1], [0, 0, 1, 1], [], []>} : vector<8x128xf32>, vector<128x128xf32>, vector<8x128xf32> -> vector<8x128xf32>
    %cst_290 = arith.constant dense<0.000000e+00> : vector<8x128xf32>
    %737 = tpu.matmul %735, %4, %cst_290 {dimension_numbers = #tpu.dot_dimension_numbers<[1], [0], [0], [1], [0, 0, 1, 1], [], []>} : vector<8x128xf32>, vector<128x128xf32>, vector<8x128xf32> -> vector<8x128xf32>
    %738 = arith.addf %736, %737 : vector<8x128xf32>
    %739 = vector.broadcast %7 : vector<1x128xf32> to vector<8x128xf32>
    %740 = arith.subf %738, %739 : vector<8x128xf32>
    %cst_291 = arith.constant dense<0.000000e+00> : vector<8x128xf32>
    %741 = tpu.matmul %726, %5, %cst_291 {dimension_numbers = #tpu.dot_dimension_numbers<[1], [0], [0], [1], [0, 0, 1, 1], [], []>} : vector<8x128xf32>, vector<128x128xf32>, vector<8x128xf32> -> vector<8x128xf32>
    %742 = arith.subf %726, %741 : vector<8x128xf32>
    %743 = arith.addf %742, %740 : vector<8x128xf32>
    %cst_292 = arith.constant 0.000000e+00 : f32
    %744 = vector.broadcast %cst_292 : f32 to vector<8x128xf32>
    %745 = arith.maximumf %743, %744 : vector<8x128xf32>
    %746 = arith.subf %745, %726 : vector<8x128xf32>
    %cst_293 = arith.constant 0.000000e+00 : f32
    %747 = vector.broadcast %cst_293 : f32 to vector<8x128xf32>
    %748 = arith.mulf %747, %746 : vector<8x128xf32>
    %749 = arith.addf %745, %748 : vector<8x128xf32>
    %cst_294 = arith.constant dense<0.000000e+00> : vector<8x128xf32>
    %750 = tpu.matmul %749, %5, %cst_294 {dimension_numbers = #tpu.dot_dimension_numbers<[1], [0], [0], [1], [0, 0, 1, 1], [], []>} : vector<8x128xf32>, vector<128x128xf32>, vector<8x128xf32> -> vector<8x128xf32>
    %751 = arith.subf %749, %750 : vector<8x128xf32>
    %752 = arith.addf %751, %740 : vector<8x128xf32>
    %cst_295 = arith.constant 0.000000e+00 : f32
    %753 = vector.broadcast %cst_295 : f32 to vector<8x128xf32>
    %754 = arith.maximumf %752, %753 : vector<8x128xf32>
    %755 = arith.subf %754, %745 : vector<8x128xf32>
    %cst_296 = arith.constant 0.28175351 : f32
    %756 = vector.broadcast %cst_296 : f32 to vector<8x128xf32>
    %757 = arith.mulf %756, %755 : vector<8x128xf32>
    %758 = arith.addf %754, %757 : vector<8x128xf32>
    %cst_297 = arith.constant dense<0.000000e+00> : vector<8x128xf32>
    %759 = tpu.matmul %758, %5, %cst_297 {dimension_numbers = #tpu.dot_dimension_numbers<[1], [0], [0], [1], [0, 0, 1, 1], [], []>} : vector<8x128xf32>, vector<128x128xf32>, vector<8x128xf32> -> vector<8x128xf32>
    %760 = arith.subf %758, %759 : vector<8x128xf32>
    %761 = arith.addf %760, %740 : vector<8x128xf32>
    %cst_298 = arith.constant 0.000000e+00 : f32
    %762 = vector.broadcast %cst_298 : f32 to vector<8x128xf32>
    %763 = arith.maximumf %761, %762 : vector<8x128xf32>
    %764 = arith.subf %763, %754 : vector<8x128xf32>
    %cst_299 = arith.constant 0.434042782 : f32
    %765 = vector.broadcast %cst_299 : f32 to vector<8x128xf32>
    %766 = arith.mulf %765, %764 : vector<8x128xf32>
    %767 = arith.addf %763, %766 : vector<8x128xf32>
    %cst_300 = arith.constant dense<0.000000e+00> : vector<8x128xf32>
    %768 = tpu.matmul %767, %5, %cst_300 {dimension_numbers = #tpu.dot_dimension_numbers<[1], [0], [0], [1], [0, 0, 1, 1], [], []>} : vector<8x128xf32>, vector<128x128xf32>, vector<8x128xf32> -> vector<8x128xf32>
    %769 = arith.subf %767, %768 : vector<8x128xf32>
    %770 = arith.addf %769, %740 : vector<8x128xf32>
    %cst_301 = arith.constant 0.000000e+00 : f32
    %771 = vector.broadcast %cst_301 : f32 to vector<8x128xf32>
    %772 = arith.maximumf %770, %771 : vector<8x128xf32>
    %773 = arith.subf %772, %763 : vector<8x128xf32>
    %cst_302 = arith.constant 0.531063795 : f32
    %774 = vector.broadcast %cst_302 : f32 to vector<8x128xf32>
    %775 = arith.mulf %774, %773 : vector<8x128xf32>
    %776 = arith.addf %772, %775 : vector<8x128xf32>
    %cst_303 = arith.constant dense<0.000000e+00> : vector<8x128xf32>
    %777 = tpu.matmul %776, %5, %cst_303 {dimension_numbers = #tpu.dot_dimension_numbers<[1], [0], [0], [1], [0, 0, 1, 1], [], []>} : vector<8x128xf32>, vector<128x128xf32>, vector<8x128xf32> -> vector<8x128xf32>
    %778 = arith.subf %776, %777 : vector<8x128xf32>
    %779 = arith.addf %778, %740 : vector<8x128xf32>
    %cst_304 = arith.constant 0.000000e+00 : f32
    %780 = vector.broadcast %cst_304 : f32 to vector<8x128xf32>
    %781 = arith.maximumf %779, %780 : vector<8x128xf32>
    %782 = arith.subf %781, %772 : vector<8x128xf32>
    %cst_305 = arith.constant 0.598778605 : f32
    %783 = vector.broadcast %cst_305 : f32 to vector<8x128xf32>
    %784 = arith.mulf %783, %782 : vector<8x128xf32>
    %785 = arith.addf %781, %784 : vector<8x128xf32>
    %cst_306 = arith.constant dense<0.000000e+00> : vector<8x128xf32>
    %786 = tpu.matmul %785, %5, %cst_306 {dimension_numbers = #tpu.dot_dimension_numbers<[1], [0], [0], [1], [0, 0, 1, 1], [], []>} : vector<8x128xf32>, vector<128x128xf32>, vector<8x128xf32> -> vector<8x128xf32>
    %787 = arith.subf %785, %786 : vector<8x128xf32>
    %788 = arith.addf %787, %740 : vector<8x128xf32>
    %cst_307 = arith.constant 0.000000e+00 : f32
    %789 = vector.broadcast %cst_307 : f32 to vector<8x128xf32>
    %790 = arith.maximumf %788, %789 : vector<8x128xf32>
    %791 = arith.subf %790, %781 : vector<8x128xf32>
    %cst_308 = arith.constant 0.648923337 : f32
    %792 = vector.broadcast %cst_308 : f32 to vector<8x128xf32>
    %793 = arith.mulf %792, %791 : vector<8x128xf32>
    %794 = arith.addf %790, %793 : vector<8x128xf32>
    %cst_309 = arith.constant dense<0.000000e+00> : vector<8x128xf32>
    %795 = tpu.matmul %794, %5, %cst_309 {dimension_numbers = #tpu.dot_dimension_numbers<[1], [0], [0], [1], [0, 0, 1, 1], [], []>} : vector<8x128xf32>, vector<128x128xf32>, vector<8x128xf32> -> vector<8x128xf32>
    %796 = arith.subf %794, %795 : vector<8x128xf32>
    %797 = arith.addf %796, %740 : vector<8x128xf32>
    %cst_310 = arith.constant 0.000000e+00 : f32
    %798 = vector.broadcast %cst_310 : f32 to vector<8x128xf32>
    %799 = arith.maximumf %797, %798 : vector<8x128xf32>
    %800 = arith.subf %799, %790 : vector<8x128xf32>
    %cst_311 = arith.constant 0.687645852 : f32
    %801 = vector.broadcast %cst_311 : f32 to vector<8x128xf32>
    %802 = arith.mulf %801, %800 : vector<8x128xf32>
    %803 = arith.addf %799, %802 : vector<8x128xf32>
    %cst_312 = arith.constant dense<0.000000e+00> : vector<8x128xf32>
    %804 = tpu.matmul %803, %5, %cst_312 {dimension_numbers = #tpu.dot_dimension_numbers<[1], [0], [0], [1], [0, 0, 1, 1], [], []>} : vector<8x128xf32>, vector<128x128xf32>, vector<8x128xf32> -> vector<8x128xf32>
    %805 = arith.subf %803, %804 : vector<8x128xf32>
    %806 = arith.addf %805, %740 : vector<8x128xf32>
    %cst_313 = arith.constant 0.000000e+00 : f32
    %807 = vector.broadcast %cst_313 : f32 to vector<8x128xf32>
    %808 = arith.maximumf %806, %807 : vector<8x128xf32>
    %809 = arith.subf %808, %799 : vector<8x128xf32>
    %cst_314 = arith.constant 0.718499839 : f32
    %810 = vector.broadcast %cst_314 : f32 to vector<8x128xf32>
    %811 = arith.mulf %810, %809 : vector<8x128xf32>
    %812 = arith.addf %808, %811 : vector<8x128xf32>
    %cst_315 = arith.constant dense<0.000000e+00> : vector<8x128xf32>
    %813 = tpu.matmul %812, %5, %cst_315 {dimension_numbers = #tpu.dot_dimension_numbers<[1], [0], [0], [1], [0, 0, 1, 1], [], []>} : vector<8x128xf32>, vector<128x128xf32>, vector<8x128xf32> -> vector<8x128xf32>
    %814 = arith.subf %812, %813 : vector<8x128xf32>
    %815 = arith.addf %814, %740 : vector<8x128xf32>
    %cst_316 = arith.constant 0.000000e+00 : f32
    %816 = vector.broadcast %cst_316 : f32 to vector<8x128xf32>
    %817 = arith.maximumf %815, %816 : vector<8x128xf32>
    %818 = arith.subf %817, %808 : vector<8x128xf32>
    %cst_317 = arith.constant 7.436910e-01 : f32
    %819 = vector.broadcast %cst_317 : f32 to vector<8x128xf32>
    %820 = arith.mulf %819, %818 : vector<8x128xf32>
    %821 = arith.addf %817, %820 : vector<8x128xf32>
    %cst_318 = arith.constant dense<0.000000e+00> : vector<8x128xf32>
    %822 = tpu.matmul %821, %5, %cst_318 {dimension_numbers = #tpu.dot_dimension_numbers<[1], [0], [0], [1], [0, 0, 1, 1], [], []>} : vector<8x128xf32>, vector<128x128xf32>, vector<8x128xf32> -> vector<8x128xf32>
    %823 = arith.subf %821, %822 : vector<8x128xf32>
    %824 = arith.addf %823, %740 : vector<8x128xf32>
    %cst_319 = arith.constant 0.000000e+00 : f32
    %825 = vector.broadcast %cst_319 : f32 to vector<8x128xf32>
    %826 = arith.maximumf %824, %825 : vector<8x128xf32>
    %827 = arith.subf %826, %817 : vector<8x128xf32>
    %cst_320 = arith.constant 0.764664709 : f32
    %828 = vector.broadcast %cst_320 : f32 to vector<8x128xf32>
    %829 = arith.mulf %828, %827 : vector<8x128xf32>
    %830 = arith.addf %826, %829 : vector<8x128xf32>
    %cst_321 = arith.constant dense<0.000000e+00> : vector<8x128xf32>
    %831 = tpu.matmul %830, %5, %cst_321 {dimension_numbers = #tpu.dot_dimension_numbers<[1], [0], [0], [1], [0, 0, 1, 1], [], []>} : vector<8x128xf32>, vector<128x128xf32>, vector<8x128xf32> -> vector<8x128xf32>
    %832 = arith.subf %830, %831 : vector<8x128xf32>
    %833 = arith.addf %832, %740 : vector<8x128xf32>
    %cst_322 = arith.constant 0.000000e+00 : f32
    %834 = vector.broadcast %cst_322 : f32 to vector<8x128xf32>
    %835 = arith.maximumf %833, %834 : vector<8x128xf32>
    %836 = arith.subf %835, %826 : vector<8x128xf32>
    %cst_323 = arith.constant 0.78240925 : f32
    %837 = vector.broadcast %cst_323 : f32 to vector<8x128xf32>
    %838 = arith.mulf %837, %836 : vector<8x128xf32>
    %839 = arith.addf %835, %838 : vector<8x128xf32>
    %cst_324 = arith.constant dense<0.000000e+00> : vector<8x128xf32>
    %840 = tpu.matmul %839, %5, %cst_324 {dimension_numbers = #tpu.dot_dimension_numbers<[1], [0], [0], [1], [0, 0, 1, 1], [], []>} : vector<8x128xf32>, vector<128x128xf32>, vector<8x128xf32> -> vector<8x128xf32>
    %841 = arith.subf %839, %840 : vector<8x128xf32>
    %842 = arith.addf %841, %740 : vector<8x128xf32>
    %cst_325 = arith.constant 0.000000e+00 : f32
    %843 = vector.broadcast %cst_325 : f32 to vector<8x128xf32>
    %844 = arith.maximumf %842, %843 : vector<8x128xf32>
    %845 = arith.subf %844, %835 : vector<8x128xf32>
    %cst_326 = arith.constant 0.797624409 : f32
    %846 = vector.broadcast %cst_326 : f32 to vector<8x128xf32>
    %847 = arith.mulf %846, %845 : vector<8x128xf32>
    %848 = arith.addf %844, %847 : vector<8x128xf32>
    %cst_327 = arith.constant dense<0.000000e+00> : vector<8x128xf32>
    %849 = tpu.matmul %848, %5, %cst_327 {dimension_numbers = #tpu.dot_dimension_numbers<[1], [0], [0], [1], [0, 0, 1, 1], [], []>} : vector<8x128xf32>, vector<128x128xf32>, vector<8x128xf32> -> vector<8x128xf32>
    %850 = arith.subf %848, %849 : vector<8x128xf32>
    %851 = arith.addf %850, %740 : vector<8x128xf32>
    %cst_328 = arith.constant 0.000000e+00 : f32
    %852 = vector.broadcast %cst_328 : f32 to vector<8x128xf32>
    %853 = arith.maximumf %851, %852 : vector<8x128xf32>
    %854 = arith.subf %853, %844 : vector<8x128xf32>
    %cst_329 = arith.constant 0.810819983 : f32
    %855 = vector.broadcast %cst_329 : f32 to vector<8x128xf32>
    %856 = arith.mulf %855, %854 : vector<8x128xf32>
    %857 = arith.addf %853, %856 : vector<8x128xf32>
    %cst_330 = arith.constant dense<0.000000e+00> : vector<8x128xf32>
    %858 = tpu.matmul %857, %5, %cst_330 {dimension_numbers = #tpu.dot_dimension_numbers<[1], [0], [0], [1], [0, 0, 1, 1], [], []>} : vector<8x128xf32>, vector<128x128xf32>, vector<8x128xf32> -> vector<8x128xf32>
    %859 = arith.subf %857, %858 : vector<8x128xf32>
    %860 = arith.addf %859, %740 : vector<8x128xf32>
    %cst_331 = arith.constant 0.000000e+00 : f32
    %861 = vector.broadcast %cst_331 : f32 to vector<8x128xf32>
    %862 = arith.maximumf %860, %861 : vector<8x128xf32>
    %863 = arith.subf %862, %853 : vector<8x128xf32>
    %cst_332 = arith.constant 0.822376668 : f32
    %864 = vector.broadcast %cst_332 : f32 to vector<8x128xf32>
    %865 = arith.mulf %864, %863 : vector<8x128xf32>
    %866 = arith.addf %862, %865 : vector<8x128xf32>
    %cst_333 = arith.constant dense<0.000000e+00> : vector<8x128xf32>
    %867 = tpu.matmul %866, %5, %cst_333 {dimension_numbers = #tpu.dot_dimension_numbers<[1], [0], [0], [1], [0, 0, 1, 1], [], []>} : vector<8x128xf32>, vector<128x128xf32>, vector<8x128xf32> -> vector<8x128xf32>
    %868 = arith.subf %866, %867 : vector<8x128xf32>
    %869 = arith.addf %868, %740 : vector<8x128xf32>
    %cst_334 = arith.constant 0.000000e+00 : f32
    %870 = vector.broadcast %cst_334 : f32 to vector<8x128xf32>
    %871 = arith.maximumf %869, %870 : vector<8x128xf32>
    %c5_335 = arith.constant 5 : index
    %c0_336 = arith.constant 0 : index
    %c0_337 = arith.constant 0 : index
    %872 = vector.load %arg10[%c5_335, %c0_336, %c0_337] : memref<6x8x128xf32, #tpu.memory_space<vmem>>, vector<1x8x128xf32>
    %873 = vector.shape_cast %872 : vector<1x8x128xf32> to vector<8x128xf32>
    %874 = vector.shape_cast %871 : vector<8x128xf32> to vector<1x8x128xf32>
    tpu.vector_store %arg10[%c5_335, %c0_336, %c0_337], %874 {strides = array<i32>} : memref<6x8x128xf32, #tpu.memory_space<vmem>>, vector<1x8x128xf32>,
    %cst_338 = arith.constant dense<0.000000e+00> : vector<8x128xf32>
    %875 = tpu.matmul %871, %6, %cst_338 {dimension_numbers = #tpu.dot_dimension_numbers<[1], [0], [0], [1], [0, 0, 1, 1], [], []>} : vector<8x128xf32>, vector<128x128xf32>, vector<8x128xf32> -> vector<8x128xf32>
    %c5_339 = arith.constant 5 : index
    %c0_340 = arith.constant 0 : index
    %c0_341 = arith.constant 0 : index
    %876 = vector.load %arg9[%c5_339, %c0_340, %c0_341] : memref<6x8x128xf32, #tpu.memory_space<vmem>>, vector<1x8x128xf32>
    %877 = vector.shape_cast %876 : vector<1x8x128xf32> to vector<8x128xf32>
    %878 = vector.shape_cast %875 : vector<8x128xf32> to vector<1x8x128xf32>
    tpu.vector_store %arg9[%c5_339, %c0_340, %c0_341], %878 {strides = array<i32>} : memref<6x8x128xf32, #tpu.memory_space<vmem>>, vector<1x8x128xf32>,
    %c0_342 = arith.constant 0 : index
    %c0_343 = arith.constant 0 : index
    %879 = vector.load %arg11[%c0_342, %c0_343] : memref<8x128xf32, #tpu.memory_space<vmem>>, vector<8x128xf32>
    tpu.vector_store %arg11[%c0_342, %c0_343], %871 {strides = array<i32>} : memref<8x128xf32, #tpu.memory_space<vmem>>, vector<8x128xf32>,
    return
  }
  func.func @transform_0(%arg0: i32, %arg1: i32) -> (i32, i32, i32) {
    %c0_i32 = arith.constant 0 : i32
    %c0_i32_0 = arith.constant 0 : i32
    return %arg1, %arg0, %c0_i32 : i32, i32, i32
  }
  func.func @transform_1(%arg0: i32, %arg1: i32) -> (i32, i32) {
    %c0_i32 = arith.constant 0 : i32
    %c0_i32_0 = arith.constant 0 : i32
    return %arg0, %c0_i32 : i32, i32
  }
  func.func @transform_2(%arg0: i32, %arg1: i32) -> (i32, i32) {
    %c0_i32 = arith.constant 0 : i32
    %c0_i32_0 = arith.constant 0 : i32
    %c0_i32_1 = arith.constant 0 : i32
    return %c0_i32, %c0_i32_0 : i32, i32
  }
  func.func @transform_3(%arg0: i32, %arg1: i32) -> (i32, i32) {
    %c0_i32 = arith.constant 0 : i32
    %c0_i32_0 = arith.constant 0 : i32
    %c0_i32_1 = arith.constant 0 : i32
    return %c0_i32, %c0_i32_0 : i32, i32
  }
  func.func @transform_4(%arg0: i32, %arg1: i32) -> (i32, i32) {
    %c0_i32 = arith.constant 0 : i32
    %c0_i32_0 = arith.constant 0 : i32
    %c0_i32_1 = arith.constant 0 : i32
    return %c0_i32, %c0_i32_0 : i32, i32
  }
  func.func @transform_5(%arg0: i32, %arg1: i32) -> (i32, i32) {
    %c0_i32 = arith.constant 0 : i32
    %c0_i32_0 = arith.constant 0 : i32
    %c0_i32_1 = arith.constant 0 : i32
    return %c0_i32, %c0_i32_0 : i32, i32
  }
  func.func @transform_6(%arg0: i32, %arg1: i32) -> (i32, i32) {
    %c0_i32 = arith.constant 0 : i32
    %c0_i32_0 = arith.constant 0 : i32
    %c0_i32_1 = arith.constant 0 : i32
    return %c0_i32, %c0_i32_0 : i32, i32
  }
  func.func @transform_7(%arg0: i32, %arg1: i32) -> (i32, i32, i32) {
    %c0_i32 = arith.constant 0 : i32
    %c0_i32_0 = arith.constant 0 : i32
    return %arg1, %arg0, %c0_i32 : i32, i32, i32
  }
  func.func @transform_8(%arg0: i32, %arg1: i32) -> (i32, i32, i32) {
    %c0_i32 = arith.constant 0 : i32
    %c0_i32_0 = arith.constant 0 : i32
    return %arg1, %arg0, %c0_i32 : i32, i32, i32
  }
}

</mosaic_0001>

<bundles_post_ra>
// kernel: tpu_custom_call.1
= control target key start
LH: loop header
LB: loop body
LE: loop exit
PB: predicated region body
PF: predicated region fallthrough
CT: control target
= control target key end

     0   :  { %14 = vsyncpa [#allocation4], 0  ;;  %s19160_s0 = inlined_call_operand.hbm [shape: f32[6,8,128], index: 0, kind: input, shape index: {}]   ;;  %s19161_s1 = inlined_call_operand.hbm [shape: f32[8,128], index: 1, kind: input, shape index: {}]   ;;  %s19162_s2 = inlined_call_operand.hbm [shape: f32[128,128], index: 2, kind: input, shape index: {}]   ;;  %s19163_s3 = inlined_call_operand.hbm [shape: f32[128,128], index: 3, kind: input, shape index: {}]   ;;  %s19164_s4 = inlined_call_operand.hbm [shape: f32[128,128], index: 4, kind: input, shape index: {}]   ;;  %s19165_s5 = inlined_call_operand.hbm [shape: f32[128,128], index: 5, kind: input, shape index: {}]   ;;  %s19166_s6 = inlined_call_operand.hbm [shape: f32[1,128], index: 6, kind: input, shape index: {}]   ;;  %s19167_s7 = inlined_call_operand.hbm [shape: f32[6,8,128], index: 7, kind: output, shape index: {0}]   ;;  %s19168_s8 = inlined_call_operand.hbm [shape: f32[6,8,128], index: 8, kind: output, shape index: {1}]  }
   0x1   :  { %15 = vsyncpa [#allocation7], 0 }
   0x2   :  { %16 = vsyncpa [#allocation10], 0 }
   0x3   :  { %17 = vsyncpa [#allocation13], 0 }
   0x4   :  { %18 = vsyncpa [#allocation5], 0 }
   0x5   :  { %19 = vsyncpa [#allocation17], 0  ;;  %s16804_s27 = smov [#allocation6]   ;;  %s16594_s9 = scalar_lea.hbm %s19161_s1, 128 }
   0x6   :  { %s38_s28 = sshll.u32 %s16804_s27, 4  ;;  %p16595_p0 = scmp.ne.s32.totalorder %s19161_s1, %s16594_s9  ;;  %s39_s28 = int_to_ptr.vmem [resolvable:$true] %s38_s28 }
   0x7   :  { %p16598_p1 = scmp.lt.u32.totalorder %s16594_s9, %s19161_s1 }
   0x9   :  { %p16600_p2 = pnand %p16598_p1, %p16595_p0 }
   0xb   :  { %16603 = shalt.err (!%p16600_p2)
}
   0xc   :  { %s16604_s14 = scalar_lea.vmem %s39_s28, 128  ;;  %p16609_p4 = scmp.lt.s32.totalorder %s39_s28, %s39_s28 }
   0xd   :  { %p16605_p3 = scmp.ne.s32.totalorder %s39_s28, %s16604_s14  ;;  %p16610_p5 = scmp.lt.s32.totalorder %s16604_s14, %s16604_s14 }
   0xf   :  { %p16611_p6 = por %p16610_p5, %p16609_p4 }
  0x11   :  { %p16612_p7 = pnand %p16611_p6, %p16605_p3 }
  0x13   :  { %16615 = shalt.err (!%p16612_p7)
}
  0x14   :  { %41 = dma.hbm_to_vmem [thread:$0]  %s19161_s1, 128, %s39_s28, [#allocation7]  }
  0x15   :  { %s16805_s17 = smov [#allocation9]   ;;  %s16806_s19 = smov [#allocation12]  }
  0x16   :  { %s59_s18 = sshll.u32 %s16805_s17, 4  ;;  %s83_s20 = sshll.u32 %s16806_s19, 4  ;;  %s60_s18 = int_to_ptr.vmem [resolvable:$true] %s59_s18  ;;  %s84_s20 = int_to_ptr.vmem [resolvable:$true] %s83_s20 }
  0x17   :  { %s16616_s23 = scalar_lea.hbm %s19163_s3, 2048 }
  0x18   :  { %p16617_p8 = scmp.ne.s32.totalorder %s19163_s3, %s16616_s23  ;;  %p16620_p9 = scmp.lt.u32.totalorder %s16616_s23, %s19163_s3 }
  0x1a   :  { %p16622_p10 = pnand %p16620_p9, %p16617_p8 }
  0x1c   :  { %16625 = shalt.err (!%p16622_p10)
}
  0x1d   :  { %s16626_s1 = scalar_lea.vmem %s60_s18, 2048  ;;  %p16631_p12 = scmp.lt.s32.totalorder %s60_s18, %s60_s18 }
  0x1e   :  { %p16627_p11 = scmp.ne.s32.totalorder %s60_s18, %s16626_s1  ;;  %p16632_p13 = scmp.lt.s32.totalorder %s16626_s1, %s16626_s1 }
  0x20   :  { %p16633_p0 = por %p16632_p13, %p16631_p12 }
  0x22   :  { %p16634_p1 = pnand %p16633_p0, %p16627_p11 }
  0x24   :  { %16637 = shalt.err (!%p16634_p1)
}
  0x25   :  { %s16807_s28 = smov 128   ;;  %s16808_s29 = smov 8  }
  0x26   :  { %65 = dma.hbm_to_vmem [thread:$0]  %s19163_s3, 2048, %s60_s18, [#allocation10], %s16807_s28, %s16807_s28, %s16808_s29  }
  0x27   :  { %s16638_s12 = scalar_lea.hbm %s19165_s5, 2048 }
  0x28   :  { %p16639_p2 = scmp.ne.s32.totalorder %s19165_s5, %s16638_s12  ;;  %p16642_p3 = scmp.lt.u32.totalorder %s16638_s12, %s19165_s5 }
  0x2a   :  { %p16644_p4 = pnand %p16642_p3, %p16639_p2 }
  0x2c   :  { %16647 = shalt.err (!%p16644_p4)
}
  0x2d   :  { %s16648_s17 = scalar_lea.vmem %s84_s20, 2048  ;;  %p16653_p6 = scmp.lt.s32.totalorder %s84_s20, %s84_s20 }
  0x2e   :  { %p16649_p5 = scmp.ne.s32.totalorder %s84_s20, %s16648_s17  ;;  %p16654_p7 = scmp.lt.s32.totalorder %s16648_s17, %s16648_s17 }
  0x30   :  { %p16655_p8 = por %p16654_p7, %p16653_p6 }
  0x32   :  { %p16656_p9 = pnand %p16655_p8, %p16649_p5 }
  0x34   :  { %16659 = shalt.err (!%p16656_p9)
}
  0x35   :  { %89 = dma.hbm_to_vmem [thread:$0]  %s19165_s5, 2048, %s84_s20, [#allocation13], %s16807_s28, %s16807_s28, %s16808_s29  }
  0x36   :  { %s16809_s19 = smov [#allocation3]   ;;  %s16810_s22 = smov [#allocation8]  }
  0x37   :  { %s25_s21 = sshll.u32 %s16809_s19, 4  ;;  %s47_s23 = sshll.u32 %s16810_s22, 4  ;;  %s26_s21 = int_to_ptr.vmem [resolvable:$true] %s25_s21  ;;  %s48_s23 = int_to_ptr.vmem [resolvable:$true] %s47_s23 }
  0x38   :  { %s16660_s26 = scalar_lea.hbm %s19160_s0, 768 }
  0x39   :  { %p16661_p10 = scmp.ne.s32.totalorder %s19160_s0, %s16660_s26  ;;  %p16664_p11 = scmp.lt.u32.totalorder %s16660_s26, %s19160_s0 }
  0x3b   :  { %p16666_p12 = pnand %p16664_p11, %p16661_p10 }
  0x3d   :  { %16669 = shalt.err (!%p16666_p12)
}
  0x3e   :  { %s16670_s5 = scalar_lea.vmem %s26_s21, 768  ;;  %p16675_p0 = scmp.lt.s32.totalorder %s26_s21, %s26_s21 }
  0x3f   :  { %p16671_p13 = scmp.ne.s32.totalorder %s26_s21, %s16670_s5  ;;  %p16676_p1 = scmp.lt.s32.totalorder %s16670_s5, %s16670_s5 }
  0x41   :  { %p16677_p2 = por %p16676_p1, %p16675_p0 }
  0x43   :  { %p16678_p3 = pnand %p16677_p2, %p16671_p13 }
  0x45   :  { %16681 = shalt.err (!%p16678_p3)
}
  0x46   :  { %31 = dma.hbm_to_vmem [thread:$0]  %s19160_s0, 768, %s26_s21, [#allocation4], %s16807_s28, %s16807_s28, %s16808_s29  }
  0x47   :  { %s16682_s13 = scalar_lea.hbm %s19162_s2, 2048 }
  0x48   :  { %p16683_p4 = scmp.ne.s32.totalorder %s19162_s2, %s16682_s13  ;;  %p16686_p5 = scmp.lt.u32.totalorder %s16682_s13, %s19162_s2 }
  0x4a   :  { %p16688_p6 = pnand %p16686_p5, %p16683_p4 }
  0x4c   :  { %16691 = shalt.err (!%p16688_p6)
}
  0x4d   :  { %s16692_s3 = scalar_lea.vmem %s48_s23, 2048  ;;  %p16697_p8 = scmp.lt.s32.totalorder %s48_s23, %s48_s23 }
  0x4e   :  { %p16693_p7 = scmp.ne.s32.totalorder %s48_s23, %s16692_s3  ;;  %p16698_p9 = scmp.lt.s32.totalorder %s16692_s3, %s16692_s3 }
  0x50   :  { %p16699_p10 = por %p16698_p9, %p16697_p8 }
  0x52   :  { %p16700_p11 = pnand %p16699_p10, %p16693_p7 }
  0x54   :  { %16703 = shalt.err (!%p16700_p11)
}
  0x55   :  { %53 = dma.hbm_to_vmem [thread:$0]  %s19162_s2, 2048, %s48_s23, [#allocation7], %s16807_s28, %s16807_s28, %s16808_s29  }
  0x56   :  { %s16811_s19 = smov [#allocation11]   ;;  %s16812_s22 = smov [#allocation14]  }
  0x57   :  { %s71_s21 = sshll.u32 %s16811_s19, 4  ;;  %s96_s24 = sshll.u32 %s16812_s22, 4  ;;  %s72_s21 = int_to_ptr.vmem [resolvable:$true] %s71_s21  ;;  %s97_s24 = int_to_ptr.vmem [resolvable:$true] %s96_s24 }
  0x58   :  { %s16704_s27 = scalar_lea.hbm %s19164_s4, 2048 }
  0x59   :  { %p16705_p12 = scmp.ne.s32.totalorder %s19164_s4, %s16704_s27  ;;  %p16708_p13 = scmp.lt.u32.totalorder %s16704_s27, %s19164_s4 }
  0x5b   :  { %p16710_p0 = pnand %p16708_p13, %p16705_p12 }
  0x5d   :  { %16713 = shalt.err (!%p16710_p0)
}
  0x5e   :  { %s16714_s2 = scalar_lea.vmem %s72_s21, 2048  ;;  %p16719_p2 = scmp.lt.s32.totalorder %s72_s21, %s72_s21 }
  0x5f   :  { %p16715_p1 = scmp.ne.s32.totalorder %s72_s21, %s16714_s2  ;;  %p16720_p3 = scmp.lt.s32.totalorder %s16714_s2, %s16714_s2 }
  0x61   :  { %p16721_p4 = por %p16720_p3, %p16719_p2 }
  0x63   :  { %p16722_p5 = pnand %p16721_p4, %p16715_p1 }
  0x65   :  { %16725 = shalt.err (!%p16722_p5)
}
  0x66   :  { %77 = dma.hbm_to_vmem [thread:$0]  %s19164_s4, 2048, %s72_s21, [#allocation10], %s16807_s28, %s16807_s28, %s16808_s29  }
  0x67   :  { %s16726_s12 = scalar_lea.hbm %s19166_s6, 16 }
  0x68   :  { %p16727_p6 = scmp.ne.s32.totalorder %s19166_s6, %s16726_s12  ;;  %p16730_p7 = scmp.lt.u32.totalorder %s16726_s12, %s19166_s6 }
  0x6a   :  { %p16732_p8 = pnand %p16730_p7, %p16727_p6 }
  0x6c   :  { %16735 = shalt.err (!%p16732_p8)
}
  0x6d   :  { %s16736_s17 = scalar_lea.vmem %s97_s24, 16  ;;  %s16740_s3 = scalar_lea.vmem %s97_s24, 32 }
  0x6e   :  { %p16737_p9 = scmp.ne.s32.totalorder %s97_s24, %s16736_s17  ;;  %p16741_p10 = scmp.lt.s32.totalorder %s97_s24, %s97_s24 }
  0x6f   :  { %p16742_p11 = scmp.lt.s32.totalorder %s16740_s3, %s16736_s17 }
  0x71   :  { %p16743_p12 = por %p16742_p11, %p16741_p10 }
  0x73   :  { %p16744_p13 = pnand %p16743_p12, %p16737_p9 }
  0x75   :  { %16747 = shalt.err (!%p16744_p13)
}
  0x76   :  { %99 = dma.hbm_to_vmem [thread:$0]  %s19166_s6, 16, %s97_s24, [#allocation13]  }
  0x77   :  { %16792 = dma.done.wait [#allocation4], 768  }
  0x78   :  { %16793 = vsyncadd [#allocation4], 4294966528 }
  0x79   :  { %16794 = dma.done.wait [#allocation7], 2176  }
  0x7a   :  { %16795 = vsyncadd [#allocation7], 4294965120 }
  0x7b   :  { %16796 = dma.done.wait [#allocation10], 4096  }
  0x7c   :  { %16797 = vsyncadd [#allocation10], 4294963200 }
  0x7d   :  { %16798 = dma.done.wait [#allocation13], 2064  }
  0x7e   :  { %16799 = vsyncadd [#allocation13], 4294965232  ;;  %v16813_v0 = vmov 0.0|0.0   ;;  %vm16814_vm0 = vmmov 0   ;;  %v16815_v1 = vmov 0.0   ;;  %v143_v2 = vld [vmem:[#allocation9] sm:$0xff] }
  0x7f   :  { %13974 = vmatprep.subr.bf16.mxu0 %v16813_v0  ;;  %14022 = vmatprep.subr.bf16.mxu1 %v16813_v0  ;;  %v144_v3 = vld [vmem:[#allocation9 + $0x8] sm:$0xff]  ;;  %v145_v4 = vld [vmem:[#allocation9 + $0x10] sm:$0xff]  ;;  %v146_v6 = vld [vmem:[#allocation9 + $0x18] sm:$0xff]  ;;  %s16816_s6 = smov [#allocation16]  }
  0x80   :  { %10226 = vmatprep.mubr.msk.f32.mxu0 %vm16814_vm0, %v16815_v1  ;;  %10296 = vmatprep.mubr.msk.f32.mxu1 %vm16814_vm0, %v16815_v1  ;;  %v16968_v5 = vpack.c.bf16 %v144_v3, %v143_v2  ;;  %v16971_v7 = vpack.c.bf16 %v146_v6, %v145_v4  ;;  %v147_v8 = vld [vmem:[#allocation9 + $0x20] sm:$0xff]  ;;  %v148_v9 = vld [vmem:[#allocation9 + $0x28] sm:$0xff]  ;;  %v161_v14 = vld [vmem:[#allocation11 + $0x10] sm:$0xff]  ;;  %s8338_s18 = sshll.u32 %s16816_s6, 4  ;;  %s8339_s18 = int_to_ptr.vmem [resolvable:$true] %s8338_s18 }
  0x81   :  { %v159_v10 = vld [vmem:[#allocation11] sm:$0xff]  ;;  %v160_v11 = vld [vmem:[#allocation11 + $0x8] sm:$0xff]  ;;  %v16977_v13 = vpack.c.bf16 %v148_v9, %v147_v8  ;;  %v162_v15 = vld [vmem:[#allocation11 + $0x18] sm:$0xff]  ;;  %s16748_s19 = scalar_lea.vmem %s8339_s18, 768  ;;  %p16753_p1 = scmp.lt.s32.totalorder %s8339_s18, %s8339_s18 }
  0x82   :  { %13976 = vmatpush3.bf16.msra.mxu0 %v16968_v5  ;;  %v16974_v12 = vpack.c.bf16 %v160_v11, %v159_v10  ;;  %v149_v16 = vld [vmem:[#allocation9 + $0x30] sm:$0xff]  ;;  %v150_v17 = vld [vmem:[#allocation9 + $0x38] sm:$0xff]  ;;  %v16981_v18 = vpack.c.bf16 %v162_v15, %v161_v14  ;;  %v163_v19 = vld [vmem:[#allocation11 + $0x20] sm:$0xff]  ;;  %p16749_p0 = scmp.ne.s32.totalorder %s8339_s18, %s16748_s19  ;;  %p16754_p2 = scmp.lt.s32.totalorder %s16748_s19, %s16748_s19 }
  0x83   :  { %13977 = vmatprep.subr.bf16.mxu0 %v16813_v0  ;;  %v164_v20 = vld [vmem:[#allocation11 + $0x28] sm:$0xff]  ;;  %v16985_v21 = vpack.c.bf16 %v150_v17, %v149_v16  ;;  %v151_v22 = vld [vmem:[#allocation9 + $0x40] sm:$0xff]  ;;  %v165_v25 = vld [vmem:[#allocation11 + $0x30] sm:$0xff] }
  0x84   :  { %14024 = vmatpush3.bf16.msra.mxu1 %v16974_v12  ;;  %v152_v23 = vld [vmem:[#allocation9 + $0x48] sm:$0xff]  ;;  %v16989_v24 = vpack.c.bf16 %v164_v20, %v163_v19  ;;  %v166_v26 = vld [vmem:[#allocation11 + $0x38] sm:$0xff]  ;;  %v153_v28 = vld [vmem:[#allocation9 + $0x50] sm:$0xff]  ;;  %p16755_p3 = por %p16754_p2, %p16753_p1 }
  0x85   :  { %14025 = vmatprep.subr.bf16.mxu1 %v16813_v0  ;;  %v16993_v27 = vpack.c.bf16 %v152_v23, %v151_v22  ;;  %v154_v29 = vld [vmem:[#allocation9 + $0x58] sm:$0xff]  ;;  %v16997_v30 = vpack.c.bf16 %v166_v26, %v165_v25  ;;  %v167_v31 = vld [vmem:[#allocation11 + $0x40] sm:$0xff]  ;;  %v168_v32 = vld [vmem:[#allocation11 + $0x48] sm:$0xff] }
  0x86   :  { %13979 = vmatpush3.bf16.msra.mxu0 %v16971_v7  ;;  %v17001_v33 = vpack.c.bf16 %v154_v29, %v153_v28  ;;  %v155_v34 = vld [vmem:[#allocation9 + $0x60] sm:$0xff]  ;;  %v156_v35 = vld [vmem:[#allocation9 + $0x68] sm:$0xff]  ;;  %v17005_v36 = vpack.c.bf16 %v168_v32, %v167_v31  ;;  %v169_v37 = vld [vmem:[#allocation11 + $0x50] sm:$0xff]  ;;  %p16756_p4 = pnand %p16755_p3, %p16749_p0 }
  0x87   :  { %13980 = vmatprep.subr.bf16.mxu0 %v16813_v0  ;;  %v170_v38 = vld [vmem:[#allocation11 + $0x58] sm:$0xff]  ;;  %v17009_v39 = vpack.c.bf16 %v156_v35, %v155_v34  ;;  %v157_v40 = vld [vmem:[#allocation9 + $0x70] sm:$0xff]  ;;  %v171_v43 = vld [vmem:[#allocation11 + $0x60] sm:$0xff] }
  0x88   :  { %14027 = vmatpush3.bf16.msra.mxu1 %v16981_v18  ;;  %v158_v41 = vld [vmem:[#allocation9 + $0x78] sm:$0xff]  ;;  %v17013_v42 = vpack.c.bf16 %v170_v38, %v169_v37  ;;  %v172_v44 = vld [vmem:[#allocation11 + $0x68] sm:$0xff]  ;;  %v127_v46 = vld [vmem:[#allocation8] sm:$0xff] }
  0x89   :  { %14028 = vmatprep.subr.bf16.mxu1 %v16813_v0  ;;  %v17017_v45 = vpack.c.bf16 %v158_v41, %v157_v40  ;;  %v128_v47 = vld [vmem:[#allocation8 + $0x8] sm:$0xff]  ;;  %v17021_v48 = vpack.c.bf16 %v172_v44, %v171_v43  ;;  %v173_v49 = vld [vmem:[#allocation11 + $0x70] sm:$0xff]  ;;  %v174_v50 = vld [vmem:[#allocation11 + $0x78] sm:$0xff] }
  0x8a   :  { %13982 = vmatpush3.bf16.msra.mxu0 %v16977_v13  ;;  %v193_v51 = vld [vmem:[#allocation3] sm:$0xff]  ;;  %v17025_v52 = vpack.c.bf16 %v128_v47, %v127_v46  ;;  %v129_v53 = vld [vmem:[#allocation8 + $0x10] sm:$0xff]  ;;  %v130_v54 = vld [vmem:[#allocation8 + $0x18] sm:$0xff]  ;;  %v17029_v55 = vpack.c.bf16 %v174_v50, %v173_v49 }
  0x8b   :  { %13983 = vmatprep.subr.bf16.mxu0 %v16813_v0  ;;  %v17033_v56 = vpack.c.bf16 %v130_v54, %v129_v53  ;;  %v131_v57 = vld [vmem:[#allocation8 + $0x20] sm:$0xff]  ;;  %v132_v58 = vld [vmem:[#allocation8 + $0x28] sm:$0xff]  ;;  %v17039_v59 = vld [vmem:[#allocation6] sm:$0xff] }
  0x8c   :  { %14030 = vmatpush3.bf16.msra.mxu1 %v16989_v24  ;;  %v17043_v60 = vpack.c.bf16 %v132_v58, %v131_v57  ;;  %v133_v61 = vld [vmem:[#allocation8 + $0x30] sm:$0xff]  ;;  %v134_v62 = vld [vmem:[#allocation8 + $0x38] sm:$0xff]  ;;  %v135_v2 = vld [vmem:[#allocation8 + $0x40] sm:$0xff] }
  0x8d   :  { %14031 = vmatprep.subr.bf16.mxu1 %v16813_v0  ;;  %v17052_v63 = vpack.c.bf16 %v134_v62, %v133_v61  ;;  %v136_v3 = vld [vmem:[#allocation8 + $0x48] sm:$0xff]  ;;  %v137_v6 = vld [vmem:[#allocation8 + $0x50] sm:$0xff]  ;;  %v138_v8 = vld [vmem:[#allocation8 + $0x58] sm:$0xff] }
  0x8e   :  { %13985 = vmatpush3.bf16.msra.mxu0 %v16985_v21  ;;  %v17058_v4 = vpack.c.bf16 %v136_v3, %v135_v2  ;;  %v17064_v9 = vpack.c.bf16 %v138_v8, %v137_v6  ;;  %v139_v10 = vld [vmem:[#allocation8 + $0x60] sm:$0xff]  ;;  %v140_v11 = vld [vmem:[#allocation8 + $0x68] sm:$0xff]  ;;  %v141_v15 = vld [vmem:[#allocation8 + $0x70] sm:$0xff] }
  0x8f   :  { %13986 = vmatprep.subr.bf16.mxu0 %v16813_v0  ;;  %v17070_v14 = vpack.c.bf16 %v140_v11, %v139_v10  ;;  %v142_v16 = vld [vmem:[#allocation8 + $0x78] sm:$0xff]  ;;  %v17106_v22 = vld [vmem:[#allocation14] ss:$0 sm:$0xff] }
  0x90   :  { %14033 = vmatpush3.bf16.msra.mxu1 %v16997_v30  ;;  %v17076_v17 = vpack.c.bf16 %v142_v16, %v141_v15 }
  0x91   :  { %14034 = vmatprep.subr.bf16.mxu1 %v16813_v0 }
  0x92   :  { %13988 = vmatpush3.bf16.msra.mxu0 %v16993_v27 }
  0x93   :  { %13989 = vmatprep.subr.bf16.mxu0 %v16813_v0 }
  0x94   :  { %14036 = vmatpush3.bf16.msra.mxu1 %v17005_v36 }
  0x95   :  { %14037 = vmatprep.subr.bf16.mxu1 %v16813_v0 }
  0x96   :  { %13991 = vmatpush3.bf16.msra.mxu0 %v17001_v33 }
  0x97   :  { %13992 = vmatprep.subr.bf16.mxu0 %v16813_v0 }
  0x98   :  { %14039 = vmatpush3.bf16.msra.mxu1 %v17013_v42 }
  0x99   :  { %14040 = vmatprep.subr.bf16.mxu1 %v16813_v0 }
  0x9a   :  { %13994 = vmatpush3.bf16.msra.mxu0 %v17009_v39 }
  0x9b   :  { %13995 = vmatprep.subr.bf16.mxu0 %v16813_v0 }
  0x9c   :  { %14042 = vmatpush3.bf16.msra.mxu1 %v17021_v48 }
  0x9d   :  { %14043 = vmatprep.subr.bf16.mxu1 %v16813_v0 }
  0x9e   :  { %13997 = vmatpush3.bf16.msra.mxu0 %v17017_v45 }
  0x9f   :  { %13998 = vmatprep.subr.bf16.mxu0 %v16813_v0 }
  0xa0   :  { %14045 = vmatpush3.bf16.msra.mxu1 %v17029_v55 }
  0xa1   :  { %10227 = vmatmul.mubr.f32.vlgmr.msra.gmra.mrb[0].mxu0 %v193_v51  ;;  %14046 = vmatprep.subr.bf16.mxu1 %v16813_v0 }
  0xa2   :  { %14000 = vmatpush3.bf16.msra.mxu0 %v17025_v52  ;;  %10261 = vmatprep.mubr.msk.f32.mxu0 %vm16814_vm0, %v16815_v1 }
  0xa3   :  { %14001 = vmatprep.subr.bf16.mxu0 %v16813_v0  ;;  %10297 = vmatmul.mubr.f32.vlgmr.msra.gmra.mrb[0].mxu1 %v17039_v59 }
  0xa4   :  { %14048 = vmatpush3.bf16.msra.mxu1 %v16974_v12  ;;  %10331 = vmatprep.mubr.msk.f32.mxu1 %vm16814_vm0, %v16815_v1 }
  0xa5   :  { %14049 = vmatprep.subr.bf16.mxu1 %v16813_v0 }
  0xa6   :  { %14003 = vmatpush3.bf16.msra.mxu0 %v17033_v56 }
  0xa7   :  { %14004 = vmatprep.subr.bf16.mxu0 %v16813_v0 }
  0xa8   :  { %14051 = vmatpush3.bf16.msra.mxu1 %v16981_v18 }
  0xa9   :  { %14052 = vmatprep.subr.bf16.mxu1 %v16813_v0 }
  0xaa   :  { %14006 = vmatpush3.bf16.msra.mxu0 %v17043_v60 }
  0xab   :  { %14007 = vmatprep.subr.bf16.mxu0 %v16813_v0 }
  0xac   :  { %14054 = vmatpush3.bf16.msra.mxu1 %v16989_v24 }
  0xad   :  { %14055 = vmatprep.subr.bf16.mxu1 %v16813_v0 }
  0xae   :  { %14009 = vmatpush3.bf16.msra.mxu0 %v17052_v63 }
  0xaf   :  { %14010 = vmatprep.subr.bf16.mxu0 %v16813_v0 }
  0xb0   :  { %14057 = vmatpush3.bf16.msra.mxu1 %v16997_v30 }
  0xb1   :  { %14058 = vmatprep.subr.bf16.mxu1 %v16813_v0 }
  0xb2   :  { %14012 = vmatpush3.bf16.msra.mxu0 %v17058_v4 }
  0xb3   :  { %14013 = vmatprep.subr.bf16.mxu0 %v16813_v0 }
  0xb4   :  { %14060 = vmatpush3.bf16.msra.mxu1 %v17005_v36 }
  0xb5   :  { %14061 = vmatprep.subr.bf16.mxu1 %v16813_v0 }
  0xb6   :  { %14015 = vmatpush3.bf16.msra.mxu0 %v17064_v9 }
  0xb7   :  { %14016 = vmatprep.subr.bf16.mxu0 %v16813_v0 }
  0xb8   :  { %14063 = vmatpush3.bf16.msra.mxu1 %v17013_v42 }
  0xb9   :  { %14064 = vmatprep.subr.bf16.mxu1 %v16813_v0 }
  0xba   :  { %14018 = vmatpush3.bf16.msra.mxu0 %v17070_v14 }
  0xbb   :  { %14019 = vmatprep.subr.bf16.mxu0 %v16813_v0 }
  0xbc   :  { %14066 = vmatpush3.bf16.msra.mxu1 %v17021_v48 }
  0xbd   :  { %14067 = vmatprep.subr.bf16.mxu1 %v16813_v0 }
  0xbe   :  { %14021 = vmatpush3.bf16.msra.mxu0 %v17076_v17 }
  0xbf   :  { %14070 = vmatprep.subr.bf16.mxu0 %v16813_v0 }
  0xc0   :  { %14069 = vmatpush3.bf16.msra.mxu1 %v17029_v55 }
  0xc1   :  { %10262 = vmatmul.mubr.f32.vlgmr.msra.gmra.mrb[0].mxu0 %v17039_v59  ;;  %14094 = vmatprep.subr.bf16.mxu1 %v16813_v0 }
  0xc2   :  { %14072 = vmatpush3.bf16.msra.mxu0 %v16974_v12  ;;  %10366 = vmatprep.mubr.msk.f32.mxu0 %vm16814_vm0, %v16815_v1 }
  0xc3   :  { %14073 = vmatprep.subr.bf16.mxu0 %v16813_v0 }
  0xc6   :  { %14075 = vmatpush3.bf16.msra.mxu0 %v16981_v18 }
  0xc7   :  { %14076 = vmatprep.subr.bf16.mxu0 %v16813_v0 }
  0xca   :  { %14078 = vmatpush3.bf16.msra.mxu0 %v16989_v24 }
  0xcb   :  { %14079 = vmatprep.subr.bf16.mxu0 %v16813_v0 }
  0xce   :  { %14081 = vmatpush3.bf16.msra.mxu0 %v16997_v30 }
  0xcf   :  { %14082 = vmatprep.subr.bf16.mxu0 %v16813_v0 }
  0xd2   :  { %14084 = vmatpush3.bf16.msra.mxu0 %v17005_v36 }
  0xd3   :  { %14085 = vmatprep.subr.bf16.mxu0 %v16813_v0 }
  0xd6   :  { %14087 = vmatpush3.bf16.msra.mxu0 %v17013_v42 }
  0xd7   :  { %14088 = vmatprep.subr.bf16.mxu0 %v16813_v0 }
  0xda   :  { %14090 = vmatpush3.bf16.msra.mxu0 %v17021_v48 }
  0xdb   :  { %14091 = vmatprep.subr.bf16.mxu0 %v16813_v0 }
  0xde   :  { %14093 = vmatpush3.bf16.msra.mxu0 %v17029_v55 }
  0xdf   :  { %14118 = vmatprep.subr.bf16.mxu0 %v16813_v0 }
 0x176   :  { %v407_v19 = vpop.f32.mrb[0].mxu1 }
 0x177   :  { %v10298_v20 = vpop.f32.mrb[1].mxu1  ;;  %v411_v23 = vsub.f32 %v17039_v59, %v407_v19 }
 0x194   :  { %v330_v25 = vpop.f32.mrb[0].mxu0 }
 0x195   :  { %v17110_v26 = vsub.f32 %v330_v25, %v17106_v22  ;;  %v10263_v28 = vpop.f32.mrb[1].mxu0 }
 0x197   :  { %v412_v29 = vadd.f32 %v411_v23, %v17110_v26 }
 0x199   :  { %v413_v31 = vmax.f32 %v412_v29, 0.0 }
 0x19b   :  { %v414_v32 = vsub.f32 %v413_v31, %v17039_v59 }
 0x19d   :  { %v415_v34 = vmul.f32 0.0, %v414_v32 }
 0x19f   :  { %v416_v35 = vadd.f32 %v415_v34, %v413_v31 }
 0x1a1   :  { %10332 = vmatmul.mubr.f32.vlgmr.msra.gmra.mrb[2].mxu1 %v416_v35 }
 0x1a2   :  { %14096 = vmatpush3.bf16.msra.mxu1 %v16974_v12  ;;  %10401 = vmatprep.mubr.msk.f32.mxu1 %vm16814_vm0, %v16815_v1 }
 0x1a3   :  { %14097 = vmatprep.subr.bf16.mxu1 %v16813_v0 }
 0x1a6   :  { %14099 = vmatpush3.bf16.msra.mxu1 %v16981_v18 }
 0x1a7   :  { %14100 = vmatprep.subr.bf16.mxu1 %v16813_v0 }
 0x1aa   :  { %14102 = vmatpush3.bf16.msra.mxu1 %v16989_v24 }
 0x1ab   :  { %14103 = vmatprep.subr.bf16.mxu1 %v16813_v0 }
 0x1ae   :  { %14105 = vmatpush3.bf16.msra.mxu1 %v16997_v30 }
 0x1af   :  { %14106 = vmatprep.subr.bf16.mxu1 %v16813_v0 }
 0x1b2   :  { %14108 = vmatpush3.bf16.msra.mxu1 %v17005_v36 }
 0x1b3   :  { %14109 = vmatprep.subr.bf16.mxu1 %v16813_v0 }
 0x1b6   :  { %14111 = vmatpush3.bf16.msra.mxu1 %v17013_v42 }
 0x1b7   :  { %14112 = vmatprep.subr.bf16.mxu1 %v16813_v0 }
 0x1ba   :  { %14114 = vmatpush3.bf16.msra.mxu1 %v17021_v48 }
 0x1bb   :  { %14115 = vmatprep.subr.bf16.mxu1 %v16813_v0 }
 0x1be   :  { %14117 = vmatpush3.bf16.msra.mxu1 %v17029_v55 }
 0x1bf   :  { %14142 = vmatprep.subr.bf16.mxu1 %v16813_v0 }
 0x274   :  { %v483_v37 = vpop.f32.mrb[2].mxu1 }
 0x275   :  { %v487_v38 = vsub.f32 %v416_v35, %v483_v37  ;;  %v10333_v40 = vpop.f32.mrb[3].mxu1 }
 0x277   :  { %v488_v41 = vadd.f32 %v487_v38, %v17110_v26 }
 0x279   :  { %v489_v43 = vmax.f32 %v488_v41, 0.0 }
 0x27b   :  { %v490_v44 = vsub.f32 %v489_v43, %v413_v31 }
 0x27d   :  { %v491_v46 = vmul.f32 0.2817535, %v490_v44 }
 0x27f   :  { %v492_v47 = vadd.f32 %v491_v46, %v489_v43 }
 0x281   :  { %10367 = vmatmul.mubr.f32.vlgmr.msra.gmra.mrb[2].mxu0 %v492_v47 }
 0x282   :  { %14120 = vmatpush3.bf16.msra.mxu0 %v16974_v12  ;;  %10436 = vmatprep.mubr.msk.f32.mxu0 %vm16814_vm0, %v16815_v1 }
 0x283   :  { %14121 = vmatprep.subr.bf16.mxu0 %v16813_v0 }
 0x286   :  { %14123 = vmatpush3.bf16.msra.mxu0 %v16981_v18 }
 0x287   :  { %14124 = vmatprep.subr.bf16.mxu0 %v16813_v0 }
 0x28a   :  { %14126 = vmatpush3.bf16.msra.mxu0 %v16989_v24 }
 0x28b   :  { %14127 = vmatprep.subr.bf16.mxu0 %v16813_v0 }
 0x28e   :  { %14129 = vmatpush3.bf16.msra.mxu0 %v16997_v30 }
 0x28f   :  { %14130 = vmatprep.subr.bf16.mxu0 %v16813_v0 }
 0x292   :  { %14132 = vmatpush3.bf16.msra.mxu0 %v17005_v36 }
 0x293   :  { %14133 = vmatprep.subr.bf16.mxu0 %v16813_v0 }
 0x296   :  { %14135 = vmatpush3.bf16.msra.mxu0 %v17013_v42 }
 0x297   :  { %14136 = vmatprep.subr.bf16.mxu0 %v16813_v0 }
 0x29a   :  { %14138 = vmatpush3.bf16.msra.mxu0 %v17021_v48 }
 0x29b   :  { %14139 = vmatprep.subr.bf16.mxu0 %v16813_v0 }
 0x29e   :  { %14141 = vmatpush3.bf16.msra.mxu0 %v17029_v55 }
 0x29f   :  { %14166 = vmatprep.subr.bf16.mxu0 %v16813_v0 }
 0x354   :  { %v559_v49 = vpop.f32.mrb[2].mxu0 }
 0x355   :  { %v563_v50 = vsub.f32 %v492_v47, %v559_v49  ;;  %v10368_v51 = vpop.f32.mrb[3].mxu0 }
 0x357   :  { %v564_v53 = vadd.f32 %v563_v50, %v17110_v26 }
 0x359   :  { %v565_v54 = vmax.f32 %v564_v53, 0.0 }
 0x35b   :  { %v566_v57 = vsub.f32 %v565_v54, %v489_v43 }
 0x35d   :  { %v567_v58 = vmul.f32 0.43404278, %v566_v57 }
 0x35f   :  { %v568_v59 = vadd.f32 %v567_v58, %v565_v54 }
 0x361   :  { %10402 = vmatmul.mubr.f32.vlgmr.msra.gmra.mrb[4].mxu1 %v568_v59 }
 0x362   :  { %14144 = vmatpush3.bf16.msra.mxu1 %v16974_v12  ;;  %10471 = vmatprep.mubr.msk.f32.mxu1 %vm16814_vm0, %v16815_v1 }
 0x363   :  { %14145 = vmatprep.subr.bf16.mxu1 %v16813_v0 }
 0x366   :  { %14147 = vmatpush3.bf16.msra.mxu1 %v16981_v18 }
 0x367   :  { %14148 = vmatprep.subr.bf16.mxu1 %v16813_v0 }
 0x36a   :  { %14150 = vmatpush3.bf16.msra.mxu1 %v16989_v24 }
 0x36b   :  { %14151 = vmatprep.subr.bf16.mxu1 %v16813_v0 }
 0x36e   :  { %14153 = vmatpush3.bf16.msra.mxu1 %v16997_v30 }
 0x36f   :  { %14154 = vmatprep.subr.bf16.mxu1 %v16813_v0 }
 0x372   :  { %14156 = vmatpush3.bf16.msra.mxu1 %v17005_v36 }
 0x373   :  { %14157 = vmatprep.subr.bf16.mxu1 %v16813_v0 }
 0x376   :  { %14159 = vmatpush3.bf16.msra.mxu1 %v17013_v42 }
 0x377   :  { %14160 = vmatprep.subr.bf16.mxu1 %v16813_v0 }
 0x37a   :  { %14162 = vmatpush3.bf16.msra.mxu1 %v17021_v48 }
 0x37b   :  { %14163 = vmatprep.subr.bf16.mxu1 %v16813_v0 }
 0x37e   :  { %14165 = vmatpush3.bf16.msra.mxu1 %v17029_v55 }
 0x37f   :  { %14190 = vmatprep.subr.bf16.mxu1 %v16813_v0 }
 0x434   :  { %v635_v61 = vpop.f32.mrb[4].mxu1 }
 0x435   :  { %v639_v62 = vsub.f32 %v568_v59, %v635_v61  ;;  %v10403_v2 = vpop.f32.mrb[5].mxu1 }
 0x437   :  { %v640_v3 = vadd.f32 %v639_v62, %v17110_v26 }
 0x439   :  { %v641_v6 = vmax.f32 %v640_v3, 0.0 }
 0x43b   :  { %v642_v8 = vsub.f32 %v641_v6, %v565_v54 }
 0x43d   :  { %v643_v10 = vmul.f32 0.5310638, %v642_v8 }
 0x43f   :  { %v644_v11 = vadd.f32 %v643_v10, %v641_v6 }
 0x441   :  { %10437 = vmatmul.mubr.f32.vlgmr.msra.gmra.mrb[4].mxu0 %v644_v11 }
 0x442   :  { %14168 = vmatpush3.bf16.msra.mxu0 %v16974_v12  ;;  %10506 = vmatprep.mubr.msk.f32.mxu0 %vm16814_vm0, %v16815_v1 }
 0x443   :  { %14169 = vmatprep.subr.bf16.mxu0 %v16813_v0 }
 0x446   :  { %14171 = vmatpush3.bf16.msra.mxu0 %v16981_v18 }
 0x447   :  { %14172 = vmatprep.subr.bf16.mxu0 %v16813_v0 }
 0x44a   :  { %14174 = vmatpush3.bf16.msra.mxu0 %v16989_v24 }
 0x44b   :  { %14175 = vmatprep.subr.bf16.mxu0 %v16813_v0 }
 0x44e   :  { %14177 = vmatpush3.bf16.msra.mxu0 %v16997_v30 }
 0x44f   :  { %14178 = vmatprep.subr.bf16.mxu0 %v16813_v0 }
 0x452   :  { %14180 = vmatpush3.bf16.msra.mxu0 %v17005_v36 }
 0x453   :  { %14181 = vmatprep.subr.bf16.mxu0 %v16813_v0 }
 0x456   :  { %14183 = vmatpush3.bf16.msra.mxu0 %v17013_v42 }
 0x457   :  { %14184 = vmatprep.subr.bf16.mxu0 %v16813_v0 }
 0x45a   :  { %14186 = vmatpush3.bf16.msra.mxu0 %v17021_v48 }
 0x45b   :  { %14187 = vmatprep.subr.bf16.mxu0 %v16813_v0 }
 0x45e   :  { %14189 = vmatpush3.bf16.msra.mxu0 %v17029_v55 }
 0x45f   :  { %14214 = vmatprep.subr.bf16.mxu0 %v16813_v0 }
 0x514   :  { %v711_v15 = vpop.f32.mrb[4].mxu0 }
 0x515   :  { %v715_v16 = vsub.f32 %v644_v11, %v711_v15  ;;  %v10438_v19 = vpop.f32.mrb[5].mxu0 }
 0x517   :  { %v716_v20 = vadd.f32 %v715_v16, %v17110_v26 }
 0x519   :  { %v717_v23 = vmax.f32 %v716_v20, 0.0 }
 0x51b   :  { %v718_v25 = vsub.f32 %v717_v23, %v641_v6 }
 0x51d   :  { %v719_v28 = vmul.f32 0.5987786, %v718_v25 }
 0x51f   :  { %v720_v29 = vadd.f32 %v719_v28, %v717_v23 }
 0x521   :  { %10472 = vmatmul.mubr.f32.vlgmr.msra.gmra.mrb[6].mxu1 %v720_v29 }
 0x522   :  { %14192 = vmatpush3.bf16.msra.mxu1 %v16974_v12  ;;  %10541 = vmatprep.mubr.msk.f32.mxu1 %vm16814_vm0, %v16815_v1 }
 0x523   :  { %14193 = vmatprep.subr.bf16.mxu1 %v16813_v0 }
 0x526   :  { %14195 = vmatpush3.bf16.msra.mxu1 %v16981_v18 }
 0x527   :  { %14196 = vmatprep.subr.bf16.mxu1 %v16813_v0 }
 0x52a   :  { %14198 = vmatpush3.bf16.msra.mxu1 %v16989_v24 }
 0x52b   :  { %14199 = vmatprep.subr.bf16.mxu1 %v16813_v0 }
 0x52e   :  { %14201 = vmatpush3.bf16.msra.mxu1 %v16997_v30 }
 0x52f   :  { %14202 = vmatprep.subr.bf16.mxu1 %v16813_v0 }
 0x532   :  { %14204 = vmatpush3.bf16.msra.mxu1 %v17005_v36 }
 0x533   :  { %14205 = vmatprep.subr.bf16.mxu1 %v16813_v0 }
 0x536   :  { %14207 = vmatpush3.bf16.msra.mxu1 %v17013_v42 }
 0x537   :  { %14208 = vmatprep.subr.bf16.mxu1 %v16813_v0 }
 0x53a   :  { %14210 = vmatpush3.bf16.msra.mxu1 %v17021_v48 }
 0x53b   :  { %14211 = vmatprep.subr.bf16.mxu1 %v16813_v0 }
 0x53e   :  { %14213 = vmatpush3.bf16.msra.mxu1 %v17029_v55 }
 0x53f   :  { %14238 = vmatprep.subr.bf16.mxu1 %v16813_v0 }
 0x5f4   :  { %v787_v31 = vpop.f32.mrb[6].mxu1 }
 0x5f5   :  { %v791_v32 = vsub.f32 %v720_v29, %v787_v31  ;;  %v10473_v34 = vpop.f32.mrb[7].mxu1 }
 0x5f7   :  { %v792_v35 = vadd.f32 %v791_v32, %v17110_v26 }
 0x5f9   :  { %v793_v37 = vmax.f32 %v792_v35, 0.0 }
 0x5fb   :  { %v794_v38 = vsub.f32 %v793_v37, %v717_v23 }
 0x5fd   :  { %v795_v40 = vmul.f32 0.64892334, %v794_v38 }
 0x5ff   :  { %v796_v41 = vadd.f32 %v795_v40, %v793_v37 }
 0x601   :  { %10507 = vmatmul.mubr.f32.vlgmr.msra.gmra.mrb[6].mxu0 %v796_v41 }
 0x602   :  { %14216 = vmatpush3.bf16.msra.mxu0 %v16974_v12  ;;  %10576 = vmatprep.mubr.msk.f32.mxu0 %vm16814_vm0, %v16815_v1 }
 0x603   :  { %14217 = vmatprep.subr.bf16.mxu0 %v16813_v0 }
 0x606   :  { %14219 = vmatpush3.bf16.msra.mxu0 %v16981_v18 }
 0x607   :  { %14220 = vmatprep.subr.bf16.mxu0 %v16813_v0 }
 0x60a   :  { %14222 = vmatpush3.bf16.msra.mxu0 %v16989_v24 }
 0x60b   :  { %14223 = vmatprep.subr.bf16.mxu0 %v16813_v0 }
 0x60e   :  { %14225 = vmatpush3.bf16.msra.mxu0 %v16997_v30 }
 0x60f   :  { %14226 = vmatprep.subr.bf16.mxu0 %v16813_v0 }
 0x612   :  { %14228 = vmatpush3.bf16.msra.mxu0 %v17005_v36 }
 0x613   :  { %14229 = vmatprep.subr.bf16.mxu0 %v16813_v0 }
 0x616   :  { %14231 = vmatpush3.bf16.msra.mxu0 %v17013_v42 }
 0x617   :  { %14232 = vmatprep.subr.bf16.mxu0 %v16813_v0 }
 0x61a   :  { %14234 = vmatpush3.bf16.msra.mxu0 %v17021_v48 }
 0x61b   :  { %14235 = vmatprep.subr.bf16.mxu0 %v16813_v0 }
 0x61e   :  { %14237 = vmatpush3.bf16.msra.mxu0 %v17029_v55 }
 0x61f   :  { %14262 = vmatprep.subr.bf16.mxu0 %v16813_v0 }
 0x6d4   :  { %v863_v43 = vpop.f32.mrb[6].mxu0 }
 0x6d5   :  { %v867_v44 = vsub.f32 %v796_v41, %v863_v43  ;;  %v10508_v46 = vpop.f32.mrb[7].mxu0 }
 0x6d7   :  { %v868_v47 = vadd.f32 %v867_v44, %v17110_v26 }
 0x6d9   :  { %v869_v49 = vmax.f32 %v868_v47, 0.0 }
 0x6db   :  { %v870_v50 = vsub.f32 %v869_v49, %v793_v37 }
 0x6dd   :  { %v871_v51 = vmul.f32 0.68764585, %v870_v50 }
 0x6df   :  { %v872_v53 = vadd.f32 %v871_v51, %v869_v49 }
 0x6e1   :  { %10542 = vmatmul.mubr.f32.vlgmr.msra.gmra.mrb[8].mxu1 %v872_v53 }
 0x6e2   :  { %14240 = vmatpush3.bf16.msra.mxu1 %v16974_v12  ;;  %10611 = vmatprep.mubr.msk.f32.mxu1 %vm16814_vm0, %v16815_v1 }
 0x6e3   :  { %14241 = vmatprep.subr.bf16.mxu1 %v16813_v0 }
 0x6e6   :  { %14243 = vmatpush3.bf16.msra.mxu1 %v16981_v18 }
 0x6e7   :  { %14244 = vmatprep.subr.bf16.mxu1 %v16813_v0 }
 0x6ea   :  { %14246 = vmatpush3.bf16.msra.mxu1 %v16989_v24 }
 0x6eb   :  { %14247 = vmatprep.subr.bf16.mxu1 %v16813_v0 }
 0x6ee   :  { %14249 = vmatpush3.bf16.msra.mxu1 %v16997_v30 }
 0x6ef   :  { %14250 = vmatprep.subr.bf16.mxu1 %v16813_v0 }
 0x6f2   :  { %14252 = vmatpush3.bf16.msra.mxu1 %v17005_v36 }
 0x6f3   :  { %14253 = vmatprep.subr.bf16.mxu1 %v16813_v0 }
 0x6f6   :  { %14255 = vmatpush3.bf16.msra.mxu1 %v17013_v42 }
 0x6f7   :  { %14256 = vmatprep.subr.bf16.mxu1 %v16813_v0 }
 0x6fa   :  { %14258 = vmatpush3.bf16.msra.mxu1 %v17021_v48 }
 0x6fb   :  { %14259 = vmatprep.subr.bf16.mxu1 %v16813_v0 }
 0x6fe   :  { %14261 = vmatpush3.bf16.msra.mxu1 %v17029_v55 }
 0x6ff   :  { %14286 = vmatprep.subr.bf16.mxu1 %v16813_v0 }
 0x7b4   :  { %v939_v54 = vpop.f32.mrb[8].mxu1 }
 0x7b5   :  { %v943_v57 = vsub.f32 %v872_v53, %v939_v54  ;;  %v10543_v58 = vpop.f32.mrb[9].mxu1 }
 0x7b7   :  { %v944_v59 = vadd.f32 %v943_v57, %v17110_v26 }
 0x7b9   :  { %v945_v61 = vmax.f32 %v944_v59, 0.0 }
 0x7bb   :  { %v946_v62 = vsub.f32 %v945_v61, %v869_v49 }
 0x7bd   :  { %v947_v2 = vmul.f32 0.71849984, %v946_v62 }
 0x7bf   :  { %v948_v3 = vadd.f32 %v947_v2, %v945_v61 }
 0x7c1   :  { %10577 = vmatmul.mubr.f32.vlgmr.msra.gmra.mrb[8].mxu0 %v948_v3 }
 0x7c2   :  { %14264 = vmatpush3.bf16.msra.mxu0 %v16974_v12  ;;  %10646 = vmatprep.mubr.msk.f32.mxu0 %vm16814_vm0, %v16815_v1 }
 0x7c3   :  { %14265 = vmatprep.subr.bf16.mxu0 %v16813_v0 }
 0x7c6   :  { %14267 = vmatpush3.bf16.msra.mxu0 %v16981_v18 }
 0x7c7   :  { %14268 = vmatprep.subr.bf16.mxu0 %v16813_v0 }
 0x7ca   :  { %14270 = vmatpush3.bf16.msra.mxu0 %v16989_v24 }
 0x7cb   :  { %14271 = vmatprep.subr.bf16.mxu0 %v16813_v0 }
 0x7ce   :  { %14273 = vmatpush3.bf16.msra.mxu0 %v16997_v30 }
 0x7cf   :  { %14274 = vmatprep.subr.bf16.mxu0 %v16813_v0 }
 0x7d2   :  { %14276 = vmatpush3.bf16.msra.mxu0 %v17005_v36 }
 0x7d3   :  { %14277 = vmatprep.subr.bf16.mxu0 %v16813_v0 }
 0x7d6   :  { %14279 = vmatpush3.bf16.msra.mxu0 %v17013_v42 }
 0x7d7   :  { %14280 = vmatprep.subr.bf16.mxu0 %v16813_v0 }
 0x7da   :  { %14282 = vmatpush3.bf16.msra.mxu0 %v17021_v48 }
 0x7db   :  { %14283 = vmatprep.subr.bf16.mxu0 %v16813_v0 }
 0x7de   :  { %14285 = vmatpush3.bf16.msra.mxu0 %v17029_v55 }
 0x7df   :  { %14310 = vmatprep.subr.bf16.mxu0 %v16813_v0 }
 0x894   :  { %v1015_v6 = vpop.f32.mrb[8].mxu0 }
 0x895   :  { %v1019_v8 = vsub.f32 %v948_v3, %v1015_v6  ;;  %v10578_v10 = vpop.f32.mrb[9].mxu0 }
 0x897   :  { %v1020_v11 = vadd.f32 %v1019_v8, %v17110_v26 }
 0x899   :  { %v1021_v15 = vmax.f32 %v1020_v11, 0.0 }
 0x89b   :  { %v1022_v16 = vsub.f32 %v1021_v15, %v945_v61 }
 0x89d   :  { %v1023_v19 = vmul.f32 0.743691, %v1022_v16  ;;  %v176_v16 = vld [vmem:[#allocation12 + $0x8] sm:$0xff] }
 0x89f   :  { %v1024_v20 = vadd.f32 %v1023_v19, %v1021_v15 }
 0x8a1   :  { %10612 = vmatmul.mubr.f32.vlgmr.msra.gmra.mrb[10].mxu1 %v1024_v20 }
 0x8a2   :  { %14288 = vmatpush3.bf16.msra.mxu1 %v16974_v12  ;;  %10681 = vmatprep.mubr.msk.f32.mxu1 %vm16814_vm0, %v16815_v1 }
 0x8a3   :  { %14289 = vmatprep.subr.bf16.mxu1 %v16813_v0 }
 0x8a6   :  { %14291 = vmatpush3.bf16.msra.mxu1 %v16981_v18 }
 0x8a7   :  { %14292 = vmatprep.subr.bf16.mxu1 %v16813_v0 }
 0x8aa   :  { %14294 = vmatpush3.bf16.msra.mxu1 %v16989_v24 }
 0x8ab   :  { %14295 = vmatprep.subr.bf16.mxu1 %v16813_v0 }
 0x8ae   :  { %14297 = vmatpush3.bf16.msra.mxu1 %v16997_v30 }
 0x8af   :  { %14298 = vmatprep.subr.bf16.mxu1 %v16813_v0 }
 0x8b2   :  { %14300 = vmatpush3.bf16.msra.mxu1 %v17005_v36 }
 0x8b3   :  { %14301 = vmatprep.subr.bf16.mxu1 %v16813_v0 }
 0x8b6   :  { %14303 = vmatpush3.bf16.msra.mxu1 %v17013_v42 }
 0x8b7   :  { %14304 = vmatprep.subr.bf16.mxu1 %v16813_v0 }
 0x8ba   :  { %14306 = vmatpush3.bf16.msra.mxu1 %v17021_v48 }
 0x8bb   :  { %14307 = vmatprep.subr.bf16.mxu1 %v16813_v0 }
 0x8be   :  { %14309 = vmatpush3.bf16.msra.mxu1 %v17029_v55 }
 0x8bf   :  { %14334 = vmatprep.subr.bf16.mxu1 %v16813_v0 }
 0x974   :  { %v1091_v23 = vpop.f32.mrb[10].mxu1 }
 0x975   :  { %v1095_v25 = vsub.f32 %v1024_v20, %v1091_v23  ;;  %v10613_v28 = vpop.f32.mrb[11].mxu1  ;;  %v177_v20 = vld [vmem:[#allocation12 + $0x10] sm:$0xff]  ;;  %v178_v23 = vld [vmem:[#allocation12 + $0x18] sm:$0xff] }
 0x976   :  { %v179_v28 = vld [vmem:[#allocation12 + $0x20] sm:$0xff] }
 0x977   :  { %v1096_v29 = vadd.f32 %v1095_v25, %v17110_v26  ;;  %v17348_v25 = vpack.c.bf16 %v178_v23, %v177_v20 }
 0x979   :  { %v1097_v31 = vmax.f32 %v1096_v29, 0.0  ;;  %v180_v29 = vld [vmem:[#allocation12 + $0x28] sm:$0xff] }
 0x97b   :  { %v1098_v32 = vsub.f32 %v1097_v31, %v1021_v15  ;;  %v175_v15 = vld [vmem:[#allocation12] sm:$0xff] }
 0x97c   :  { %v17344_v19 = vpack.c.bf16 %v176_v16, %v175_v15 }
 0x97d   :  { %v1099_v34 = vmul.f32 0.7646647, %v1098_v32  ;;  %v181_v32 = vld [vmem:[#allocation12 + $0x30] sm:$0xff] }
 0x97f   :  { %v1100_v35 = vadd.f32 %v1099_v34, %v1097_v31  ;;  %v182_v34 = vld [vmem:[#allocation12 + $0x38] sm:$0xff] }
 0x981   :  { %10647 = vmatmul.mubr.f32.vlgmr.msra.gmra.mrb[10].mxu0 %v1100_v35 }
 0x982   :  { %14312 = vmatpush3.bf16.msra.mxu0 %v16974_v12  ;;  %10716 = vmatprep.mubr.msk.f32.mxu0 %vm16814_vm0, %v16815_v1 }
 0x983   :  { %14313 = vmatprep.subr.bf16.mxu0 %v16813_v0 }
 0x986   :  { %14315 = vmatpush3.bf16.msra.mxu0 %v16981_v18 }
 0x987   :  { %14316 = vmatprep.subr.bf16.mxu0 %v16813_v0 }
 0x98a   :  { %14318 = vmatpush3.bf16.msra.mxu0 %v16989_v24 }
 0x98b   :  { %14319 = vmatprep.subr.bf16.mxu0 %v16813_v0 }
 0x98e   :  { %14321 = vmatpush3.bf16.msra.mxu0 %v16997_v30 }
 0x98f   :  { %14322 = vmatprep.subr.bf16.mxu0 %v16813_v0 }
 0x992   :  { %14324 = vmatpush3.bf16.msra.mxu0 %v17005_v36 }
 0x993   :  { %14325 = vmatprep.subr.bf16.mxu0 %v16813_v0 }
 0x996   :  { %14327 = vmatpush3.bf16.msra.mxu0 %v17013_v42 }
 0x997   :  { %14328 = vmatprep.subr.bf16.mxu0 %v16813_v0 }
 0x99a   :  { %14330 = vmatpush3.bf16.msra.mxu0 %v17021_v48 }
 0x99b   :  { %14331 = vmatprep.subr.bf16.mxu0 %v16813_v0 }
 0x99e   :  { %14333 = vmatpush3.bf16.msra.mxu0 %v17029_v55 }
 0x99f   :  { %14358 = vmatprep.subr.bf16.mxu0 %v16813_v0 }
 0xa54   :  { %v1167_v37 = vpop.f32.mrb[10].mxu0 }
 0xa55   :  { %v1171_v38 = vsub.f32 %v1100_v35, %v1167_v37  ;;  %v10648_v40 = vpop.f32.mrb[11].mxu0  ;;  %v17356_v35 = vpack.c.bf16 %v182_v34, %v181_v32  ;;  %v183_v37 = vld [vmem:[#allocation12 + $0x40] sm:$0xff] }
 0xa57   :  { %v1172_v41 = vadd.f32 %v1171_v38, %v17110_v26  ;;  %v184_v38 = vld [vmem:[#allocation12 + $0x48] sm:$0xff] }
 0xa58   :  { %v17360_v40 = vpack.c.bf16 %v184_v38, %v183_v37 }
 0xa59   :  { %v1173_v43 = vmax.f32 %v1172_v41, 0.0  ;;  %v185_v41 = vld [vmem:[#allocation12 + $0x50] sm:$0xff] }
 0xa5b   :  { %v1174_v44 = vsub.f32 %v1173_v43, %v1097_v31  ;;  %v17352_v31 = vpack.c.bf16 %v180_v29, %v179_v28 }
 0xa5d   :  { %v1175_v46 = vmul.f32 0.78240925, %v1174_v44 }
 0xa5f   :  { %v1176_v47 = vadd.f32 %v1175_v46, %v1173_v43  ;;  %v187_v46 = vld [vmem:[#allocation12 + $0x60] sm:$0xff] }
 0xa61   :  { %10682 = vmatmul.mubr.f32.vlgmr.msra.gmra.mrb[12].mxu1 %v1176_v47 }
 0xa62   :  { %14336 = vmatpush3.bf16.msra.mxu1 %v16974_v12  ;;  %10751 = vmatprep.mubr.msk.f32.mxu1 %vm16814_vm0, %v16815_v1 }
 0xa63   :  { %14337 = vmatprep.subr.bf16.mxu1 %v16813_v0 }
 0xa66   :  { %14339 = vmatpush3.bf16.msra.mxu1 %v16981_v18 }
 0xa67   :  { %14340 = vmatprep.subr.bf16.mxu1 %v16813_v0 }
 0xa6a   :  { %14342 = vmatpush3.bf16.msra.mxu1 %v16989_v24 }
 0xa6b   :  { %14343 = vmatprep.subr.bf16.mxu1 %v16813_v0 }
 0xa6e   :  { %14345 = vmatpush3.bf16.msra.mxu1 %v16997_v30 }
 0xa6f   :  { %14346 = vmatprep.subr.bf16.mxu1 %v16813_v0 }
 0xa72   :  { %14348 = vmatpush3.bf16.msra.mxu1 %v17005_v36 }
 0xa73   :  { %14349 = vmatprep.subr.bf16.mxu1 %v16813_v0 }
 0xa76   :  { %14351 = vmatpush3.bf16.msra.mxu1 %v17013_v42 }
 0xa77   :  { %14352 = vmatprep.subr.bf16.mxu1 %v16813_v0 }
 0xa7a   :  { %14354 = vmatpush3.bf16.msra.mxu1 %v17021_v48 }
 0xa7b   :  { %14355 = vmatprep.subr.bf16.mxu1 %v16813_v0 }
 0xa7e   :  { %14357 = vmatpush3.bf16.msra.mxu1 %v17029_v55 }
 0xa7f   :  { %14382 = vmatprep.subr.bf16.mxu1 %v16813_v0 }
 0xb34   :  { %v1243_v49 = vpop.f32.mrb[12].mxu1 }
 0xb35   :  { %v1247_v50 = vsub.f32 %v1176_v47, %v1243_v49  ;;  %v10683_v51 = vpop.f32.mrb[13].mxu1  ;;  %v188_v47 = vld [vmem:[#allocation12 + $0x68] sm:$0xff] }
 0xb36   :  { %v17368_v49 = vpack.c.bf16 %v188_v47, %v187_v46 }
 0xb37   :  { %v1248_v53 = vadd.f32 %v1247_v50, %v17110_v26 }
 0xb39   :  { %v1249_v54 = vmax.f32 %v1248_v53, 0.0 }
 0xb3b   :  { %v1250_v57 = vsub.f32 %v1249_v54, %v1173_v43  ;;  %v186_v43 = vld [vmem:[#allocation12 + $0x58] sm:$0xff] }
 0xb3c   :  { %v17364_v44 = vpack.c.bf16 %v186_v43, %v185_v41 }
 0xb3d   :  { %v1251_v58 = vmul.f32 0.7976244, %v1250_v57 }
 0xb3f   :  { %v1252_v59 = vadd.f32 %v1251_v58, %v1249_v54 }
 0xb41   :  { %10717 = vmatmul.mubr.f32.vlgmr.msra.gmra.mrb[12].mxu0 %v1252_v59 }
 0xb42   :  { %14360 = vmatpush3.bf16.msra.mxu0 %v16974_v12  ;;  %10786 = vmatprep.mubr.msk.f32.mxu0 %vm16814_vm0, %v16815_v1 }
 0xb43   :  { %14361 = vmatprep.subr.bf16.mxu0 %v16813_v0 }
 0xb46   :  { %14363 = vmatpush3.bf16.msra.mxu0 %v16981_v18 }
 0xb47   :  { %14364 = vmatprep.subr.bf16.mxu0 %v16813_v0 }
 0xb4a   :  { %14366 = vmatpush3.bf16.msra.mxu0 %v16989_v24 }
 0xb4b   :  { %14367 = vmatprep.subr.bf16.mxu0 %v16813_v0 }
 0xb4e   :  { %14369 = vmatpush3.bf16.msra.mxu0 %v16997_v30 }
 0xb4f   :  { %14370 = vmatprep.subr.bf16.mxu0 %v16813_v0 }
 0xb52   :  { %14372 = vmatpush3.bf16.msra.mxu0 %v17005_v36 }
 0xb53   :  { %14373 = vmatprep.subr.bf16.mxu0 %v16813_v0 }
 0xb56   :  { %14375 = vmatpush3.bf16.msra.mxu0 %v17013_v42 }
 0xb57   :  { %14376 = vmatprep.subr.bf16.mxu0 %v16813_v0 }
 0xb5a   :  { %14378 = vmatpush3.bf16.msra.mxu0 %v17021_v48 }
 0xb5b   :  { %14379 = vmatprep.subr.bf16.mxu0 %v16813_v0 }
 0xb5e   :  { %14381 = vmatpush3.bf16.msra.mxu0 %v17029_v55 }
 0xb5f   :  { %14406 = vmatprep.subr.bf16.mxu0 %v16813_v0 }
 0xc14   :  { %v1319_v61 = vpop.f32.mrb[12].mxu0 }
 0xc15   :  { %v1323_v62 = vsub.f32 %v1252_v59, %v1319_v61  ;;  %v10718_v2 = vpop.f32.mrb[13].mxu0 }
 0xc16   :  { %v189_v2 = vld [vmem:[#allocation12 + $0x70] sm:$0xff] }
 0xc17   :  { %v1324_v3 = vadd.f32 %v1323_v62, %v17110_v26  ;;  %v1551_v62 = vld [vmem:[#allocation3 + $0x8] sm:$0xff] }
 0xc19   :  { %v1325_v6 = vmax.f32 %v1324_v3, 0.0  ;;  %v190_v3 = vld [vmem:[#allocation12 + $0x78] sm:$0xff] }
 0xc1b   :  { %v1326_v8 = vsub.f32 %v1325_v6, %v1249_v54 }
 0xc1d   :  { %v1327_v10 = vmul.f32 0.81082, %v1326_v8 }
 0xc1f   :  { %v1328_v11 = vadd.f32 %v1327_v10, %v1325_v6 }
 0xc21   :  { %10752 = vmatmul.mubr.f32.vlgmr.msra.gmra.mrb[14].mxu1 %v1328_v11 }
 0xc22   :  { %10821 = vmatprep.mubr.msk.f32.mxu1 %vm16814_vm0, %v16815_v1  ;;  %14384 = vmatpush3.bf16.msra.mxu1 %v17344_v19 }
 0xc23   :  { %14385 = vmatprep.subr.bf16.mxu1 %v16813_v0 }
 0xc26   :  { %14387 = vmatpush3.bf16.msra.mxu1 %v17348_v25 }
 0xc27   :  { %14388 = vmatprep.subr.bf16.mxu1 %v16813_v0 }
 0xc2a   :  { %14390 = vmatpush3.bf16.msra.mxu1 %v17352_v31 }
 0xc2b   :  { %14391 = vmatprep.subr.bf16.mxu1 %v16813_v0 }
 0xc2e   :  { %14393 = vmatpush3.bf16.msra.mxu1 %v17356_v35 }
 0xc2f   :  { %14394 = vmatprep.subr.bf16.mxu1 %v16813_v0 }
 0xc32   :  { %14396 = vmatpush3.bf16.msra.mxu1 %v17360_v40 }
 0xc33   :  { %14397 = vmatprep.subr.bf16.mxu1 %v16813_v0 }
 0xc36   :  { %14399 = vmatpush3.bf16.msra.mxu1 %v17364_v44 }
 0xc37   :  { %14400 = vmatprep.subr.bf16.mxu1 %v16813_v0 }
 0xc3a   :  { %14402 = vmatpush3.bf16.msra.mxu1 %v17368_v49 }
 0xc3b   :  { %14403 = vmatprep.subr.bf16.mxu1 %v16813_v0 }
 0xcf4   :  { %v1395_v50 = vpop.f32.mrb[14].mxu1 }
 0xcf5   :  { %v1399_v51 = vsub.f32 %v1328_v11, %v1395_v50  ;;  %v10753_v53 = vpop.f32.mrb[15].mxu1 }
 0xcf7   :  { %v1400_v54 = vadd.f32 %v1399_v51, %v17110_v26 }
 0xcf9   :  { %v1401_v57 = vmax.f32 %v1400_v54, 0.0 }
 0xcfb   :  { %v1402_v58 = vsub.f32 %v1401_v57, %v1325_v6  ;;  %v17409_v6 = vpack.c.bf16 %v190_v3, %v189_v2 }
 0xcfd   :  { %v1403_v59 = vmul.f32 0.82237667, %v1402_v58  ;;  %14405 = vmatpush3.bf16.msra.mxu1 %v17409_v6 }
 0xcfe   :  { %14454 = vmatprep.subr.bf16.mxu1 %v16813_v0 }
 0xcff   :  { %v1404_v61 = vadd.f32 %v1403_v59, %v1401_v57 }
 0xd01   :  { %10787 = vmatmul.mubr.f32.vlgmr.msra.gmra.mrb[14].mxu0 %v1404_v61 }
 0xd02   :  { %14408 = vmatpush3.bf16.msra.mxu0 %v16968_v5  ;;  %10856 = vmatprep.mubr.msk.f32.mxu0 %vm16814_vm0, %v16815_v1 }
 0xd03   :  { %14409 = vmatprep.subr.bf16.mxu0 %v16813_v0 }
 0xd06   :  { %14411 = vmatpush3.bf16.msra.mxu0 %v16971_v7 }
 0xd07   :  { %14412 = vmatprep.subr.bf16.mxu0 %v16813_v0 }
 0xd0a   :  { %14414 = vmatpush3.bf16.msra.mxu0 %v16977_v13 }
 0xd0b   :  { %14415 = vmatprep.subr.bf16.mxu0 %v16813_v0 }
 0xd0e   :  { %14417 = vmatpush3.bf16.msra.mxu0 %v16985_v21 }
 0xd0f   :  { %14418 = vmatprep.subr.bf16.mxu0 %v16813_v0 }
 0xd12   :  { %14420 = vmatpush3.bf16.msra.mxu0 %v16993_v27 }
 0xd13   :  { %14421 = vmatprep.subr.bf16.mxu0 %v16813_v0 }
 0xd16   :  { %14423 = vmatpush3.bf16.msra.mxu0 %v17001_v33 }
 0xd17   :  { %14424 = vmatprep.subr.bf16.mxu0 %v16813_v0 }
 0xd1a   :  { %14426 = vmatpush3.bf16.msra.mxu0 %v17009_v39 }
 0xd1b   :  { %14427 = vmatprep.subr.bf16.mxu0 %v16813_v0 }
 0xd1e   :  { %14429 = vmatpush3.bf16.msra.mxu0 %v17017_v45 }
 0xd1f   :  { %14430 = vmatprep.subr.bf16.mxu0 %v16813_v0 }
 0xd21   :  { %10857 = vmatmul.mubr.f32.vlgmr.msra.gmra.mrb[16].mxu0 %v1551_v62 }
 0xd22   :  { %14432 = vmatpush3.bf16.msra.mxu0 %v17025_v52  ;;  %10891 = vmatprep.mubr.msk.f32.mxu0 %vm16814_vm0, %v16815_v1 }
 0xd23   :  { %14433 = vmatprep.subr.bf16.mxu0 %v16813_v0 }
 0xd26   :  { %14435 = vmatpush3.bf16.msra.mxu0 %v17033_v56 }
 0xd27   :  { %14436 = vmatprep.subr.bf16.mxu0 %v16813_v0 }
 0xd2a   :  { %14438 = vmatpush3.bf16.msra.mxu0 %v17043_v60 }
 0xd2b   :  { %14439 = vmatprep.subr.bf16.mxu0 %v16813_v0 }
 0xd2e   :  { %14441 = vmatpush3.bf16.msra.mxu0 %v17052_v63 }
 0xd2f   :  { %14442 = vmatprep.subr.bf16.mxu0 %v16813_v0 }
 0xd32   :  { %14444 = vmatpush3.bf16.msra.mxu0 %v17058_v4 }
 0xd33   :  { %14445 = vmatprep.subr.bf16.mxu0 %v16813_v0 }
 0xd36   :  { %14447 = vmatpush3.bf16.msra.mxu0 %v17064_v9 }
 0xd37   :  { %14448 = vmatprep.subr.bf16.mxu0 %v16813_v0 }
 0xd3a   :  { %14450 = vmatpush3.bf16.msra.mxu0 %v17070_v14 }
 0xd3b   :  { %14451 = vmatprep.subr.bf16.mxu0 %v16813_v0 }
 0xd3e   :  { %14453 = vmatpush3.bf16.msra.mxu0 %v17076_v17 }
 0xd3f   :  { %14502 = vmatprep.subr.bf16.mxu0 %v16813_v0 }
 0xdd4   :  { %v1471_v8 = vpop.f32.mrb[14].mxu0 }
 0xdd5   :  { %v1475_v10 = vsub.f32 %v1404_v61, %v1471_v8  ;;  %v10788_v11 = vpop.f32.mrb[15].mxu0 }
 0xdd7   :  { %v1476_v15 = vadd.f32 %v1475_v10, %v17110_v26 }
 0xdd9   :  { %v17414_v16 = vmax.f32 %v1476_v15, 0.0 }
 0xddb   :  { %1478 = vst [vmem:[#allocation16] sm:$0xff] %v17414_v16  ;;  %10822 = vmatmul.mubr.f32.vlgmr.msra.gmra.mrb[16].mxu1 %v17414_v16  ;;  %10892 = vmatmul.mubr.f32.vlgmr.msra.gmra.mrb[16].mxu0 %v17414_v16 }
 0xddc   :  { %14456 = vmatpush3.bf16.msra.mxu1 %v16974_v12  ;;  %10926 = vmatprep.mubr.msk.f32.mxu1 %vm16814_vm0, %v16815_v1 }
 0xddd   :  { %14457 = vmatprep.subr.bf16.mxu1 %v16813_v0  ;;  %14504 = vmatpush3.bf16.msra.mxu0 %v16974_v12 }
 0xdde   :  { %14505 = vmatprep.subr.bf16.mxu0 %v16813_v0  ;;  %10996 = vmatprep.mubr.msk.f32.mxu0 %vm16814_vm0, %v16815_v1 }
 0xde0   :  { %14459 = vmatpush3.bf16.msra.mxu1 %v16981_v18 }
 0xde1   :  { %14460 = vmatprep.subr.bf16.mxu1 %v16813_v0  ;;  %14507 = vmatpush3.bf16.msra.mxu0 %v16981_v18 }
 0xde2   :  { %14508 = vmatprep.subr.bf16.mxu0 %v16813_v0 }
 0xde4   :  { %14462 = vmatpush3.bf16.msra.mxu1 %v16989_v24 }
 0xde5   :  { %14463 = vmatprep.subr.bf16.mxu1 %v16813_v0  ;;  %14510 = vmatpush3.bf16.msra.mxu0 %v16989_v24 }
 0xde6   :  { %14511 = vmatprep.subr.bf16.mxu0 %v16813_v0 }
 0xde8   :  { %14465 = vmatpush3.bf16.msra.mxu1 %v16997_v30 }
 0xde9   :  { %14466 = vmatprep.subr.bf16.mxu1 %v16813_v0  ;;  %14513 = vmatpush3.bf16.msra.mxu0 %v16997_v30 }
 0xdea   :  { %14514 = vmatprep.subr.bf16.mxu0 %v16813_v0 }
 0xdec   :  { %14468 = vmatpush3.bf16.msra.mxu1 %v17005_v36 }
 0xded   :  { %14469 = vmatprep.subr.bf16.mxu1 %v16813_v0  ;;  %14516 = vmatpush3.bf16.msra.mxu0 %v17005_v36 }
 0xdee   :  { %14517 = vmatprep.subr.bf16.mxu0 %v16813_v0 }
 0xdf0   :  { %14471 = vmatpush3.bf16.msra.mxu1 %v17013_v42 }
 0xdf1   :  { %14472 = vmatprep.subr.bf16.mxu1 %v16813_v0  ;;  %14519 = vmatpush3.bf16.msra.mxu0 %v17013_v42 }
 0xdf2   :  { %14520 = vmatprep.subr.bf16.mxu0 %v16813_v0 }
 0xdf4   :  { %14474 = vmatpush3.bf16.msra.mxu1 %v17021_v48 }
 0xdf5   :  { %14475 = vmatprep.subr.bf16.mxu1 %v16813_v0  ;;  %14522 = vmatpush3.bf16.msra.mxu0 %v17021_v48 }
 0xdf6   :  { %14523 = vmatprep.subr.bf16.mxu0 %v16813_v0 }
 0xdf8   :  { %14477 = vmatpush3.bf16.msra.mxu1 %v17029_v55 }
 0xdf9   :  { %14478 = vmatprep.subr.bf16.mxu1 %v16813_v0  ;;  %14525 = vmatpush3.bf16.msra.mxu0 %v17029_v55 }
 0xdfa   :  { %14550 = vmatprep.subr.bf16.mxu0 %v16813_v0 }
 0xdfb   :  { %10927 = vmatmul.mubr.f32.vlgmr.msra.gmra.mrb[18].mxu1 %v17414_v16 }
 0xdfc   :  { %14480 = vmatpush3.bf16.msra.mxu1 %v16974_v12  ;;  %10961 = vmatprep.mubr.msk.f32.mxu1 %vm16814_vm0, %v16815_v1 }
 0xdfd   :  { %14481 = vmatprep.subr.bf16.mxu1 %v16813_v0 }
 0xe00   :  { %14483 = vmatpush3.bf16.msra.mxu1 %v16981_v18 }
 0xe01   :  { %14484 = vmatprep.subr.bf16.mxu1 %v16813_v0 }
 0xe04   :  { %14486 = vmatpush3.bf16.msra.mxu1 %v16989_v24 }
 0xe05   :  { %14487 = vmatprep.subr.bf16.mxu1 %v16813_v0 }
 0xe08   :  { %14489 = vmatpush3.bf16.msra.mxu1 %v16997_v30 }
 0xe09   :  { %14490 = vmatprep.subr.bf16.mxu1 %v16813_v0 }
 0xe0c   :  { %14492 = vmatpush3.bf16.msra.mxu1 %v17005_v36 }
 0xe0d   :  { %14493 = vmatprep.subr.bf16.mxu1 %v16813_v0 }
 0xe10   :  { %14495 = vmatpush3.bf16.msra.mxu1 %v17013_v42 }
 0xe11   :  { %14496 = vmatprep.subr.bf16.mxu1 %v16813_v0 }
 0xe14   :  { %14498 = vmatpush3.bf16.msra.mxu1 %v17021_v48 }
 0xe15   :  { %14499 = vmatprep.subr.bf16.mxu1 %v16813_v0 }
 0xe18   :  { %14501 = vmatpush3.bf16.msra.mxu1 %v17029_v55 }
 0xe19   :  { %14526 = vmatprep.subr.bf16.mxu1 %v16813_v0 }
 0xeae   :  { %v1545_v26 = vpop.f32.mrb[16].mxu1  ;;  %v1688_v20 = vpop.f32.mrb[16].mxu0 }
 0xeaf   :  { %1549 = vst [vmem:[#allocation15] sm:$0xff] %v1545_v26  ;;  %v10823_v23 = vpop.f32.mrb[17].mxu1  ;;  %v10893_v28 = vpop.f32.mrb[17].mxu0  ;;  %v17475_v32 = vsub.f32 %v1688_v20, %v17106_v22 }
 0xece   :  { %v1759_v29 = vpop.f32.mrb[18].mxu1 }
 0xecf   :  { %v1763_v34 = vsub.f32 %v17414_v16, %v1759_v29  ;;  %v10928_v37 = vpop.f32.mrb[19].mxu1 }
 0xed1   :  { %v1764_v38 = vadd.f32 %v1763_v34, %v17475_v32 }
 0xed3   :  { %v1765_v41 = vmax.f32 %v1764_v38, 0.0 }
 0xed5   :  { %v1766_v43 = vsub.f32 %v1765_v41, %v17414_v16 }
 0xed7   :  { %v1767_v46 = vmul.f32 0.0, %v1766_v43 }
 0xed9   :  { %v1768_v47 = vadd.f32 %v1767_v46, %v1765_v41 }
 0xedb   :  { %10962 = vmatmul.mubr.f32.vlgmr.msra.gmra.mrb[20].mxu1 %v1768_v47 }
 0xedc   :  { %14528 = vmatpush3.bf16.msra.mxu1 %v16974_v12  ;;  %11031 = vmatprep.mubr.msk.f32.mxu1 %vm16814_vm0, %v16815_v1 }
 0xedd   :  { %14529 = vmatprep.subr.bf16.mxu1 %v16813_v0 }
 0xee0   :  { %14531 = vmatpush3.bf16.msra.mxu1 %v16981_v18 }
 0xee1   :  { %14532 = vmatprep.subr.bf16.mxu1 %v16813_v0 }
 0xee4   :  { %14534 = vmatpush3.bf16.msra.mxu1 %v16989_v24 }
 0xee5   :  { %14535 = vmatprep.subr.bf16.mxu1 %v16813_v0 }
 0xee8   :  { %14537 = vmatpush3.bf16.msra.mxu1 %v16997_v30 }
 0xee9   :  { %14538 = vmatprep.subr.bf16.mxu1 %v16813_v0 }
 0xeec   :  { %14540 = vmatpush3.bf16.msra.mxu1 %v17005_v36 }
 0xeed   :  { %14541 = vmatprep.subr.bf16.mxu1 %v16813_v0 }
 0xef0   :  { %14543 = vmatpush3.bf16.msra.mxu1 %v17013_v42 }
 0xef1   :  { %14544 = vmatprep.subr.bf16.mxu1 %v16813_v0 }
 0xef4   :  { %14546 = vmatpush3.bf16.msra.mxu1 %v17021_v48 }
 0xef5   :  { %14547 = vmatprep.subr.bf16.mxu1 %v16813_v0 }
 0xef8   :  { %14549 = vmatpush3.bf16.msra.mxu1 %v17029_v55 }
 0xef9   :  { %14574 = vmatprep.subr.bf16.mxu1 %v16813_v0 }
 0xfae   :  { %v1835_v22 = vpop.f32.mrb[20].mxu1 }
 0xfaf   :  { %v1839_v50 = vsub.f32 %v1768_v47, %v1835_v22  ;;  %v10963_v51 = vpop.f32.mrb[21].mxu1 }
 0xfb1   :  { %v1840_v53 = vadd.f32 %v1839_v50, %v17475_v32 }
 0xfb3   :  { %v1841_v54 = vmax.f32 %v1840_v53, 0.0 }
 0xfb5   :  { %v1842_v57 = vsub.f32 %v1841_v54, %v1765_v41 }
 0xfb7   :  { %v1843_v58 = vmul.f32 0.2817535, %v1842_v57 }
 0xfb9   :  { %v1844_v59 = vadd.f32 %v1843_v58, %v1841_v54 }
 0xfbb   :  { %10997 = vmatmul.mubr.f32.vlgmr.msra.gmra.mrb[18].mxu0 %v1844_v59 }
 0xfbc   :  { %14552 = vmatpush3.bf16.msra.mxu0 %v16974_v12  ;;  %11066 = vmatprep.mubr.msk.f32.mxu0 %vm16814_vm0, %v16815_v1 }
 0xfbd   :  { %14553 = vmatprep.subr.bf16.mxu0 %v16813_v0 }
 0xfc0   :  { %14555 = vmatpush3.bf16.msra.mxu0 %v16981_v18 }
 0xfc1   :  { %14556 = vmatprep.subr.bf16.mxu0 %v16813_v0 }
 0xfc4   :  { %14558 = vmatpush3.bf16.msra.mxu0 %v16989_v24 }
 0xfc5   :  { %14559 = vmatprep.subr.bf16.mxu0 %v16813_v0 }
 0xfc8   :  { %14561 = vmatpush3.bf16.msra.mxu0 %v16997_v30 }
 0xfc9   :  { %14562 = vmatprep.subr.bf16.mxu0 %v16813_v0 }
 0xfcc   :  { %14564 = vmatpush3.bf16.msra.mxu0 %v17005_v36 }
 0xfcd   :  { %14565 = vmatprep.subr.bf16.mxu0 %v16813_v0 }
 0xfd0   :  { %14567 = vmatpush3.bf16.msra.mxu0 %v17013_v42 }
 0xfd1   :  { %14568 = vmatprep.subr.bf16.mxu0 %v16813_v0 }
 0xfd4   :  { %14570 = vmatpush3.bf16.msra.mxu0 %v17021_v48 }
 0xfd5   :  { %14571 = vmatprep.subr.bf16.mxu0 %v16813_v0 }
 0xfd8   :  { %14573 = vmatpush3.bf16.msra.mxu0 %v17029_v55 }
 0xfd9   :  { %14598 = vmatprep.subr.bf16.mxu0 %v16813_v0 }
0x108e   :  { %v1911_v61 = vpop.f32.mrb[18].mxu0 }
0x108f   :  { %v1915_v62 = vsub.f32 %v1844_v59, %v1911_v61  ;;  %v10998_v2 = vpop.f32.mrb[19].mxu0 }
0x1091   :  { %v1916_v3 = vadd.f32 %v1915_v62, %v17475_v32 }
0x1093   :  { %v1917_v8 = vmax.f32 %v1916_v3, 0.0 }
0x1095   :  { %v1918_v10 = vsub.f32 %v1917_v8, %v1841_v54 }
0x1097   :  { %v1919_v11 = vmul.f32 0.43404278, %v1918_v10 }
0x1099   :  { %v1920_v15 = vadd.f32 %v1919_v11, %v1917_v8 }
0x109b   :  { %11032 = vmatmul.mubr.f32.vlgmr.msra.gmra.mrb[22].mxu1 %v1920_v15 }
0x109c   :  { %14576 = vmatpush3.bf16.msra.mxu1 %v16974_v12  ;;  %11101 = vmatprep.mubr.msk.f32.mxu1 %vm16814_vm0, %v16815_v1 }
0x109d   :  { %14577 = vmatprep.subr.bf16.mxu1 %v16813_v0 }
0x10a0   :  { %14579 = vmatpush3.bf16.msra.mxu1 %v16981_v18 }
0x10a1   :  { %14580 = vmatprep.subr.bf16.mxu1 %v16813_v0 }
0x10a4   :  { %14582 = vmatpush3.bf16.msra.mxu1 %v16989_v24 }
0x10a5   :  { %14583 = vmatprep.subr.bf16.mxu1 %v16813_v0 }
0x10a8   :  { %14585 = vmatpush3.bf16.msra.mxu1 %v16997_v30 }
0x10a9   :  { %14586 = vmatprep.subr.bf16.mxu1 %v16813_v0 }
0x10ac   :  { %14588 = vmatpush3.bf16.msra.mxu1 %v17005_v36 }
0x10ad   :  { %14589 = vmatprep.subr.bf16.mxu1 %v16813_v0 }
0x10b0   :  { %14591 = vmatpush3.bf16.msra.mxu1 %v17013_v42 }
0x10b1   :  { %14592 = vmatprep.subr.bf16.mxu1 %v16813_v0 }
0x10b4   :  { %14594 = vmatpush3.bf16.msra.mxu1 %v17021_v48 }
0x10b5   :  { %14595 = vmatprep.subr.bf16.mxu1 %v16813_v0 }
0x10b8   :  { %14597 = vmatpush3.bf16.msra.mxu1 %v17029_v55 }
0x10b9   :  { %14622 = vmatprep.subr.bf16.mxu1 %v16813_v0 }
0x116e   :  { %v1987_v16 = vpop.f32.mrb[22].mxu1 }
0x116f   :  { %v1991_v26 = vsub.f32 %v1920_v15, %v1987_v16  ;;  %v11033_v20 = vpop.f32.mrb[23].mxu1 }
0x1171   :  { %v1992_v23 = vadd.f32 %v1991_v26, %v17475_v32 }
0x1173   :  { %v1993_v28 = vmax.f32 %v1992_v23, 0.0 }
0x1175   :  { %v1994_v29 = vsub.f32 %v1993_v28, %v1917_v8 }
0x1177   :  { %v1995_v34 = vmul.f32 0.5310638, %v1994_v29 }
0x1179   :  { %v1996_v37 = vadd.f32 %v1995_v34, %v1993_v28 }
0x117b   :  { %11067 = vmatmul.mubr.f32.vlgmr.msra.gmra.mrb[20].mxu0 %v1996_v37 }
0x117c   :  { %14600 = vmatpush3.bf16.msra.mxu0 %v16974_v12  ;;  %11136 = vmatprep.mubr.msk.f32.mxu0 %vm16814_vm0, %v16815_v1 }
0x117d   :  { %14601 = vmatprep.subr.bf16.mxu0 %v16813_v0 }
0x1180   :  { %14603 = vmatpush3.bf16.msra.mxu0 %v16981_v18 }
0x1181   :  { %14604 = vmatprep.subr.bf16.mxu0 %v16813_v0 }
0x1184   :  { %14606 = vmatpush3.bf16.msra.mxu0 %v16989_v24 }
0x1185   :  { %14607 = vmatprep.subr.bf16.mxu0 %v16813_v0 }
0x1188   :  { %14609 = vmatpush3.bf16.msra.mxu0 %v16997_v30 }
0x1189   :  { %14610 = vmatprep.subr.bf16.mxu0 %v16813_v0 }
0x118c   :  { %14612 = vmatpush3.bf16.msra.mxu0 %v17005_v36 }
0x118d   :  { %14613 = vmatprep.subr.bf16.mxu0 %v16813_v0 }
0x1190   :  { %14615 = vmatpush3.bf16.msra.mxu0 %v17013_v42 }
0x1191   :  { %14616 = vmatprep.subr.bf16.mxu0 %v16813_v0 }
0x1194   :  { %14618 = vmatpush3.bf16.msra.mxu0 %v17021_v48 }
0x1195   :  { %14619 = vmatprep.subr.bf16.mxu0 %v16813_v0 }
0x1198   :  { %14621 = vmatpush3.bf16.msra.mxu0 %v17029_v55 }
0x1199   :  { %14646 = vmatprep.subr.bf16.mxu0 %v16813_v0 }
0x124e   :  { %v2063_v38 = vpop.f32.mrb[20].mxu0 }
0x124f   :  { %v2067_v41 = vsub.f32 %v1996_v37, %v2063_v38  ;;  %v11068_v43 = vpop.f32.mrb[21].mxu0 }
0x1251   :  { %v2068_v46 = vadd.f32 %v2067_v41, %v17475_v32 }
0x1253   :  { %v2069_v47 = vmax.f32 %v2068_v46, 0.0 }
0x1255   :  { %v2070_v22 = vsub.f32 %v2069_v47, %v1993_v28 }
0x1257   :  { %v2071_v50 = vmul.f32 0.5987786, %v2070_v22 }
0x1259   :  { %v2072_v51 = vadd.f32 %v2071_v50, %v2069_v47 }
0x125b   :  { %11102 = vmatmul.mubr.f32.vlgmr.msra.gmra.mrb[24].mxu1 %v2072_v51 }
0x125c   :  { %14624 = vmatpush3.bf16.msra.mxu1 %v16974_v12  ;;  %11171 = vmatprep.mubr.msk.f32.mxu1 %vm16814_vm0, %v16815_v1 }
0x125d   :  { %14625 = vmatprep.subr.bf16.mxu1 %v16813_v0 }
0x1260   :  { %14627 = vmatpush3.bf16.msra.mxu1 %v16981_v18 }
0x1261   :  { %14628 = vmatprep.subr.bf16.mxu1 %v16813_v0 }
0x1264   :  { %14630 = vmatpush3.bf16.msra.mxu1 %v16989_v24 }
0x1265   :  { %14631 = vmatprep.subr.bf16.mxu1 %v16813_v0 }
0x1268   :  { %14633 = vmatpush3.bf16.msra.mxu1 %v16997_v30 }
0x1269   :  { %14634 = vmatprep.subr.bf16.mxu1 %v16813_v0 }
0x126c   :  { %14636 = vmatpush3.bf16.msra.mxu1 %v17005_v36 }
0x126d   :  { %14637 = vmatprep.subr.bf16.mxu1 %v16813_v0 }
0x1270   :  { %14639 = vmatpush3.bf16.msra.mxu1 %v17013_v42 }
0x1271   :  { %14640 = vmatprep.subr.bf16.mxu1 %v16813_v0 }
0x1274   :  { %14642 = vmatpush3.bf16.msra.mxu1 %v17021_v48 }
0x1275   :  { %14643 = vmatprep.subr.bf16.mxu1 %v16813_v0 }
0x1278   :  { %14645 = vmatpush3.bf16.msra.mxu1 %v17029_v55 }
0x1279   :  { %14670 = vmatprep.subr.bf16.mxu1 %v16813_v0 }
0x132e   :  { %v2139_v53 = vpop.f32.mrb[24].mxu1 }
0x132f   :  { %v2143_v54 = vsub.f32 %v2072_v51, %v2139_v53  ;;  %v11103_v57 = vpop.f32.mrb[25].mxu1 }
0x1331   :  { %v2144_v58 = vadd.f32 %v2143_v54, %v17475_v32 }
0x1333   :  { %v2145_v59 = vmax.f32 %v2144_v58, 0.0 }
0x1335   :  { %v2146_v61 = vsub.f32 %v2145_v59, %v2069_v47 }
0x1337   :  { %v2147_v62 = vmul.f32 0.64892334, %v2146_v61 }
0x1339   :  { %v2148_v2 = vadd.f32 %v2147_v62, %v2145_v59 }
0x133b   :  { %11137 = vmatmul.mubr.f32.vlgmr.msra.gmra.mrb[22].mxu0 %v2148_v2 }
0x133c   :  { %14648 = vmatpush3.bf16.msra.mxu0 %v16974_v12  ;;  %11206 = vmatprep.mubr.msk.f32.mxu0 %vm16814_vm0, %v16815_v1 }
0x133d   :  { %14649 = vmatprep.subr.bf16.mxu0 %v16813_v0 }
0x1340   :  { %14651 = vmatpush3.bf16.msra.mxu0 %v16981_v18 }
0x1341   :  { %14652 = vmatprep.subr.bf16.mxu0 %v16813_v0 }
0x1344   :  { %14654 = vmatpush3.bf16.msra.mxu0 %v16989_v24 }
0x1345   :  { %14655 = vmatprep.subr.bf16.mxu0 %v16813_v0 }
0x1348   :  { %14657 = vmatpush3.bf16.msra.mxu0 %v16997_v30 }
0x1349   :  { %14658 = vmatprep.subr.bf16.mxu0 %v16813_v0 }
0x134c   :  { %14660 = vmatpush3.bf16.msra.mxu0 %v17005_v36 }
0x134d   :  { %14661 = vmatprep.subr.bf16.mxu0 %v16813_v0 }
0x1350   :  { %14663 = vmatpush3.bf16.msra.mxu0 %v17013_v42 }
0x1351   :  { %14664 = vmatprep.subr.bf16.mxu0 %v16813_v0 }
0x1354   :  { %14666 = vmatpush3.bf16.msra.mxu0 %v17021_v48 }
0x1355   :  { %14667 = vmatprep.subr.bf16.mxu0 %v16813_v0 }
0x1358   :  { %14669 = vmatpush3.bf16.msra.mxu0 %v17029_v55 }
0x1359   :  { %14694 = vmatprep.subr.bf16.mxu0 %v16813_v0 }
0x140e   :  { %v2215_v3 = vpop.f32.mrb[22].mxu0 }
0x140f   :  { %v2219_v8 = vsub.f32 %v2148_v2, %v2215_v3  ;;  %v11138_v10 = vpop.f32.mrb[23].mxu0 }
0x1411   :  { %v2220_v11 = vadd.f32 %v2219_v8, %v17475_v32 }
0x1413   :  { %v2221_v15 = vmax.f32 %v2220_v11, 0.0 }
0x1415   :  { %v2222_v16 = vsub.f32 %v2221_v15, %v2145_v59 }
0x1417   :  { %v2223_v26 = vmul.f32 0.68764585, %v2222_v16 }
0x1419   :  { %v2224_v20 = vadd.f32 %v2223_v26, %v2221_v15 }
0x141b   :  { %11172 = vmatmul.mubr.f32.vlgmr.msra.gmra.mrb[26].mxu1 %v2224_v20 }
0x141c   :  { %14672 = vmatpush3.bf16.msra.mxu1 %v16974_v12  ;;  %11241 = vmatprep.mubr.msk.f32.mxu1 %vm16814_vm0, %v16815_v1 }
0x141d   :  { %14673 = vmatprep.subr.bf16.mxu1 %v16813_v0 }
0x1420   :  { %14675 = vmatpush3.bf16.msra.mxu1 %v16981_v18 }
0x1421   :  { %14676 = vmatprep.subr.bf16.mxu1 %v16813_v0 }
0x1424   :  { %14678 = vmatpush3.bf16.msra.mxu1 %v16989_v24 }
0x1425   :  { %14679 = vmatprep.subr.bf16.mxu1 %v16813_v0 }
0x1428   :  { %14681 = vmatpush3.bf16.msra.mxu1 %v16997_v30 }
0x1429   :  { %14682 = vmatprep.subr.bf16.mxu1 %v16813_v0 }
0x142c   :  { %14684 = vmatpush3.bf16.msra.mxu1 %v17005_v36 }
0x142d   :  { %14685 = vmatprep.subr.bf16.mxu1 %v16813_v0 }
0x1430   :  { %14687 = vmatpush3.bf16.msra.mxu1 %v17013_v42 }
0x1431   :  { %14688 = vmatprep.subr.bf16.mxu1 %v16813_v0 }
0x1434   :  { %14690 = vmatpush3.bf16.msra.mxu1 %v17021_v48 }
0x1435   :  { %14691 = vmatprep.subr.bf16.mxu1 %v16813_v0 }
0x1438   :  { %14693 = vmatpush3.bf16.msra.mxu1 %v17029_v55 }
0x1439   :  { %14718 = vmatprep.subr.bf16.mxu1 %v16813_v0 }
0x14ee   :  { %v2291_v23 = vpop.f32.mrb[26].mxu1 }
0x14ef   :  { %v2295_v28 = vsub.f32 %v2224_v20, %v2291_v23  ;;  %v11173_v29 = vpop.f32.mrb[27].mxu1 }
0x14f1   :  { %v2296_v34 = vadd.f32 %v2295_v28, %v17475_v32 }
0x14f3   :  { %v2297_v37 = vmax.f32 %v2296_v34, 0.0 }
0x14f5   :  { %v2298_v38 = vsub.f32 %v2297_v37, %v2221_v15 }
0x14f7   :  { %v2299_v41 = vmul.f32 0.71849984, %v2298_v38 }
0x14f9   :  { %v2300_v43 = vadd.f32 %v2299_v41, %v2297_v37 }
0x14fb   :  { %11207 = vmatmul.mubr.f32.vlgmr.msra.gmra.mrb[24].mxu0 %v2300_v43 }
0x14fc   :  { %14696 = vmatpush3.bf16.msra.mxu0 %v16974_v12  ;;  %11276 = vmatprep.mubr.msk.f32.mxu0 %vm16814_vm0, %v16815_v1 }
0x14fd   :  { %14697 = vmatprep.subr.bf16.mxu0 %v16813_v0 }
0x1500   :  { %14699 = vmatpush3.bf16.msra.mxu0 %v16981_v18 }
0x1501   :  { %14700 = vmatprep.subr.bf16.mxu0 %v16813_v0 }
0x1504   :  { %14702 = vmatpush3.bf16.msra.mxu0 %v16989_v24 }
0x1505   :  { %14703 = vmatprep.subr.bf16.mxu0 %v16813_v0 }
0x1508   :  { %14705 = vmatpush3.bf16.msra.mxu0 %v16997_v30 }
0x1509   :  { %14706 = vmatprep.subr.bf16.mxu0 %v16813_v0 }
0x150c   :  { %14708 = vmatpush3.bf16.msra.mxu0 %v17005_v36 }
0x150d   :  { %14709 = vmatprep.subr.bf16.mxu0 %v16813_v0 }
0x1510   :  { %14711 = vmatpush3.bf16.msra.mxu0 %v17013_v42 }
0x1511   :  { %14712 = vmatprep.subr.bf16.mxu0 %v16813_v0 }
0x1514   :  { %14714 = vmatpush3.bf16.msra.mxu0 %v17021_v48 }
0x1515   :  { %14715 = vmatprep.subr.bf16.mxu0 %v16813_v0 }
0x1518   :  { %14717 = vmatpush3.bf16.msra.mxu0 %v17029_v55 }
0x1519   :  { %14742 = vmatprep.subr.bf16.mxu0 %v16813_v0 }
0x15ce   :  { %v2367_v46 = vpop.f32.mrb[24].mxu0 }
0x15cf   :  { %v2371_v47 = vsub.f32 %v2300_v43, %v2367_v46  ;;  %v11208_v22 = vpop.f32.mrb[25].mxu0 }
0x15d1   :  { %v2372_v50 = vadd.f32 %v2371_v47, %v17475_v32 }
0x15d3   :  { %v2373_v51 = vmax.f32 %v2372_v50, 0.0 }
0x15d5   :  { %v2374_v53 = vsub.f32 %v2373_v51, %v2297_v37 }
0x15d7   :  { %v2375_v54 = vmul.f32 0.743691, %v2374_v53 }
0x15d9   :  { %v2376_v57 = vadd.f32 %v2375_v54, %v2373_v51 }
0x15db   :  { %11242 = vmatmul.mubr.f32.vlgmr.msra.gmra.mrb[28].mxu1 %v2376_v57 }
0x15dc   :  { %14720 = vmatpush3.bf16.msra.mxu1 %v16974_v12  ;;  %11311 = vmatprep.mubr.msk.f32.mxu1 %vm16814_vm0, %v16815_v1 }
0x15dd   :  { %14721 = vmatprep.subr.bf16.mxu1 %v16813_v0 }
0x15e0   :  { %14723 = vmatpush3.bf16.msra.mxu1 %v16981_v18 }
0x15e1   :  { %14724 = vmatprep.subr.bf16.mxu1 %v16813_v0 }
0x15e4   :  { %14726 = vmatpush3.bf16.msra.mxu1 %v16989_v24 }
0x15e5   :  { %14727 = vmatprep.subr.bf16.mxu1 %v16813_v0 }
0x15e8   :  { %14729 = vmatpush3.bf16.msra.mxu1 %v16997_v30 }
0x15e9   :  { %14730 = vmatprep.subr.bf16.mxu1 %v16813_v0 }
0x15ec   :  { %14732 = vmatpush3.bf16.msra.mxu1 %v17005_v36 }
0x15ed   :  { %14733 = vmatprep.subr.bf16.mxu1 %v16813_v0 }
0x15f0   :  { %14735 = vmatpush3.bf16.msra.mxu1 %v17013_v42 }
0x15f1   :  { %14736 = vmatprep.subr.bf16.mxu1 %v16813_v0 }
0x15f4   :  { %14738 = vmatpush3.bf16.msra.mxu1 %v17021_v48 }
0x15f5   :  { %14739 = vmatprep.subr.bf16.mxu1 %v16813_v0 }
0x15f8   :  { %14741 = vmatpush3.bf16.msra.mxu1 %v17029_v55 }
0x15f9   :  { %14766 = vmatprep.subr.bf16.mxu1 %v16813_v0 }
0x16ae   :  { %v2443_v58 = vpop.f32.mrb[28].mxu1 }
0x16af   :  { %v2447_v59 = vsub.f32 %v2376_v57, %v2443_v58  ;;  %v11243_v61 = vpop.f32.mrb[29].mxu1 }
0x16b1   :  { %v2448_v62 = vadd.f32 %v2447_v59, %v17475_v32 }
0x16b3   :  { %v2449_v2 = vmax.f32 %v2448_v62, 0.0 }
0x16b5   :  { %v2450_v3 = vsub.f32 %v2449_v2, %v2373_v51 }
0x16b7   :  { %v2451_v8 = vmul.f32 0.7646647, %v2450_v3 }
0x16b9   :  { %v2452_v10 = vadd.f32 %v2451_v8, %v2449_v2 }
0x16bb   :  { %11277 = vmatmul.mubr.f32.vlgmr.msra.gmra.mrb[26].mxu0 %v2452_v10 }
0x16bc   :  { %14744 = vmatpush3.bf16.msra.mxu0 %v16974_v12  ;;  %11346 = vmatprep.mubr.msk.f32.mxu0 %vm16814_vm0, %v16815_v1 }
0x16bd   :  { %14745 = vmatprep.subr.bf16.mxu0 %v16813_v0 }
0x16c0   :  { %14747 = vmatpush3.bf16.msra.mxu0 %v16981_v18 }
0x16c1   :  { %14748 = vmatprep.subr.bf16.mxu0 %v16813_v0 }
0x16c4   :  { %14750 = vmatpush3.bf16.msra.mxu0 %v16989_v24 }
0x16c5   :  { %14751 = vmatprep.subr.bf16.mxu0 %v16813_v0 }
0x16c8   :  { %14753 = vmatpush3.bf16.msra.mxu0 %v16997_v30 }
0x16c9   :  { %14754 = vmatprep.subr.bf16.mxu0 %v16813_v0 }
0x16cc   :  { %14756 = vmatpush3.bf16.msra.mxu0 %v17005_v36 }
0x16cd   :  { %14757 = vmatprep.subr.bf16.mxu0 %v16813_v0 }
0x16d0   :  { %14759 = vmatpush3.bf16.msra.mxu0 %v17013_v42 }
0x16d1   :  { %14760 = vmatprep.subr.bf16.mxu0 %v16813_v0 }
0x16d4   :  { %14762 = vmatpush3.bf16.msra.mxu0 %v17021_v48 }
0x16d5   :  { %14763 = vmatprep.subr.bf16.mxu0 %v16813_v0 }
0x16d8   :  { %14765 = vmatpush3.bf16.msra.mxu0 %v17029_v55 }
0x16d9   :  { %14790 = vmatprep.subr.bf16.mxu0 %v16813_v0 }
0x178e   :  { %v2519_v11 = vpop.f32.mrb[26].mxu0 }
0x178f   :  { %v2523_v15 = vsub.f32 %v2452_v10, %v2519_v11  ;;  %v11278_v16 = vpop.f32.mrb[27].mxu0 }
0x1791   :  { %v2524_v26 = vadd.f32 %v2523_v15, %v17475_v32 }
0x1793   :  { %v2525_v20 = vmax.f32 %v2524_v26, 0.0  ;;  %v2905_v26 = vld [vmem:[#allocation3 + $0x10] sm:$0xff] }
0x1795   :  { %v2526_v23 = vsub.f32 %v2525_v20, %v2449_v2 }
0x1797   :  { %v2527_v28 = vmul.f32 0.78240925, %v2526_v23 }
0x1799   :  { %v2528_v29 = vadd.f32 %v2527_v28, %v2525_v20 }
0x179b   :  { %11312 = vmatmul.mubr.f32.vlgmr.msra.gmra.mrb[30].mxu1 %v2528_v29 }
0x179c   :  { %14768 = vmatpush3.bf16.msra.mxu1 %v16974_v12  ;;  %11381 = vmatprep.mubr.msk.f32.mxu1 %vm16814_vm0, %v16815_v1 }
0x179d   :  { %14769 = vmatprep.subr.bf16.mxu1 %v16813_v0 }
0x17a0   :  { %14771 = vmatpush3.bf16.msra.mxu1 %v16981_v18 }
0x17a1   :  { %14772 = vmatprep.subr.bf16.mxu1 %v16813_v0 }
0x17a4   :  { %14774 = vmatpush3.bf16.msra.mxu1 %v16989_v24 }
0x17a5   :  { %14775 = vmatprep.subr.bf16.mxu1 %v16813_v0 }
0x17a8   :  { %14777 = vmatpush3.bf16.msra.mxu1 %v16997_v30 }
0x17a9   :  { %14778 = vmatprep.subr.bf16.mxu1 %v16813_v0 }
0x17ac   :  { %14780 = vmatpush3.bf16.msra.mxu1 %v17005_v36 }
0x17ad   :  { %14781 = vmatprep.subr.bf16.mxu1 %v16813_v0 }
0x17b0   :  { %14783 = vmatpush3.bf16.msra.mxu1 %v17013_v42 }
0x17b1   :  { %14784 = vmatprep.subr.bf16.mxu1 %v16813_v0 }
0x17b4   :  { %14786 = vmatpush3.bf16.msra.mxu1 %v17021_v48 }
0x17b5   :  { %14787 = vmatprep.subr.bf16.mxu1 %v16813_v0 }
0x17b8   :  { %14789 = vmatpush3.bf16.msra.mxu1 %v17029_v55 }
0x17b9   :  { %14814 = vmatprep.subr.bf16.mxu1 %v16813_v0 }
0x186e   :  { %v2595_v34 = vpop.f32.mrb[30].mxu1 }
0x186f   :  { %v2599_v37 = vsub.f32 %v2528_v29, %v2595_v34  ;;  %v11313_v38 = vpop.f32.mrb[31].mxu1 }
0x1871   :  { %v2600_v41 = vadd.f32 %v2599_v37, %v17475_v32 }
0x1873   :  { %v2601_v43 = vmax.f32 %v2600_v41, 0.0 }
0x1875   :  { %v2602_v46 = vsub.f32 %v2601_v43, %v2525_v20 }
0x1877   :  { %v2603_v47 = vmul.f32 0.7976244, %v2602_v46  ;;  %v17824_v46 = vld [vmem:[#allocation14] ss:$0 sm:$0xff] }
0x1879   :  { %v2604_v22 = vadd.f32 %v2603_v47, %v2601_v43 }
0x187b   :  { %11347 = vmatmul.mubr.f32.vlgmr.msra.gmra.mrb[28].mxu0 %v2604_v22 }
0x187c   :  { %14792 = vmatpush3.bf16.msra.mxu0 %v16974_v12  ;;  %11416 = vmatprep.mubr.msk.f32.mxu0 %vm16814_vm0, %v16815_v1 }
0x187d   :  { %14793 = vmatprep.subr.bf16.mxu0 %v16813_v0 }
0x1880   :  { %14795 = vmatpush3.bf16.msra.mxu0 %v16981_v18 }
0x1881   :  { %14796 = vmatprep.subr.bf16.mxu0 %v16813_v0 }
0x1884   :  { %14798 = vmatpush3.bf16.msra.mxu0 %v16989_v24 }
0x1885   :  { %14799 = vmatprep.subr.bf16.mxu0 %v16813_v0 }
0x1888   :  { %14801 = vmatpush3.bf16.msra.mxu0 %v16997_v30 }
0x1889   :  { %14802 = vmatprep.subr.bf16.mxu0 %v16813_v0 }
0x188c   :  { %14804 = vmatpush3.bf16.msra.mxu0 %v17005_v36 }
0x188d   :  { %14805 = vmatprep.subr.bf16.mxu0 %v16813_v0 }
0x1890   :  { %14807 = vmatpush3.bf16.msra.mxu0 %v17013_v42 }
0x1891   :  { %14808 = vmatprep.subr.bf16.mxu0 %v16813_v0 }
0x1894   :  { %14810 = vmatpush3.bf16.msra.mxu0 %v17021_v48 }
0x1895   :  { %14811 = vmatprep.subr.bf16.mxu0 %v16813_v0 }
0x1898   :  { %14813 = vmatpush3.bf16.msra.mxu0 %v17029_v55 }
0x1899   :  { %14838 = vmatprep.subr.bf16.mxu0 %v16813_v0 }
0x194e   :  { %v2671_v50 = vpop.f32.mrb[28].mxu0 }
0x194f   :  { %v2675_v51 = vsub.f32 %v2604_v22, %v2671_v50  ;;  %v11348_v53 = vpop.f32.mrb[29].mxu0 }
0x1951   :  { %v2676_v54 = vadd.f32 %v2675_v51, %v17475_v32 }
0x1953   :  { %v2677_v57 = vmax.f32 %v2676_v54, 0.0 }
0x1955   :  { %v2678_v58 = vsub.f32 %v2677_v57, %v2601_v43 }
0x1957   :  { %v2679_v59 = vmul.f32 0.81082, %v2678_v58 }
0x1959   :  { %v2680_v61 = vadd.f32 %v2679_v59, %v2677_v57 }
0x195b   :  { %11382 = vmatmul.mubr.f32.vlgmr.msra.gmra.mrb[32].mxu1 %v2680_v61 }
0x195c   :  { %14816 = vmatpush3.bf16.msra.mxu1 %v17344_v19  ;;  %11451 = vmatprep.mubr.msk.f32.mxu1 %vm16814_vm0, %v16815_v1 }
0x195d   :  { %14817 = vmatprep.subr.bf16.mxu1 %v16813_v0 }
0x1960   :  { %14819 = vmatpush3.bf16.msra.mxu1 %v17348_v25 }
0x1961   :  { %14820 = vmatprep.subr.bf16.mxu1 %v16813_v0 }
0x1964   :  { %14822 = vmatpush3.bf16.msra.mxu1 %v17352_v31 }
0x1965   :  { %14823 = vmatprep.subr.bf16.mxu1 %v16813_v0 }
0x1968   :  { %14825 = vmatpush3.bf16.msra.mxu1 %v17356_v35 }
0x1969   :  { %14826 = vmatprep.subr.bf16.mxu1 %v16813_v0 }
0x196c   :  { %14828 = vmatpush3.bf16.msra.mxu1 %v17360_v40 }
0x196d   :  { %14829 = vmatprep.subr.bf16.mxu1 %v16813_v0 }
0x1970   :  { %14831 = vmatpush3.bf16.msra.mxu1 %v17364_v44 }
0x1971   :  { %14832 = vmatprep.subr.bf16.mxu1 %v16813_v0 }
0x1974   :  { %14834 = vmatpush3.bf16.msra.mxu1 %v17368_v49 }
0x1975   :  { %14835 = vmatprep.subr.bf16.mxu1 %v16813_v0 }
0x1978   :  { %14837 = vmatpush3.bf16.msra.mxu1 %v17409_v6 }
0x1979   :  { %14886 = vmatprep.subr.bf16.mxu1 %v16813_v0 }
0x1a2e   :  { %v2747_v62 = vpop.f32.mrb[32].mxu1 }
0x1a2f   :  { %v2751_v2 = vsub.f32 %v2680_v61, %v2747_v62  ;;  %v11383_v3 = vpop.f32.mrb[33].mxu1 }
0x1a31   :  { %v2752_v8 = vadd.f32 %v2751_v2, %v17475_v32 }
0x1a33   :  { %v2753_v10 = vmax.f32 %v2752_v8, 0.0 }
0x1a35   :  { %v2754_v11 = vsub.f32 %v2753_v10, %v2677_v57 }
0x1a37   :  { %v2755_v15 = vmul.f32 0.82237667, %v2754_v11 }
0x1a39   :  { %v2756_v16 = vadd.f32 %v2755_v15, %v2753_v10 }
0x1a3b   :  { %11417 = vmatmul.mubr.f32.vlgmr.msra.gmra.mrb[30].mxu0 %v2756_v16 }
0x1a3c   :  { %14840 = vmatpush3.bf16.msra.mxu0 %v16968_v5  ;;  %11486 = vmatprep.mubr.msk.f32.mxu0 %vm16814_vm0, %v16815_v1 }
0x1a3d   :  { %14841 = vmatprep.subr.bf16.mxu0 %v16813_v0 }
0x1a40   :  { %14843 = vmatpush3.bf16.msra.mxu0 %v16971_v7 }
0x1a41   :  { %14844 = vmatprep.subr.bf16.mxu0 %v16813_v0 }
0x1a44   :  { %14846 = vmatpush3.bf16.msra.mxu0 %v16977_v13 }
0x1a45   :  { %14847 = vmatprep.subr.bf16.mxu0 %v16813_v0 }
0x1a48   :  { %14849 = vmatpush3.bf16.msra.mxu0 %v16985_v21 }
0x1a49   :  { %14850 = vmatprep.subr.bf16.mxu0 %v16813_v0 }
0x1a4c   :  { %14852 = vmatpush3.bf16.msra.mxu0 %v16993_v27 }
0x1a4d   :  { %14853 = vmatprep.subr.bf16.mxu0 %v16813_v0 }
0x1a50   :  { %14855 = vmatpush3.bf16.msra.mxu0 %v17001_v33 }
0x1a51   :  { %14856 = vmatprep.subr.bf16.mxu0 %v16813_v0 }
0x1a54   :  { %14858 = vmatpush3.bf16.msra.mxu0 %v17009_v39 }
0x1a55   :  { %14859 = vmatprep.subr.bf16.mxu0 %v16813_v0 }
0x1a58   :  { %14861 = vmatpush3.bf16.msra.mxu0 %v17017_v45 }
0x1a59   :  { %14862 = vmatprep.subr.bf16.mxu0 %v16813_v0 }
0x1a5b   :  { %11487 = vmatmul.mubr.f32.vlgmr.msra.gmra.mrb[32].mxu0 %v2905_v26 }
0x1a5c   :  { %14864 = vmatpush3.bf16.msra.mxu0 %v17025_v52  ;;  %11521 = vmatprep.mubr.msk.f32.mxu0 %vm16814_vm0, %v16815_v1 }
0x1a5d   :  { %14865 = vmatprep.subr.bf16.mxu0 %v16813_v0 }
0x1a60   :  { %14867 = vmatpush3.bf16.msra.mxu0 %v17033_v56 }
0x1a61   :  { %14868 = vmatprep.subr.bf16.mxu0 %v16813_v0 }
0x1a64   :  { %14870 = vmatpush3.bf16.msra.mxu0 %v17043_v60 }
0x1a65   :  { %14871 = vmatprep.subr.bf16.mxu0 %v16813_v0 }
0x1a68   :  { %14873 = vmatpush3.bf16.msra.mxu0 %v17052_v63 }
0x1a69   :  { %14874 = vmatprep.subr.bf16.mxu0 %v16813_v0 }
0x1a6c   :  { %14876 = vmatpush3.bf16.msra.mxu0 %v17058_v4 }
0x1a6d   :  { %14877 = vmatprep.subr.bf16.mxu0 %v16813_v0 }
0x1a70   :  { %14879 = vmatpush3.bf16.msra.mxu0 %v17064_v9 }
0x1a71   :  { %14880 = vmatprep.subr.bf16.mxu0 %v16813_v0 }
0x1a74   :  { %14882 = vmatpush3.bf16.msra.mxu0 %v17070_v14 }
0x1a75   :  { %14883 = vmatprep.subr.bf16.mxu0 %v16813_v0 }
0x1a78   :  { %14885 = vmatpush3.bf16.msra.mxu0 %v17076_v17 }
0x1a79   :  { %14934 = vmatprep.subr.bf16.mxu0 %v16813_v0 }
0x1b0e   :  { %v2823_v20 = vpop.f32.mrb[30].mxu0 }
0x1b0f   :  { %v2827_v23 = vsub.f32 %v2756_v16, %v2823_v20  ;;  %v11418_v28 = vpop.f32.mrb[31].mxu0 }
0x1b11   :  { %v2828_v29 = vadd.f32 %v2827_v23, %v17475_v32 }
0x1b13   :  { %v17764_v34 = vmax.f32 %v2828_v29, 0.0 }
0x1b15   :  { %2831 = vst [vmem:[#allocation16 + $0x8] sm:$0xff] %v17764_v34  ;;  %11452 = vmatmul.mubr.f32.vlgmr.msra.gmra.mrb[34].mxu1 %v17764_v34  ;;  %11522 = vmatmul.mubr.f32.vlgmr.msra.gmra.mrb[32].mxu0 %v17764_v34 }
0x1b16   :  { %14888 = vmatpush3.bf16.msra.mxu1 %v16974_v12  ;;  %11556 = vmatprep.mubr.msk.f32.mxu1 %vm16814_vm0, %v16815_v1 }
0x1b17   :  { %14889 = vmatprep.subr.bf16.mxu1 %v16813_v0  ;;  %14936 = vmatpush3.bf16.msra.mxu0 %v16974_v12 }
0x1b18   :  { %14937 = vmatprep.subr.bf16.mxu0 %v16813_v0  ;;  %11626 = vmatprep.mubr.msk.f32.mxu0 %vm16814_vm0, %v16815_v1 }
0x1b1a   :  { %14891 = vmatpush3.bf16.msra.mxu1 %v16981_v18 }
0x1b1b   :  { %14892 = vmatprep.subr.bf16.mxu1 %v16813_v0  ;;  %14939 = vmatpush3.bf16.msra.mxu0 %v16981_v18 }
0x1b1c   :  { %14940 = vmatprep.subr.bf16.mxu0 %v16813_v0 }
0x1b1e   :  { %14894 = vmatpush3.bf16.msra.mxu1 %v16989_v24 }
0x1b1f   :  { %14895 = vmatprep.subr.bf16.mxu1 %v16813_v0  ;;  %14942 = vmatpush3.bf16.msra.mxu0 %v16989_v24 }
0x1b20   :  { %14943 = vmatprep.subr.bf16.mxu0 %v16813_v0 }
0x1b22   :  { %14897 = vmatpush3.bf16.msra.mxu1 %v16997_v30 }
0x1b23   :  { %14898 = vmatprep.subr.bf16.mxu1 %v16813_v0  ;;  %14945 = vmatpush3.bf16.msra.mxu0 %v16997_v30 }
0x1b24   :  { %14946 = vmatprep.subr.bf16.mxu0 %v16813_v0 }
0x1b26   :  { %14900 = vmatpush3.bf16.msra.mxu1 %v17005_v36 }
0x1b27   :  { %14901 = vmatprep.subr.bf16.mxu1 %v16813_v0  ;;  %14948 = vmatpush3.bf16.msra.mxu0 %v17005_v36 }
0x1b28   :  { %14949 = vmatprep.subr.bf16.mxu0 %v16813_v0 }
0x1b2a   :  { %14903 = vmatpush3.bf16.msra.mxu1 %v17013_v42 }
0x1b2b   :  { %14904 = vmatprep.subr.bf16.mxu1 %v16813_v0  ;;  %14951 = vmatpush3.bf16.msra.mxu0 %v17013_v42 }
0x1b2c   :  { %14952 = vmatprep.subr.bf16.mxu0 %v16813_v0 }
0x1b2e   :  { %14906 = vmatpush3.bf16.msra.mxu1 %v17021_v48 }
0x1b2f   :  { %14907 = vmatprep.subr.bf16.mxu1 %v16813_v0  ;;  %14954 = vmatpush3.bf16.msra.mxu0 %v17021_v48 }
0x1b30   :  { %14955 = vmatprep.subr.bf16.mxu0 %v16813_v0 }
0x1b32   :  { %14909 = vmatpush3.bf16.msra.mxu1 %v17029_v55 }
0x1b33   :  { %14910 = vmatprep.subr.bf16.mxu1 %v16813_v0  ;;  %14957 = vmatpush3.bf16.msra.mxu0 %v17029_v55 }
0x1b34   :  { %14982 = vmatprep.subr.bf16.mxu0 %v16813_v0 }
0x1b35   :  { %11557 = vmatmul.mubr.f32.vlgmr.msra.gmra.mrb[36].mxu1 %v17764_v34 }
0x1b36   :  { %14912 = vmatpush3.bf16.msra.mxu1 %v16974_v12  ;;  %11591 = vmatprep.mubr.msk.f32.mxu1 %vm16814_vm0, %v16815_v1 }
0x1b37   :  { %14913 = vmatprep.subr.bf16.mxu1 %v16813_v0 }
0x1b3a   :  { %14915 = vmatpush3.bf16.msra.mxu1 %v16981_v18 }
0x1b3b   :  { %14916 = vmatprep.subr.bf16.mxu1 %v16813_v0 }
0x1b3e   :  { %14918 = vmatpush3.bf16.msra.mxu1 %v16989_v24 }
0x1b3f   :  { %14919 = vmatprep.subr.bf16.mxu1 %v16813_v0 }
0x1b42   :  { %14921 = vmatpush3.bf16.msra.mxu1 %v16997_v30 }
0x1b43   :  { %14922 = vmatprep.subr.bf16.mxu1 %v16813_v0 }
0x1b46   :  { %14924 = vmatpush3.bf16.msra.mxu1 %v17005_v36 }
0x1b47   :  { %14925 = vmatprep.subr.bf16.mxu1 %v16813_v0 }
0x1b4a   :  { %14927 = vmatpush3.bf16.msra.mxu1 %v17013_v42 }
0x1b4b   :  { %14928 = vmatprep.subr.bf16.mxu1 %v16813_v0 }
0x1b4e   :  { %14930 = vmatpush3.bf16.msra.mxu1 %v17021_v48 }
0x1b4f   :  { %14931 = vmatprep.subr.bf16.mxu1 %v16813_v0 }
0x1b52   :  { %14933 = vmatpush3.bf16.msra.mxu1 %v17029_v55 }
0x1b53   :  { %14958 = vmatprep.subr.bf16.mxu1 %v16813_v0 }
0x1be8   :  { %v2898_v32 = vpop.f32.mrb[34].mxu1  ;;  %v3042_v37 = vpop.f32.mrb[32].mxu0 }
0x1be9   :  { %2903 = vst [vmem:[#allocation15 + $0x8] sm:$0xff] %v2898_v32  ;;  %v11453_v38 = vpop.f32.mrb[35].mxu1  ;;  %v11523_v41 = vpop.f32.mrb[33].mxu0  ;;  %v17827_v47 = vsub.f32 %v3042_v37, %v17824_v46 }
0x1c08   :  { %v3113_v43 = vpop.f32.mrb[36].mxu1 }
0x1c09   :  { %v3117_v22 = vsub.f32 %v17764_v34, %v3113_v43  ;;  %v11558_v50 = vpop.f32.mrb[37].mxu1 }
0x1c0b   :  { %v3118_v51 = vadd.f32 %v3117_v22, %v17827_v47 }
0x1c0d   :  { %v3119_v53 = vmax.f32 %v3118_v51, 0.0 }
0x1c0f   :  { %v3120_v54 = vsub.f32 %v3119_v53, %v17764_v34 }
0x1c11   :  { %v3121_v57 = vmul.f32 0.0, %v3120_v54 }
0x1c13   :  { %v3122_v58 = vadd.f32 %v3121_v57, %v3119_v53 }
0x1c15   :  { %11592 = vmatmul.mubr.f32.vlgmr.msra.gmra.mrb[38].mxu1 %v3122_v58 }
0x1c16   :  { %14960 = vmatpush3.bf16.msra.mxu1 %v16974_v12  ;;  %11661 = vmatprep.mubr.msk.f32.mxu1 %vm16814_vm0, %v16815_v1 }
0x1c17   :  { %14961 = vmatprep.subr.bf16.mxu1 %v16813_v0 }
0x1c1a   :  { %14963 = vmatpush3.bf16.msra.mxu1 %v16981_v18 }
0x1c1b   :  { %14964 = vmatprep.subr.bf16.mxu1 %v16813_v0 }
0x1c1e   :  { %14966 = vmatpush3.bf16.msra.mxu1 %v16989_v24 }
0x1c1f   :  { %14967 = vmatprep.subr.bf16.mxu1 %v16813_v0 }
0x1c22   :  { %14969 = vmatpush3.bf16.msra.mxu1 %v16997_v30 }
0x1c23   :  { %14970 = vmatprep.subr.bf16.mxu1 %v16813_v0 }
0x1c26   :  { %14972 = vmatpush3.bf16.msra.mxu1 %v17005_v36 }
0x1c27   :  { %14973 = vmatprep.subr.bf16.mxu1 %v16813_v0 }
0x1c2a   :  { %14975 = vmatpush3.bf16.msra.mxu1 %v17013_v42 }
0x1c2b   :  { %14976 = vmatprep.subr.bf16.mxu1 %v16813_v0 }
0x1c2e   :  { %14978 = vmatpush3.bf16.msra.mxu1 %v17021_v48 }
0x1c2f   :  { %14979 = vmatprep.subr.bf16.mxu1 %v16813_v0 }
0x1c32   :  { %14981 = vmatpush3.bf16.msra.mxu1 %v17029_v55 }
0x1c33   :  { %15006 = vmatprep.subr.bf16.mxu1 %v16813_v0 }
0x1ce8   :  { %v3189_v59 = vpop.f32.mrb[38].mxu1 }
0x1ce9   :  { %v3193_v61 = vsub.f32 %v3122_v58, %v3189_v59  ;;  %v11593_v62 = vpop.f32.mrb[39].mxu1 }
0x1ceb   :  { %v3194_v2 = vadd.f32 %v3193_v61, %v17827_v47 }
0x1ced   :  { %v3195_v3 = vmax.f32 %v3194_v2, 0.0 }
0x1cef   :  { %v3196_v8 = vsub.f32 %v3195_v3, %v3119_v53 }
0x1cf1   :  { %v3197_v10 = vmul.f32 0.2817535, %v3196_v8 }
0x1cf3   :  { %v3198_v11 = vadd.f32 %v3197_v10, %v3195_v3 }
0x1cf5   :  { %11627 = vmatmul.mubr.f32.vlgmr.msra.gmra.mrb[34].mxu0 %v3198_v11 }
0x1cf6   :  { %14984 = vmatpush3.bf16.msra.mxu0 %v16974_v12  ;;  %11696 = vmatprep.mubr.msk.f32.mxu0 %vm16814_vm0, %v16815_v1 }
0x1cf7   :  { %14985 = vmatprep.subr.bf16.mxu0 %v16813_v0 }
0x1cfa   :  { %14987 = vmatpush3.bf16.msra.mxu0 %v16981_v18 }
0x1cfb   :  { %14988 = vmatprep.subr.bf16.mxu0 %v16813_v0 }
0x1cfe   :  { %14990 = vmatpush3.bf16.msra.mxu0 %v16989_v24 }
0x1cff   :  { %14991 = vmatprep.subr.bf16.mxu0 %v16813_v0 }
0x1d02   :  { %14993 = vmatpush3.bf16.msra.mxu0 %v16997_v30 }
0x1d03   :  { %14994 = vmatprep.subr.bf16.mxu0 %v16813_v0 }
0x1d06   :  { %14996 = vmatpush3.bf16.msra.mxu0 %v17005_v36 }
0x1d07   :  { %14997 = vmatprep.subr.bf16.mxu0 %v16813_v0 }
0x1d0a   :  { %14999 = vmatpush3.bf16.msra.mxu0 %v17013_v42 }
0x1d0b   :  { %15000 = vmatprep.subr.bf16.mxu0 %v16813_v0 }
0x1d0e   :  { %15002 = vmatpush3.bf16.msra.mxu0 %v17021_v48 }
0x1d0f   :  { %15003 = vmatprep.subr.bf16.mxu0 %v16813_v0 }
0x1d12   :  { %15005 = vmatpush3.bf16.msra.mxu0 %v17029_v55 }
0x1d13   :  { %15030 = vmatprep.subr.bf16.mxu0 %v16813_v0 }
0x1dc8   :  { %v3265_v15 = vpop.f32.mrb[34].mxu0 }
0x1dc9   :  { %v3269_v16 = vsub.f32 %v3198_v11, %v3265_v15  ;;  %v11628_v26 = vpop.f32.mrb[35].mxu0 }
0x1dcb   :  { %v3270_v20 = vadd.f32 %v3269_v16, %v17827_v47 }
0x1dcd   :  { %v3271_v23 = vmax.f32 %v3270_v20, 0.0 }
0x1dcf   :  { %v3272_v28 = vsub.f32 %v3271_v23, %v3195_v3 }
0x1dd1   :  { %v3273_v29 = vmul.f32 0.43404278, %v3272_v28 }
0x1dd3   :  { %v3274_v34 = vadd.f32 %v3273_v29, %v3271_v23 }
0x1dd5   :  { %11662 = vmatmul.mubr.f32.vlgmr.msra.gmra.mrb[40].mxu1 %v3274_v34 }
0x1dd6   :  { %15008 = vmatpush3.bf16.msra.mxu1 %v16974_v12  ;;  %11731 = vmatprep.mubr.msk.f32.mxu1 %vm16814_vm0, %v16815_v1 }
0x1dd7   :  { %15009 = vmatprep.subr.bf16.mxu1 %v16813_v0 }
0x1dda   :  { %15011 = vmatpush3.bf16.msra.mxu1 %v16981_v18 }
0x1ddb   :  { %15012 = vmatprep.subr.bf16.mxu1 %v16813_v0 }
0x1dde   :  { %15014 = vmatpush3.bf16.msra.mxu1 %v16989_v24 }
0x1ddf   :  { %15015 = vmatprep.subr.bf16.mxu1 %v16813_v0 }
0x1de2   :  { %15017 = vmatpush3.bf16.msra.mxu1 %v16997_v30 }
0x1de3   :  { %15018 = vmatprep.subr.bf16.mxu1 %v16813_v0 }
0x1de6   :  { %15020 = vmatpush3.bf16.msra.mxu1 %v17005_v36 }
0x1de7   :  { %15021 = vmatprep.subr.bf16.mxu1 %v16813_v0 }
0x1dea   :  { %15023 = vmatpush3.bf16.msra.mxu1 %v17013_v42 }
0x1deb   :  { %15024 = vmatprep.subr.bf16.mxu1 %v16813_v0 }
0x1dee   :  { %15026 = vmatpush3.bf16.msra.mxu1 %v17021_v48 }
0x1def   :  { %15027 = vmatprep.subr.bf16.mxu1 %v16813_v0 }
0x1df2   :  { %15029 = vmatpush3.bf16.msra.mxu1 %v17029_v55 }
0x1df3   :  { %15054 = vmatprep.subr.bf16.mxu1 %v16813_v0 }
0x1ea8   :  { %v3341_v32 = vpop.f32.mrb[40].mxu1 }
0x1ea9   :  { %v3345_v37 = vsub.f32 %v3274_v34, %v3341_v32  ;;  %v11663_v38 = vpop.f32.mrb[41].mxu1 }
0x1eab   :  { %v3346_v41 = vadd.f32 %v3345_v37, %v17827_v47 }
0x1ead   :  { %v3347_v43 = vmax.f32 %v3346_v41, 0.0 }
0x1eaf   :  { %v3348_v22 = vsub.f32 %v3347_v43, %v3271_v23 }
0x1eb1   :  { %v3349_v50 = vmul.f32 0.5310638, %v3348_v22 }
0x1eb3   :  { %v3350_v51 = vadd.f32 %v3349_v50, %v3347_v43 }
0x1eb5   :  { %11697 = vmatmul.mubr.f32.vlgmr.msra.gmra.mrb[36].mxu0 %v3350_v51 }
0x1eb6   :  { %15032 = vmatpush3.bf16.msra.mxu0 %v16974_v12  ;;  %11766 = vmatprep.mubr.msk.f32.mxu0 %vm16814_vm0, %v16815_v1 }
0x1eb7   :  { %15033 = vmatprep.subr.bf16.mxu0 %v16813_v0 }
0x1eba   :  { %15035 = vmatpush3.bf16.msra.mxu0 %v16981_v18 }
0x1ebb   :  { %15036 = vmatprep.subr.bf16.mxu0 %v16813_v0 }
0x1ebe   :  { %15038 = vmatpush3.bf16.msra.mxu0 %v16989_v24 }
0x1ebf   :  { %15039 = vmatprep.subr.bf16.mxu0 %v16813_v0 }
0x1ec2   :  { %15041 = vmatpush3.bf16.msra.mxu0 %v16997_v30 }
0x1ec3   :  { %15042 = vmatprep.subr.bf16.mxu0 %v16813_v0 }
0x1ec6   :  { %15044 = vmatpush3.bf16.msra.mxu0 %v17005_v36 }
0x1ec7   :  { %15045 = vmatprep.subr.bf16.mxu0 %v16813_v0 }
0x1eca   :  { %15047 = vmatpush3.bf16.msra.mxu0 %v17013_v42 }
0x1ecb   :  { %15048 = vmatprep.subr.bf16.mxu0 %v16813_v0 }
0x1ece   :  { %15050 = vmatpush3.bf16.msra.mxu0 %v17021_v48 }
0x1ecf   :  { %15051 = vmatprep.subr.bf16.mxu0 %v16813_v0 }
0x1ed2   :  { %15053 = vmatpush3.bf16.msra.mxu0 %v17029_v55 }
0x1ed3   :  { %15078 = vmatprep.subr.bf16.mxu0 %v16813_v0 }
0x1f88   :  { %v3417_v53 = vpop.f32.mrb[36].mxu0 }
0x1f89   :  { %v3421_v54 = vsub.f32 %v3350_v51, %v3417_v53  ;;  %v11698_v57 = vpop.f32.mrb[37].mxu0 }
0x1f8b   :  { %v3422_v58 = vadd.f32 %v3421_v54, %v17827_v47 }
0x1f8d   :  { %v3423_v59 = vmax.f32 %v3422_v58, 0.0 }
0x1f8f   :  { %v3424_v61 = vsub.f32 %v3423_v59, %v3347_v43 }
0x1f91   :  { %v3425_v62 = vmul.f32 0.5987786, %v3424_v61 }
0x1f93   :  { %v3426_v2 = vadd.f32 %v3425_v62, %v3423_v59 }
0x1f95   :  { %11732 = vmatmul.mubr.f32.vlgmr.msra.gmra.mrb[42].mxu1 %v3426_v2 }
0x1f96   :  { %15056 = vmatpush3.bf16.msra.mxu1 %v16974_v12  ;;  %11801 = vmatprep.mubr.msk.f32.mxu1 %vm16814_vm0, %v16815_v1 }
0x1f97   :  { %15057 = vmatprep.subr.bf16.mxu1 %v16813_v0 }
0x1f9a   :  { %15059 = vmatpush3.bf16.msra.mxu1 %v16981_v18 }
0x1f9b   :  { %15060 = vmatprep.subr.bf16.mxu1 %v16813_v0 }
0x1f9e   :  { %15062 = vmatpush3.bf16.msra.mxu1 %v16989_v24 }
0x1f9f   :  { %15063 = vmatprep.subr.bf16.mxu1 %v16813_v0 }
0x1fa2   :  { %15065 = vmatpush3.bf16.msra.mxu1 %v16997_v30 }
0x1fa3   :  { %15066 = vmatprep.subr.bf16.mxu1 %v16813_v0 }
0x1fa6   :  { %15068 = vmatpush3.bf16.msra.mxu1 %v17005_v36 }
0x1fa7   :  { %15069 = vmatprep.subr.bf16.mxu1 %v16813_v0 }
0x1faa   :  { %15071 = vmatpush3.bf16.msra.mxu1 %v17013_v42 }
0x1fab   :  { %15072 = vmatprep.subr.bf16.mxu1 %v16813_v0 }
0x1fae   :  { %15074 = vmatpush3.bf16.msra.mxu1 %v17021_v48 }
0x1faf   :  { %15075 = vmatprep.subr.bf16.mxu1 %v16813_v0 }
0x1fb2   :  { %15077 = vmatpush3.bf16.msra.mxu1 %v17029_v55 }
0x1fb3   :  { %15102 = vmatprep.subr.bf16.mxu1 %v16813_v0 }
0x2068   :  { %v3493_v3 = vpop.f32.mrb[42].mxu1 }
0x2069   :  { %v3497_v8 = vsub.f32 %v3426_v2, %v3493_v3  ;;  %v11733_v10 = vpop.f32.mrb[43].mxu1 }
0x206b   :  { %v3498_v11 = vadd.f32 %v3497_v8, %v17827_v47 }
0x206d   :  { %v3499_v15 = vmax.f32 %v3498_v11, 0.0 }
0x206f   :  { %v3500_v16 = vsub.f32 %v3499_v15, %v3423_v59 }
0x2071   :  { %v3501_v26 = vmul.f32 0.64892334, %v3500_v16 }
0x2073   :  { %v3502_v20 = vadd.f32 %v3501_v26, %v3499_v15 }
0x2075   :  { %11767 = vmatmul.mubr.f32.vlgmr.msra.gmra.mrb[38].mxu0 %v3502_v20 }
0x2076   :  { %15080 = vmatpush3.bf16.msra.mxu0 %v16974_v12  ;;  %11836 = vmatprep.mubr.msk.f32.mxu0 %vm16814_vm0, %v16815_v1 }
0x2077   :  { %15081 = vmatprep.subr.bf16.mxu0 %v16813_v0 }
0x207a   :  { %15083 = vmatpush3.bf16.msra.mxu0 %v16981_v18 }
0x207b   :  { %15084 = vmatprep.subr.bf16.mxu0 %v16813_v0 }
0x207e   :  { %15086 = vmatpush3.bf16.msra.mxu0 %v16989_v24 }
0x207f   :  { %15087 = vmatprep.subr.bf16.mxu0 %v16813_v0 }
0x2082   :  { %15089 = vmatpush3.bf16.msra.mxu0 %v16997_v30 }
0x2083   :  { %15090 = vmatprep.subr.bf16.mxu0 %v16813_v0 }
0x2086   :  { %15092 = vmatpush3.bf16.msra.mxu0 %v17005_v36 }
0x2087   :  { %15093 = vmatprep.subr.bf16.mxu0 %v16813_v0 }
0x208a   :  { %15095 = vmatpush3.bf16.msra.mxu0 %v17013_v42 }
0x208b   :  { %15096 = vmatprep.subr.bf16.mxu0 %v16813_v0 }
0x208e   :  { %15098 = vmatpush3.bf16.msra.mxu0 %v17021_v48 }
0x208f   :  { %15099 = vmatprep.subr.bf16.mxu0 %v16813_v0 }
0x2092   :  { %15101 = vmatpush3.bf16.msra.mxu0 %v17029_v55 }
0x2093   :  { %15126 = vmatprep.subr.bf16.mxu0 %v16813_v0 }
0x2148   :  { %v3569_v23 = vpop.f32.mrb[38].mxu0 }
0x2149   :  { %v3573_v28 = vsub.f32 %v3502_v20, %v3569_v23  ;;  %v11768_v29 = vpop.f32.mrb[39].mxu0 }
0x214b   :  { %v3574_v34 = vadd.f32 %v3573_v28, %v17827_v47 }
0x214d   :  { %v3575_v32 = vmax.f32 %v3574_v34, 0.0 }
0x214f   :  { %v3576_v37 = vsub.f32 %v3575_v32, %v3499_v15 }
0x2151   :  { %v3577_v38 = vmul.f32 0.68764585, %v3576_v37 }
0x2153   :  { %v3578_v41 = vadd.f32 %v3577_v38, %v3575_v32 }
0x2155   :  { %11802 = vmatmul.mubr.f32.vlgmr.msra.gmra.mrb[44].mxu1 %v3578_v41 }
0x2156   :  { %15104 = vmatpush3.bf16.msra.mxu1 %v16974_v12  ;;  %11871 = vmatprep.mubr.msk.f32.mxu1 %vm16814_vm0, %v16815_v1 }
0x2157   :  { %15105 = vmatprep.subr.bf16.mxu1 %v16813_v0 }
0x215a   :  { %15107 = vmatpush3.bf16.msra.mxu1 %v16981_v18 }
0x215b   :  { %15108 = vmatprep.subr.bf16.mxu1 %v16813_v0 }
0x215e   :  { %15110 = vmatpush3.bf16.msra.mxu1 %v16989_v24 }
0x215f   :  { %15111 = vmatprep.subr.bf16.mxu1 %v16813_v0 }
0x2162   :  { %15113 = vmatpush3.bf16.msra.mxu1 %v16997_v30 }
0x2163   :  { %15114 = vmatprep.subr.bf16.mxu1 %v16813_v0 }
0x2166   :  { %15116 = vmatpush3.bf16.msra.mxu1 %v17005_v36 }
0x2167   :  { %15117 = vmatprep.subr.bf16.mxu1 %v16813_v0 }
0x216a   :  { %15119 = vmatpush3.bf16.msra.mxu1 %v17013_v42 }
0x216b   :  { %15120 = vmatprep.subr.bf16.mxu1 %v16813_v0 }
0x216e   :  { %15122 = vmatpush3.bf16.msra.mxu1 %v17021_v48 }
0x216f   :  { %15123 = vmatprep.subr.bf16.mxu1 %v16813_v0 }
0x2172   :  { %15125 = vmatpush3.bf16.msra.mxu1 %v17029_v55 }
0x2173   :  { %15150 = vmatprep.subr.bf16.mxu1 %v16813_v0 }
0x2228   :  { %v3645_v43 = vpop.f32.mrb[44].mxu1 }
0x2229   :  { %v3649_v22 = vsub.f32 %v3578_v41, %v3645_v43  ;;  %v11803_v50 = vpop.f32.mrb[45].mxu1 }
0x222b   :  { %v3650_v51 = vadd.f32 %v3649_v22, %v17827_v47 }
0x222d   :  { %v3651_v53 = vmax.f32 %v3650_v51, 0.0 }
0x222f   :  { %v3652_v54 = vsub.f32 %v3651_v53, %v3575_v32 }
0x2231   :  { %v3653_v57 = vmul.f32 0.71849984, %v3652_v54 }
0x2233   :  { %v3654_v58 = vadd.f32 %v3653_v57, %v3651_v53 }
0x2235   :  { %11837 = vmatmul.mubr.f32.vlgmr.msra.gmra.mrb[40].mxu0 %v3654_v58 }
0x2236   :  { %15128 = vmatpush3.bf16.msra.mxu0 %v16974_v12  ;;  %11906 = vmatprep.mubr.msk.f32.mxu0 %vm16814_vm0, %v16815_v1 }
0x2237   :  { %15129 = vmatprep.subr.bf16.mxu0 %v16813_v0 }
0x223a   :  { %15131 = vmatpush3.bf16.msra.mxu0 %v16981_v18 }
0x223b   :  { %15132 = vmatprep.subr.bf16.mxu0 %v16813_v0 }
0x223e   :  { %15134 = vmatpush3.bf16.msra.mxu0 %v16989_v24 }
0x223f   :  { %15135 = vmatprep.subr.bf16.mxu0 %v16813_v0 }
0x2242   :  { %15137 = vmatpush3.bf16.msra.mxu0 %v16997_v30 }
0x2243   :  { %15138 = vmatprep.subr.bf16.mxu0 %v16813_v0 }
0x2246   :  { %15140 = vmatpush3.bf16.msra.mxu0 %v17005_v36 }
0x2247   :  { %15141 = vmatprep.subr.bf16.mxu0 %v16813_v0 }
0x224a   :  { %15143 = vmatpush3.bf16.msra.mxu0 %v17013_v42 }
0x224b   :  { %15144 = vmatprep.subr.bf16.mxu0 %v16813_v0 }
0x224e   :  { %15146 = vmatpush3.bf16.msra.mxu0 %v17021_v48 }
0x224f   :  { %15147 = vmatprep.subr.bf16.mxu0 %v16813_v0 }
0x2252   :  { %15149 = vmatpush3.bf16.msra.mxu0 %v17029_v55 }
0x2253   :  { %15174 = vmatprep.subr.bf16.mxu0 %v16813_v0 }
0x2308   :  { %v3721_v59 = vpop.f32.mrb[40].mxu0 }
0x2309   :  { %v3725_v61 = vsub.f32 %v3654_v58, %v3721_v59  ;;  %v11838_v62 = vpop.f32.mrb[41].mxu0 }
0x230b   :  { %v3726_v2 = vadd.f32 %v3725_v61, %v17827_v47 }
0x230d   :  { %v3727_v3 = vmax.f32 %v3726_v2, 0.0 }
0x230f   :  { %v3728_v8 = vsub.f32 %v3727_v3, %v3651_v53 }
0x2311   :  { %v3729_v10 = vmul.f32 0.743691, %v3728_v8 }
0x2313   :  { %v3730_v11 = vadd.f32 %v3729_v10, %v3727_v3 }
0x2315   :  { %11872 = vmatmul.mubr.f32.vlgmr.msra.gmra.mrb[46].mxu1 %v3730_v11 }
0x2316   :  { %15152 = vmatpush3.bf16.msra.mxu1 %v16974_v12  ;;  %11941 = vmatprep.mubr.msk.f32.mxu1 %vm16814_vm0, %v16815_v1 }
0x2317   :  { %15153 = vmatprep.subr.bf16.mxu1 %v16813_v0 }
0x231a   :  { %15155 = vmatpush3.bf16.msra.mxu1 %v16981_v18 }
0x231b   :  { %15156 = vmatprep.subr.bf16.mxu1 %v16813_v0 }
0x231e   :  { %15158 = vmatpush3.bf16.msra.mxu1 %v16989_v24 }
0x231f   :  { %15159 = vmatprep.subr.bf16.mxu1 %v16813_v0 }
0x2322   :  { %15161 = vmatpush3.bf16.msra.mxu1 %v16997_v30 }
0x2323   :  { %15162 = vmatprep.subr.bf16.mxu1 %v16813_v0 }
0x2326   :  { %15164 = vmatpush3.bf16.msra.mxu1 %v17005_v36 }
0x2327   :  { %15165 = vmatprep.subr.bf16.mxu1 %v16813_v0 }
0x232a   :  { %15167 = vmatpush3.bf16.msra.mxu1 %v17013_v42 }
0x232b   :  { %15168 = vmatprep.subr.bf16.mxu1 %v16813_v0 }
0x232e   :  { %15170 = vmatpush3.bf16.msra.mxu1 %v17021_v48 }
0x232f   :  { %15171 = vmatprep.subr.bf16.mxu1 %v16813_v0 }
0x2332   :  { %15173 = vmatpush3.bf16.msra.mxu1 %v17029_v55 }
0x2333   :  { %15198 = vmatprep.subr.bf16.mxu1 %v16813_v0 }
0x23e8   :  { %v3797_v15 = vpop.f32.mrb[46].mxu1 }
0x23e9   :  { %v3801_v16 = vsub.f32 %v3730_v11, %v3797_v15  ;;  %v11873_v26 = vpop.f32.mrb[47].mxu1 }
0x23eb   :  { %v3802_v20 = vadd.f32 %v3801_v16, %v17827_v47 }
0x23ed   :  { %v3803_v23 = vmax.f32 %v3802_v20, 0.0 }
0x23ef   :  { %v3804_v28 = vsub.f32 %v3803_v23, %v3727_v3 }
0x23f1   :  { %v3805_v29 = vmul.f32 0.7646647, %v3804_v28 }
0x23f3   :  { %v3806_v34 = vadd.f32 %v3805_v29, %v3803_v23 }
0x23f5   :  { %11907 = vmatmul.mubr.f32.vlgmr.msra.gmra.mrb[42].mxu0 %v3806_v34 }
0x23f6   :  { %15176 = vmatpush3.bf16.msra.mxu0 %v16974_v12  ;;  %11976 = vmatprep.mubr.msk.f32.mxu0 %vm16814_vm0, %v16815_v1 }
0x23f7   :  { %15177 = vmatprep.subr.bf16.mxu0 %v16813_v0 }
0x23fa   :  { %15179 = vmatpush3.bf16.msra.mxu0 %v16981_v18 }
0x23fb   :  { %15180 = vmatprep.subr.bf16.mxu0 %v16813_v0 }
0x23fe   :  { %15182 = vmatpush3.bf16.msra.mxu0 %v16989_v24 }
0x23ff   :  { %15183 = vmatprep.subr.bf16.mxu0 %v16813_v0 }
0x2402   :  { %15185 = vmatpush3.bf16.msra.mxu0 %v16997_v30 }
0x2403   :  { %15186 = vmatprep.subr.bf16.mxu0 %v16813_v0 }
0x2406   :  { %15188 = vmatpush3.bf16.msra.mxu0 %v17005_v36 }
0x2407   :  { %15189 = vmatprep.subr.bf16.mxu0 %v16813_v0 }
0x240a   :  { %15191 = vmatpush3.bf16.msra.mxu0 %v17013_v42 }
0x240b   :  { %15192 = vmatprep.subr.bf16.mxu0 %v16813_v0 }
0x240e   :  { %15194 = vmatpush3.bf16.msra.mxu0 %v17021_v48 }
0x240f   :  { %15195 = vmatprep.subr.bf16.mxu0 %v16813_v0 }
0x2412   :  { %15197 = vmatpush3.bf16.msra.mxu0 %v17029_v55 }
0x2413   :  { %15222 = vmatprep.subr.bf16.mxu0 %v16813_v0 }
0x24c8   :  { %v3873_v32 = vpop.f32.mrb[42].mxu0 }
0x24c9   :  { %v3877_v37 = vsub.f32 %v3806_v34, %v3873_v32  ;;  %v11908_v38 = vpop.f32.mrb[43].mxu0 }
0x24cb   :  { %v3878_v41 = vadd.f32 %v3877_v37, %v17827_v47 }
0x24cd   :  { %v3879_v43 = vmax.f32 %v3878_v41, 0.0 }
0x24cf   :  { %v3880_v22 = vsub.f32 %v3879_v43, %v3803_v23 }
0x24d1   :  { %v3881_v50 = vmul.f32 0.78240925, %v3880_v22 }
0x24d3   :  { %v3882_v51 = vadd.f32 %v3881_v50, %v3879_v43 }
0x24d5   :  { %11942 = vmatmul.mubr.f32.vlgmr.msra.gmra.mrb[48].mxu1 %v3882_v51 }
0x24d6   :  { %15200 = vmatpush3.bf16.msra.mxu1 %v16974_v12  ;;  %12011 = vmatprep.mubr.msk.f32.mxu1 %vm16814_vm0, %v16815_v1 }
0x24d7   :  { %15201 = vmatprep.subr.bf16.mxu1 %v16813_v0 }
0x24da   :  { %15203 = vmatpush3.bf16.msra.mxu1 %v16981_v18 }
0x24db   :  { %15204 = vmatprep.subr.bf16.mxu1 %v16813_v0 }
0x24de   :  { %15206 = vmatpush3.bf16.msra.mxu1 %v16989_v24 }
0x24df   :  { %15207 = vmatprep.subr.bf16.mxu1 %v16813_v0 }
0x24e2   :  { %15209 = vmatpush3.bf16.msra.mxu1 %v16997_v30 }
0x24e3   :  { %15210 = vmatprep.subr.bf16.mxu1 %v16813_v0 }
0x24e6   :  { %15212 = vmatpush3.bf16.msra.mxu1 %v17005_v36 }
0x24e7   :  { %15213 = vmatprep.subr.bf16.mxu1 %v16813_v0 }
0x24ea   :  { %15215 = vmatpush3.bf16.msra.mxu1 %v17013_v42 }
0x24eb   :  { %15216 = vmatprep.subr.bf16.mxu1 %v16813_v0 }
0x24ee   :  { %15218 = vmatpush3.bf16.msra.mxu1 %v17021_v48 }
0x24ef   :  { %15219 = vmatprep.subr.bf16.mxu1 %v16813_v0 }
0x24f2   :  { %15221 = vmatpush3.bf16.msra.mxu1 %v17029_v55 }
0x24f3   :  { %15246 = vmatprep.subr.bf16.mxu1 %v16813_v0 }
0x25a8   :  { %v3949_v53 = vpop.f32.mrb[48].mxu1 }
0x25a9   :  { %v3953_v54 = vsub.f32 %v3882_v51, %v3949_v53  ;;  %v11943_v57 = vpop.f32.mrb[49].mxu1 }
0x25ab   :  { %v3954_v58 = vadd.f32 %v3953_v54, %v17827_v47 }
0x25ad   :  { %v3955_v59 = vmax.f32 %v3954_v58, 0.0 }
0x25af   :  { %v3956_v61 = vsub.f32 %v3955_v59, %v3879_v43  ;;  %v4259_v43 = vld [vmem:[#allocation3 + $0x18] sm:$0xff] }
0x25b1   :  { %v3957_v62 = vmul.f32 0.7976244, %v3956_v61 }
0x25b3   :  { %v3958_v2 = vadd.f32 %v3957_v62, %v3955_v59 }
0x25b5   :  { %11977 = vmatmul.mubr.f32.vlgmr.msra.gmra.mrb[44].mxu0 %v3958_v2 }
0x25b6   :  { %15224 = vmatpush3.bf16.msra.mxu0 %v16974_v12  ;;  %12046 = vmatprep.mubr.msk.f32.mxu0 %vm16814_vm0, %v16815_v1 }
0x25b7   :  { %15225 = vmatprep.subr.bf16.mxu0 %v16813_v0 }
0x25ba   :  { %15227 = vmatpush3.bf16.msra.mxu0 %v16981_v18 }
0x25bb   :  { %15228 = vmatprep.subr.bf16.mxu0 %v16813_v0 }
0x25be   :  { %15230 = vmatpush3.bf16.msra.mxu0 %v16989_v24 }
0x25bf   :  { %15231 = vmatprep.subr.bf16.mxu0 %v16813_v0 }
0x25c2   :  { %15233 = vmatpush3.bf16.msra.mxu0 %v16997_v30 }
0x25c3   :  { %15234 = vmatprep.subr.bf16.mxu0 %v16813_v0 }
0x25c6   :  { %15236 = vmatpush3.bf16.msra.mxu0 %v17005_v36 }
0x25c7   :  { %15237 = vmatprep.subr.bf16.mxu0 %v16813_v0 }
0x25ca   :  { %15239 = vmatpush3.bf16.msra.mxu0 %v17013_v42 }
0x25cb   :  { %15240 = vmatprep.subr.bf16.mxu0 %v16813_v0 }
0x25ce   :  { %15242 = vmatpush3.bf16.msra.mxu0 %v17021_v48 }
0x25cf   :  { %15243 = vmatprep.subr.bf16.mxu0 %v16813_v0 }
0x25d2   :  { %15245 = vmatpush3.bf16.msra.mxu0 %v17029_v55 }
0x25d3   :  { %15270 = vmatprep.subr.bf16.mxu0 %v16813_v0 }
0x2688   :  { %v4025_v3 = vpop.f32.mrb[44].mxu0 }
0x2689   :  { %v4029_v8 = vsub.f32 %v3958_v2, %v4025_v3  ;;  %v11978_v10 = vpop.f32.mrb[45].mxu0 }
0x268b   :  { %v4030_v11 = vadd.f32 %v4029_v8, %v17827_v47 }
0x268d   :  { %v4031_v15 = vmax.f32 %v4030_v11, 0.0 }
0x268f   :  { %v4032_v16 = vsub.f32 %v4031_v15, %v3955_v59 }
0x2691   :  { %v4033_v26 = vmul.f32 0.81082, %v4032_v16 }
0x2693   :  { %v4034_v20 = vadd.f32 %v4033_v26, %v4031_v15 }
0x2695   :  { %12012 = vmatmul.mubr.f32.vlgmr.msra.gmra.mrb[50].mxu1 %v4034_v20 }
0x2696   :  { %15248 = vmatpush3.bf16.msra.mxu1 %v17344_v19  ;;  %12081 = vmatprep.mubr.msk.f32.mxu1 %vm16814_vm0, %v16815_v1 }
0x2697   :  { %15249 = vmatprep.subr.bf16.mxu1 %v16813_v0 }
0x269a   :  { %15251 = vmatpush3.bf16.msra.mxu1 %v17348_v25 }
0x269b   :  { %15252 = vmatprep.subr.bf16.mxu1 %v16813_v0 }
0x269e   :  { %15254 = vmatpush3.bf16.msra.mxu1 %v17352_v31 }
0x269f   :  { %15255 = vmatprep.subr.bf16.mxu1 %v16813_v0 }
0x26a2   :  { %15257 = vmatpush3.bf16.msra.mxu1 %v17356_v35 }
0x26a3   :  { %15258 = vmatprep.subr.bf16.mxu1 %v16813_v0 }
0x26a6   :  { %15260 = vmatpush3.bf16.msra.mxu1 %v17360_v40 }
0x26a7   :  { %15261 = vmatprep.subr.bf16.mxu1 %v16813_v0 }
0x26aa   :  { %15263 = vmatpush3.bf16.msra.mxu1 %v17364_v44 }
0x26ab   :  { %15264 = vmatprep.subr.bf16.mxu1 %v16813_v0 }
0x26ae   :  { %15266 = vmatpush3.bf16.msra.mxu1 %v17368_v49 }
0x26af   :  { %15267 = vmatprep.subr.bf16.mxu1 %v16813_v0 }
0x26b2   :  { %15269 = vmatpush3.bf16.msra.mxu1 %v17409_v6 }
0x26b3   :  { %15318 = vmatprep.subr.bf16.mxu1 %v16813_v0 }
0x2768   :  { %v4101_v23 = vpop.f32.mrb[50].mxu1 }
0x2769   :  { %v4105_v28 = vsub.f32 %v4034_v20, %v4101_v23  ;;  %v12013_v29 = vpop.f32.mrb[51].mxu1 }
0x276b   :  { %v4106_v34 = vadd.f32 %v4105_v28, %v17827_v47 }
0x276d   :  { %v4107_v32 = vmax.f32 %v4106_v34, 0.0 }
0x276f   :  { %v4108_v37 = vsub.f32 %v4107_v32, %v4031_v15 }
0x2771   :  { %v4109_v38 = vmul.f32 0.82237667, %v4108_v37 }
0x2773   :  { %v4110_v41 = vadd.f32 %v4109_v38, %v4107_v32 }
0x2775   :  { %12047 = vmatmul.mubr.f32.vlgmr.msra.gmra.mrb[46].mxu0 %v4110_v41 }
0x2776   :  { %15272 = vmatpush3.bf16.msra.mxu0 %v16968_v5  ;;  %12116 = vmatprep.mubr.msk.f32.mxu0 %vm16814_vm0, %v16815_v1 }
0x2777   :  { %15273 = vmatprep.subr.bf16.mxu0 %v16813_v0 }
0x277a   :  { %15275 = vmatpush3.bf16.msra.mxu0 %v16971_v7 }
0x277b   :  { %15276 = vmatprep.subr.bf16.mxu0 %v16813_v0 }
0x277e   :  { %15278 = vmatpush3.bf16.msra.mxu0 %v16977_v13 }
0x277f   :  { %15279 = vmatprep.subr.bf16.mxu0 %v16813_v0 }
0x2782   :  { %15281 = vmatpush3.bf16.msra.mxu0 %v16985_v21 }
0x2783   :  { %15282 = vmatprep.subr.bf16.mxu0 %v16813_v0 }
0x2786   :  { %15284 = vmatpush3.bf16.msra.mxu0 %v16993_v27 }
0x2787   :  { %15285 = vmatprep.subr.bf16.mxu0 %v16813_v0 }
0x278a   :  { %15287 = vmatpush3.bf16.msra.mxu0 %v17001_v33 }
0x278b   :  { %15288 = vmatprep.subr.bf16.mxu0 %v16813_v0 }
0x278e   :  { %15290 = vmatpush3.bf16.msra.mxu0 %v17009_v39 }
0x278f   :  { %15291 = vmatprep.subr.bf16.mxu0 %v16813_v0 }
0x2792   :  { %15293 = vmatpush3.bf16.msra.mxu0 %v17017_v45 }
0x2793   :  { %15294 = vmatprep.subr.bf16.mxu0 %v16813_v0 }
0x2795   :  { %12117 = vmatmul.mubr.f32.vlgmr.msra.gmra.mrb[48].mxu0 %v4259_v43 }
0x2796   :  { %15296 = vmatpush3.bf16.msra.mxu0 %v17025_v52  ;;  %12151 = vmatprep.mubr.msk.f32.mxu0 %vm16814_vm0, %v16815_v1 }
0x2797   :  { %15297 = vmatprep.subr.bf16.mxu0 %v16813_v0 }
0x279a   :  { %15299 = vmatpush3.bf16.msra.mxu0 %v17033_v56 }
0x279b   :  { %15300 = vmatprep.subr.bf16.mxu0 %v16813_v0 }
0x279e   :  { %15302 = vmatpush3.bf16.msra.mxu0 %v17043_v60 }
0x279f   :  { %15303 = vmatprep.subr.bf16.mxu0 %v16813_v0 }
0x27a2   :  { %15305 = vmatpush3.bf16.msra.mxu0 %v17052_v63 }
0x27a3   :  { %15306 = vmatprep.subr.bf16.mxu0 %v16813_v0 }
0x27a6   :  { %15308 = vmatpush3.bf16.msra.mxu0 %v17058_v4 }
0x27a7   :  { %15309 = vmatprep.subr.bf16.mxu0 %v16813_v0 }
0x27aa   :  { %15311 = vmatpush3.bf16.msra.mxu0 %v17064_v9 }
0x27ab   :  { %15312 = vmatprep.subr.bf16.mxu0 %v16813_v0 }
0x27ae   :  { %15314 = vmatpush3.bf16.msra.mxu0 %v17070_v14 }
0x27af   :  { %15315 = vmatprep.subr.bf16.mxu0 %v16813_v0 }
0x27b2   :  { %15317 = vmatpush3.bf16.msra.mxu0 %v17076_v17 }
0x27b3   :  { %15366 = vmatprep.subr.bf16.mxu0 %v16813_v0 }
0x2848   :  { %v4177_v22 = vpop.f32.mrb[46].mxu0 }
0x2849   :  { %v4181_v50 = vsub.f32 %v4110_v41, %v4177_v22  ;;  %v12048_v51 = vpop.f32.mrb[47].mxu0 }
0x284b   :  { %v4182_v53 = vadd.f32 %v4181_v50, %v17827_v47 }
0x284d   :  { %v18116_v54 = vmax.f32 %v4182_v53, 0.0 }
0x284f   :  { %4185 = vst [vmem:[#allocation16 + $0x10] sm:$0xff] %v18116_v54  ;;  %12082 = vmatmul.mubr.f32.vlgmr.msra.gmra.mrb[52].mxu1 %v18116_v54  ;;  %12152 = vmatmul.mubr.f32.vlgmr.msra.gmra.mrb[48].mxu0 %v18116_v54 }
0x2850   :  { %15320 = vmatpush3.bf16.msra.mxu1 %v16974_v12  ;;  %12186 = vmatprep.mubr.msk.f32.mxu1 %vm16814_vm0, %v16815_v1 }
0x2851   :  { %15321 = vmatprep.subr.bf16.mxu1 %v16813_v0  ;;  %15368 = vmatpush3.bf16.msra.mxu0 %v16974_v12 }
0x2852   :  { %15369 = vmatprep.subr.bf16.mxu0 %v16813_v0  ;;  %12256 = vmatprep.mubr.msk.f32.mxu0 %vm16814_vm0, %v16815_v1 }
0x2854   :  { %15323 = vmatpush3.bf16.msra.mxu1 %v16981_v18 }
0x2855   :  { %15324 = vmatprep.subr.bf16.mxu1 %v16813_v0  ;;  %15371 = vmatpush3.bf16.msra.mxu0 %v16981_v18 }
0x2856   :  { %15372 = vmatprep.subr.bf16.mxu0 %v16813_v0 }
0x2858   :  { %15326 = vmatpush3.bf16.msra.mxu1 %v16989_v24 }
0x2859   :  { %15327 = vmatprep.subr.bf16.mxu1 %v16813_v0  ;;  %15374 = vmatpush3.bf16.msra.mxu0 %v16989_v24 }
0x285a   :  { %15375 = vmatprep.subr.bf16.mxu0 %v16813_v0 }
0x285c   :  { %15329 = vmatpush3.bf16.msra.mxu1 %v16997_v30 }
0x285d   :  { %15330 = vmatprep.subr.bf16.mxu1 %v16813_v0  ;;  %15377 = vmatpush3.bf16.msra.mxu0 %v16997_v30 }
0x285e   :  { %15378 = vmatprep.subr.bf16.mxu0 %v16813_v0 }
0x2860   :  { %15332 = vmatpush3.bf16.msra.mxu1 %v17005_v36 }
0x2861   :  { %15333 = vmatprep.subr.bf16.mxu1 %v16813_v0  ;;  %15380 = vmatpush3.bf16.msra.mxu0 %v17005_v36 }
0x2862   :  { %15381 = vmatprep.subr.bf16.mxu0 %v16813_v0 }
0x2864   :  { %15335 = vmatpush3.bf16.msra.mxu1 %v17013_v42 }
0x2865   :  { %15336 = vmatprep.subr.bf16.mxu1 %v16813_v0  ;;  %15383 = vmatpush3.bf16.msra.mxu0 %v17013_v42 }
0x2866   :  { %15384 = vmatprep.subr.bf16.mxu0 %v16813_v0 }
0x2868   :  { %15338 = vmatpush3.bf16.msra.mxu1 %v17021_v48 }
0x2869   :  { %15339 = vmatprep.subr.bf16.mxu1 %v16813_v0  ;;  %15386 = vmatpush3.bf16.msra.mxu0 %v17021_v48 }
0x286a   :  { %15387 = vmatprep.subr.bf16.mxu0 %v16813_v0 }
0x286c   :  { %15341 = vmatpush3.bf16.msra.mxu1 %v17029_v55 }
0x286d   :  { %15342 = vmatprep.subr.bf16.mxu1 %v16813_v0  ;;  %15389 = vmatpush3.bf16.msra.mxu0 %v17029_v55 }
0x286e   :  { %15414 = vmatprep.subr.bf16.mxu0 %v16813_v0 }
0x286f   :  { %12187 = vmatmul.mubr.f32.vlgmr.msra.gmra.mrb[54].mxu1 %v18116_v54 }
0x2870   :  { %15344 = vmatpush3.bf16.msra.mxu1 %v16974_v12  ;;  %12221 = vmatprep.mubr.msk.f32.mxu1 %vm16814_vm0, %v16815_v1 }
0x2871   :  { %15345 = vmatprep.subr.bf16.mxu1 %v16813_v0 }
0x2874   :  { %15347 = vmatpush3.bf16.msra.mxu1 %v16981_v18 }
0x2875   :  { %15348 = vmatprep.subr.bf16.mxu1 %v16813_v0 }
0x2878   :  { %15350 = vmatpush3.bf16.msra.mxu1 %v16989_v24 }
0x2879   :  { %15351 = vmatprep.subr.bf16.mxu1 %v16813_v0 }
0x287c   :  { %15353 = vmatpush3.bf16.msra.mxu1 %v16997_v30 }
0x287d   :  { %15354 = vmatprep.subr.bf16.mxu1 %v16813_v0 }
0x2880   :  { %15356 = vmatpush3.bf16.msra.mxu1 %v17005_v36 }
0x2881   :  { %15357 = vmatprep.subr.bf16.mxu1 %v16813_v0 }
0x2884   :  { %15359 = vmatpush3.bf16.msra.mxu1 %v17013_v42 }
0x2885   :  { %15360 = vmatprep.subr.bf16.mxu1 %v16813_v0 }
0x2888   :  { %15362 = vmatpush3.bf16.msra.mxu1 %v17021_v48 }
0x2889   :  { %15363 = vmatprep.subr.bf16.mxu1 %v16813_v0 }
0x288c   :  { %15365 = vmatpush3.bf16.msra.mxu1 %v17029_v55 }
0x288d   :  { %15390 = vmatprep.subr.bf16.mxu1 %v16813_v0 }
0x2922   :  { %v4252_v47 = vpop.f32.mrb[52].mxu1  ;;  %v4396_v57 = vpop.f32.mrb[48].mxu0 }
0x2923   :  { %4257 = vst [vmem:[#allocation15 + $0x10] sm:$0xff] %v4252_v47  ;;  %v12083_v58 = vpop.f32.mrb[53].mxu1  ;;  %v12153_v59 = vpop.f32.mrb[49].mxu0  ;;  %v18177_v62 = vsub.f32 %v4396_v57, %v17824_v46 }
0x2942   :  { %v4467_v61 = vpop.f32.mrb[54].mxu1 }
0x2943   :  { %v4471_v2 = vsub.f32 %v18116_v54, %v4467_v61  ;;  %v12188_v3 = vpop.f32.mrb[55].mxu1 }
0x2945   :  { %v4472_v8 = vadd.f32 %v4471_v2, %v18177_v62 }
0x2947   :  { %v4473_v10 = vmax.f32 %v4472_v8, 0.0 }
0x2949   :  { %v4474_v11 = vsub.f32 %v4473_v10, %v18116_v54 }
0x294b   :  { %v4475_v15 = vmul.f32 0.0, %v4474_v11 }
0x294d   :  { %v4476_v16 = vadd.f32 %v4475_v15, %v4473_v10 }
0x294f   :  { %12222 = vmatmul.mubr.f32.vlgmr.msra.gmra.mrb[56].mxu1 %v4476_v16 }
0x2950   :  { %15392 = vmatpush3.bf16.msra.mxu1 %v16974_v12  ;;  %12291 = vmatprep.mubr.msk.f32.mxu1 %vm16814_vm0, %v16815_v1 }
0x2951   :  { %15393 = vmatprep.subr.bf16.mxu1 %v16813_v0 }
0x2954   :  { %15395 = vmatpush3.bf16.msra.mxu1 %v16981_v18 }
0x2955   :  { %15396 = vmatprep.subr.bf16.mxu1 %v16813_v0 }
0x2958   :  { %15398 = vmatpush3.bf16.msra.mxu1 %v16989_v24 }
0x2959   :  { %15399 = vmatprep.subr.bf16.mxu1 %v16813_v0 }
0x295c   :  { %15401 = vmatpush3.bf16.msra.mxu1 %v16997_v30 }
0x295d   :  { %15402 = vmatprep.subr.bf16.mxu1 %v16813_v0 }
0x2960   :  { %15404 = vmatpush3.bf16.msra.mxu1 %v17005_v36 }
0x2961   :  { %15405 = vmatprep.subr.bf16.mxu1 %v16813_v0 }
0x2964   :  { %15407 = vmatpush3.bf16.msra.mxu1 %v17013_v42 }
0x2965   :  { %15408 = vmatprep.subr.bf16.mxu1 %v16813_v0 }
0x2968   :  { %15410 = vmatpush3.bf16.msra.mxu1 %v17021_v48 }
0x2969   :  { %15411 = vmatprep.subr.bf16.mxu1 %v16813_v0 }
0x296c   :  { %15413 = vmatpush3.bf16.msra.mxu1 %v17029_v55 }
0x296d   :  { %15438 = vmatprep.subr.bf16.mxu1 %v16813_v0 }
0x2a22   :  { %v4543_v46 = vpop.f32.mrb[56].mxu1 }
0x2a23   :  { %v4547_v26 = vsub.f32 %v4476_v16, %v4543_v46  ;;  %v12223_v20 = vpop.f32.mrb[57].mxu1 }
0x2a25   :  { %v4548_v23 = vadd.f32 %v4547_v26, %v18177_v62 }
0x2a27   :  { %v4549_v28 = vmax.f32 %v4548_v23, 0.0 }
0x2a29   :  { %v4550_v29 = vsub.f32 %v4549_v28, %v4473_v10 }
0x2a2b   :  { %v4551_v34 = vmul.f32 0.2817535, %v4550_v29 }
0x2a2d   :  { %v4552_v32 = vadd.f32 %v4551_v34, %v4549_v28 }
0x2a2f   :  { %12257 = vmatmul.mubr.f32.vlgmr.msra.gmra.mrb[50].mxu0 %v4552_v32 }
0x2a30   :  { %15416 = vmatpush3.bf16.msra.mxu0 %v16974_v12  ;;  %12326 = vmatprep.mubr.msk.f32.mxu0 %vm16814_vm0, %v16815_v1 }
0x2a31   :  { %15417 = vmatprep.subr.bf16.mxu0 %v16813_v0 }
0x2a34   :  { %15419 = vmatpush3.bf16.msra.mxu0 %v16981_v18 }
0x2a35   :  { %15420 = vmatprep.subr.bf16.mxu0 %v16813_v0 }
0x2a38   :  { %15422 = vmatpush3.bf16.msra.mxu0 %v16989_v24 }
0x2a39   :  { %15423 = vmatprep.subr.bf16.mxu0 %v16813_v0 }
0x2a3c   :  { %15425 = vmatpush3.bf16.msra.mxu0 %v16997_v30 }
0x2a3d   :  { %15426 = vmatprep.subr.bf16.mxu0 %v16813_v0 }
0x2a40   :  { %15428 = vmatpush3.bf16.msra.mxu0 %v17005_v36 }
0x2a41   :  { %15429 = vmatprep.subr.bf16.mxu0 %v16813_v0 }
0x2a44   :  { %15431 = vmatpush3.bf16.msra.mxu0 %v17013_v42 }
0x2a45   :  { %15432 = vmatprep.subr.bf16.mxu0 %v16813_v0 }
0x2a48   :  { %15434 = vmatpush3.bf16.msra.mxu0 %v17021_v48 }
0x2a49   :  { %15435 = vmatprep.subr.bf16.mxu0 %v16813_v0 }
0x2a4c   :  { %15437 = vmatpush3.bf16.msra.mxu0 %v17029_v55 }
0x2a4d   :  { %15462 = vmatprep.subr.bf16.mxu0 %v16813_v0 }
0x2b02   :  { %v4619_v37 = vpop.f32.mrb[50].mxu0 }
0x2b03   :  { %v4623_v38 = vsub.f32 %v4552_v32, %v4619_v37  ;;  %v12258_v41 = vpop.f32.mrb[51].mxu0 }
0x2b05   :  { %v4624_v43 = vadd.f32 %v4623_v38, %v18177_v62 }
0x2b07   :  { %v4625_v22 = vmax.f32 %v4624_v43, 0.0 }
0x2b09   :  { %v4626_v50 = vsub.f32 %v4625_v22, %v4549_v28 }
0x2b0b   :  { %v4627_v51 = vmul.f32 0.43404278, %v4626_v50 }
0x2b0d   :  { %v4628_v53 = vadd.f32 %v4627_v51, %v4625_v22 }
0x2b0f   :  { %12292 = vmatmul.mubr.f32.vlgmr.msra.gmra.mrb[58].mxu1 %v4628_v53 }
0x2b10   :  { %15440 = vmatpush3.bf16.msra.mxu1 %v16974_v12  ;;  %12361 = vmatprep.mubr.msk.f32.mxu1 %vm16814_vm0, %v16815_v1 }
0x2b11   :  { %15441 = vmatprep.subr.bf16.mxu1 %v16813_v0 }
0x2b14   :  { %15443 = vmatpush3.bf16.msra.mxu1 %v16981_v18 }
0x2b15   :  { %15444 = vmatprep.subr.bf16.mxu1 %v16813_v0 }
0x2b18   :  { %15446 = vmatpush3.bf16.msra.mxu1 %v16989_v24 }
0x2b19   :  { %15447 = vmatprep.subr.bf16.mxu1 %v16813_v0 }
0x2b1c   :  { %15449 = vmatpush3.bf16.msra.mxu1 %v16997_v30 }
0x2b1d   :  { %15450 = vmatprep.subr.bf16.mxu1 %v16813_v0 }
0x2b20   :  { %15452 = vmatpush3.bf16.msra.mxu1 %v17005_v36 }
0x2b21   :  { %15453 = vmatprep.subr.bf16.mxu1 %v16813_v0 }
0x2b24   :  { %15455 = vmatpush3.bf16.msra.mxu1 %v17013_v42 }
0x2b25   :  { %15456 = vmatprep.subr.bf16.mxu1 %v16813_v0 }
0x2b28   :  { %15458 = vmatpush3.bf16.msra.mxu1 %v17021_v48 }
0x2b29   :  { %15459 = vmatprep.subr.bf16.mxu1 %v16813_v0 }
0x2b2c   :  { %15461 = vmatpush3.bf16.msra.mxu1 %v17029_v55 }
0x2b2d   :  { %15486 = vmatprep.subr.bf16.mxu1 %v16813_v0 }
0x2be2   :  { %v4695_v54 = vpop.f32.mrb[58].mxu1 }
0x2be3   :  { %v4699_v47 = vsub.f32 %v4628_v53, %v4695_v54  ;;  %v12293_v57 = vpop.f32.mrb[59].mxu1 }
0x2be5   :  { %v4700_v58 = vadd.f32 %v4699_v47, %v18177_v62 }
0x2be7   :  { %v4701_v59 = vmax.f32 %v4700_v58, 0.0 }
0x2be9   :  { %v4702_v61 = vsub.f32 %v4701_v59, %v4625_v22 }
0x2beb   :  { %v4703_v2 = vmul.f32 0.5310638, %v4702_v61 }
0x2bed   :  { %v4704_v3 = vadd.f32 %v4703_v2, %v4701_v59 }
0x2bef   :  { %12327 = vmatmul.mubr.f32.vlgmr.msra.gmra.mrb[52].mxu0 %v4704_v3 }
0x2bf0   :  { %15464 = vmatpush3.bf16.msra.mxu0 %v16974_v12  ;;  %12396 = vmatprep.mubr.msk.f32.mxu0 %vm16814_vm0, %v16815_v1 }
0x2bf1   :  { %15465 = vmatprep.subr.bf16.mxu0 %v16813_v0 }
0x2bf4   :  { %15467 = vmatpush3.bf16.msra.mxu0 %v16981_v18 }
0x2bf5   :  { %15468 = vmatprep.subr.bf16.mxu0 %v16813_v0 }
0x2bf8   :  { %15470 = vmatpush3.bf16.msra.mxu0 %v16989_v24 }
0x2bf9   :  { %15471 = vmatprep.subr.bf16.mxu0 %v16813_v0 }
0x2bfc   :  { %15473 = vmatpush3.bf16.msra.mxu0 %v16997_v30 }
0x2bfd   :  { %15474 = vmatprep.subr.bf16.mxu0 %v16813_v0 }
0x2c00   :  { %15476 = vmatpush3.bf16.msra.mxu0 %v17005_v36 }
0x2c01   :  { %15477 = vmatprep.subr.bf16.mxu0 %v16813_v0 }
0x2c04   :  { %15479 = vmatpush3.bf16.msra.mxu0 %v17013_v42 }
0x2c05   :  { %15480 = vmatprep.subr.bf16.mxu0 %v16813_v0 }
0x2c08   :  { %15482 = vmatpush3.bf16.msra.mxu0 %v17021_v48 }
0x2c09   :  { %15483 = vmatprep.subr.bf16.mxu0 %v16813_v0 }
0x2c0c   :  { %15485 = vmatpush3.bf16.msra.mxu0 %v17029_v55 }
0x2c0d   :  { %15510 = vmatprep.subr.bf16.mxu0 %v16813_v0 }
0x2cc2   :  { %v4771_v8 = vpop.f32.mrb[52].mxu0 }
0x2cc3   :  { %v4775_v10 = vsub.f32 %v4704_v3, %v4771_v8  ;;  %v12328_v11 = vpop.f32.mrb[53].mxu0 }
0x2cc5   :  { %v4776_v15 = vadd.f32 %v4775_v10, %v18177_v62 }
0x2cc7   :  { %v4777_v16 = vmax.f32 %v4776_v15, 0.0 }
0x2cc9   :  { %v4778_v46 = vsub.f32 %v4777_v16, %v4701_v59 }
0x2ccb   :  { %v4779_v26 = vmul.f32 0.5987786, %v4778_v46 }
0x2ccd   :  { %v4780_v20 = vadd.f32 %v4779_v26, %v4777_v16 }
0x2ccf   :  { %12362 = vmatmul.mubr.f32.vlgmr.msra.gmra.mrb[60].mxu1 %v4780_v20 }
0x2cd0   :  { %15488 = vmatpush3.bf16.msra.mxu1 %v16974_v12  ;;  %12431 = vmatprep.mubr.msk.f32.mxu1 %vm16814_vm0, %v16815_v1 }
0x2cd1   :  { %15489 = vmatprep.subr.bf16.mxu1 %v16813_v0 }
0x2cd4   :  { %15491 = vmatpush3.bf16.msra.mxu1 %v16981_v18 }
0x2cd5   :  { %15492 = vmatprep.subr.bf16.mxu1 %v16813_v0 }
0x2cd8   :  { %15494 = vmatpush3.bf16.msra.mxu1 %v16989_v24 }
0x2cd9   :  { %15495 = vmatprep.subr.bf16.mxu1 %v16813_v0 }
0x2cdc   :  { %15497 = vmatpush3.bf16.msra.mxu1 %v16997_v30 }
0x2cdd   :  { %15498 = vmatprep.subr.bf16.mxu1 %v16813_v0 }
0x2ce0   :  { %15500 = vmatpush3.bf16.msra.mxu1 %v17005_v36 }
0x2ce1   :  { %15501 = vmatprep.subr.bf16.mxu1 %v16813_v0 }
0x2ce4   :  { %15503 = vmatpush3.bf16.msra.mxu1 %v17013_v42 }
0x2ce5   :  { %15504 = vmatprep.subr.bf16.mxu1 %v16813_v0 }
0x2ce8   :  { %15506 = vmatpush3.bf16.msra.mxu1 %v17021_v48 }
0x2ce9   :  { %15507 = vmatprep.subr.bf16.mxu1 %v16813_v0 }
0x2cec   :  { %15509 = vmatpush3.bf16.msra.mxu1 %v17029_v55 }
0x2ced   :  { %15534 = vmatprep.subr.bf16.mxu1 %v16813_v0 }
0x2da2   :  { %v4847_v23 = vpop.f32.mrb[60].mxu1 }
0x2da3   :  { %v4851_v28 = vsub.f32 %v4780_v20, %v4847_v23  ;;  %v12363_v29 = vpop.f32.mrb[61].mxu1 }
0x2da5   :  { %v4852_v34 = vadd.f32 %v4851_v28, %v18177_v62 }
0x2da7   :  { %v4853_v32 = vmax.f32 %v4852_v34, 0.0 }
0x2da9   :  { %v4854_v37 = vsub.f32 %v4853_v32, %v4777_v16 }
0x2dab   :  { %v4855_v38 = vmul.f32 0.64892334, %v4854_v37 }
0x2dad   :  { %v4856_v41 = vadd.f32 %v4855_v38, %v4853_v32 }
0x2daf   :  { %12397 = vmatmul.mubr.f32.vlgmr.msra.gmra.mrb[54].mxu0 %v4856_v41 }
0x2db0   :  { %15512 = vmatpush3.bf16.msra.mxu0 %v16974_v12  ;;  %12466 = vmatprep.mubr.msk.f32.mxu0 %vm16814_vm0, %v16815_v1 }
0x2db1   :  { %15513 = vmatprep.subr.bf16.mxu0 %v16813_v0 }
0x2db4   :  { %15515 = vmatpush3.bf16.msra.mxu0 %v16981_v18 }
0x2db5   :  { %15516 = vmatprep.subr.bf16.mxu0 %v16813_v0 }
0x2db8   :  { %15518 = vmatpush3.bf16.msra.mxu0 %v16989_v24 }
0x2db9   :  { %15519 = vmatprep.subr.bf16.mxu0 %v16813_v0 }
0x2dbc   :  { %15521 = vmatpush3.bf16.msra.mxu0 %v16997_v30 }
0x2dbd   :  { %15522 = vmatprep.subr.bf16.mxu0 %v16813_v0 }
0x2dc0   :  { %15524 = vmatpush3.bf16.msra.mxu0 %v17005_v36 }
0x2dc1   :  { %15525 = vmatprep.subr.bf16.mxu0 %v16813_v0 }
0x2dc4   :  { %15527 = vmatpush3.bf16.msra.mxu0 %v17013_v42 }
0x2dc5   :  { %15528 = vmatprep.subr.bf16.mxu0 %v16813_v0 }
0x2dc8   :  { %15530 = vmatpush3.bf16.msra.mxu0 %v17021_v48 }
0x2dc9   :  { %15531 = vmatprep.subr.bf16.mxu0 %v16813_v0 }
0x2dcc   :  { %15533 = vmatpush3.bf16.msra.mxu0 %v17029_v55 }
0x2dcd   :  { %15558 = vmatprep.subr.bf16.mxu0 %v16813_v0 }
0x2e82   :  { %v4923_v43 = vpop.f32.mrb[54].mxu0 }
0x2e83   :  { %v4927_v22 = vsub.f32 %v4856_v41, %v4923_v43  ;;  %v12398_v50 = vpop.f32.mrb[55].mxu0 }
0x2e85   :  { %v4928_v51 = vadd.f32 %v4927_v22, %v18177_v62 }
0x2e87   :  { %v4929_v53 = vmax.f32 %v4928_v51, 0.0 }
0x2e89   :  { %v4930_v54 = vsub.f32 %v4929_v53, %v4853_v32 }
0x2e8b   :  { %v4931_v47 = vmul.f32 0.68764585, %v4930_v54 }
0x2e8d   :  { %v4932_v57 = vadd.f32 %v4931_v47, %v4929_v53 }
0x2e8f   :  { %12432 = vmatmul.mubr.f32.vlgmr.msra.gmra.mrb[62].mxu1 %v4932_v57 }
0x2e90   :  { %15536 = vmatpush3.bf16.msra.mxu1 %v16974_v12  ;;  %12501 = vmatprep.mubr.msk.f32.mxu1 %vm16814_vm0, %v16815_v1 }
0x2e91   :  { %15537 = vmatprep.subr.bf16.mxu1 %v16813_v0 }
0x2e94   :  { %15539 = vmatpush3.bf16.msra.mxu1 %v16981_v18 }
0x2e95   :  { %15540 = vmatprep.subr.bf16.mxu1 %v16813_v0 }
0x2e98   :  { %15542 = vmatpush3.bf16.msra.mxu1 %v16989_v24 }
0x2e99   :  { %15543 = vmatprep.subr.bf16.mxu1 %v16813_v0 }
0x2e9c   :  { %15545 = vmatpush3.bf16.msra.mxu1 %v16997_v30 }
0x2e9d   :  { %15546 = vmatprep.subr.bf16.mxu1 %v16813_v0 }
0x2ea0   :  { %15548 = vmatpush3.bf16.msra.mxu1 %v17005_v36 }
0x2ea1   :  { %15549 = vmatprep.subr.bf16.mxu1 %v16813_v0 }
0x2ea4   :  { %15551 = vmatpush3.bf16.msra.mxu1 %v17013_v42 }
0x2ea5   :  { %15552 = vmatprep.subr.bf16.mxu1 %v16813_v0 }
0x2ea8   :  { %15554 = vmatpush3.bf16.msra.mxu1 %v17021_v48 }
0x2ea9   :  { %15555 = vmatprep.subr.bf16.mxu1 %v16813_v0 }
0x2eac   :  { %15557 = vmatpush3.bf16.msra.mxu1 %v17029_v55 }
0x2ead   :  { %15582 = vmatprep.subr.bf16.mxu1 %v16813_v0 }
0x2f62   :  { %v4999_v58 = vpop.f32.mrb[62].mxu1 }
0x2f63   :  { %v5003_v59 = vsub.f32 %v4932_v57, %v4999_v58  ;;  %v12433_v61 = vpop.f32.mrb[63].mxu1 }
0x2f65   :  { %v5004_v2 = vadd.f32 %v5003_v59, %v18177_v62 }
0x2f67   :  { %v5005_v3 = vmax.f32 %v5004_v2, 0.0 }
0x2f69   :  { %v5006_v8 = vsub.f32 %v5005_v3, %v4929_v53 }
0x2f6b   :  { %v5007_v10 = vmul.f32 0.71849984, %v5006_v8 }
0x2f6d   :  { %v5008_v11 = vadd.f32 %v5007_v10, %v5005_v3 }
0x2f6f   :  { %12467 = vmatmul.mubr.f32.vlgmr.msra.gmra.mrb[56].mxu0 %v5008_v11 }
0x2f70   :  { %15560 = vmatpush3.bf16.msra.mxu0 %v16974_v12  ;;  %12536 = vmatprep.mubr.msk.f32.mxu0 %vm16814_vm0, %v16815_v1 }
0x2f71   :  { %15561 = vmatprep.subr.bf16.mxu0 %v16813_v0 }
0x2f74   :  { %15563 = vmatpush3.bf16.msra.mxu0 %v16981_v18 }
0x2f75   :  { %15564 = vmatprep.subr.bf16.mxu0 %v16813_v0 }
0x2f78   :  { %15566 = vmatpush3.bf16.msra.mxu0 %v16989_v24 }
0x2f79   :  { %15567 = vmatprep.subr.bf16.mxu0 %v16813_v0 }
0x2f7c   :  { %15569 = vmatpush3.bf16.msra.mxu0 %v16997_v30 }
0x2f7d   :  { %15570 = vmatprep.subr.bf16.mxu0 %v16813_v0 }
0x2f80   :  { %15572 = vmatpush3.bf16.msra.mxu0 %v17005_v36 }
0x2f81   :  { %15573 = vmatprep.subr.bf16.mxu0 %v16813_v0 }
0x2f84   :  { %15575 = vmatpush3.bf16.msra.mxu0 %v17013_v42 }
0x2f85   :  { %15576 = vmatprep.subr.bf16.mxu0 %v16813_v0 }
0x2f88   :  { %15578 = vmatpush3.bf16.msra.mxu0 %v17021_v48 }
0x2f89   :  { %15579 = vmatprep.subr.bf16.mxu0 %v16813_v0 }
0x2f8c   :  { %15581 = vmatpush3.bf16.msra.mxu0 %v17029_v55 }
0x2f8d   :  { %15606 = vmatprep.subr.bf16.mxu0 %v16813_v0 }
0x3042   :  { %v5075_v15 = vpop.f32.mrb[56].mxu0 }
0x3043   :  { %v5079_v16 = vsub.f32 %v5008_v11, %v5075_v15  ;;  %v12468_v46 = vpop.f32.mrb[57].mxu0 }
0x3045   :  { %v5080_v26 = vadd.f32 %v5079_v16, %v18177_v62 }
0x3047   :  { %v5081_v20 = vmax.f32 %v5080_v26, 0.0 }
0x3049   :  { %v5082_v23 = vsub.f32 %v5081_v20, %v5005_v3 }
0x304b   :  { %v5083_v28 = vmul.f32 0.743691, %v5082_v23 }
0x304d   :  { %v5084_v29 = vadd.f32 %v5083_v28, %v5081_v20 }
0x304f   :  { %12502 = vmatmul.mubr.f32.vlgmr.msra.gmra.mrb[64].mxu1 %v5084_v29 }
0x3050   :  { %15584 = vmatpush3.bf16.msra.mxu1 %v16974_v12  ;;  %12571 = vmatprep.mubr.msk.f32.mxu1 %vm16814_vm0, %v16815_v1 }
0x3051   :  { %15585 = vmatprep.subr.bf16.mxu1 %v16813_v0 }
0x3054   :  { %15587 = vmatpush3.bf16.msra.mxu1 %v16981_v18 }
0x3055   :  { %15588 = vmatprep.subr.bf16.mxu1 %v16813_v0 }
0x3058   :  { %15590 = vmatpush3.bf16.msra.mxu1 %v16989_v24 }
0x3059   :  { %15591 = vmatprep.subr.bf16.mxu1 %v16813_v0 }
0x305c   :  { %15593 = vmatpush3.bf16.msra.mxu1 %v16997_v30 }
0x305d   :  { %15594 = vmatprep.subr.bf16.mxu1 %v16813_v0 }
0x3060   :  { %15596 = vmatpush3.bf16.msra.mxu1 %v17005_v36 }
0x3061   :  { %15597 = vmatprep.subr.bf16.mxu1 %v16813_v0 }
0x3064   :  { %15599 = vmatpush3.bf16.msra.mxu1 %v17013_v42 }
0x3065   :  { %15600 = vmatprep.subr.bf16.mxu1 %v16813_v0 }
0x3068   :  { %15602 = vmatpush3.bf16.msra.mxu1 %v17021_v48 }
0x3069   :  { %15603 = vmatprep.subr.bf16.mxu1 %v16813_v0 }
0x306c   :  { %15605 = vmatpush3.bf16.msra.mxu1 %v17029_v55 }
0x306d   :  { %15630 = vmatprep.subr.bf16.mxu1 %v16813_v0 }
0x3122   :  { %v5151_v34 = vpop.f32.mrb[64].mxu1 }
0x3123   :  { %v5155_v32 = vsub.f32 %v5084_v29, %v5151_v34  ;;  %v12503_v37 = vpop.f32.mrb[65].mxu1 }
0x3125   :  { %v5156_v38 = vadd.f32 %v5155_v32, %v18177_v62 }
0x3127   :  { %v5157_v41 = vmax.f32 %v5156_v38, 0.0 }
0x3129   :  { %v5158_v43 = vsub.f32 %v5157_v41, %v5081_v20 }
0x312b   :  { %v5159_v22 = vmul.f32 0.7646647, %v5158_v43 }
0x312d   :  { %v5160_v50 = vadd.f32 %v5159_v22, %v5157_v41 }
0x312f   :  { %12537 = vmatmul.mubr.f32.vlgmr.msra.gmra.mrb[58].mxu0 %v5160_v50 }
0x3130   :  { %15608 = vmatpush3.bf16.msra.mxu0 %v16974_v12  ;;  %12606 = vmatprep.mubr.msk.f32.mxu0 %vm16814_vm0, %v16815_v1 }
0x3131   :  { %15609 = vmatprep.subr.bf16.mxu0 %v16813_v0 }
0x3134   :  { %15611 = vmatpush3.bf16.msra.mxu0 %v16981_v18 }
0x3135   :  { %15612 = vmatprep.subr.bf16.mxu0 %v16813_v0 }
0x3138   :  { %15614 = vmatpush3.bf16.msra.mxu0 %v16989_v24 }
0x3139   :  { %15615 = vmatprep.subr.bf16.mxu0 %v16813_v0 }
0x313c   :  { %15617 = vmatpush3.bf16.msra.mxu0 %v16997_v30 }
0x313d   :  { %15618 = vmatprep.subr.bf16.mxu0 %v16813_v0 }
0x3140   :  { %15620 = vmatpush3.bf16.msra.mxu0 %v17005_v36 }
0x3141   :  { %15621 = vmatprep.subr.bf16.mxu0 %v16813_v0 }
0x3144   :  { %15623 = vmatpush3.bf16.msra.mxu0 %v17013_v42 }
0x3145   :  { %15624 = vmatprep.subr.bf16.mxu0 %v16813_v0 }
0x3148   :  { %15626 = vmatpush3.bf16.msra.mxu0 %v17021_v48 }
0x3149   :  { %15627 = vmatprep.subr.bf16.mxu0 %v16813_v0 }
0x314c   :  { %15629 = vmatpush3.bf16.msra.mxu0 %v17029_v55 }
0x314d   :  { %15654 = vmatprep.subr.bf16.mxu0 %v16813_v0 }
0x3202   :  { %v5227_v51 = vpop.f32.mrb[58].mxu0 }
0x3203   :  { %v5231_v53 = vsub.f32 %v5160_v50, %v5227_v51  ;;  %v12538_v54 = vpop.f32.mrb[59].mxu0 }
0x3205   :  { %v5232_v47 = vadd.f32 %v5231_v53, %v18177_v62 }
0x3207   :  { %v5233_v57 = vmax.f32 %v5232_v47, 0.0  ;;  %v5613_v47 = vld [vmem:[#allocation3 + $0x20] sm:$0xff] }
0x3209   :  { %v5234_v58 = vsub.f32 %v5233_v57, %v5157_v41 }
0x320b   :  { %v5235_v59 = vmul.f32 0.78240925, %v5234_v58 }
0x320d   :  { %v5236_v61 = vadd.f32 %v5235_v59, %v5233_v57 }
0x320f   :  { %12572 = vmatmul.mubr.f32.vlgmr.msra.gmra.mrb[66].mxu1 %v5236_v61 }
0x3210   :  { %15632 = vmatpush3.bf16.msra.mxu1 %v16974_v12  ;;  %12641 = vmatprep.mubr.msk.f32.mxu1 %vm16814_vm0, %v16815_v1 }
0x3211   :  { %15633 = vmatprep.subr.bf16.mxu1 %v16813_v0 }
0x3214   :  { %15635 = vmatpush3.bf16.msra.mxu1 %v16981_v18 }
0x3215   :  { %15636 = vmatprep.subr.bf16.mxu1 %v16813_v0 }
0x3218   :  { %15638 = vmatpush3.bf16.msra.mxu1 %v16989_v24 }
0x3219   :  { %15639 = vmatprep.subr.bf16.mxu1 %v16813_v0 }
0x321c   :  { %15641 = vmatpush3.bf16.msra.mxu1 %v16997_v30 }
0x321d   :  { %15642 = vmatprep.subr.bf16.mxu1 %v16813_v0 }
0x3220   :  { %15644 = vmatpush3.bf16.msra.mxu1 %v17005_v36 }
0x3221   :  { %15645 = vmatprep.subr.bf16.mxu1 %v16813_v0 }
0x3224   :  { %15647 = vmatpush3.bf16.msra.mxu1 %v17013_v42 }
0x3225   :  { %15648 = vmatprep.subr.bf16.mxu1 %v16813_v0 }
0x3228   :  { %15650 = vmatpush3.bf16.msra.mxu1 %v17021_v48 }
0x3229   :  { %15651 = vmatprep.subr.bf16.mxu1 %v16813_v0 }
0x322c   :  { %15653 = vmatpush3.bf16.msra.mxu1 %v17029_v55 }
0x322d   :  { %15678 = vmatprep.subr.bf16.mxu1 %v16813_v0 }
0x32e2   :  { %v5303_v2 = vpop.f32.mrb[66].mxu1 }
0x32e3   :  { %v5307_v3 = vsub.f32 %v5236_v61, %v5303_v2  ;;  %v12573_v8 = vpop.f32.mrb[67].mxu1 }
0x32e5   :  { %v5308_v10 = vadd.f32 %v5307_v3, %v18177_v62 }
0x32e7   :  { %v5309_v11 = vmax.f32 %v5308_v10, 0.0 }
0x32e9   :  { %v5310_v15 = vsub.f32 %v5309_v11, %v5233_v57 }
0x32eb   :  { %v5311_v16 = vmul.f32 0.7976244, %v5310_v15  ;;  %v18526_v15 = vld [vmem:[#allocation14] ss:$0 sm:$0xff] }
0x32ed   :  { %v5312_v46 = vadd.f32 %v5311_v16, %v5309_v11 }
0x32ef   :  { %12607 = vmatmul.mubr.f32.vlgmr.msra.gmra.mrb[60].mxu0 %v5312_v46 }
0x32f0   :  { %15656 = vmatpush3.bf16.msra.mxu0 %v16974_v12  ;;  %12676 = vmatprep.mubr.msk.f32.mxu0 %vm16814_vm0, %v16815_v1 }
0x32f1   :  { %15657 = vmatprep.subr.bf16.mxu0 %v16813_v0 }
0x32f4   :  { %15659 = vmatpush3.bf16.msra.mxu0 %v16981_v18 }
0x32f5   :  { %15660 = vmatprep.subr.bf16.mxu0 %v16813_v0 }
0x32f8   :  { %15662 = vmatpush3.bf16.msra.mxu0 %v16989_v24 }
0x32f9   :  { %15663 = vmatprep.subr.bf16.mxu0 %v16813_v0 }
0x32fc   :  { %15665 = vmatpush3.bf16.msra.mxu0 %v16997_v30 }
0x32fd   :  { %15666 = vmatprep.subr.bf16.mxu0 %v16813_v0 }
0x3300   :  { %15668 = vmatpush3.bf16.msra.mxu0 %v17005_v36 }
0x3301   :  { %15669 = vmatprep.subr.bf16.mxu0 %v16813_v0 }
0x3304   :  { %15671 = vmatpush3.bf16.msra.mxu0 %v17013_v42 }
0x3305   :  { %15672 = vmatprep.subr.bf16.mxu0 %v16813_v0 }
0x3308   :  { %15674 = vmatpush3.bf16.msra.mxu0 %v17021_v48 }
0x3309   :  { %15675 = vmatprep.subr.bf16.mxu0 %v16813_v0 }
0x330c   :  { %15677 = vmatpush3.bf16.msra.mxu0 %v17029_v55 }
0x330d   :  { %15702 = vmatprep.subr.bf16.mxu0 %v16813_v0 }
0x33c2   :  { %v5379_v26 = vpop.f32.mrb[60].mxu0 }
0x33c3   :  { %v5383_v20 = vsub.f32 %v5312_v46, %v5379_v26  ;;  %v12608_v23 = vpop.f32.mrb[61].mxu0 }
0x33c5   :  { %v5384_v28 = vadd.f32 %v5383_v20, %v18177_v62 }
0x33c7   :  { %v5385_v29 = vmax.f32 %v5384_v28, 0.0 }
0x33c9   :  { %v5386_v34 = vsub.f32 %v5385_v29, %v5309_v11 }
0x33cb   :  { %v5387_v32 = vmul.f32 0.81082, %v5386_v34 }
0x33cd   :  { %v5388_v37 = vadd.f32 %v5387_v32, %v5385_v29 }
0x33cf   :  { %12642 = vmatmul.mubr.f32.vlgmr.msra.gmra.mrb[68].mxu1 %v5388_v37 }
0x33d0   :  { %15680 = vmatpush3.bf16.msra.mxu1 %v17344_v19  ;;  %12711 = vmatprep.mubr.msk.f32.mxu1 %vm16814_vm0, %v16815_v1 }
0x33d1   :  { %15681 = vmatprep.subr.bf16.mxu1 %v16813_v0 }
0x33d4   :  { %15683 = vmatpush3.bf16.msra.mxu1 %v17348_v25 }
0x33d5   :  { %15684 = vmatprep.subr.bf16.mxu1 %v16813_v0 }
0x33d8   :  { %15686 = vmatpush3.bf16.msra.mxu1 %v17352_v31 }
0x33d9   :  { %15687 = vmatprep.subr.bf16.mxu1 %v16813_v0 }
0x33dc   :  { %15689 = vmatpush3.bf16.msra.mxu1 %v17356_v35 }
0x33dd   :  { %15690 = vmatprep.subr.bf16.mxu1 %v16813_v0 }
0x33e0   :  { %15692 = vmatpush3.bf16.msra.mxu1 %v17360_v40 }
0x33e1   :  { %15693 = vmatprep.subr.bf16.mxu1 %v16813_v0 }
0x33e4   :  { %15695 = vmatpush3.bf16.msra.mxu1 %v17364_v44 }
0x33e5   :  { %15696 = vmatprep.subr.bf16.mxu1 %v16813_v0 }
0x33e8   :  { %15698 = vmatpush3.bf16.msra.mxu1 %v17368_v49 }
0x33e9   :  { %15699 = vmatprep.subr.bf16.mxu1 %v16813_v0 }
0x33ec   :  { %15701 = vmatpush3.bf16.msra.mxu1 %v17409_v6 }
0x33ed   :  { %15750 = vmatprep.subr.bf16.mxu1 %v16813_v0 }
0x34a2   :  { %v5455_v38 = vpop.f32.mrb[68].mxu1 }
0x34a3   :  { %v5459_v41 = vsub.f32 %v5388_v37, %v5455_v38  ;;  %v12643_v43 = vpop.f32.mrb[69].mxu1 }
0x34a5   :  { %v5460_v22 = vadd.f32 %v5459_v41, %v18177_v62 }
0x34a7   :  { %v5461_v50 = vmax.f32 %v5460_v22, 0.0 }
0x34a9   :  { %v5462_v51 = vsub.f32 %v5461_v50, %v5385_v29 }
0x34ab   :  { %v5463_v53 = vmul.f32 0.82237667, %v5462_v51 }
0x34ad   :  { %v5464_v54 = vadd.f32 %v5463_v53, %v5461_v50 }
0x34af   :  { %12677 = vmatmul.mubr.f32.vlgmr.msra.gmra.mrb[62].mxu0 %v5464_v54 }
0x34b0   :  { %15704 = vmatpush3.bf16.msra.mxu0 %v16968_v5  ;;  %12746 = vmatprep.mubr.msk.f32.mxu0 %vm16814_vm0, %v16815_v1 }
0x34b1   :  { %15705 = vmatprep.subr.bf16.mxu0 %v16813_v0 }
0x34b4   :  { %15707 = vmatpush3.bf16.msra.mxu0 %v16971_v7 }
0x34b5   :  { %15708 = vmatprep.subr.bf16.mxu0 %v16813_v0 }
0x34b8   :  { %15710 = vmatpush3.bf16.msra.mxu0 %v16977_v13 }
0x34b9   :  { %15711 = vmatprep.subr.bf16.mxu0 %v16813_v0 }
0x34bc   :  { %15713 = vmatpush3.bf16.msra.mxu0 %v16985_v21 }
0x34bd   :  { %15714 = vmatprep.subr.bf16.mxu0 %v16813_v0 }
0x34c0   :  { %15716 = vmatpush3.bf16.msra.mxu0 %v16993_v27 }
0x34c1   :  { %15717 = vmatprep.subr.bf16.mxu0 %v16813_v0 }
0x34c4   :  { %15719 = vmatpush3.bf16.msra.mxu0 %v17001_v33 }
0x34c5   :  { %15720 = vmatprep.subr.bf16.mxu0 %v16813_v0 }
0x34c8   :  { %15722 = vmatpush3.bf16.msra.mxu0 %v17009_v39 }
0x34c9   :  { %15723 = vmatprep.subr.bf16.mxu0 %v16813_v0 }
0x34cc   :  { %15725 = vmatpush3.bf16.msra.mxu0 %v17017_v45 }
0x34cd   :  { %15726 = vmatprep.subr.bf16.mxu0 %v16813_v0 }
0x34cf   :  { %12747 = vmatmul.mubr.f32.vlgmr.msra.gmra.mrb[64].mxu0 %v5613_v47 }
0x34d0   :  { %15728 = vmatpush3.bf16.msra.mxu0 %v17025_v52  ;;  %12781 = vmatprep.mubr.msk.f32.mxu0 %vm16814_vm0, %v16815_v1 }
0x34d1   :  { %15729 = vmatprep.subr.bf16.mxu0 %v16813_v0 }
0x34d4   :  { %15731 = vmatpush3.bf16.msra.mxu0 %v17033_v56 }
0x34d5   :  { %15732 = vmatprep.subr.bf16.mxu0 %v16813_v0 }
0x34d8   :  { %15734 = vmatpush3.bf16.msra.mxu0 %v17043_v60 }
0x34d9   :  { %15735 = vmatprep.subr.bf16.mxu0 %v16813_v0 }
0x34dc   :  { %15737 = vmatpush3.bf16.msra.mxu0 %v17052_v63 }
0x34dd   :  { %15738 = vmatprep.subr.bf16.mxu0 %v16813_v0 }
0x34e0   :  { %15740 = vmatpush3.bf16.msra.mxu0 %v17058_v4 }
0x34e1   :  { %15741 = vmatprep.subr.bf16.mxu0 %v16813_v0 }
0x34e4   :  { %15743 = vmatpush3.bf16.msra.mxu0 %v17064_v9 }
0x34e5   :  { %15744 = vmatprep.subr.bf16.mxu0 %v16813_v0 }
0x34e8   :  { %15746 = vmatpush3.bf16.msra.mxu0 %v17070_v14 }
0x34e9   :  { %15747 = vmatprep.subr.bf16.mxu0 %v16813_v0 }
0x34ec   :  { %15749 = vmatpush3.bf16.msra.mxu0 %v17076_v17 }
0x34ed   :  { %15798 = vmatprep.subr.bf16.mxu0 %v16813_v0 }
0x3582   :  { %v5531_v57 = vpop.f32.mrb[62].mxu0 }
0x3583   :  { %v5535_v58 = vsub.f32 %v5464_v54, %v5531_v57  ;;  %v12678_v59 = vpop.f32.mrb[63].mxu0 }
0x3585   :  { %v5536_v61 = vadd.f32 %v5535_v58, %v18177_v62 }
0x3587   :  { %v18466_v2 = vmax.f32 %v5536_v61, 0.0 }
0x3589   :  { %5539 = vst [vmem:[#allocation16 + $0x18] sm:$0xff] %v18466_v2  ;;  %12712 = vmatmul.mubr.f32.vlgmr.msra.gmra.mrb[70].mxu1 %v18466_v2  ;;  %12782 = vmatmul.mubr.f32.vlgmr.msra.gmra.mrb[64].mxu0 %v18466_v2 }
0x358a   :  { %15752 = vmatpush3.bf16.msra.mxu1 %v16974_v12  ;;  %12816 = vmatprep.mubr.msk.f32.mxu1 %vm16814_vm0, %v16815_v1 }
0x358b   :  { %15753 = vmatprep.subr.bf16.mxu1 %v16813_v0  ;;  %15800 = vmatpush3.bf16.msra.mxu0 %v16974_v12 }
0x358c   :  { %15801 = vmatprep.subr.bf16.mxu0 %v16813_v0  ;;  %12886 = vmatprep.mubr.msk.f32.mxu0 %vm16814_vm0, %v16815_v1 }
0x358e   :  { %15755 = vmatpush3.bf16.msra.mxu1 %v16981_v18 }
0x358f   :  { %15756 = vmatprep.subr.bf16.mxu1 %v16813_v0  ;;  %15803 = vmatpush3.bf16.msra.mxu0 %v16981_v18 }
0x3590   :  { %15804 = vmatprep.subr.bf16.mxu0 %v16813_v0 }
0x3592   :  { %15758 = vmatpush3.bf16.msra.mxu1 %v16989_v24 }
0x3593   :  { %15759 = vmatprep.subr.bf16.mxu1 %v16813_v0  ;;  %15806 = vmatpush3.bf16.msra.mxu0 %v16989_v24 }
0x3594   :  { %15807 = vmatprep.subr.bf16.mxu0 %v16813_v0 }
0x3596   :  { %15761 = vmatpush3.bf16.msra.mxu1 %v16997_v30 }
0x3597   :  { %15762 = vmatprep.subr.bf16.mxu1 %v16813_v0  ;;  %15809 = vmatpush3.bf16.msra.mxu0 %v16997_v30 }
0x3598   :  { %15810 = vmatprep.subr.bf16.mxu0 %v16813_v0 }
0x359a   :  { %15764 = vmatpush3.bf16.msra.mxu1 %v17005_v36 }
0x359b   :  { %15765 = vmatprep.subr.bf16.mxu1 %v16813_v0  ;;  %15812 = vmatpush3.bf16.msra.mxu0 %v17005_v36 }
0x359c   :  { %15813 = vmatprep.subr.bf16.mxu0 %v16813_v0 }
0x359e   :  { %15767 = vmatpush3.bf16.msra.mxu1 %v17013_v42 }
0x359f   :  { %15768 = vmatprep.subr.bf16.mxu1 %v16813_v0  ;;  %15815 = vmatpush3.bf16.msra.mxu0 %v17013_v42 }
0x35a0   :  { %15816 = vmatprep.subr.bf16.mxu0 %v16813_v0 }
0x35a2   :  { %15770 = vmatpush3.bf16.msra.mxu1 %v17021_v48 }
0x35a3   :  { %15771 = vmatprep.subr.bf16.mxu1 %v16813_v0  ;;  %15818 = vmatpush3.bf16.msra.mxu0 %v17021_v48 }
0x35a4   :  { %15819 = vmatprep.subr.bf16.mxu0 %v16813_v0 }
0x35a6   :  { %15773 = vmatpush3.bf16.msra.mxu1 %v17029_v55 }
0x35a7   :  { %15774 = vmatprep.subr.bf16.mxu1 %v16813_v0  ;;  %15821 = vmatpush3.bf16.msra.mxu0 %v17029_v55 }
0x35a8   :  { %15846 = vmatprep.subr.bf16.mxu0 %v16813_v0 }
0x35a9   :  { %12817 = vmatmul.mubr.f32.vlgmr.msra.gmra.mrb[72].mxu1 %v18466_v2 }
0x35aa   :  { %15776 = vmatpush3.bf16.msra.mxu1 %v16974_v12  ;;  %12851 = vmatprep.mubr.msk.f32.mxu1 %vm16814_vm0, %v16815_v1 }
0x35ab   :  { %15777 = vmatprep.subr.bf16.mxu1 %v16813_v0 }
0x35ae   :  { %15779 = vmatpush3.bf16.msra.mxu1 %v16981_v18 }
0x35af   :  { %15780 = vmatprep.subr.bf16.mxu1 %v16813_v0 }
0x35b2   :  { %15782 = vmatpush3.bf16.msra.mxu1 %v16989_v24 }
0x35b3   :  { %15783 = vmatprep.subr.bf16.mxu1 %v16813_v0 }
0x35b6   :  { %15785 = vmatpush3.bf16.msra.mxu1 %v16997_v30 }
0x35b7   :  { %15786 = vmatprep.subr.bf16.mxu1 %v16813_v0 }
0x35ba   :  { %15788 = vmatpush3.bf16.msra.mxu1 %v17005_v36 }
0x35bb   :  { %15789 = vmatprep.subr.bf16.mxu1 %v16813_v0 }
0x35be   :  { %15791 = vmatpush3.bf16.msra.mxu1 %v17013_v42 }
0x35bf   :  { %15792 = vmatprep.subr.bf16.mxu1 %v16813_v0 }
0x35c2   :  { %15794 = vmatpush3.bf16.msra.mxu1 %v17021_v48 }
0x35c3   :  { %15795 = vmatprep.subr.bf16.mxu1 %v16813_v0 }
0x35c6   :  { %15797 = vmatpush3.bf16.msra.mxu1 %v17029_v55 }
0x35c7   :  { %15822 = vmatprep.subr.bf16.mxu1 %v16813_v0 }
0x365c   :  { %v5606_v62 = vpop.f32.mrb[70].mxu1  ;;  %v5750_v3 = vpop.f32.mrb[64].mxu0 }
0x365d   :  { %5611 = vst [vmem:[#allocation15 + $0x18] sm:$0xff] %v5606_v62  ;;  %v12713_v8 = vpop.f32.mrb[71].mxu1  ;;  %v12783_v10 = vpop.f32.mrb[65].mxu0  ;;  %v18529_v16 = vsub.f32 %v5750_v3, %v18526_v15 }
0x367c   :  { %v5821_v11 = vpop.f32.mrb[72].mxu1 }
0x367d   :  { %v5825_v46 = vsub.f32 %v18466_v2, %v5821_v11  ;;  %v12818_v26 = vpop.f32.mrb[73].mxu1 }
0x367f   :  { %v5826_v20 = vadd.f32 %v5825_v46, %v18529_v16 }
0x3681   :  { %v5827_v23 = vmax.f32 %v5826_v20, 0.0 }
0x3683   :  { %v5828_v28 = vsub.f32 %v5827_v23, %v18466_v2 }
0x3685   :  { %v5829_v29 = vmul.f32 0.0, %v5828_v28 }
0x3687   :  { %v5830_v34 = vadd.f32 %v5829_v29, %v5827_v23 }
0x3689   :  { %12852 = vmatmul.mubr.f32.vlgmr.msra.gmra.mrb[74].mxu1 %v5830_v34 }
0x368a   :  { %15824 = vmatpush3.bf16.msra.mxu1 %v16974_v12  ;;  %12921 = vmatprep.mubr.msk.f32.mxu1 %vm16814_vm0, %v16815_v1 }
0x368b   :  { %15825 = vmatprep.subr.bf16.mxu1 %v16813_v0 }
0x368e   :  { %15827 = vmatpush3.bf16.msra.mxu1 %v16981_v18 }
0x368f   :  { %15828 = vmatprep.subr.bf16.mxu1 %v16813_v0 }
0x3692   :  { %15830 = vmatpush3.bf16.msra.mxu1 %v16989_v24 }
0x3693   :  { %15831 = vmatprep.subr.bf16.mxu1 %v16813_v0 }
0x3696   :  { %15833 = vmatpush3.bf16.msra.mxu1 %v16997_v30 }
0x3697   :  { %15834 = vmatprep.subr.bf16.mxu1 %v16813_v0 }
0x369a   :  { %15836 = vmatpush3.bf16.msra.mxu1 %v17005_v36 }
0x369b   :  { %15837 = vmatprep.subr.bf16.mxu1 %v16813_v0 }
0x369e   :  { %15839 = vmatpush3.bf16.msra.mxu1 %v17013_v42 }
0x369f   :  { %15840 = vmatprep.subr.bf16.mxu1 %v16813_v0 }
0x36a2   :  { %15842 = vmatpush3.bf16.msra.mxu1 %v17021_v48 }
0x36a3   :  { %15843 = vmatprep.subr.bf16.mxu1 %v16813_v0 }
0x36a6   :  { %15845 = vmatpush3.bf16.msra.mxu1 %v17029_v55 }
0x36a7   :  { %15870 = vmatprep.subr.bf16.mxu1 %v16813_v0 }
0x375c   :  { %v5897_v32 = vpop.f32.mrb[74].mxu1 }
0x375d   :  { %v5901_v37 = vsub.f32 %v5830_v34, %v5897_v32  ;;  %v12853_v38 = vpop.f32.mrb[75].mxu1 }
0x375f   :  { %v5902_v41 = vadd.f32 %v5901_v37, %v18529_v16 }
0x3761   :  { %v5903_v43 = vmax.f32 %v5902_v41, 0.0 }
0x3763   :  { %v5904_v22 = vsub.f32 %v5903_v43, %v5827_v23 }
0x3765   :  { %v5905_v50 = vmul.f32 0.2817535, %v5904_v22 }
0x3767   :  { %v5906_v51 = vadd.f32 %v5905_v50, %v5903_v43 }
0x3769   :  { %12887 = vmatmul.mubr.f32.vlgmr.msra.gmra.mrb[66].mxu0 %v5906_v51 }
0x376a   :  { %15848 = vmatpush3.bf16.msra.mxu0 %v16974_v12  ;;  %12956 = vmatprep.mubr.msk.f32.mxu0 %vm16814_vm0, %v16815_v1 }
0x376b   :  { %15849 = vmatprep.subr.bf16.mxu0 %v16813_v0 }
0x376e   :  { %15851 = vmatpush3.bf16.msra.mxu0 %v16981_v18 }
0x376f   :  { %15852 = vmatprep.subr.bf16.mxu0 %v16813_v0 }
0x3772   :  { %15854 = vmatpush3.bf16.msra.mxu0 %v16989_v24 }
0x3773   :  { %15855 = vmatprep.subr.bf16.mxu0 %v16813_v0 }
0x3776   :  { %15857 = vmatpush3.bf16.msra.mxu0 %v16997_v30 }
0x3777   :  { %15858 = vmatprep.subr.bf16.mxu0 %v16813_v0 }
0x377a   :  { %15860 = vmatpush3.bf16.msra.mxu0 %v17005_v36 }
0x377b   :  { %15861 = vmatprep.subr.bf16.mxu0 %v16813_v0 }
0x377e   :  { %15863 = vmatpush3.bf16.msra.mxu0 %v17013_v42 }
0x377f   :  { %15864 = vmatprep.subr.bf16.mxu0 %v16813_v0 }
0x3782   :  { %15866 = vmatpush3.bf16.msra.mxu0 %v17021_v48 }
0x3783   :  { %15867 = vmatprep.subr.bf16.mxu0 %v16813_v0 }
0x3786   :  { %15869 = vmatpush3.bf16.msra.mxu0 %v17029_v55 }
0x3787   :  { %15894 = vmatprep.subr.bf16.mxu0 %v16813_v0 }
0x383c   :  { %v5973_v53 = vpop.f32.mrb[66].mxu0 }
0x383d   :  { %v5977_v54 = vsub.f32 %v5906_v51, %v5973_v53  ;;  %v12888_v47 = vpop.f32.mrb[67].mxu0 }
0x383f   :  { %v5978_v57 = vadd.f32 %v5977_v54, %v18529_v16 }
0x3841   :  { %v5979_v58 = vmax.f32 %v5978_v57, 0.0 }
0x3843   :  { %v5980_v59 = vsub.f32 %v5979_v58, %v5903_v43 }
0x3845   :  { %v5981_v61 = vmul.f32 0.43404278, %v5980_v59 }
0x3847   :  { %v5982_v2 = vadd.f32 %v5981_v61, %v5979_v58 }
0x3849   :  { %12922 = vmatmul.mubr.f32.vlgmr.msra.gmra.mrb[76].mxu1 %v5982_v2 }
0x384a   :  { %15872 = vmatpush3.bf16.msra.mxu1 %v16974_v12  ;;  %12991 = vmatprep.mubr.msk.f32.mxu1 %vm16814_vm0, %v16815_v1 }
0x384b   :  { %15873 = vmatprep.subr.bf16.mxu1 %v16813_v0 }
0x384e   :  { %15875 = vmatpush3.bf16.msra.mxu1 %v16981_v18 }
0x384f   :  { %15876 = vmatprep.subr.bf16.mxu1 %v16813_v0 }
0x3852   :  { %15878 = vmatpush3.bf16.msra.mxu1 %v16989_v24 }
0x3853   :  { %15879 = vmatprep.subr.bf16.mxu1 %v16813_v0 }
0x3856   :  { %15881 = vmatpush3.bf16.msra.mxu1 %v16997_v30 }
0x3857   :  { %15882 = vmatprep.subr.bf16.mxu1 %v16813_v0 }
0x385a   :  { %15884 = vmatpush3.bf16.msra.mxu1 %v17005_v36 }
0x385b   :  { %15885 = vmatprep.subr.bf16.mxu1 %v16813_v0 }
0x385e   :  { %15887 = vmatpush3.bf16.msra.mxu1 %v17013_v42 }
0x385f   :  { %15888 = vmatprep.subr.bf16.mxu1 %v16813_v0 }
0x3862   :  { %15890 = vmatpush3.bf16.msra.mxu1 %v17021_v48 }
0x3863   :  { %15891 = vmatprep.subr.bf16.mxu1 %v16813_v0 }
0x3866   :  { %15893 = vmatpush3.bf16.msra.mxu1 %v17029_v55 }
0x3867   :  { %15918 = vmatprep.subr.bf16.mxu1 %v16813_v0 }
0x391c   :  { %v6049_v62 = vpop.f32.mrb[76].mxu1 }
0x391d   :  { %v6053_v3 = vsub.f32 %v5982_v2, %v6049_v62  ;;  %v12923_v8 = vpop.f32.mrb[77].mxu1 }
0x391f   :  { %v6054_v10 = vadd.f32 %v6053_v3, %v18529_v16 }
0x3921   :  { %v6055_v11 = vmax.f32 %v6054_v10, 0.0 }
0x3923   :  { %v6056_v46 = vsub.f32 %v6055_v11, %v5979_v58 }
0x3925   :  { %v6057_v26 = vmul.f32 0.5310638, %v6056_v46 }
0x3927   :  { %v6058_v20 = vadd.f32 %v6057_v26, %v6055_v11 }
0x3929   :  { %12957 = vmatmul.mubr.f32.vlgmr.msra.gmra.mrb[68].mxu0 %v6058_v20 }
0x392a   :  { %15896 = vmatpush3.bf16.msra.mxu0 %v16974_v12  ;;  %13026 = vmatprep.mubr.msk.f32.mxu0 %vm16814_vm0, %v16815_v1 }
0x392b   :  { %15897 = vmatprep.subr.bf16.mxu0 %v16813_v0 }
0x392e   :  { %15899 = vmatpush3.bf16.msra.mxu0 %v16981_v18 }
0x392f   :  { %15900 = vmatprep.subr.bf16.mxu0 %v16813_v0 }
0x3932   :  { %15902 = vmatpush3.bf16.msra.mxu0 %v16989_v24 }
0x3933   :  { %15903 = vmatprep.subr.bf16.mxu0 %v16813_v0 }
0x3936   :  { %15905 = vmatpush3.bf16.msra.mxu0 %v16997_v30 }
0x3937   :  { %15906 = vmatprep.subr.bf16.mxu0 %v16813_v0 }
0x393a   :  { %15908 = vmatpush3.bf16.msra.mxu0 %v17005_v36 }
0x393b   :  { %15909 = vmatprep.subr.bf16.mxu0 %v16813_v0 }
0x393e   :  { %15911 = vmatpush3.bf16.msra.mxu0 %v17013_v42 }
0x393f   :  { %15912 = vmatprep.subr.bf16.mxu0 %v16813_v0 }
0x3942   :  { %15914 = vmatpush3.bf16.msra.mxu0 %v17021_v48 }
0x3943   :  { %15915 = vmatprep.subr.bf16.mxu0 %v16813_v0 }
0x3946   :  { %15917 = vmatpush3.bf16.msra.mxu0 %v17029_v55 }
0x3947   :  { %15942 = vmatprep.subr.bf16.mxu0 %v16813_v0 }
0x39fc   :  { %v6125_v23 = vpop.f32.mrb[68].mxu0 }
0x39fd   :  { %v6129_v28 = vsub.f32 %v6058_v20, %v6125_v23  ;;  %v12958_v29 = vpop.f32.mrb[69].mxu0 }
0x39ff   :  { %v6130_v34 = vadd.f32 %v6129_v28, %v18529_v16 }
0x3a01   :  { %v6131_v32 = vmax.f32 %v6130_v34, 0.0 }
0x3a03   :  { %v6132_v37 = vsub.f32 %v6131_v32, %v6055_v11 }
0x3a05   :  { %v6133_v38 = vmul.f32 0.5987786, %v6132_v37 }
0x3a07   :  { %v6134_v41 = vadd.f32 %v6133_v38, %v6131_v32 }
0x3a09   :  { %12992 = vmatmul.mubr.f32.vlgmr.msra.gmra.mrb[78].mxu1 %v6134_v41 }
0x3a0a   :  { %15920 = vmatpush3.bf16.msra.mxu1 %v16974_v12  ;;  %13061 = vmatprep.mubr.msk.f32.mxu1 %vm16814_vm0, %v16815_v1 }
0x3a0b   :  { %15921 = vmatprep.subr.bf16.mxu1 %v16813_v0 }
0x3a0e   :  { %15923 = vmatpush3.bf16.msra.mxu1 %v16981_v18 }
0x3a0f   :  { %15924 = vmatprep.subr.bf16.mxu1 %v16813_v0 }
0x3a12   :  { %15926 = vmatpush3.bf16.msra.mxu1 %v16989_v24 }
0x3a13   :  { %15927 = vmatprep.subr.bf16.mxu1 %v16813_v0 }
0x3a16   :  { %15929 = vmatpush3.bf16.msra.mxu1 %v16997_v30 }
0x3a17   :  { %15930 = vmatprep.subr.bf16.mxu1 %v16813_v0 }
0x3a1a   :  { %15932 = vmatpush3.bf16.msra.mxu1 %v17005_v36 }
0x3a1b   :  { %15933 = vmatprep.subr.bf16.mxu1 %v16813_v0 }
0x3a1e   :  { %15935 = vmatpush3.bf16.msra.mxu1 %v17013_v42 }
0x3a1f   :  { %15936 = vmatprep.subr.bf16.mxu1 %v16813_v0 }
0x3a22   :  { %15938 = vmatpush3.bf16.msra.mxu1 %v17021_v48 }
0x3a23   :  { %15939 = vmatprep.subr.bf16.mxu1 %v16813_v0 }
0x3a26   :  { %15941 = vmatpush3.bf16.msra.mxu1 %v17029_v55 }
0x3a27   :  { %15966 = vmatprep.subr.bf16.mxu1 %v16813_v0 }
0x3adc   :  { %v6201_v43 = vpop.f32.mrb[78].mxu1 }
0x3add   :  { %v6205_v22 = vsub.f32 %v6134_v41, %v6201_v43  ;;  %v12993_v50 = vpop.f32.mrb[79].mxu1 }
0x3adf   :  { %v6206_v51 = vadd.f32 %v6205_v22, %v18529_v16 }
0x3ae1   :  { %v6207_v53 = vmax.f32 %v6206_v51, 0.0 }
0x3ae3   :  { %v6208_v54 = vsub.f32 %v6207_v53, %v6131_v32 }
0x3ae5   :  { %v6209_v47 = vmul.f32 0.64892334, %v6208_v54 }
0x3ae7   :  { %v6210_v57 = vadd.f32 %v6209_v47, %v6207_v53 }
0x3ae9   :  { %13027 = vmatmul.mubr.f32.vlgmr.msra.gmra.mrb[70].mxu0 %v6210_v57 }
0x3aea   :  { %15944 = vmatpush3.bf16.msra.mxu0 %v16974_v12  ;;  %13096 = vmatprep.mubr.msk.f32.mxu0 %vm16814_vm0, %v16815_v1 }
0x3aeb   :  { %15945 = vmatprep.subr.bf16.mxu0 %v16813_v0 }
0x3aee   :  { %15947 = vmatpush3.bf16.msra.mxu0 %v16981_v18 }
0x3aef   :  { %15948 = vmatprep.subr.bf16.mxu0 %v16813_v0 }
0x3af2   :  { %15950 = vmatpush3.bf16.msra.mxu0 %v16989_v24 }
0x3af3   :  { %15951 = vmatprep.subr.bf16.mxu0 %v16813_v0 }
0x3af6   :  { %15953 = vmatpush3.bf16.msra.mxu0 %v16997_v30 }
0x3af7   :  { %15954 = vmatprep.subr.bf16.mxu0 %v16813_v0 }
0x3afa   :  { %15956 = vmatpush3.bf16.msra.mxu0 %v17005_v36 }
0x3afb   :  { %15957 = vmatprep.subr.bf16.mxu0 %v16813_v0 }
0x3afe   :  { %15959 = vmatpush3.bf16.msra.mxu0 %v17013_v42 }
0x3aff   :  { %15960 = vmatprep.subr.bf16.mxu0 %v16813_v0 }
0x3b02   :  { %15962 = vmatpush3.bf16.msra.mxu0 %v17021_v48 }
0x3b03   :  { %15963 = vmatprep.subr.bf16.mxu0 %v16813_v0 }
0x3b06   :  { %15965 = vmatpush3.bf16.msra.mxu0 %v17029_v55 }
0x3b07   :  { %15990 = vmatprep.subr.bf16.mxu0 %v16813_v0 }
0x3bbc   :  { %v6277_v58 = vpop.f32.mrb[70].mxu0 }
0x3bbd   :  { %v6281_v59 = vsub.f32 %v6210_v57, %v6277_v58  ;;  %v13028_v61 = vpop.f32.mrb[71].mxu0 }
0x3bbf   :  { %v6282_v2 = vadd.f32 %v6281_v59, %v18529_v16 }
0x3bc1   :  { %v6283_v62 = vmax.f32 %v6282_v2, 0.0 }
0x3bc3   :  { %v6284_v3 = vsub.f32 %v6283_v62, %v6207_v53 }
0x3bc5   :  { %v6285_v8 = vmul.f32 0.68764585, %v6284_v3 }
0x3bc7   :  { %v6286_v10 = vadd.f32 %v6285_v8, %v6283_v62 }
0x3bc9   :  { %13062 = vmatmul.mubr.f32.vlgmr.msra.gmra.mrb[80].mxu1 %v6286_v10 }
0x3bca   :  { %15968 = vmatpush3.bf16.msra.mxu1 %v16974_v12  ;;  %13131 = vmatprep.mubr.msk.f32.mxu1 %vm16814_vm0, %v16815_v1 }
0x3bcb   :  { %15969 = vmatprep.subr.bf16.mxu1 %v16813_v0 }
0x3bce   :  { %15971 = vmatpush3.bf16.msra.mxu1 %v16981_v18 }
0x3bcf   :  { %15972 = vmatprep.subr.bf16.mxu1 %v16813_v0 }
0x3bd2   :  { %15974 = vmatpush3.bf16.msra.mxu1 %v16989_v24 }
0x3bd3   :  { %15975 = vmatprep.subr.bf16.mxu1 %v16813_v0 }
0x3bd6   :  { %15977 = vmatpush3.bf16.msra.mxu1 %v16997_v30 }
0x3bd7   :  { %15978 = vmatprep.subr.bf16.mxu1 %v16813_v0 }
0x3bda   :  { %15980 = vmatpush3.bf16.msra.mxu1 %v17005_v36 }
0x3bdb   :  { %15981 = vmatprep.subr.bf16.mxu1 %v16813_v0 }
0x3bde   :  { %15983 = vmatpush3.bf16.msra.mxu1 %v17013_v42 }
0x3bdf   :  { %15984 = vmatprep.subr.bf16.mxu1 %v16813_v0 }
0x3be2   :  { %15986 = vmatpush3.bf16.msra.mxu1 %v17021_v48 }
0x3be3   :  { %15987 = vmatprep.subr.bf16.mxu1 %v16813_v0 }
0x3be6   :  { %15989 = vmatpush3.bf16.msra.mxu1 %v17029_v55 }
0x3be7   :  { %16014 = vmatprep.subr.bf16.mxu1 %v16813_v0 }
0x3c9c   :  { %v6353_v11 = vpop.f32.mrb[80].mxu1 }
0x3c9d   :  { %v6357_v46 = vsub.f32 %v6286_v10, %v6353_v11  ;;  %v13063_v26 = vpop.f32.mrb[81].mxu1 }
0x3c9f   :  { %v6358_v20 = vadd.f32 %v6357_v46, %v18529_v16 }
0x3ca1   :  { %v6359_v23 = vmax.f32 %v6358_v20, 0.0 }
0x3ca3   :  { %v6360_v28 = vsub.f32 %v6359_v23, %v6283_v62 }
0x3ca5   :  { %v6361_v29 = vmul.f32 0.71849984, %v6360_v28 }
0x3ca7   :  { %v6362_v34 = vadd.f32 %v6361_v29, %v6359_v23 }
0x3ca9   :  { %13097 = vmatmul.mubr.f32.vlgmr.msra.gmra.mrb[72].mxu0 %v6362_v34 }
0x3caa   :  { %15992 = vmatpush3.bf16.msra.mxu0 %v16974_v12  ;;  %13166 = vmatprep.mubr.msk.f32.mxu0 %vm16814_vm0, %v16815_v1 }
0x3cab   :  { %15993 = vmatprep.subr.bf16.mxu0 %v16813_v0 }
0x3cae   :  { %15995 = vmatpush3.bf16.msra.mxu0 %v16981_v18 }
0x3caf   :  { %15996 = vmatprep.subr.bf16.mxu0 %v16813_v0 }
0x3cb2   :  { %15998 = vmatpush3.bf16.msra.mxu0 %v16989_v24 }
0x3cb3   :  { %15999 = vmatprep.subr.bf16.mxu0 %v16813_v0 }
0x3cb6   :  { %16001 = vmatpush3.bf16.msra.mxu0 %v16997_v30 }
0x3cb7   :  { %16002 = vmatprep.subr.bf16.mxu0 %v16813_v0 }
0x3cba   :  { %16004 = vmatpush3.bf16.msra.mxu0 %v17005_v36 }
0x3cbb   :  { %16005 = vmatprep.subr.bf16.mxu0 %v16813_v0 }
0x3cbe   :  { %16007 = vmatpush3.bf16.msra.mxu0 %v17013_v42 }
0x3cbf   :  { %16008 = vmatprep.subr.bf16.mxu0 %v16813_v0 }
0x3cc2   :  { %16010 = vmatpush3.bf16.msra.mxu0 %v17021_v48 }
0x3cc3   :  { %16011 = vmatprep.subr.bf16.mxu0 %v16813_v0 }
0x3cc6   :  { %16013 = vmatpush3.bf16.msra.mxu0 %v17029_v55 }
0x3cc7   :  { %16038 = vmatprep.subr.bf16.mxu0 %v16813_v0 }
0x3d7c   :  { %v6429_v32 = vpop.f32.mrb[72].mxu0 }
0x3d7d   :  { %v6433_v37 = vsub.f32 %v6362_v34, %v6429_v32  ;;  %v13098_v38 = vpop.f32.mrb[73].mxu0 }
0x3d7f   :  { %v6434_v41 = vadd.f32 %v6433_v37, %v18529_v16 }
0x3d81   :  { %v6435_v43 = vmax.f32 %v6434_v41, 0.0 }
0x3d83   :  { %v6436_v22 = vsub.f32 %v6435_v43, %v6359_v23 }
0x3d85   :  { %v6437_v50 = vmul.f32 0.743691, %v6436_v22 }
0x3d87   :  { %v6438_v51 = vadd.f32 %v6437_v50, %v6435_v43 }
0x3d89   :  { %13132 = vmatmul.mubr.f32.vlgmr.msra.gmra.mrb[82].mxu1 %v6438_v51 }
0x3d8a   :  { %16016 = vmatpush3.bf16.msra.mxu1 %v16974_v12  ;;  %13201 = vmatprep.mubr.msk.f32.mxu1 %vm16814_vm0, %v16815_v1 }
0x3d8b   :  { %16017 = vmatprep.subr.bf16.mxu1 %v16813_v0 }
0x3d8e   :  { %16019 = vmatpush3.bf16.msra.mxu1 %v16981_v18 }
0x3d8f   :  { %16020 = vmatprep.subr.bf16.mxu1 %v16813_v0 }
0x3d92   :  { %16022 = vmatpush3.bf16.msra.mxu1 %v16989_v24 }
0x3d93   :  { %16023 = vmatprep.subr.bf16.mxu1 %v16813_v0 }
0x3d96   :  { %16025 = vmatpush3.bf16.msra.mxu1 %v16997_v30 }
0x3d97   :  { %16026 = vmatprep.subr.bf16.mxu1 %v16813_v0 }
0x3d9a   :  { %16028 = vmatpush3.bf16.msra.mxu1 %v17005_v36 }
0x3d9b   :  { %16029 = vmatprep.subr.bf16.mxu1 %v16813_v0 }
0x3d9e   :  { %16031 = vmatpush3.bf16.msra.mxu1 %v17013_v42 }
0x3d9f   :  { %16032 = vmatprep.subr.bf16.mxu1 %v16813_v0 }
0x3da2   :  { %16034 = vmatpush3.bf16.msra.mxu1 %v17021_v48 }
0x3da3   :  { %16035 = vmatprep.subr.bf16.mxu1 %v16813_v0 }
0x3da6   :  { %16037 = vmatpush3.bf16.msra.mxu1 %v17029_v55 }
0x3da7   :  { %16062 = vmatprep.subr.bf16.mxu1 %v16813_v0 }
0x3e5c   :  { %v6505_v53 = vpop.f32.mrb[82].mxu1 }
0x3e5d   :  { %v6509_v54 = vsub.f32 %v6438_v51, %v6505_v53  ;;  %v13133_v47 = vpop.f32.mrb[83].mxu1 }
0x3e5f   :  { %v6510_v57 = vadd.f32 %v6509_v54, %v18529_v16 }
0x3e61   :  { %v6511_v58 = vmax.f32 %v6510_v57, 0.0 }
0x3e63   :  { %v6512_v59 = vsub.f32 %v6511_v58, %v6435_v43 }
0x3e65   :  { %v6513_v61 = vmul.f32 0.7646647, %v6512_v59 }
0x3e67   :  { %v6514_v2 = vadd.f32 %v6513_v61, %v6511_v58 }
0x3e69   :  { %13167 = vmatmul.mubr.f32.vlgmr.msra.gmra.mrb[74].mxu0 %v6514_v2 }
0x3e6a   :  { %16040 = vmatpush3.bf16.msra.mxu0 %v16974_v12  ;;  %13236 = vmatprep.mubr.msk.f32.mxu0 %vm16814_vm0, %v16815_v1 }
0x3e6b   :  { %16041 = vmatprep.subr.bf16.mxu0 %v16813_v0 }
0x3e6e   :  { %16043 = vmatpush3.bf16.msra.mxu0 %v16981_v18 }
0x3e6f   :  { %16044 = vmatprep.subr.bf16.mxu0 %v16813_v0 }
0x3e72   :  { %16046 = vmatpush3.bf16.msra.mxu0 %v16989_v24 }
0x3e73   :  { %16047 = vmatprep.subr.bf16.mxu0 %v16813_v0 }
0x3e76   :  { %16049 = vmatpush3.bf16.msra.mxu0 %v16997_v30 }
0x3e77   :  { %16050 = vmatprep.subr.bf16.mxu0 %v16813_v0 }
0x3e7a   :  { %16052 = vmatpush3.bf16.msra.mxu0 %v17005_v36 }
0x3e7b   :  { %16053 = vmatprep.subr.bf16.mxu0 %v16813_v0 }
0x3e7e   :  { %16055 = vmatpush3.bf16.msra.mxu0 %v17013_v42 }
0x3e7f   :  { %16056 = vmatprep.subr.bf16.mxu0 %v16813_v0 }
0x3e82   :  { %16058 = vmatpush3.bf16.msra.mxu0 %v17021_v48 }
0x3e83   :  { %16059 = vmatprep.subr.bf16.mxu0 %v16813_v0 }
0x3e86   :  { %16061 = vmatpush3.bf16.msra.mxu0 %v17029_v55 }
0x3e87   :  { %16086 = vmatprep.subr.bf16.mxu0 %v16813_v0 }
0x3f3c   :  { %v6581_v62 = vpop.f32.mrb[74].mxu0 }
0x3f3d   :  { %v6585_v3 = vsub.f32 %v6514_v2, %v6581_v62  ;;  %v13168_v8 = vpop.f32.mrb[75].mxu0 }
0x3f3f   :  { %v6586_v10 = vadd.f32 %v6585_v3, %v18529_v16 }
0x3f41   :  { %v6587_v11 = vmax.f32 %v6586_v10, 0.0 }
0x3f43   :  { %v6588_v46 = vsub.f32 %v6587_v11, %v6511_v58 }
0x3f45   :  { %v6589_v26 = vmul.f32 0.78240925, %v6588_v46 }
0x3f47   :  { %v6590_v20 = vadd.f32 %v6589_v26, %v6587_v11 }
0x3f49   :  { %13202 = vmatmul.mubr.f32.vlgmr.msra.gmra.mrb[84].mxu1 %v6590_v20 }
0x3f4a   :  { %16064 = vmatpush3.bf16.msra.mxu1 %v16974_v12  ;;  %13271 = vmatprep.mubr.msk.f32.mxu1 %vm16814_vm0, %v16815_v1 }
0x3f4b   :  { %16065 = vmatprep.subr.bf16.mxu1 %v16813_v0 }
0x3f4e   :  { %16067 = vmatpush3.bf16.msra.mxu1 %v16981_v18 }
0x3f4f   :  { %16068 = vmatprep.subr.bf16.mxu1 %v16813_v0 }
0x3f52   :  { %16070 = vmatpush3.bf16.msra.mxu1 %v16989_v24 }
0x3f53   :  { %16071 = vmatprep.subr.bf16.mxu1 %v16813_v0 }
0x3f56   :  { %16073 = vmatpush3.bf16.msra.mxu1 %v16997_v30 }
0x3f57   :  { %16074 = vmatprep.subr.bf16.mxu1 %v16813_v0 }
0x3f5a   :  { %16076 = vmatpush3.bf16.msra.mxu1 %v17005_v36 }
0x3f5b   :  { %16077 = vmatprep.subr.bf16.mxu1 %v16813_v0 }
0x3f5e   :  { %16079 = vmatpush3.bf16.msra.mxu1 %v17013_v42 }
0x3f5f   :  { %16080 = vmatprep.subr.bf16.mxu1 %v16813_v0 }
0x3f62   :  { %16082 = vmatpush3.bf16.msra.mxu1 %v17021_v48 }
0x3f63   :  { %16083 = vmatprep.subr.bf16.mxu1 %v16813_v0 }
0x3f66   :  { %16085 = vmatpush3.bf16.msra.mxu1 %v17029_v55 }
0x3f67   :  { %16110 = vmatprep.subr.bf16.mxu1 %v16813_v0 }
0x401c   :  { %v6657_v23 = vpop.f32.mrb[84].mxu1 }
0x401d   :  { %v6661_v28 = vsub.f32 %v6590_v20, %v6657_v23  ;;  %v13203_v29 = vpop.f32.mrb[85].mxu1 }
0x401f   :  { %v6662_v34 = vadd.f32 %v6661_v28, %v18529_v16 }
0x4021   :  { %v6663_v32 = vmax.f32 %v6662_v34, 0.0 }
0x4023   :  { %v6664_v37 = vsub.f32 %v6663_v32, %v6587_v11 }
0x4025   :  { %v6665_v38 = vmul.f32 0.7976244, %v6664_v37 }
0x4027   :  { %v6666_v41 = vadd.f32 %v6665_v38, %v6663_v32 }
0x4029   :  { %13237 = vmatmul.mubr.f32.vlgmr.msra.gmra.mrb[76].mxu0 %v6666_v41 }
0x402a   :  { %16088 = vmatpush3.bf16.msra.mxu0 %v16974_v12  ;;  %13306 = vmatprep.mubr.msk.f32.mxu0 %vm16814_vm0, %v16815_v1 }
0x402b   :  { %16089 = vmatprep.subr.bf16.mxu0 %v16813_v0 }
0x402e   :  { %16091 = vmatpush3.bf16.msra.mxu0 %v16981_v18 }
0x402f   :  { %16092 = vmatprep.subr.bf16.mxu0 %v16813_v0 }
0x4032   :  { %16094 = vmatpush3.bf16.msra.mxu0 %v16989_v24 }
0x4033   :  { %16095 = vmatprep.subr.bf16.mxu0 %v16813_v0 }
0x4036   :  { %16097 = vmatpush3.bf16.msra.mxu0 %v16997_v30 }
0x4037   :  { %16098 = vmatprep.subr.bf16.mxu0 %v16813_v0 }
0x403a   :  { %16100 = vmatpush3.bf16.msra.mxu0 %v17005_v36 }
0x403b   :  { %16101 = vmatprep.subr.bf16.mxu0 %v16813_v0 }
0x403e   :  { %16103 = vmatpush3.bf16.msra.mxu0 %v17013_v42 }
0x403f   :  { %16104 = vmatprep.subr.bf16.mxu0 %v16813_v0 }
0x4042   :  { %16106 = vmatpush3.bf16.msra.mxu0 %v17021_v48 }
0x4043   :  { %16107 = vmatprep.subr.bf16.mxu0 %v16813_v0 }
0x4046   :  { %16109 = vmatpush3.bf16.msra.mxu0 %v17029_v55 }
0x4047   :  { %16134 = vmatprep.subr.bf16.mxu0 %v16813_v0 }
0x40fc   :  { %v6733_v43 = vpop.f32.mrb[76].mxu0 }
0x40fd   :  { %v6737_v22 = vsub.f32 %v6666_v41, %v6733_v43  ;;  %v13238_v50 = vpop.f32.mrb[77].mxu0 }
0x40ff   :  { %v6738_v51 = vadd.f32 %v6737_v22, %v18529_v16 }
0x4101   :  { %v6739_v53 = vmax.f32 %v6738_v51, 0.0 }
0x4103   :  { %v6740_v54 = vsub.f32 %v6739_v53, %v6663_v32 }
0x4105   :  { %v6741_v47 = vmul.f32 0.81082, %v6740_v54 }
0x4107   :  { %v6742_v57 = vadd.f32 %v6741_v47, %v6739_v53 }
0x4109   :  { %13272 = vmatmul.mubr.f32.vlgmr.msra.gmra.mrb[86].mxu1 %v6742_v57 }
0x410a   :  { %16112 = vmatpush3.bf16.msra.mxu1 %v17344_v19  ;;  %13341 = vmatprep.mubr.msk.f32.mxu1 %vm16814_vm0, %v16815_v1 }
0x410b   :  { %16113 = vmatprep.subr.bf16.mxu1 %v16813_v0 }
0x410e   :  { %16115 = vmatpush3.bf16.msra.mxu1 %v17348_v25 }
0x410f   :  { %16116 = vmatprep.subr.bf16.mxu1 %v16813_v0 }
0x4112   :  { %16118 = vmatpush3.bf16.msra.mxu1 %v17352_v31 }
0x4113   :  { %16119 = vmatprep.subr.bf16.mxu1 %v16813_v0 }
0x4116   :  { %16121 = vmatpush3.bf16.msra.mxu1 %v17356_v35 }
0x4117   :  { %16122 = vmatprep.subr.bf16.mxu1 %v16813_v0 }
0x411a   :  { %16124 = vmatpush3.bf16.msra.mxu1 %v17360_v40 }
0x411b   :  { %16125 = vmatprep.subr.bf16.mxu1 %v16813_v0 }
0x411e   :  { %16127 = vmatpush3.bf16.msra.mxu1 %v17364_v44 }
0x411f   :  { %16128 = vmatprep.subr.bf16.mxu1 %v16813_v0 }
0x4122   :  { %16130 = vmatpush3.bf16.msra.mxu1 %v17368_v49 }
0x4123   :  { %16131 = vmatprep.subr.bf16.mxu1 %v16813_v0 }
0x4126   :  { %16133 = vmatpush3.bf16.msra.mxu1 %v17409_v6 }
0x4127   :  { %16182 = vmatprep.subr.bf16.mxu1 %v16813_v0 }
0x41dc   :  { %v6809_v58 = vpop.f32.mrb[86].mxu1 }
0x41dd   :  { %v6813_v59 = vsub.f32 %v6742_v57, %v6809_v58  ;;  %v13273_v61 = vpop.f32.mrb[87].mxu1 }
0x41df   :  { %v6814_v2 = vadd.f32 %v6813_v59, %v18529_v16 }
0x41e1   :  { %v6815_v62 = vmax.f32 %v6814_v2, 0.0 }
0x41e3   :  { %v6816_v3 = vsub.f32 %v6815_v62, %v6739_v53 }
0x41e5   :  { %v6817_v8 = vmul.f32 0.82237667, %v6816_v3 }
0x41e7   :  { %v6818_v10 = vadd.f32 %v6817_v8, %v6815_v62 }
0x41e9   :  { %13307 = vmatmul.mubr.f32.vlgmr.msra.gmra.mrb[78].mxu0 %v6818_v10 }
0x41ea   :  { %16136 = vmatpush3.bf16.msra.mxu0 %v16968_v5  ;;  %13376 = vmatprep.mubr.msk.f32.mxu0 %vm16814_vm0, %v16815_v1  ;;  %v6967_v5 = vld [vmem:[#allocation3 + $0x28] sm:$0xff] }
0x41eb   :  { %16137 = vmatprep.subr.bf16.mxu0 %v16813_v0 }
0x41ee   :  { %16139 = vmatpush3.bf16.msra.mxu0 %v16971_v7 }
0x41ef   :  { %16140 = vmatprep.subr.bf16.mxu0 %v16813_v0 }
0x41f2   :  { %16142 = vmatpush3.bf16.msra.mxu0 %v16977_v13 }
0x41f3   :  { %16143 = vmatprep.subr.bf16.mxu0 %v16813_v0 }
0x41f6   :  { %16145 = vmatpush3.bf16.msra.mxu0 %v16985_v21 }
0x41f7   :  { %16146 = vmatprep.subr.bf16.mxu0 %v16813_v0 }
0x41fa   :  { %16148 = vmatpush3.bf16.msra.mxu0 %v16993_v27 }
0x41fb   :  { %16149 = vmatprep.subr.bf16.mxu0 %v16813_v0 }
0x41fe   :  { %16151 = vmatpush3.bf16.msra.mxu0 %v17001_v33 }
0x41ff   :  { %16152 = vmatprep.subr.bf16.mxu0 %v16813_v0 }
0x4202   :  { %16154 = vmatpush3.bf16.msra.mxu0 %v17009_v39 }
0x4203   :  { %16155 = vmatprep.subr.bf16.mxu0 %v16813_v0 }
0x4206   :  { %16157 = vmatpush3.bf16.msra.mxu0 %v17017_v45 }
0x4207   :  { %16158 = vmatprep.subr.bf16.mxu0 %v16813_v0 }
0x4209   :  { %13377 = vmatmul.mubr.f32.vlgmr.msra.gmra.mrb[80].mxu0 %v6967_v5 }
0x420a   :  { %16160 = vmatpush3.bf16.msra.mxu0 %v17025_v52  ;;  %13411 = vmatprep.mubr.msk.f32.mxu0 %vm16814_vm0, %v16815_v1 }
0x420b   :  { %16161 = vmatprep.subr.bf16.mxu0 %v16813_v0 }
0x420e   :  { %16163 = vmatpush3.bf16.msra.mxu0 %v17033_v56 }
0x420f   :  { %16164 = vmatprep.subr.bf16.mxu0 %v16813_v0 }
0x4212   :  { %16166 = vmatpush3.bf16.msra.mxu0 %v17043_v60 }
0x4213   :  { %16167 = vmatprep.subr.bf16.mxu0 %v16813_v0 }
0x4216   :  { %16169 = vmatpush3.bf16.msra.mxu0 %v17052_v63 }
0x4217   :  { %16170 = vmatprep.subr.bf16.mxu0 %v16813_v0 }
0x421a   :  { %16172 = vmatpush3.bf16.msra.mxu0 %v17058_v4 }
0x421b   :  { %16173 = vmatprep.subr.bf16.mxu0 %v16813_v0 }
0x421e   :  { %16175 = vmatpush3.bf16.msra.mxu0 %v17064_v9 }
0x421f   :  { %16176 = vmatprep.subr.bf16.mxu0 %v16813_v0 }
0x4222   :  { %16178 = vmatpush3.bf16.msra.mxu0 %v17070_v14 }
0x4223   :  { %16179 = vmatprep.subr.bf16.mxu0 %v16813_v0 }
0x4226   :  { %16181 = vmatpush3.bf16.msra.mxu0 %v17076_v17 }
0x4227   :  { %16230 = vmatprep.subr.bf16.mxu0 %v16813_v0 }
0x42bc   :  { %v6885_v7 = vpop.f32.mrb[78].mxu0 }
0x42bd   :  { %v6889_v13 = vsub.f32 %v6818_v10, %v6885_v7  ;;  %v13308_v21 = vpop.f32.mrb[79].mxu0 }
0x42bf   :  { %v6890_v27 = vadd.f32 %v6889_v13, %v18529_v16 }
0x42c1   :  { %v18818_v33 = vmax.f32 %v6890_v27, 0.0 }
0x42c3   :  { %6893 = vst [vmem:[#allocation16 + $0x20] sm:$0xff] %v18818_v33  ;;  %13342 = vmatmul.mubr.f32.vlgmr.msra.gmra.mrb[88].mxu1 %v18818_v33  ;;  %13412 = vmatmul.mubr.f32.vlgmr.msra.gmra.mrb[80].mxu0 %v18818_v33 }
0x42c4   :  { %16184 = vmatpush3.bf16.msra.mxu1 %v16974_v12  ;;  %13446 = vmatprep.mubr.msk.f32.mxu1 %vm16814_vm0, %v16815_v1 }
0x42c5   :  { %16185 = vmatprep.subr.bf16.mxu1 %v16813_v0  ;;  %16232 = vmatpush3.bf16.msra.mxu0 %v16974_v12 }
0x42c6   :  { %16233 = vmatprep.subr.bf16.mxu0 %v16813_v0  ;;  %13516 = vmatprep.mubr.msk.f32.mxu0 %vm16814_vm0, %v16815_v1 }
0x42c8   :  { %16187 = vmatpush3.bf16.msra.mxu1 %v16981_v18 }
0x42c9   :  { %16188 = vmatprep.subr.bf16.mxu1 %v16813_v0  ;;  %16235 = vmatpush3.bf16.msra.mxu0 %v16981_v18 }
0x42ca   :  { %16236 = vmatprep.subr.bf16.mxu0 %v16813_v0 }
0x42cc   :  { %16190 = vmatpush3.bf16.msra.mxu1 %v16989_v24 }
0x42cd   :  { %16191 = vmatprep.subr.bf16.mxu1 %v16813_v0  ;;  %16238 = vmatpush3.bf16.msra.mxu0 %v16989_v24 }
0x42ce   :  { %16239 = vmatprep.subr.bf16.mxu0 %v16813_v0 }
0x42d0   :  { %16193 = vmatpush3.bf16.msra.mxu1 %v16997_v30 }
0x42d1   :  { %16194 = vmatprep.subr.bf16.mxu1 %v16813_v0  ;;  %16241 = vmatpush3.bf16.msra.mxu0 %v16997_v30 }
0x42d2   :  { %16242 = vmatprep.subr.bf16.mxu0 %v16813_v0 }
0x42d4   :  { %16196 = vmatpush3.bf16.msra.mxu1 %v17005_v36 }
0x42d5   :  { %16197 = vmatprep.subr.bf16.mxu1 %v16813_v0  ;;  %16244 = vmatpush3.bf16.msra.mxu0 %v17005_v36 }
0x42d6   :  { %16245 = vmatprep.subr.bf16.mxu0 %v16813_v0 }
0x42d8   :  { %16199 = vmatpush3.bf16.msra.mxu1 %v17013_v42 }
0x42d9   :  { %16200 = vmatprep.subr.bf16.mxu1 %v16813_v0  ;;  %16247 = vmatpush3.bf16.msra.mxu0 %v17013_v42 }
0x42da   :  { %16248 = vmatprep.subr.bf16.mxu0 %v16813_v0 }
0x42dc   :  { %16202 = vmatpush3.bf16.msra.mxu1 %v17021_v48 }
0x42dd   :  { %16203 = vmatprep.subr.bf16.mxu1 %v16813_v0  ;;  %16250 = vmatpush3.bf16.msra.mxu0 %v17021_v48 }
0x42de   :  { %16251 = vmatprep.subr.bf16.mxu0 %v16813_v0 }
0x42e0   :  { %16205 = vmatpush3.bf16.msra.mxu1 %v17029_v55 }
0x42e1   :  { %16206 = vmatprep.subr.bf16.mxu1 %v16813_v0  ;;  %16253 = vmatpush3.bf16.msra.mxu0 %v17029_v55 }
0x42e2   :  { %16278 = vmatprep.subr.bf16.mxu0 %v16813_v0 }
0x42e3   :  { %13447 = vmatmul.mubr.f32.vlgmr.msra.gmra.mrb[90].mxu1 %v18818_v33 }
0x42e4   :  { %16208 = vmatpush3.bf16.msra.mxu1 %v16974_v12  ;;  %13481 = vmatprep.mubr.msk.f32.mxu1 %vm16814_vm0, %v16815_v1 }
0x42e5   :  { %16209 = vmatprep.subr.bf16.mxu1 %v16813_v0 }
0x42e8   :  { %16211 = vmatpush3.bf16.msra.mxu1 %v16981_v18 }
0x42e9   :  { %16212 = vmatprep.subr.bf16.mxu1 %v16813_v0 }
0x42ec   :  { %16214 = vmatpush3.bf16.msra.mxu1 %v16989_v24 }
0x42ed   :  { %16215 = vmatprep.subr.bf16.mxu1 %v16813_v0 }
0x42f0   :  { %16217 = vmatpush3.bf16.msra.mxu1 %v16997_v30 }
0x42f1   :  { %16218 = vmatprep.subr.bf16.mxu1 %v16813_v0 }
0x42f4   :  { %16220 = vmatpush3.bf16.msra.mxu1 %v17005_v36 }
0x42f5   :  { %16221 = vmatprep.subr.bf16.mxu1 %v16813_v0 }
0x42f8   :  { %16223 = vmatpush3.bf16.msra.mxu1 %v17013_v42 }
0x42f9   :  { %16224 = vmatprep.subr.bf16.mxu1 %v16813_v0 }
0x42fc   :  { %16226 = vmatpush3.bf16.msra.mxu1 %v17021_v48 }
0x42fd   :  { %16227 = vmatprep.subr.bf16.mxu1 %v16813_v0 }
0x4300   :  { %16229 = vmatpush3.bf16.msra.mxu1 %v17029_v55 }
0x4301   :  { %16254 = vmatprep.subr.bf16.mxu1 %v16813_v0 }
0x4396   :  { %v6960_v39 = vpop.f32.mrb[88].mxu1  ;;  %v7104_v45 = vpop.f32.mrb[80].mxu0 }
0x4397   :  { %6965 = vst [vmem:[#allocation15 + $0x20] sm:$0xff] %v6960_v39  ;;  %v13343_v52 = vpop.f32.mrb[89].mxu1  ;;  %v13413_v56 = vpop.f32.mrb[81].mxu0  ;;  %v18879_v63 = vsub.f32 %v7104_v45, %v18526_v15 }
0x43b6   :  { %v7175_v60 = vpop.f32.mrb[90].mxu1 }
0x43b7   :  { %v7179_v4 = vsub.f32 %v18818_v33, %v7175_v60  ;;  %v13448_v9 = vpop.f32.mrb[91].mxu1 }
0x43b9   :  { %v7180_v14 = vadd.f32 %v7179_v4, %v18879_v63 }
0x43bb   :  { %v7181_v17 = vmax.f32 %v7180_v14, 0.0 }
0x43bd   :  { %v7182_v16 = vsub.f32 %v7181_v17, %v18818_v33 }
0x43bf   :  { %v7183_v11 = vmul.f32 0.0, %v7182_v16 }
0x43c1   :  { %v7184_v46 = vadd.f32 %v7183_v11, %v7181_v17 }
0x43c3   :  { %13482 = vmatmul.mubr.f32.vlgmr.msra.gmra.mrb[92].mxu1 %v7184_v46 }
0x43c4   :  { %16256 = vmatpush3.bf16.msra.mxu1 %v16974_v12  ;;  %13551 = vmatprep.mubr.msk.f32.mxu1 %vm16814_vm0, %v16815_v1 }
0x43c5   :  { %16257 = vmatprep.subr.bf16.mxu1 %v16813_v0 }
0x43c8   :  { %16259 = vmatpush3.bf16.msra.mxu1 %v16981_v18 }
0x43c9   :  { %16260 = vmatprep.subr.bf16.mxu1 %v16813_v0 }
0x43cc   :  { %16262 = vmatpush3.bf16.msra.mxu1 %v16989_v24 }
0x43cd   :  { %16263 = vmatprep.subr.bf16.mxu1 %v16813_v0 }
0x43d0   :  { %16265 = vmatpush3.bf16.msra.mxu1 %v16997_v30 }
0x43d1   :  { %16266 = vmatprep.subr.bf16.mxu1 %v16813_v0 }
0x43d4   :  { %16268 = vmatpush3.bf16.msra.mxu1 %v17005_v36 }
0x43d5   :  { %16269 = vmatprep.subr.bf16.mxu1 %v16813_v0 }
0x43d8   :  { %16271 = vmatpush3.bf16.msra.mxu1 %v17013_v42 }
0x43d9   :  { %16272 = vmatprep.subr.bf16.mxu1 %v16813_v0 }
0x43dc   :  { %16274 = vmatpush3.bf16.msra.mxu1 %v17021_v48 }
0x43dd   :  { %16275 = vmatprep.subr.bf16.mxu1 %v16813_v0 }
0x43e0   :  { %16277 = vmatpush3.bf16.msra.mxu1 %v17029_v55 }
0x43e1   :  { %16302 = vmatprep.subr.bf16.mxu1 %v16813_v0 }
0x4496   :  { %v7251_v15 = vpop.f32.mrb[92].mxu1 }
0x4497   :  { %v7255_v26 = vsub.f32 %v7184_v46, %v7251_v15  ;;  %v13483_v20 = vpop.f32.mrb[93].mxu1 }
0x4499   :  { %v7256_v23 = vadd.f32 %v7255_v26, %v18879_v63 }
0x449b   :  { %v7257_v28 = vmax.f32 %v7256_v23, 0.0 }
0x449d   :  { %v7258_v29 = vsub.f32 %v7257_v28, %v7181_v17 }
0x449f   :  { %v7259_v34 = vmul.f32 0.2817535, %v7258_v29 }
0x44a1   :  { %v7260_v32 = vadd.f32 %v7259_v34, %v7257_v28 }
0x44a3   :  { %13517 = vmatmul.mubr.f32.vlgmr.msra.gmra.mrb[82].mxu0 %v7260_v32 }
0x44a4   :  { %16280 = vmatpush3.bf16.msra.mxu0 %v16974_v12  ;;  %13586 = vmatprep.mubr.msk.f32.mxu0 %vm16814_vm0, %v16815_v1 }
0x44a5   :  { %16281 = vmatprep.subr.bf16.mxu0 %v16813_v0 }
0x44a8   :  { %16283 = vmatpush3.bf16.msra.mxu0 %v16981_v18 }
0x44a9   :  { %16284 = vmatprep.subr.bf16.mxu0 %v16813_v0 }
0x44ac   :  { %16286 = vmatpush3.bf16.msra.mxu0 %v16989_v24 }
0x44ad   :  { %16287 = vmatprep.subr.bf16.mxu0 %v16813_v0 }
0x44b0   :  { %16289 = vmatpush3.bf16.msra.mxu0 %v16997_v30 }
0x44b1   :  { %16290 = vmatprep.subr.bf16.mxu0 %v16813_v0 }
0x44b4   :  { %16292 = vmatpush3.bf16.msra.mxu0 %v17005_v36 }
0x44b5   :  { %16293 = vmatprep.subr.bf16.mxu0 %v16813_v0 }
0x44b8   :  { %16295 = vmatpush3.bf16.msra.mxu0 %v17013_v42 }
0x44b9   :  { %16296 = vmatprep.subr.bf16.mxu0 %v16813_v0 }
0x44bc   :  { %16298 = vmatpush3.bf16.msra.mxu0 %v17021_v48 }
0x44bd   :  { %16299 = vmatprep.subr.bf16.mxu0 %v16813_v0 }
0x44c0   :  { %16301 = vmatpush3.bf16.msra.mxu0 %v17029_v55 }
0x44c1   :  { %16326 = vmatprep.subr.bf16.mxu0 %v16813_v0 }
0x4576   :  { %v7327_v37 = vpop.f32.mrb[82].mxu0 }
0x4577   :  { %v7331_v38 = vsub.f32 %v7260_v32, %v7327_v37  ;;  %v13518_v41 = vpop.f32.mrb[83].mxu0 }
0x4579   :  { %v7332_v43 = vadd.f32 %v7331_v38, %v18879_v63 }
0x457b   :  { %v7333_v22 = vmax.f32 %v7332_v43, 0.0 }
0x457d   :  { %v7334_v50 = vsub.f32 %v7333_v22, %v7257_v28 }
0x457f   :  { %v7335_v51 = vmul.f32 0.43404278, %v7334_v50 }
0x4581   :  { %v7336_v53 = vadd.f32 %v7335_v51, %v7333_v22 }
0x4583   :  { %13552 = vmatmul.mubr.f32.vlgmr.msra.gmra.mrb[94].mxu1 %v7336_v53 }
0x4584   :  { %16304 = vmatpush3.bf16.msra.mxu1 %v16974_v12  ;;  %13621 = vmatprep.mubr.msk.f32.mxu1 %vm16814_vm0, %v16815_v1 }
0x4585   :  { %16305 = vmatprep.subr.bf16.mxu1 %v16813_v0 }
0x4588   :  { %16307 = vmatpush3.bf16.msra.mxu1 %v16981_v18 }
0x4589   :  { %16308 = vmatprep.subr.bf16.mxu1 %v16813_v0 }
0x458c   :  { %16310 = vmatpush3.bf16.msra.mxu1 %v16989_v24 }
0x458d   :  { %16311 = vmatprep.subr.bf16.mxu1 %v16813_v0 }
0x4590   :  { %16313 = vmatpush3.bf16.msra.mxu1 %v16997_v30 }
0x4591   :  { %16314 = vmatprep.subr.bf16.mxu1 %v16813_v0 }
0x4594   :  { %16316 = vmatpush3.bf16.msra.mxu1 %v17005_v36 }
0x4595   :  { %16317 = vmatprep.subr.bf16.mxu1 %v16813_v0 }
0x4598   :  { %16319 = vmatpush3.bf16.msra.mxu1 %v17013_v42 }
0x4599   :  { %16320 = vmatprep.subr.bf16.mxu1 %v16813_v0 }
0x459c   :  { %16322 = vmatpush3.bf16.msra.mxu1 %v17021_v48 }
0x459d   :  { %16323 = vmatprep.subr.bf16.mxu1 %v16813_v0 }
0x45a0   :  { %16325 = vmatpush3.bf16.msra.mxu1 %v17029_v55 }
0x45a1   :  { %16350 = vmatprep.subr.bf16.mxu1 %v16813_v0 }
0x4656   :  { %v7403_v54 = vpop.f32.mrb[94].mxu1 }
0x4657   :  { %v7407_v47 = vsub.f32 %v7336_v53, %v7403_v54  ;;  %v13553_v57 = vpop.f32.mrb[95].mxu1 }
0x4659   :  { %v7408_v58 = vadd.f32 %v7407_v47, %v18879_v63 }
0x465b   :  { %v7409_v59 = vmax.f32 %v7408_v58, 0.0 }
0x465d   :  { %v7410_v61 = vsub.f32 %v7409_v59, %v7333_v22 }
0x465f   :  { %v7411_v2 = vmul.f32 0.5310638, %v7410_v61 }
0x4661   :  { %v7412_v62 = vadd.f32 %v7411_v2, %v7409_v59 }
0x4663   :  { %13587 = vmatmul.mubr.f32.vlgmr.msra.gmra.mrb[84].mxu0 %v7412_v62 }
0x4664   :  { %16328 = vmatpush3.bf16.msra.mxu0 %v16974_v12  ;;  %13656 = vmatprep.mubr.msk.f32.mxu0 %vm16814_vm0, %v16815_v1 }
0x4665   :  { %16329 = vmatprep.subr.bf16.mxu0 %v16813_v0 }
0x4668   :  { %16331 = vmatpush3.bf16.msra.mxu0 %v16981_v18 }
0x4669   :  { %16332 = vmatprep.subr.bf16.mxu0 %v16813_v0 }
0x466c   :  { %16334 = vmatpush3.bf16.msra.mxu0 %v16989_v24 }
0x466d   :  { %16335 = vmatprep.subr.bf16.mxu0 %v16813_v0 }
0x4670   :  { %16337 = vmatpush3.bf16.msra.mxu0 %v16997_v30 }
0x4671   :  { %16338 = vmatprep.subr.bf16.mxu0 %v16813_v0 }
0x4674   :  { %16340 = vmatpush3.bf16.msra.mxu0 %v17005_v36 }
0x4675   :  { %16341 = vmatprep.subr.bf16.mxu0 %v16813_v0 }
0x4678   :  { %16343 = vmatpush3.bf16.msra.mxu0 %v17013_v42 }
0x4679   :  { %16344 = vmatprep.subr.bf16.mxu0 %v16813_v0 }
0x467c   :  { %16346 = vmatpush3.bf16.msra.mxu0 %v17021_v48 }
0x467d   :  { %16347 = vmatprep.subr.bf16.mxu0 %v16813_v0 }
0x4680   :  { %16349 = vmatpush3.bf16.msra.mxu0 %v17029_v55 }
0x4681   :  { %16374 = vmatprep.subr.bf16.mxu0 %v16813_v0 }
0x4736   :  { %v7479_v3 = vpop.f32.mrb[84].mxu0 }
0x4737   :  { %v7483_v8 = vsub.f32 %v7412_v62, %v7479_v3  ;;  %v13588_v10 = vpop.f32.mrb[85].mxu0 }
0x4739   :  { %v7484_v5 = vadd.f32 %v7483_v8, %v18879_v63 }
0x473b   :  { %v7485_v7 = vmax.f32 %v7484_v5, 0.0 }
0x473d   :  { %v7486_v13 = vsub.f32 %v7485_v7, %v7409_v59 }
0x473f   :  { %v7487_v21 = vmul.f32 0.5987786, %v7486_v13 }
0x4741   :  { %v7488_v27 = vadd.f32 %v7487_v21, %v7485_v7 }
0x4743   :  { %13622 = vmatmul.mubr.f32.vlgmr.msra.gmra.mrb[96].mxu1 %v7488_v27 }
0x4744   :  { %16352 = vmatpush3.bf16.msra.mxu1 %v16974_v12  ;;  %13691 = vmatprep.mubr.msk.f32.mxu1 %vm16814_vm0, %v16815_v1 }
0x4745   :  { %16353 = vmatprep.subr.bf16.mxu1 %v16813_v0 }
0x4748   :  { %16355 = vmatpush3.bf16.msra.mxu1 %v16981_v18 }
0x4749   :  { %16356 = vmatprep.subr.bf16.mxu1 %v16813_v0 }
0x474c   :  { %16358 = vmatpush3.bf16.msra.mxu1 %v16989_v24 }
0x474d   :  { %16359 = vmatprep.subr.bf16.mxu1 %v16813_v0 }
0x4750   :  { %16361 = vmatpush3.bf16.msra.mxu1 %v16997_v30 }
0x4751   :  { %16362 = vmatprep.subr.bf16.mxu1 %v16813_v0 }
0x4754   :  { %16364 = vmatpush3.bf16.msra.mxu1 %v17005_v36 }
0x4755   :  { %16365 = vmatprep.subr.bf16.mxu1 %v16813_v0 }
0x4758   :  { %16367 = vmatpush3.bf16.msra.mxu1 %v17013_v42 }
0x4759   :  { %16368 = vmatprep.subr.bf16.mxu1 %v16813_v0 }
0x475c   :  { %16370 = vmatpush3.bf16.msra.mxu1 %v17021_v48 }
0x475d   :  { %16371 = vmatprep.subr.bf16.mxu1 %v16813_v0 }
0x4760   :  { %16373 = vmatpush3.bf16.msra.mxu1 %v17029_v55 }
0x4761   :  { %16398 = vmatprep.subr.bf16.mxu1 %v16813_v0 }
0x4816   :  { %v7555_v33 = vpop.f32.mrb[96].mxu1 }
0x4817   :  { %v7559_v39 = vsub.f32 %v7488_v27, %v7555_v33  ;;  %v13623_v45 = vpop.f32.mrb[97].mxu1 }
0x4819   :  { %v7560_v52 = vadd.f32 %v7559_v39, %v18879_v63 }
0x481b   :  { %v7561_v56 = vmax.f32 %v7560_v52, 0.0 }
0x481d   :  { %v7562_v60 = vsub.f32 %v7561_v56, %v7485_v7 }
0x481f   :  { %v7563_v4 = vmul.f32 0.64892334, %v7562_v60 }
0x4821   :  { %v7564_v9 = vadd.f32 %v7563_v4, %v7561_v56 }
0x4823   :  { %13657 = vmatmul.mubr.f32.vlgmr.msra.gmra.mrb[86].mxu0 %v7564_v9 }
0x4824   :  { %16376 = vmatpush3.bf16.msra.mxu0 %v16974_v12  ;;  %13726 = vmatprep.mubr.msk.f32.mxu0 %vm16814_vm0, %v16815_v1 }
0x4825   :  { %16377 = vmatprep.subr.bf16.mxu0 %v16813_v0 }
0x4828   :  { %16379 = vmatpush3.bf16.msra.mxu0 %v16981_v18 }
0x4829   :  { %16380 = vmatprep.subr.bf16.mxu0 %v16813_v0 }
0x482c   :  { %16382 = vmatpush3.bf16.msra.mxu0 %v16989_v24 }
0x482d   :  { %16383 = vmatprep.subr.bf16.mxu0 %v16813_v0 }
0x4830   :  { %16385 = vmatpush3.bf16.msra.mxu0 %v16997_v30 }
0x4831   :  { %16386 = vmatprep.subr.bf16.mxu0 %v16813_v0 }
0x4834   :  { %16388 = vmatpush3.bf16.msra.mxu0 %v17005_v36 }
0x4835   :  { %16389 = vmatprep.subr.bf16.mxu0 %v16813_v0 }
0x4838   :  { %16391 = vmatpush3.bf16.msra.mxu0 %v17013_v42 }
0x4839   :  { %16392 = vmatprep.subr.bf16.mxu0 %v16813_v0 }
0x483c   :  { %16394 = vmatpush3.bf16.msra.mxu0 %v17021_v48 }
0x483d   :  { %16395 = vmatprep.subr.bf16.mxu0 %v16813_v0 }
0x4840   :  { %16397 = vmatpush3.bf16.msra.mxu0 %v17029_v55 }
0x4841   :  { %16422 = vmatprep.subr.bf16.mxu0 %v16813_v0 }
0x48f6   :  { %v7631_v14 = vpop.f32.mrb[86].mxu0 }
0x48f7   :  { %v7635_v17 = vsub.f32 %v7564_v9, %v7631_v14  ;;  %v13658_v16 = vpop.f32.mrb[87].mxu0 }
0x48f9   :  { %v7636_v11 = vadd.f32 %v7635_v17, %v18879_v63 }
0x48fb   :  { %v7637_v46 = vmax.f32 %v7636_v11, 0.0 }
0x48fd   :  { %v7638_v15 = vsub.f32 %v7637_v46, %v7561_v56 }
0x48ff   :  { %v7639_v26 = vmul.f32 0.68764585, %v7638_v15 }
0x4901   :  { %v7640_v20 = vadd.f32 %v7639_v26, %v7637_v46 }
0x4903   :  { %13692 = vmatmul.mubr.f32.vlgmr.msra.gmra.mrb[98].mxu1 %v7640_v20 }
0x4904   :  { %16400 = vmatpush3.bf16.msra.mxu1 %v16974_v12  ;;  %13761 = vmatprep.mubr.msk.f32.mxu1 %vm16814_vm0, %v16815_v1 }
0x4905   :  { %16401 = vmatprep.subr.bf16.mxu1 %v16813_v0 }
0x4908   :  { %16403 = vmatpush3.bf16.msra.mxu1 %v16981_v18 }
0x4909   :  { %16404 = vmatprep.subr.bf16.mxu1 %v16813_v0 }
0x490c   :  { %16406 = vmatpush3.bf16.msra.mxu1 %v16989_v24 }
0x490d   :  { %16407 = vmatprep.subr.bf16.mxu1 %v16813_v0 }
0x4910   :  { %16409 = vmatpush3.bf16.msra.mxu1 %v16997_v30 }
0x4911   :  { %16410 = vmatprep.subr.bf16.mxu1 %v16813_v0 }
0x4914   :  { %16412 = vmatpush3.bf16.msra.mxu1 %v17005_v36 }
0x4915   :  { %16413 = vmatprep.subr.bf16.mxu1 %v16813_v0 }
0x4918   :  { %16415 = vmatpush3.bf16.msra.mxu1 %v17013_v42 }
0x4919   :  { %16416 = vmatprep.subr.bf16.mxu1 %v16813_v0 }
0x491c   :  { %16418 = vmatpush3.bf16.msra.mxu1 %v17021_v48 }
0x491d   :  { %16419 = vmatprep.subr.bf16.mxu1 %v16813_v0 }
0x4920   :  { %16421 = vmatpush3.bf16.msra.mxu1 %v17029_v55 }
0x4921   :  { %16446 = vmatprep.subr.bf16.mxu1 %v16813_v0 }
0x49d6   :  { %v7707_v23 = vpop.f32.mrb[98].mxu1 }
0x49d7   :  { %v7711_v28 = vsub.f32 %v7640_v20, %v7707_v23  ;;  %v13693_v29 = vpop.f32.mrb[99].mxu1 }
0x49d9   :  { %v7712_v34 = vadd.f32 %v7711_v28, %v18879_v63 }
0x49db   :  { %v7713_v32 = vmax.f32 %v7712_v34, 0.0 }
0x49dd   :  { %v7714_v37 = vsub.f32 %v7713_v32, %v7637_v46 }
0x49df   :  { %v7715_v38 = vmul.f32 0.71849984, %v7714_v37 }
0x49e1   :  { %v7716_v41 = vadd.f32 %v7715_v38, %v7713_v32 }
0x49e3   :  { %13727 = vmatmul.mubr.f32.vlgmr.msra.gmra.mrb[88].mxu0 %v7716_v41 }
0x49e4   :  { %16424 = vmatpush3.bf16.msra.mxu0 %v16974_v12  ;;  %13796 = vmatprep.mubr.msk.f32.mxu0 %vm16814_vm0, %v16815_v1 }
0x49e5   :  { %16425 = vmatprep.subr.bf16.mxu0 %v16813_v0 }
0x49e8   :  { %16427 = vmatpush3.bf16.msra.mxu0 %v16981_v18 }
0x49e9   :  { %16428 = vmatprep.subr.bf16.mxu0 %v16813_v0 }
0x49ec   :  { %16430 = vmatpush3.bf16.msra.mxu0 %v16989_v24 }
0x49ed   :  { %16431 = vmatprep.subr.bf16.mxu0 %v16813_v0 }
0x49f0   :  { %16433 = vmatpush3.bf16.msra.mxu0 %v16997_v30 }
0x49f1   :  { %16434 = vmatprep.subr.bf16.mxu0 %v16813_v0 }
0x49f4   :  { %16436 = vmatpush3.bf16.msra.mxu0 %v17005_v36 }
0x49f5   :  { %16437 = vmatprep.subr.bf16.mxu0 %v16813_v0 }
0x49f8   :  { %16439 = vmatpush3.bf16.msra.mxu0 %v17013_v42 }
0x49f9   :  { %16440 = vmatprep.subr.bf16.mxu0 %v16813_v0 }
0x49fc   :  { %16442 = vmatpush3.bf16.msra.mxu0 %v17021_v48 }
0x49fd   :  { %16443 = vmatprep.subr.bf16.mxu0 %v16813_v0 }
0x4a00   :  { %16445 = vmatpush3.bf16.msra.mxu0 %v17029_v55 }
0x4a01   :  { %16470 = vmatprep.subr.bf16.mxu0 %v16813_v0 }
0x4ab6   :  { %v7783_v43 = vpop.f32.mrb[88].mxu0 }
0x4ab7   :  { %v7787_v22 = vsub.f32 %v7716_v41, %v7783_v43  ;;  %v13728_v50 = vpop.f32.mrb[89].mxu0 }
0x4ab9   :  { %v7788_v51 = vadd.f32 %v7787_v22, %v18879_v63 }
0x4abb   :  { %v7789_v53 = vmax.f32 %v7788_v51, 0.0 }
0x4abd   :  { %v7790_v54 = vsub.f32 %v7789_v53, %v7713_v32 }
0x4abf   :  { %v7791_v47 = vmul.f32 0.743691, %v7790_v54 }
0x4ac1   :  { %v7792_v57 = vadd.f32 %v7791_v47, %v7789_v53 }
0x4ac3   :  { %13762 = vmatmul.mubr.f32.vlgmr.msra.gmra.mrb[100].mxu1 %v7792_v57 }
0x4ac4   :  { %16448 = vmatpush3.bf16.msra.mxu1 %v16974_v12  ;;  %13831 = vmatprep.mubr.msk.f32.mxu1 %vm16814_vm0, %v16815_v1 }
0x4ac5   :  { %16449 = vmatprep.subr.bf16.mxu1 %v16813_v0 }
0x4ac8   :  { %16451 = vmatpush3.bf16.msra.mxu1 %v16981_v18 }
0x4ac9   :  { %16452 = vmatprep.subr.bf16.mxu1 %v16813_v0 }
0x4acc   :  { %16454 = vmatpush3.bf16.msra.mxu1 %v16989_v24 }
0x4acd   :  { %16455 = vmatprep.subr.bf16.mxu1 %v16813_v0 }
0x4ad0   :  { %16457 = vmatpush3.bf16.msra.mxu1 %v16997_v30 }
0x4ad1   :  { %16458 = vmatprep.subr.bf16.mxu1 %v16813_v0 }
0x4ad4   :  { %16460 = vmatpush3.bf16.msra.mxu1 %v17005_v36 }
0x4ad5   :  { %16461 = vmatprep.subr.bf16.mxu1 %v16813_v0 }
0x4ad8   :  { %16463 = vmatpush3.bf16.msra.mxu1 %v17013_v42 }
0x4ad9   :  { %16464 = vmatprep.subr.bf16.mxu1 %v16813_v0 }
0x4adc   :  { %16466 = vmatpush3.bf16.msra.mxu1 %v17021_v48 }
0x4add   :  { %16467 = vmatprep.subr.bf16.mxu1 %v16813_v0 }
0x4ae0   :  { %16469 = vmatpush3.bf16.msra.mxu1 %v17029_v55 }
0x4ae1   :  { %16494 = vmatprep.subr.bf16.mxu1 %v16813_v0 }
0x4b96   :  { %v7859_v58 = vpop.f32.mrb[100].mxu1 }
0x4b97   :  { %v7863_v59 = vsub.f32 %v7792_v57, %v7859_v58  ;;  %v13763_v61 = vpop.f32.mrb[101].mxu1 }
0x4b99   :  { %v7864_v2 = vadd.f32 %v7863_v59, %v18879_v63 }
0x4b9b   :  { %v7865_v62 = vmax.f32 %v7864_v2, 0.0 }
0x4b9d   :  { %v7866_v3 = vsub.f32 %v7865_v62, %v7789_v53 }
0x4b9f   :  { %v7867_v8 = vmul.f32 0.7646647, %v7866_v3 }
0x4ba1   :  { %v7868_v10 = vadd.f32 %v7867_v8, %v7865_v62 }
0x4ba3   :  { %13797 = vmatmul.mubr.f32.vlgmr.msra.gmra.mrb[90].mxu0 %v7868_v10 }
0x4ba4   :  { %16472 = vmatpush3.bf16.msra.mxu0 %v16974_v12  ;;  %13866 = vmatprep.mubr.msk.f32.mxu0 %vm16814_vm0, %v16815_v1 }
0x4ba5   :  { %16473 = vmatprep.subr.bf16.mxu0 %v16813_v0 }
0x4ba8   :  { %16475 = vmatpush3.bf16.msra.mxu0 %v16981_v18 }
0x4ba9   :  { %16476 = vmatprep.subr.bf16.mxu0 %v16813_v0 }
0x4bac   :  { %16478 = vmatpush3.bf16.msra.mxu0 %v16989_v24 }
0x4bad   :  { %16479 = vmatprep.subr.bf16.mxu0 %v16813_v0 }
0x4bb0   :  { %16481 = vmatpush3.bf16.msra.mxu0 %v16997_v30 }
0x4bb1   :  { %16482 = vmatprep.subr.bf16.mxu0 %v16813_v0 }
0x4bb4   :  { %16484 = vmatpush3.bf16.msra.mxu0 %v17005_v36 }
0x4bb5   :  { %16485 = vmatprep.subr.bf16.mxu0 %v16813_v0 }
0x4bb8   :  { %16487 = vmatpush3.bf16.msra.mxu0 %v17013_v42 }
0x4bb9   :  { %16488 = vmatprep.subr.bf16.mxu0 %v16813_v0 }
0x4bbc   :  { %16490 = vmatpush3.bf16.msra.mxu0 %v17021_v48 }
0x4bbd   :  { %16491 = vmatprep.subr.bf16.mxu0 %v16813_v0 }
0x4bc0   :  { %16493 = vmatpush3.bf16.msra.mxu0 %v17029_v55 }
0x4bc1   :  { %16518 = vmatprep.subr.bf16.mxu0 %v16813_v0 }
0x4c76   :  { %v7935_v5 = vpop.f32.mrb[90].mxu0 }
0x4c77   :  { %v7939_v7 = vsub.f32 %v7868_v10, %v7935_v5  ;;  %v13798_v13 = vpop.f32.mrb[91].mxu0 }
0x4c79   :  { %v7940_v21 = vadd.f32 %v7939_v7, %v18879_v63 }
0x4c7b   :  { %v7941_v27 = vmax.f32 %v7940_v21, 0.0 }
0x4c7d   :  { %v7942_v33 = vsub.f32 %v7941_v27, %v7865_v62 }
0x4c7f   :  { %v7943_v39 = vmul.f32 0.78240925, %v7942_v33 }
0x4c81   :  { %v7944_v45 = vadd.f32 %v7943_v39, %v7941_v27 }
0x4c83   :  { %13832 = vmatmul.mubr.f32.vlgmr.msra.gmra.mrb[102].mxu1 %v7944_v45 }
0x4c84   :  { %16496 = vmatpush3.bf16.msra.mxu1 %v16974_v12  ;;  %13901 = vmatprep.mubr.msk.f32.mxu1 %vm16814_vm0, %v16815_v1 }
0x4c85   :  { %16497 = vmatprep.subr.bf16.mxu1 %v16813_v0 }
0x4c88   :  { %16499 = vmatpush3.bf16.msra.mxu1 %v16981_v18 }
0x4c89   :  { %16500 = vmatprep.subr.bf16.mxu1 %v16813_v0 }
0x4c8c   :  { %16502 = vmatpush3.bf16.msra.mxu1 %v16989_v24 }
0x4c8d   :  { %16503 = vmatprep.subr.bf16.mxu1 %v16813_v0 }
0x4c90   :  { %16505 = vmatpush3.bf16.msra.mxu1 %v16997_v30 }
0x4c91   :  { %16506 = vmatprep.subr.bf16.mxu1 %v16813_v0 }
0x4c94   :  { %16508 = vmatpush3.bf16.msra.mxu1 %v17005_v36 }
0x4c95   :  { %16509 = vmatprep.subr.bf16.mxu1 %v16813_v0 }
0x4c98   :  { %16511 = vmatpush3.bf16.msra.mxu1 %v17013_v42 }
0x4c99   :  { %16512 = vmatprep.subr.bf16.mxu1 %v16813_v0 }
0x4c9c   :  { %16514 = vmatpush3.bf16.msra.mxu1 %v17021_v48 }
0x4c9d   :  { %16515 = vmatprep.subr.bf16.mxu1 %v16813_v0 }
0x4ca0   :  { %16517 = vmatpush3.bf16.msra.mxu1 %v17029_v55 }
0x4ca1   :  { %16542 = vmatprep.subr.bf16.mxu1 %v16813_v0 }
0x4d56   :  { %v8011_v52 = vpop.f32.mrb[102].mxu1 }
0x4d57   :  { %v8015_v56 = vsub.f32 %v7944_v45, %v8011_v52  ;;  %v13833_v60 = vpop.f32.mrb[103].mxu1 }
0x4d59   :  { %v8016_v4 = vadd.f32 %v8015_v56, %v18879_v63 }
0x4d5b   :  { %v8017_v9 = vmax.f32 %v8016_v4, 0.0 }
0x4d5d   :  { %v8018_v14 = vsub.f32 %v8017_v9, %v7941_v27 }
0x4d5f   :  { %v8019_v17 = vmul.f32 0.7976244, %v8018_v14 }
0x4d61   :  { %v8020_v16 = vadd.f32 %v8019_v17, %v8017_v9 }
0x4d63   :  { %13867 = vmatmul.mubr.f32.vlgmr.msra.gmra.mrb[92].mxu0 %v8020_v16 }
0x4d64   :  { %16520 = vmatpush3.bf16.msra.mxu0 %v16974_v12  ;;  %13936 = vmatprep.mubr.msk.f32.mxu0 %vm16814_vm0, %v16815_v1 }
0x4d65   :  { %16521 = vmatprep.subr.bf16.mxu0 %v16813_v0 }
0x4d68   :  { %16523 = vmatpush3.bf16.msra.mxu0 %v16981_v18 }
0x4d69   :  { %16524 = vmatprep.subr.bf16.mxu0 %v16813_v0 }
0x4d6c   :  { %16526 = vmatpush3.bf16.msra.mxu0 %v16989_v24 }
0x4d6d   :  { %16527 = vmatprep.subr.bf16.mxu0 %v16813_v0 }
0x4d70   :  { %16529 = vmatpush3.bf16.msra.mxu0 %v16997_v30 }
0x4d71   :  { %16530 = vmatprep.subr.bf16.mxu0 %v16813_v0 }
0x4d74   :  { %16532 = vmatpush3.bf16.msra.mxu0 %v17005_v36 }
0x4d75   :  { %16533 = vmatprep.subr.bf16.mxu0 %v16813_v0 }
0x4d78   :  { %16535 = vmatpush3.bf16.msra.mxu0 %v17013_v42 }
0x4d79   :  { %16536 = vmatprep.subr.bf16.mxu0 %v16813_v0 }
0x4d7c   :  { %16538 = vmatpush3.bf16.msra.mxu0 %v17021_v48 }
0x4d7d   :  { %16539 = vmatprep.subr.bf16.mxu0 %v16813_v0 }
0x4d80   :  { %16541 = vmatpush3.bf16.msra.mxu0 %v17029_v55 }
0x4e36   :  { %v8087_v12 = vpop.f32.mrb[92].mxu0 }
0x4e37   :  { %v8091_v18 = vsub.f32 %v8020_v16, %v8087_v12  ;;  %v13868_v24 = vpop.f32.mrb[93].mxu0 }
0x4e39   :  { %v8092_v30 = vadd.f32 %v8091_v18, %v18879_v63 }
0x4e3b   :  { %v8093_v11 = vmax.f32 %v8092_v30, 0.0 }
0x4e3d   :  { %v8094_v46 = vsub.f32 %v8093_v11, %v8017_v9 }
0x4e3f   :  { %v8095_v36 = vmul.f32 0.81082, %v8094_v46 }
0x4e41   :  { %v8096_v15 = vadd.f32 %v8095_v36, %v8093_v11 }
0x4e43   :  { %13902 = vmatmul.mubr.f32.vlgmr.msra.gmra.mrb[104].mxu1 %v8096_v15 }
0x4e44   :  { %16544 = vmatpush3.bf16.msra.mxu1 %v17344_v19  ;;  %13971 = vmatprep.mubr.msk.f32.mxu1 %vm16814_vm0, %v16815_v1 }
0x4e45   :  { %16545 = vmatprep.subr.bf16.mxu1 %v16813_v0 }
0x4e48   :  { %16547 = vmatpush3.bf16.msra.mxu1 %v17348_v25 }
0x4e49   :  { %16548 = vmatprep.subr.bf16.mxu1 %v16813_v0 }
0x4e4c   :  { %16550 = vmatpush3.bf16.msra.mxu1 %v17352_v31 }
0x4e4d   :  { %16551 = vmatprep.subr.bf16.mxu1 %v16813_v0 }
0x4e50   :  { %16553 = vmatpush3.bf16.msra.mxu1 %v17356_v35 }
0x4e51   :  { %16554 = vmatprep.subr.bf16.mxu1 %v16813_v0 }
0x4e54   :  { %16556 = vmatpush3.bf16.msra.mxu1 %v17360_v40 }
0x4e55   :  { %16557 = vmatprep.subr.bf16.mxu1 %v16813_v0 }
0x4e58   :  { %16559 = vmatpush3.bf16.msra.mxu1 %v17364_v44 }
0x4e59   :  { %16560 = vmatprep.subr.bf16.mxu1 %v16813_v0 }
0x4e5c   :  { %16562 = vmatpush3.bf16.msra.mxu1 %v17368_v49 }
0x4e5d   :  { %16563 = vmatprep.subr.bf16.mxu1 %v16813_v0 }
0x4e60   :  { %16565 = vmatpush3.bf16.msra.mxu1 %v17409_v6 }
0x4f16   :  { %v8163_v1 = vpop.f32.mrb[104].mxu1 }
0x4f17   :  { %v8167_v42 = vsub.f32 %v8096_v15, %v8163_v1  ;;  %v13903_v48 = vpop.f32.mrb[105].mxu1 }
0x4f19   :  { %v8168_v55 = vadd.f32 %v8167_v42, %v18879_v63 }
0x4f1b   :  { %v8169_v19 = vmax.f32 %v8168_v55, 0.0 }
0x4f1d   :  { %v8170_v25 = vsub.f32 %v8169_v19, %v8093_v11 }
0x4f1f   :  { %v8171_v31 = vmul.f32 0.82237667, %v8170_v25 }
0x4f21   :  { %v8172_v35 = vadd.f32 %v8171_v31, %v8169_v19 }
0x4f23   :  { %13937 = vmatmul.mubr.f32.vlgmr.msra.gmra.mrb[94].mxu0 %v8172_v35 }
0x4ff6   :  { %v8239_v40 = vpop.f32.mrb[94].mxu0 }
0x4ff7   :  { %v8243_v44 = vsub.f32 %v8172_v35, %v8239_v40  ;;  %v13938_v26 = vpop.f32.mrb[95].mxu0 }
0x4ff9   :  { %v8244_v20 = vadd.f32 %v8243_v44, %v18879_v63 }
0x4ffb   :  { %v8245_v49 = vmax.f32 %v8244_v20, 0.0 }
0x4ffd   :  { %8247 = vst [vmem:[#allocation16 + $0x28] sm:$0xff] %v8245_v49  ;;  %13972 = vmatmul.mubr.f32.vlgmr.msra.gmra.mrb[106].mxu1 %v8245_v49 }
0x4ffe   :  { %16759 = shalt.err (!%p16756_p4)
}
0x4fff   :  { %s16760_s24 = scalar_lea.hbm %s19168_s8, 768 }
0x5000   :  { %p16761_p5 = scmp.ne.s32.totalorder %s19168_s8, %s16760_s24  ;;  %p16764_p6 = scmp.lt.u32.totalorder %s16760_s24, %s19168_s8 }
0x5002   :  { %p16766_p7 = pnand %p16764_p6, %p16761_p5 }
0x5004   :  { %16769 = shalt.err (!%p16766_p7)
}
0x5005   :  { %8344 = dma.vmem_to_hbm [thread:$0]  %s8339_s18, 768, %s19168_s8, [#allocation17], %s16807_s28, %s16807_s28, %s16808_s29  }
0x5006   :  { %s16817_s5 = smov [#allocation15]  }
0x5007   :  { %s8326_s2 = sshll.u32 %s16817_s5, 4  ;;  %s8327_s2 = int_to_ptr.vmem [resolvable:$true] %s8326_s2 }
0x5008   :  { %s16770_s23 = scalar_lea.vmem %s8327_s2, 768  ;;  %p16775_p9 = scmp.lt.s32.totalorder %s8327_s2, %s8327_s2 }
0x5009   :  { %p16771_p8 = scmp.ne.s32.totalorder %s8327_s2, %s16770_s23  ;;  %p16776_p10 = scmp.lt.s32.totalorder %s16770_s23, %s16770_s23 }
0x500b   :  { %p16777_p11 = por %p16776_p10, %p16775_p9 }
0x500d   :  { %p16778_p12 = pnand %p16777_p11, %p16771_p8 }
0x50d0   :  { %v8314_v0 = vpop.f32.mrb[106].mxu1 }
0x50d1   :  { %8319 = vst [vmem:[#allocation15 + $0x28] sm:$0xff] %v8314_v0  ;;  %v13973_v6 = vpop.f32.mrb[107].mxu1 }
0x50d2   :  { %16781 = shalt.err (!%p16778_p12)
}
0x50d3   :  { %s16782_s11 = scalar_lea.hbm %s19167_s7, 768 }
0x50d4   :  { %p16783_p13 = scmp.ne.s32.totalorder %s19167_s7, %s16782_s11  ;;  %p16786_p0 = scmp.lt.u32.totalorder %s16782_s11, %s19167_s7 }
0x50d6   :  { %p16788_p1 = pnand %p16786_p0, %p16783_p13 }
0x50d8   :  { %16791 = shalt.err (!%p16788_p1)
}
0x50d9   :  { %8332 = dma.vmem_to_hbm [thread:$0]  %s8327_s2, 768, %s19167_s7, [#allocation5], %s16807_s28, %s16807_s28, %s16808_s29  }
0x50da   :  { %16800 = dma.done.wait [#allocation5], 768  }
0x50db   :  { %16801 = vsyncadd [#allocation5], 4294966528 }
0x50dc   :  { %16802 = dma.done.wait [#allocation17], 768  }
0x50dd   :  { %16803 = vsyncadd [#allocation17], 4294966528 }
0x50de   :  { %8351 = vsyncpa [#allocation4], 1 }
0x50df   :  { %8352 = vsyncpa [#allocation7], 1 }
0x50e0   :  { %8353 = vsyncpa [#allocation10], 1 }
0x50e1   :  { %8354 = vsyncpa [#allocation13], 1 }
0x50e2   :  { %8355 = vsyncpa [#allocation5], 1 }
0x50e3   :  { %8356 = vsyncpa [#allocation17], 1 }

</bundles_post_ra>
